<compile_context>
chip_gen: v6e
topology: v6e:2x2x1
jax: 0.10.0
libtpu: 0.0.40
codegen_flags: <defaults>
</compile_context>

<pallas_src>
import functools

import jax
import jax.numpy as jnp
from jax.experimental import pallas as pl
from jax.experimental.pallas import tpu as pltpu

# (cin, cout, kernel, stride, pad) for the 5 conv blocks of self.features
CONV_CFG = [
    (1, 128, 80, 4, 0),
    (128, 128, 3, 1, 1),
    (128, 256, 3, 1, 1),
    (256, 256, 3, 1, 1),
    (256, 512, 3, 1, 1),
]
BN_EPS = 1e-5
LANE = 128  # TPU lane width: block-1 contraction and the logits are padded to this


# ----------------------------- in-kernel helpers ----------------------------

def _roll_rows(y, shift):
    """result[i] = y[(i - shift) % L]  (jnp.roll semantics along rows).

    Uses the XLU rotate when the row count is a whole number of sublanes,
    otherwise (tiny arrays only) a cheap two-slice concat with identical
    semantics.
    """
    l = y.shape[0]
    shift = shift % l
    if shift == 0:
        return y
    if l % 8 == 0:
        return pltpu.roll(y, shift, axis=0)
    return jnp.concatenate([y[l - shift:], y[:l - shift]], axis=0)


def _conv3_bn_relu(a, w0, w1, w2, scale, bias):
    """Conv1d(k=3, s=1, p=1) + folded BatchNorm(eval) + ReLU on one sample.

    a: (L, Cin) bf16.  w0/w1/w2: (Cin, Cout) bf16 taps multiplying x[i-1],
    x[i], x[i+1].  Computed as three K=Cin matmuls whose f32 partial outputs
    are row-rotated (XLU) and edge-masked -- no (L, 3*Cin) im2col patches are
    materialised.  Returns (L, Cout) f32.
    """
    l = a.shape[0]
    y_prev = jnp.dot(a, w0, preferred_element_type=jnp.float32)
    y_cur = jnp.dot(a, w1, preferred_element_type=jnp.float32)
    y_next = jnp.dot(a, w2, preferred_element_type=jnp.float32)
    row = jax.lax.broadcasted_iota(jnp.int32, (l, 1), 0)
    y = (y_cur
         + jnp.where(row == 0, 0.0, _roll_rows(y_prev, 1))         # x[-1] = 0 pad
         + jnp.where(row == l - 1, 0.0, _roll_rows(y_next, -1)))   # x[L]  = 0 pad
    return jnp.maximum(y * scale + bias, 0.0)                      # BN(eval) + ReLU


def _maxpool4_rows(y, sel):
    """MaxPool1d(kernel=4, stride=4) over rows: (L, C) f32 -> (L//4, C) bf16.

    Running max over the 3 preceding rows via XLU rotates; the wrap-
    contaminated rows 0..2 of each 4-group are never selected, so no mask is
    needed.  Rows 3, 7, 11, ... are then picked with a tiny bf16 0/1 selection
    matmul (avoids strided sublane gathers and f32-emulated MXU passes).
    """
    m = jnp.maximum(y, _roll_rows(y, 1))
    m = jnp.maximum(m, _roll_rows(m, 2))
    return jnp.dot(sel, m.astype(jnp.bfloat16),
                   preferred_element_type=jnp.float32).astype(jnp.bfloat16)


# ----------------------------- the fused kernel -----------------------------

def _fused_forward_kernel(
    p_ref,                                            # (1, 4*T1, 128) bf16 slab patches
    w1_ref, s1_ref, b1_ref,                           # block 1 (K padded to 128)
    w2a_ref, w2b_ref, w2c_ref, s2_ref, b2_ref, sel2_ref,
    w3a_ref, w3b_ref, w3c_ref, s3_ref, b3_ref, sel3_ref,
    w4a_ref, w4b_ref, w4c_ref, s4_ref, b4_ref, sel4_ref,
    w5a_ref, w5b_ref, w5c_ref, s5_ref, b5_ref,
    fw1_ref, fb1_ref, fw2_ref, fb2_ref, fw3_ref, fb3_ref,
    o_ref,                                            # (1, 1, 128) f32 padded logits
):
    # ---- block 1: Conv1d(1,128,k=80,s=4) + BN + ReLU + MaxPool(4,4) ----------
    # Patches arrive slab-major (rows [m*T1, (m+1)*T1) = pool member m), so the
    # pool is an element-wise max over four aligned, contiguous row slices.
    y = jnp.dot(p_ref[0], w1_ref[...], preferred_element_type=jnp.float32)
    y = jnp.maximum(y * s1_ref[...] + b1_ref[...], 0.0).astype(jnp.bfloat16)
    t1 = y.shape[0] // 4
    a = jnp.maximum(jnp.maximum(y[:t1], y[t1:2 * t1]),
                    jnp.maximum(y[2 * t1:3 * t1], y[3 * t1:]))      # (T1, 128) bf16

    # ---- blocks 2-4: Conv1d(k=3,p=1) + BN + ReLU + MaxPool(4,4) --------------
    a = _maxpool4_rows(_conv3_bn_relu(a, w2a_ref[...], w2b_ref[...], w2c_ref[...],
                                      s2_ref[...], b2_ref[...]), sel2_ref[...])
    a = _maxpool4_rows(_conv3_bn_relu(a, w3a_ref[...], w3b_ref[...], w3c_ref[...],
                                      s3_ref[...], b3_ref[...]), sel3_ref[...])
    a = _maxpool4_rows(_conv3_bn_relu(a, w4a_ref[...], w4b_ref[...], w4c_ref[...],
                                      s4_ref[...], b4_ref[...]), sel4_ref[...])

    # ---- block 5: Conv1d(k=3,p=1) + BN + ReLU + MaxPool(4,4) -> single row ----
    y5 = _conv3_bn_relu(a, w5a_ref[...], w5b_ref[...], w5c_ref[...],
                        s5_ref[...], b5_ref[...])                   # (4, 512) f32
    a = jnp.max(y5, axis=0, keepdims=True).astype(jnp.bfloat16)     # (1, 512) bf16

    # ---- classifier: Linear+ReLU (+Dropout=id) x2, then Linear ---------------
    # Final spatial length is 1, so flatten(1) == the pooled channel vector.
    h = jnp.dot(a, fw1_ref[...], preferred_element_type=jnp.float32) + fb1_ref[...]
    h = jnp.maximum(h, 0.0).astype(jnp.bfloat16)
    h = jnp.dot(h, fw2_ref[...], preferred_element_type=jnp.float32) + fb2_ref[...]
    h = jnp.maximum(h, 0.0).astype(jnp.bfloat16)
    o_ref[0] = (jnp.dot(h, fw3_ref[...], preferred_element_type=jnp.float32)
                + fb3_ref[...])
    # TODO(synk): stack several samples per grid step for batch >> 4 so these
    #             M=16/4/1 matmuls stop running at a few percent MXU fill.


# ----------------------------- pallas_call wrapper --------------------------

def _weight_spec(shape):
    """Full-extent, loop-invariant operand; single-buffered when supported."""
    index_map = lambda i: (0,) * len(shape)
    try:
        return pl.BlockSpec(shape, index_map, pipeline_mode=pl.Buffered(1))
    except (AttributeError, TypeError, ValueError):
        # older jax without pipeline_mode / Buffered(1): default double buffering
        return pl.BlockSpec(shape, index_map)


def fused_forward(patches, operands):
    """Whole forward (conv blocks 1-5 + classifier) in one pallas_call."""
    n, rows, kin = patches.shape
    in_specs = [pl.BlockSpec((1, rows, kin), lambda i: (i, 0, 0))]
    in_specs += [_weight_spec(op.shape) for op in operands]
    return pl.pallas_call(
        _fused_forward_kernel,
        out_shape=jax.ShapeDtypeStruct((n, 1, LANE), jnp.float32),
        grid_spec=pltpu.PrefetchScalarGridSpec(
            num_scalar_prefetch=0,
            grid=(n,),
            in_specs=in_specs,
            out_specs=pl.BlockSpec((1, 1, LANE), lambda i: (i, 0, 0)),
        ),
        compiler_params=pltpu.CompilerParams(
            dimension_semantics=("parallel",),   # v7x: the two TCs split the batch
            vmem_limit_bytes=32 * 1024 * 1024,   # explicit budget; ~4 MB actually used
        ),
    )(patches, *operands)


# ----------------------------- host-side glue (inside jit) ------------------

def block1_patches_slab(x_ncl):
    """im2col for Conv1d(1,128,k=80,s=4), emitted directly in slab-major row
    order (MaxPool member-major) so the in-kernel pool is an element-wise max
    over four aligned row slices -- no separate transpose pass.  The
    contraction dim is zero-padded 80 -> 128 so every patch vreg is lane-dense.
    Returns (N, L1, 128) bf16 where L1 is the conv-1 output length.
    """
    _, _, k1, s1, _ = CONV_CFG[0]
    n, cin0, length = x_ncl.shape
    assert cin0 == 1 and length % s1 == 0 and (length - k1) % s1 == 0
    l1 = (length - k1) // s1 + 1
    assert l1 % 4 == 0
    t = l1 // 4
    taps = k1 // s1                                        # 20 stride-4 taps
    x = x_ncl[:, 0, :].astype(jnp.bfloat16)
    xr = x.reshape(n, length // s1, s1)                    # (N, L/4, 4) phase split
    need = 4 * t + taps + 2                                # keep every slice in-bounds
    if xr.shape[1] < need:
        xr = jnp.pad(xr, ((0, 0), (0, need - xr.shape[1]), (0, 0)))
    zeros = jnp.zeros((n, t, LANE - k1), jnp.bfloat16)     # K pad 80 -> 128
    slabs = []
    for m in range(4):                                     # pool member m = conv pos 4t'+m
        cols = [xr[:, m + kk: m + kk + 4 * t: 4, :] for kk in range(taps)]
        slabs.append(jnp.concatenate(cols + [zeros], axis=-1))   # (N, t, 128)
    return jnp.concatenate(slabs, axis=1)                        # (N, 4t, 128) slab-major


# ----------------------------- parameters -----------------------------------

def init_params(key, input_length, num_classes):
    """Random parameters in PyTorch layout (Conv1d: (Cout,Cin,K), Linear: (in,out))."""
    params = {"features": [], "classifier": []}
    for cin, cout, k, _, _ in CONV_CFG:
        key, kw, kb, kg, kbe, km, kv = jax.random.split(key, 7)
        fan_in = cin * k
        params["features"].append({
            "w": jax.random.normal(kw, (cout, cin, k), jnp.float32)
                 / jnp.sqrt(float(fan_in)),
            "b": 0.1 * jax.random.normal(kb, (cout,), jnp.float32),
            "gamma": 1.0 + 0.1 * jax.random.normal(kg, (cout,), jnp.float32),
            "beta": 0.1 * jax.random.normal(kbe, (cout,), jnp.float32),
            "mean": 0.1 * jax.random.normal(km, (cout,), jnp.float32),
            "var": 1.0 + 0.1 * jnp.abs(jax.random.normal(kv, (cout,), jnp.float32)),
        })
    # Flattened-size computation (mirrors the torch.no_grad() probe in __init__).
    length = input_length
    for _, _, k, s, p in CONV_CFG:
        length = (length + 2 * p - k) // s + 1      # conv
        length = length // 4                        # maxpool(4,4)
    flattened = length * CONV_CFG[-1][1]
    for din, dout in [(flattened, 512), (512, 256), (256, num_classes)]:
        key, kw, kb = jax.random.split(key, 3)
        params["classifier"].append({
            "w": jax.random.normal(kw, (din, dout), jnp.float32)
                 / jnp.sqrt(float(din)),            # stored as (in, out)
            "b": 0.1 * jax.random.normal(kb, (dout,), jnp.float32),
        })
    return params, flattened


def _pool_select(rows_out):
    """bf16 0/1 matrix selecting rows 3, 7, 11, ... of the running max."""
    r = jnp.arange(rows_out)[:, None]
    c = jnp.arange(4 * rows_out)[None, :]
    return (c == 4 * r + 3).astype(jnp.bfloat16)


def prepare_params(params, input_length):
    """One-time prep: fold BN(eval) into per-channel scale/bias, split conv
    weights into bf16 matmul form (per-tap matrices for the k=3 convs), pad
    block-1's contraction to a lane-dense K=128, pad the logits to a 128-lane
    block, and precompute the bf16 MaxPool selection matrices.  Returns the
    flat operand tuple in the fused kernel's argument order."""
    feats = []
    for (_, cout, _, _, _), layer in zip(CONV_CFG, params["features"]):
        scale = (layer["gamma"] / jnp.sqrt(layer["var"] + BN_EPS)).astype(jnp.float32)
        bias = ((layer["b"] - layer["mean"]) * scale + layer["beta"]).astype(jnp.float32)
        feats.append((layer["w"], scale.reshape(1, cout), bias.reshape(1, cout)))

    _, _, k1, s1, _ = CONV_CFG[0]
    w1, s1v, b1v = feats[0]
    w1_mat = jnp.transpose(w1[:, 0, :], (1, 0))                   # (80, 128)
    w1_mat = jnp.pad(w1_mat, ((0, LANE - k1), (0, 0)))            # K 80 -> 128, lane-dense
    operands = [w1_mat.astype(jnp.bfloat16), s1v, b1v]

    l1 = (input_length - k1) // s1 + 1
    length = l1 // 4                                              # rows entering block 2
    for blk in range(1, len(CONV_CFG)):
        w, sv, bv = feats[blk]
        # per-tap (Cin, Cout) matrices: tap j multiplies x[i + j - 1]
        operands += [jnp.transpose(w[:, :, j], (1, 0)).astype(jnp.bfloat16)
                     for j in range(3)]
        operands += [sv, bv]
        if blk < len(CONV_CFG) - 1:
            operands.append(_pool_select(length // 4))            # bf16 pool selector
        length //= 4
    assert length == 1, "fused kernel assumes the final feature map has length 1"

    n_fc = len(params["classifier"])
    for idx, layer in enumerate(params["classifier"]):
        w, b = layer["w"], layer["b"]
        if idx == n_fc - 1:                                       # lane-dense logits
            dpad = max(LANE, -(-w.shape[1] // LANE) * LANE)
            w = jnp.pad(w, ((0, 0), (0, dpad - w.shape[1])))
            b = jnp.pad(b, (0, dpad - b.shape[0]))
        operands += [w.astype(jnp.bfloat16), b.reshape(1, -1).astype(jnp.float32)]
    return tuple(operands)


# ----------------------------- forward ---------------------------------------

@functools.partial(jax.jit, static_argnames=("num_classes",))
def raw_audio_cnn_forward(operands, x_ncl, *, num_classes):
    """x_ncl: (N, 1, L), exactly like the PyTorch module's input."""
    n = x_ncl.shape[0]
    patches = block1_patches_slab(x_ncl)       # (N, L1, 128) bf16, slab order
    out = fused_forward(patches, operands)     # (N, 1, 128) f32 padded logits
    return out.reshape(n, -1)[:, :num_classes]


# ----------------------------- driver ---------------------------------------

if __name__ == "__main__":
    # Smallest input_length giving a length-1 feature map after conv(k=80,s=4)
    # and five MaxPool(4,4) stages: (4172-80)/4+1 = 1024 -> 256 -> 64 -> 16 -> 4 -> 1.
    INPUT_LENGTH = 4172
    NUM_CLASSES = 10
    BATCH = 2

    key = jax.random.PRNGKey(0)
    pkey, xkey = jax.random.split(key)
    params, flattened = init_params(pkey, INPUT_LENGTH, NUM_CLASSES)
    assert flattened == 512
    operands = prepare_params(params, INPUT_LENGTH)   # one-time host prep (hoisted)

    x = jax.random.normal(xkey, (BATCH, 1, INPUT_LENGTH), jnp.float32)  # NCL input
    out = raw_audio_cnn_forward(operands, x, num_classes=NUM_CLASSES)
    out = jax.block_until_ready(out)
    assert out.shape == (BATCH, NUM_CLASSES)
    assert bool(jnp.all(jnp.isfinite(out)))
    print("KERNEL_OK")
</pallas_src>

<mosaic_0001>
module attributes {stable_mosaic.version = 11 : i64} {
  func.func @_fused_forward_kernel(%arg0: i32, %arg1: memref<1x1024x128xbf16, #tpu.memory_space<vmem>>, %arg2: memref<128x128xbf16, #tpu.memory_space<vmem>>, %arg3: memref<1x128xf32, #tpu.memory_space<vmem>>, %arg4: memref<1x128xf32, #tpu.memory_space<vmem>>, %arg5: memref<128x128xbf16, #tpu.memory_space<vmem>>, %arg6: memref<128x128xbf16, #tpu.memory_space<vmem>>, %arg7: memref<128x128xbf16, #tpu.memory_space<vmem>>, %arg8: memref<1x128xf32, #tpu.memory_space<vmem>>, %arg9: memref<1x128xf32, #tpu.memory_space<vmem>>, %arg10: memref<64x256xbf16, #tpu.memory_space<vmem>>, %arg11: memref<128x256xbf16, #tpu.memory_space<vmem>>, %arg12: memref<128x256xbf16, #tpu.memory_space<vmem>>, %arg13: memref<128x256xbf16, #tpu.memory_space<vmem>>, %arg14: memref<1x256xf32, #tpu.memory_space<vmem>>, %arg15: memref<1x256xf32, #tpu.memory_space<vmem>>, %arg16: memref<16x64xbf16, #tpu.memory_space<vmem>>, %arg17: memref<256x256xbf16, #tpu.memory_space<vmem>>, %arg18: memref<256x256xbf16, #tpu.memory_space<vmem>>, %arg19: memref<256x256xbf16, #tpu.memory_space<vmem>>, %arg20: memref<1x256xf32, #tpu.memory_space<vmem>>, %arg21: memref<1x256xf32, #tpu.memory_space<vmem>>, %arg22: memref<4x16xbf16, #tpu.memory_space<vmem>>, %arg23: memref<256x512xbf16, #tpu.memory_space<vmem>>, %arg24: memref<256x512xbf16, #tpu.memory_space<vmem>>, %arg25: memref<256x512xbf16, #tpu.memory_space<vmem>>, %arg26: memref<1x512xf32, #tpu.memory_space<vmem>>, %arg27: memref<1x512xf32, #tpu.memory_space<vmem>>, %arg28: memref<512x512xbf16, #tpu.memory_space<vmem>>, %arg29: memref<1x512xf32, #tpu.memory_space<vmem>>, %arg30: memref<512x256xbf16, #tpu.memory_space<vmem>>, %arg31: memref<1x256xf32, #tpu.memory_space<vmem>>, %arg32: memref<256x128xbf16, #tpu.memory_space<vmem>>, %arg33: memref<1x128xf32, #tpu.memory_space<vmem>>, %arg34: memref<1x1x128xf32, #tpu.memory_space<vmem>>) attributes {dimension_semantics = [#tpu.dimension_semantics<parallel>], iteration_bounds = array<i64: 2>, scalar_prefetch = 0 : i64, scratch_operands = 0 : i64, tpu.core_type = #tpu.core_type<tc>, window_params = [{transform_indices = @transform_0, window_bounds = array<i64: 1, 1024, 128>}, {pipeline_mode = #tpu.pipeline_mode<synchronous>, transform_indices = @transform_1, window_bounds = array<i64: 128, 128>}, {pipeline_mode = #tpu.pipeline_mode<synchronous>, transform_indices = @transform_2, window_bounds = array<i64: 1, 128>}, {pipeline_mode = #tpu.pipeline_mode<synchronous>, transform_indices = @transform_3, window_bounds = array<i64: 1, 128>}, {pipeline_mode = #tpu.pipeline_mode<synchronous>, transform_indices = @transform_4, window_bounds = array<i64: 128, 128>}, {pipeline_mode = #tpu.pipeline_mode<synchronous>, transform_indices = @transform_5, window_bounds = array<i64: 128, 128>}, {pipeline_mode = #tpu.pipeline_mode<synchronous>, transform_indices = @transform_6, window_bounds = array<i64: 128, 128>}, {pipeline_mode = #tpu.pipeline_mode<synchronous>, transform_indices = @transform_7, window_bounds = array<i64: 1, 128>}, {pipeline_mode = #tpu.pipeline_mode<synchronous>, transform_indices = @transform_8, window_bounds = array<i64: 1, 128>}, {pipeline_mode = #tpu.pipeline_mode<synchronous>, transform_indices = @transform_9, window_bounds = array<i64: 64, 256>}, {pipeline_mode = #tpu.pipeline_mode<synchronous>, transform_indices = @transform_10, window_bounds = array<i64: 128, 256>}, {pipeline_mode = #tpu.pipeline_mode<synchronous>, transform_indices = @transform_11, window_bounds = array<i64: 128, 256>}, {pipeline_mode = #tpu.pipeline_mode<synchronous>, transform_indices = @transform_12, window_bounds = array<i64: 128, 256>}, {pipeline_mode = #tpu.pipeline_mode<synchronous>, transform_indices = @transform_13, window_bounds = array<i64: 1, 256>}, {pipeline_mode = #tpu.pipeline_mode<synchronous>, transform_indices = @transform_14, window_bounds = array<i64: 1, 256>}, {pipeline_mode = #tpu.pipeline_mode<synchronous>, transform_indices = @transform_15, window_bounds = array<i64: 16, 64>}, {pipeline_mode = #tpu.pipeline_mode<synchronous>, transform_indices = @transform_16, window_bounds = array<i64: 256, 256>}, {pipeline_mode = #tpu.pipeline_mode<synchronous>, transform_indices = @transform_17, window_bounds = array<i64: 256, 256>}, {pipeline_mode = #tpu.pipeline_mode<synchronous>, transform_indices = @transform_18, window_bounds = array<i64: 256, 256>}, {pipeline_mode = #tpu.pipeline_mode<synchronous>, transform_indices = @transform_19, window_bounds = array<i64: 1, 256>}, {pipeline_mode = #tpu.pipeline_mode<synchronous>, transform_indices = @transform_20, window_bounds = array<i64: 1, 256>}, {pipeline_mode = #tpu.pipeline_mode<synchronous>, transform_indices = @transform_21, window_bounds = array<i64: 4, 16>}, {pipeline_mode = #tpu.pipeline_mode<synchronous>, transform_indices = @transform_22, window_bounds = array<i64: 256, 512>}, {pipeline_mode = #tpu.pipeline_mode<synchronous>, transform_indices = @transform_23, window_bounds = array<i64: 256, 512>}, {pipeline_mode = #tpu.pipeline_mode<synchronous>, transform_indices = @transform_24, window_bounds = array<i64: 256, 512>}, {pipeline_mode = #tpu.pipeline_mode<synchronous>, transform_indices = @transform_25, window_bounds = array<i64: 1, 512>}, {pipeline_mode = #tpu.pipeline_mode<synchronous>, transform_indices = @transform_26, window_bounds = array<i64: 1, 512>}, {pipeline_mode = #tpu.pipeline_mode<synchronous>, transform_indices = @transform_27, window_bounds = array<i64: 512, 512>}, {pipeline_mode = #tpu.pipeline_mode<synchronous>, transform_indices = @transform_28, window_bounds = array<i64: 1, 512>}, {pipeline_mode = #tpu.pipeline_mode<synchronous>, transform_indices = @transform_29, window_bounds = array<i64: 512, 256>}, {pipeline_mode = #tpu.pipeline_mode<synchronous>, transform_indices = @transform_30, window_bounds = array<i64: 1, 256>}, {pipeline_mode = #tpu.pipeline_mode<synchronous>, transform_indices = @transform_31, window_bounds = array<i64: 256, 128>}, {pipeline_mode = #tpu.pipeline_mode<synchronous>, transform_indices = @transform_32, window_bounds = array<i64: 1, 128>}, {transform_indices = @transform_33, window_bounds = array<i64: 1, 1, 128>}]} {
    %c0 = arith.constant 0 : index
    %c0_0 = arith.constant 0 : index
    %c0_1 = arith.constant 0 : index
    %0 = vector.load %arg1[%c0, %c0_0, %c0_1] : memref<1x1024x128xbf16, #tpu.memory_space<vmem>>, vector<1x1024x128xbf16>
    %1 = vector.shape_cast %0 : vector<1x1024x128xbf16> to vector<1024x128xbf16>
    %c0_2 = arith.constant 0 : index
    %c0_3 = arith.constant 0 : index
    %2 = vector.load %arg2[%c0_2, %c0_3] : memref<128x128xbf16, #tpu.memory_space<vmem>>, vector<128x128xbf16>
    %cst = arith.constant dense<0.000000e+00> : vector<1024x128xf32>
    %3 = tpu.matmul %1, %2, %cst {dimension_numbers = #tpu.dot_dimension_numbers<[1], [0], [0], [1], [0, 0, 1, 1], [], []>} : vector<1024x128xbf16>, vector<128x128xbf16>, vector<1024x128xf32> -> vector<1024x128xf32>
    %c0_4 = arith.constant 0 : index
    %c0_5 = arith.constant 0 : index
    %4 = vector.load %arg3[%c0_4, %c0_5] : memref<1x128xf32, #tpu.memory_space<vmem>>, vector<1x128xf32>
    %5 = vector.broadcast %4 : vector<1x128xf32> to vector<1024x128xf32>
    %6 = arith.mulf %3, %5 : vector<1024x128xf32>
    %c0_6 = arith.constant 0 : index
    %c0_7 = arith.constant 0 : index
    %7 = vector.load %arg4[%c0_6, %c0_7] : memref<1x128xf32, #tpu.memory_space<vmem>>, vector<1x128xf32>
    %8 = vector.broadcast %7 : vector<1x128xf32> to vector<1024x128xf32>
    %9 = arith.addf %6, %8 : vector<1024x128xf32>
    %cst_8 = arith.constant 0.000000e+00 : f32
    %10 = vector.broadcast %cst_8 : f32 to vector<1024x128xf32>
    %11 = arith.maximumf %9, %10 : vector<1024x128xf32>
    %12 = arith.truncf %11 : vector<1024x128xf32> to vector<1024x128xbf16>
    %13 = vector.extract_strided_slice %12 {offsets = [0, 0], sizes = [256, 128], strides = [1, 1]} : vector<1024x128xbf16> to vector<256x128xbf16>
    %14 = vector.extract_strided_slice %12 {offsets = [256, 0], sizes = [256, 128], strides = [1, 1]} : vector<1024x128xbf16> to vector<256x128xbf16>
    %15 = arith.maximumf %13, %14 : vector<256x128xbf16>
    %16 = vector.extract_strided_slice %12 {offsets = [512, 0], sizes = [256, 128], strides = [1, 1]} : vector<1024x128xbf16> to vector<256x128xbf16>
    %17 = vector.extract_strided_slice %12 {offsets = [768, 0], sizes = [256, 128], strides = [1, 1]} : vector<1024x128xbf16> to vector<256x128xbf16>
    %18 = arith.maximumf %16, %17 : vector<256x128xbf16>
    %19 = arith.maximumf %15, %18 : vector<256x128xbf16>
    %c0_9 = arith.constant 0 : index
    %c0_10 = arith.constant 0 : index
    %20 = vector.load %arg5[%c0_9, %c0_10] : memref<128x128xbf16, #tpu.memory_space<vmem>>, vector<128x128xbf16>
    %c0_11 = arith.constant 0 : index
    %c0_12 = arith.constant 0 : index
    %21 = vector.load %arg6[%c0_11, %c0_12] : memref<128x128xbf16, #tpu.memory_space<vmem>>, vector<128x128xbf16>
    %c0_13 = arith.constant 0 : index
    %c0_14 = arith.constant 0 : index
    %22 = vector.load %arg7[%c0_13, %c0_14] : memref<128x128xbf16, #tpu.memory_space<vmem>>, vector<128x128xbf16>
    %c0_15 = arith.constant 0 : index
    %c0_16 = arith.constant 0 : index
    %23 = vector.load %arg8[%c0_15, %c0_16] : memref<1x128xf32, #tpu.memory_space<vmem>>, vector<1x128xf32>
    %c0_17 = arith.constant 0 : index
    %c0_18 = arith.constant 0 : index
    %24 = vector.load %arg9[%c0_17, %c0_18] : memref<1x128xf32, #tpu.memory_space<vmem>>, vector<1x128xf32>
    %cst_19 = arith.constant dense<0.000000e+00> : vector<256x128xf32>
    %25 = tpu.matmul %19, %20, %cst_19 {dimension_numbers = #tpu.dot_dimension_numbers<[1], [0], [0], [1], [0, 0, 1, 1], [], []>} : vector<256x128xbf16>, vector<128x128xbf16>, vector<256x128xf32> -> vector<256x128xf32>
    %cst_20 = arith.constant dense<0.000000e+00> : vector<256x128xf32>
    %26 = tpu.matmul %19, %21, %cst_20 {dimension_numbers = #tpu.dot_dimension_numbers<[1], [0], [0], [1], [0, 0, 1, 1], [], []>} : vector<256x128xbf16>, vector<128x128xbf16>, vector<256x128xf32> -> vector<256x128xf32>
    %cst_21 = arith.constant dense<0.000000e+00> : vector<256x128xf32>
    %27 = tpu.matmul %19, %22, %cst_21 {dimension_numbers = #tpu.dot_dimension_numbers<[1], [0], [0], [1], [0, 0, 1, 1], [], []>} : vector<256x128xbf16>, vector<128x128xbf16>, vector<256x128xf32> -> vector<256x128xf32>
    %28 = tpu.iota {dimensions = array<i32: 0>} : vector<256x1xi32>
    %c0_i32 = arith.constant 0 : i32
    %29 = vector.broadcast %c0_i32 : i32 to vector<256x1xi32>
    %30 = arith.cmpi eq, %28, %29 : vector<256x1xi32>
    %c1_i32 = arith.constant 1 : i32
    %31 = tpu.dynamic_rotate %25 by %c1_i32 dim 0 : vector<256x128xf32>, i32 -> vector<256x128xf32>
    %cst_22 = arith.constant 0.000000e+00 : f32
    %32 = vector.shape_cast %30 : vector<256x1xi1> to vector<256x1xi1>
    %33 = vector.broadcast %32 : vector<256x1xi1> to vector<256x128xi1>
    %34 = vector.broadcast %cst_22 : f32 to vector<256x128xf32>
    %35 = arith.select %33, %34, %31 : vector<256x128xi1>, vector<256x128xf32>
    %36 = arith.addf %26, %35 : vector<256x128xf32>
    %c255_i32 = arith.constant 255 : i32
    %37 = vector.broadcast %c255_i32 : i32 to vector<256x1xi32>
    %38 = arith.cmpi eq, %28, %37 : vector<256x1xi32>
    %c255_i32_23 = arith.constant 255 : i32
    %39 = tpu.dynamic_rotate %27 by %c255_i32_23 dim 0 : vector<256x128xf32>, i32 -> vector<256x128xf32>
    %cst_24 = arith.constant 0.000000e+00 : f32
    %40 = vector.shape_cast %38 : vector<256x1xi1> to vector<256x1xi1>
    %41 = vector.broadcast %40 : vector<256x1xi1> to vector<256x128xi1>
    %42 = vector.broadcast %cst_24 : f32 to vector<256x128xf32>
    %43 = arith.select %41, %42, %39 : vector<256x128xi1>, vector<256x128xf32>
    %44 = arith.addf %36, %43 : vector<256x128xf32>
    %45 = vector.broadcast %23 : vector<1x128xf32> to vector<256x128xf32>
    %46 = arith.mulf %44, %45 : vector<256x128xf32>
    %47 = vector.broadcast %24 : vector<1x128xf32> to vector<256x128xf32>
    %48 = arith.addf %46, %47 : vector<256x128xf32>
    %cst_25 = arith.constant 0.000000e+00 : f32
    %49 = vector.broadcast %cst_25 : f32 to vector<256x128xf32>
    %50 = arith.maximumf %48, %49 : vector<256x128xf32>
    %c0_26 = arith.constant 0 : index
    %c0_27 = arith.constant 0 : index
    %51 = vector.load %arg10[%c0_26, %c0_27] : memref<64x256xbf16, #tpu.memory_space<vmem>>, vector<64x256xbf16>
    %c1_i32_28 = arith.constant 1 : i32
    %52 = tpu.dynamic_rotate %50 by %c1_i32_28 dim 0 : vector<256x128xf32>, i32 -> vector<256x128xf32>
    %53 = arith.maximumf %50, %52 : vector<256x128xf32>
    %c2_i32 = arith.constant 2 : i32
    %54 = tpu.dynamic_rotate %53 by %c2_i32 dim 0 : vector<256x128xf32>, i32 -> vector<256x128xf32>
    %55 = arith.maximumf %53, %54 : vector<256x128xf32>
    %56 = arith.truncf %55 : vector<256x128xf32> to vector<256x128xbf16>
    %cst_29 = arith.constant dense<0.000000e+00> : vector<64x128xf32>
    %57 = tpu.matmul %51, %56, %cst_29 {dimension_numbers = #tpu.dot_dimension_numbers<[1], [0], [0], [1], [0, 0, 1, 1], [], []>} : vector<64x256xbf16>, vector<256x128xbf16>, vector<64x128xf32> -> vector<64x128xf32>
    %58 = arith.truncf %57 : vector<64x128xf32> to vector<64x128xbf16>
    %c0_30 = arith.constant 0 : index
    %c0_31 = arith.constant 0 : index
    %59 = vector.load %arg11[%c0_30, %c0_31] : memref<128x256xbf16, #tpu.memory_space<vmem>>, vector<128x256xbf16>
    %c0_32 = arith.constant 0 : index
    %c0_33 = arith.constant 0 : index
    %60 = vector.load %arg12[%c0_32, %c0_33] : memref<128x256xbf16, #tpu.memory_space<vmem>>, vector<128x256xbf16>
    %c0_34 = arith.constant 0 : index
    %c0_35 = arith.constant 0 : index
    %61 = vector.load %arg13[%c0_34, %c0_35] : memref<128x256xbf16, #tpu.memory_space<vmem>>, vector<128x256xbf16>
    %c0_36 = arith.constant 0 : index
    %c0_37 = arith.constant 0 : index
    %62 = vector.load %arg14[%c0_36, %c0_37] : memref<1x256xf32, #tpu.memory_space<vmem>>, vector<1x256xf32>
    %c0_38 = arith.constant 0 : index
    %c0_39 = arith.constant 0 : index
    %63 = vector.load %arg15[%c0_38, %c0_39] : memref<1x256xf32, #tpu.memory_space<vmem>>, vector<1x256xf32>
    %cst_40 = arith.constant dense<0.000000e+00> : vector<64x256xf32>
    %64 = tpu.matmul %58, %59, %cst_40 {dimension_numbers = #tpu.dot_dimension_numbers<[1], [0], [0], [1], [0, 0, 1, 1], [], []>} : vector<64x128xbf16>, vector<128x256xbf16>, vector<64x256xf32> -> vector<64x256xf32>
    %cst_41 = arith.constant dense<0.000000e+00> : vector<64x256xf32>
    %65 = tpu.matmul %58, %60, %cst_41 {dimension_numbers = #tpu.dot_dimension_numbers<[1], [0], [0], [1], [0, 0, 1, 1], [], []>} : vector<64x128xbf16>, vector<128x256xbf16>, vector<64x256xf32> -> vector<64x256xf32>
    %cst_42 = arith.constant dense<0.000000e+00> : vector<64x256xf32>
    %66 = tpu.matmul %58, %61, %cst_42 {dimension_numbers = #tpu.dot_dimension_numbers<[1], [0], [0], [1], [0, 0, 1, 1], [], []>} : vector<64x128xbf16>, vector<128x256xbf16>, vector<64x256xf32> -> vector<64x256xf32>
    %67 = tpu.iota {dimensions = array<i32: 0>} : vector<64x1xi32>
    %c0_i32_43 = arith.constant 0 : i32
    %68 = vector.broadcast %c0_i32_43 : i32 to vector<64x1xi32>
    %69 = arith.cmpi eq, %67, %68 : vector<64x1xi32>
    %c1_i32_44 = arith.constant 1 : i32
    %70 = tpu.dynamic_rotate %64 by %c1_i32_44 dim 0 : vector<64x256xf32>, i32 -> vector<64x256xf32>
    %cst_45 = arith.constant 0.000000e+00 : f32
    %71 = vector.shape_cast %69 : vector<64x1xi1> to vector<64x1xi1>
    %72 = vector.broadcast %71 : vector<64x1xi1> to vector<64x256xi1>
    %73 = vector.broadcast %cst_45 : f32 to vector<64x256xf32>
    %74 = arith.select %72, %73, %70 : vector<64x256xi1>, vector<64x256xf32>
    %75 = arith.addf %65, %74 : vector<64x256xf32>
    %c63_i32 = arith.constant 63 : i32
    %76 = vector.broadcast %c63_i32 : i32 to vector<64x1xi32>
    %77 = arith.cmpi eq, %67, %76 : vector<64x1xi32>
    %c63_i32_46 = arith.constant 63 : i32
    %78 = tpu.dynamic_rotate %66 by %c63_i32_46 dim 0 : vector<64x256xf32>, i32 -> vector<64x256xf32>
    %cst_47 = arith.constant 0.000000e+00 : f32
    %79 = vector.shape_cast %77 : vector<64x1xi1> to vector<64x1xi1>
    %80 = vector.broadcast %79 : vector<64x1xi1> to vector<64x256xi1>
    %81 = vector.broadcast %cst_47 : f32 to vector<64x256xf32>
    %82 = arith.select %80, %81, %78 : vector<64x256xi1>, vector<64x256xf32>
    %83 = arith.addf %75, %82 : vector<64x256xf32>
    %84 = vector.broadcast %62 : vector<1x256xf32> to vector<64x256xf32>
    %85 = arith.mulf %83, %84 : vector<64x256xf32>
    %86 = vector.broadcast %63 : vector<1x256xf32> to vector<64x256xf32>
    %87 = arith.addf %85, %86 : vector<64x256xf32>
    %cst_48 = arith.constant 0.000000e+00 : f32
    %88 = vector.broadcast %cst_48 : f32 to vector<64x256xf32>
    %89 = arith.maximumf %87, %88 : vector<64x256xf32>
    %c0_49 = arith.constant 0 : index
    %c0_50 = arith.constant 0 : index
    %90 = vector.load %arg16[%c0_49, %c0_50] : memref<16x64xbf16, #tpu.memory_space<vmem>>, vector<16x64xbf16>
    %c1_i32_51 = arith.constant 1 : i32
    %91 = tpu.dynamic_rotate %89 by %c1_i32_51 dim 0 : vector<64x256xf32>, i32 -> vector<64x256xf32>
    %92 = arith.maximumf %89, %91 : vector<64x256xf32>
    %c2_i32_52 = arith.constant 2 : i32
    %93 = tpu.dynamic_rotate %92 by %c2_i32_52 dim 0 : vector<64x256xf32>, i32 -> vector<64x256xf32>
    %94 = arith.maximumf %92, %93 : vector<64x256xf32>
    %95 = arith.truncf %94 : vector<64x256xf32> to vector<64x256xbf16>
    %cst_53 = arith.constant dense<0.000000e+00> : vector<16x256xf32>
    %96 = tpu.matmul %90, %95, %cst_53 {dimension_numbers = #tpu.dot_dimension_numbers<[1], [0], [0], [1], [0, 0, 1, 1], [], []>} : vector<16x64xbf16>, vector<64x256xbf16>, vector<16x256xf32> -> vector<16x256xf32>
    %97 = arith.truncf %96 : vector<16x256xf32> to vector<16x256xbf16>
    %c0_54 = arith.constant 0 : index
    %c0_55 = arith.constant 0 : index
    %98 = vector.load %arg17[%c0_54, %c0_55] : memref<256x256xbf16, #tpu.memory_space<vmem>>, vector<256x256xbf16>
    %c0_56 = arith.constant 0 : index
    %c0_57 = arith.constant 0 : index
    %99 = vector.load %arg18[%c0_56, %c0_57] : memref<256x256xbf16, #tpu.memory_space<vmem>>, vector<256x256xbf16>
    %c0_58 = arith.constant 0 : index
    %c0_59 = arith.constant 0 : index
    %100 = vector.load %arg19[%c0_58, %c0_59] : memref<256x256xbf16, #tpu.memory_space<vmem>>, vector<256x256xbf16>
    %c0_60 = arith.constant 0 : index
    %c0_61 = arith.constant 0 : index
    %101 = vector.load %arg20[%c0_60, %c0_61] : memref<1x256xf32, #tpu.memory_space<vmem>>, vector<1x256xf32>
    %c0_62 = arith.constant 0 : index
    %c0_63 = arith.constant 0 : index
    %102 = vector.load %arg21[%c0_62, %c0_63] : memref<1x256xf32, #tpu.memory_space<vmem>>, vector<1x256xf32>
    %cst_64 = arith.constant dense<0.000000e+00> : vector<16x256xf32>
    %103 = tpu.matmul %97, %98, %cst_64 {dimension_numbers = #tpu.dot_dimension_numbers<[1], [0], [0], [1], [0, 0, 1, 1], [], []>} : vector<16x256xbf16>, vector<256x256xbf16>, vector<16x256xf32> -> vector<16x256xf32>
    %cst_65 = arith.constant dense<0.000000e+00> : vector<16x256xf32>
    %104 = tpu.matmul %97, %99, %cst_65 {dimension_numbers = #tpu.dot_dimension_numbers<[1], [0], [0], [1], [0, 0, 1, 1], [], []>} : vector<16x256xbf16>, vector<256x256xbf16>, vector<16x256xf32> -> vector<16x256xf32>
    %cst_66 = arith.constant dense<0.000000e+00> : vector<16x256xf32>
    %105 = tpu.matmul %97, %100, %cst_66 {dimension_numbers = #tpu.dot_dimension_numbers<[1], [0], [0], [1], [0, 0, 1, 1], [], []>} : vector<16x256xbf16>, vector<256x256xbf16>, vector<16x256xf32> -> vector<16x256xf32>
    %106 = tpu.iota {dimensions = array<i32: 0>} : vector<16x1xi32>
    %c0_i32_67 = arith.constant 0 : i32
    %107 = vector.broadcast %c0_i32_67 : i32 to vector<16x1xi32>
    %108 = arith.cmpi eq, %106, %107 : vector<16x1xi32>
    %c1_i32_68 = arith.constant 1 : i32
    %109 = tpu.dynamic_rotate %103 by %c1_i32_68 dim 0 : vector<16x256xf32>, i32 -> vector<16x256xf32>
    %cst_69 = arith.constant 0.000000e+00 : f32
    %110 = vector.shape_cast %108 : vector<16x1xi1> to vector<16x1xi1>
    %111 = vector.broadcast %110 : vector<16x1xi1> to vector<16x256xi1>
    %112 = vector.broadcast %cst_69 : f32 to vector<16x256xf32>
    %113 = arith.select %111, %112, %109 : vector<16x256xi1>, vector<16x256xf32>
    %114 = arith.addf %104, %113 : vector<16x256xf32>
    %c15_i32 = arith.constant 15 : i32
    %115 = vector.broadcast %c15_i32 : i32 to vector<16x1xi32>
    %116 = arith.cmpi eq, %106, %115 : vector<16x1xi32>
    %c15_i32_70 = arith.constant 15 : i32
    %117 = tpu.dynamic_rotate %105 by %c15_i32_70 dim 0 : vector<16x256xf32>, i32 -> vector<16x256xf32>
    %cst_71 = arith.constant 0.000000e+00 : f32
    %118 = vector.shape_cast %116 : vector<16x1xi1> to vector<16x1xi1>
    %119 = vector.broadcast %118 : vector<16x1xi1> to vector<16x256xi1>
    %120 = vector.broadcast %cst_71 : f32 to vector<16x256xf32>
    %121 = arith.select %119, %120, %117 : vector<16x256xi1>, vector<16x256xf32>
    %122 = arith.addf %114, %121 : vector<16x256xf32>
    %123 = vector.broadcast %101 : vector<1x256xf32> to vector<16x256xf32>
    %124 = arith.mulf %122, %123 : vector<16x256xf32>
    %125 = vector.broadcast %102 : vector<1x256xf32> to vector<16x256xf32>
    %126 = arith.addf %124, %125 : vector<16x256xf32>
    %cst_72 = arith.constant 0.000000e+00 : f32
    %127 = vector.broadcast %cst_72 : f32 to vector<16x256xf32>
    %128 = arith.maximumf %126, %127 : vector<16x256xf32>
    %c0_73 = arith.constant 0 : index
    %c0_74 = arith.constant 0 : index
    %129 = vector.load %arg22[%c0_73, %c0_74] : memref<4x16xbf16, #tpu.memory_space<vmem>>, vector<4x16xbf16>
    %c1_i32_75 = arith.constant 1 : i32
    %130 = tpu.dynamic_rotate %128 by %c1_i32_75 dim 0 : vector<16x256xf32>, i32 -> vector<16x256xf32>
    %131 = arith.maximumf %128, %130 : vector<16x256xf32>
    %c2_i32_76 = arith.constant 2 : i32
    %132 = tpu.dynamic_rotate %131 by %c2_i32_76 dim 0 : vector<16x256xf32>, i32 -> vector<16x256xf32>
    %133 = arith.maximumf %131, %132 : vector<16x256xf32>
    %134 = arith.truncf %133 : vector<16x256xf32> to vector<16x256xbf16>
    %cst_77 = arith.constant dense<0.000000e+00> : vector<4x256xf32>
    %135 = tpu.matmul %129, %134, %cst_77 {dimension_numbers = #tpu.dot_dimension_numbers<[1], [0], [0], [1], [0, 0, 1, 1], [], []>} : vector<4x16xbf16>, vector<16x256xbf16>, vector<4x256xf32> -> vector<4x256xf32>
    %136 = arith.truncf %135 : vector<4x256xf32> to vector<4x256xbf16>
    %c0_78 = arith.constant 0 : index
    %c0_79 = arith.constant 0 : index
    %137 = vector.load %arg23[%c0_78, %c0_79] : memref<256x512xbf16, #tpu.memory_space<vmem>>, vector<256x512xbf16>
    %c0_80 = arith.constant 0 : index
    %c0_81 = arith.constant 0 : index
    %138 = vector.load %arg24[%c0_80, %c0_81] : memref<256x512xbf16, #tpu.memory_space<vmem>>, vector<256x512xbf16>
    %c0_82 = arith.constant 0 : index
    %c0_83 = arith.constant 0 : index
    %139 = vector.load %arg25[%c0_82, %c0_83] : memref<256x512xbf16, #tpu.memory_space<vmem>>, vector<256x512xbf16>
    %c0_84 = arith.constant 0 : index
    %c0_85 = arith.constant 0 : index
    %140 = vector.load %arg26[%c0_84, %c0_85] : memref<1x512xf32, #tpu.memory_space<vmem>>, vector<1x512xf32>
    %c0_86 = arith.constant 0 : index
    %c0_87 = arith.constant 0 : index
    %141 = vector.load %arg27[%c0_86, %c0_87] : memref<1x512xf32, #tpu.memory_space<vmem>>, vector<1x512xf32>
    %cst_88 = arith.constant dense<0.000000e+00> : vector<4x512xf32>
    %142 = tpu.matmul %136, %137, %cst_88 {dimension_numbers = #tpu.dot_dimension_numbers<[1], [0], [0], [1], [0, 0, 1, 1], [], []>} : vector<4x256xbf16>, vector<256x512xbf16>, vector<4x512xf32> -> vector<4x512xf32>
    %cst_89 = arith.constant dense<0.000000e+00> : vector<4x512xf32>
    %143 = tpu.matmul %136, %138, %cst_89 {dimension_numbers = #tpu.dot_dimension_numbers<[1], [0], [0], [1], [0, 0, 1, 1], [], []>} : vector<4x256xbf16>, vector<256x512xbf16>, vector<4x512xf32> -> vector<4x512xf32>
    %cst_90 = arith.constant dense<0.000000e+00> : vector<4x512xf32>
    %144 = tpu.matmul %136, %139, %cst_90 {dimension_numbers = #tpu.dot_dimension_numbers<[1], [0], [0], [1], [0, 0, 1, 1], [], []>} : vector<4x256xbf16>, vector<256x512xbf16>, vector<4x512xf32> -> vector<4x512xf32>
    %145 = tpu.iota {dimensions = array<i32: 0>} : vector<4x1xi32>
    %c0_i32_91 = arith.constant 0 : i32
    %146 = vector.broadcast %c0_i32_91 : i32 to vector<4x1xi32>
    %147 = arith.cmpi eq, %145, %146 : vector<4x1xi32>
    %148 = vector.extract_strided_slice %142 {offsets = [3, 0], sizes = [1, 512], strides = [1, 1]} : vector<4x512xf32> to vector<1x512xf32>
    %149 = vector.extract_strided_slice %142 {offsets = [0, 0], sizes = [3, 512], strides = [1, 1]} : vector<4x512xf32> to vector<3x512xf32>
    %150 = tpu.concatenate %148, %149 in 0 : vector<1x512xf32>, vector<3x512xf32> -> vector<4x512xf32>
    %cst_92 = arith.constant 0.000000e+00 : f32
    %151 = vector.shape_cast %147 : vector<4x1xi1> to vector<4x1xi1>
    %152 = vector.broadcast %151 : vector<4x1xi1> to vector<4x512xi1>
    %153 = vector.broadcast %cst_92 : f32 to vector<4x512xf32>
    %154 = arith.select %152, %153, %150 : vector<4x512xi1>, vector<4x512xf32>
    %155 = arith.addf %143, %154 : vector<4x512xf32>
    %c3_i32 = arith.constant 3 : i32
    %156 = vector.broadcast %c3_i32 : i32 to vector<4x1xi32>
    %157 = arith.cmpi eq, %145, %156 : vector<4x1xi32>
    %158 = vector.extract_strided_slice %144 {offsets = [1, 0], sizes = [3, 512], strides = [1, 1]} : vector<4x512xf32> to vector<3x512xf32>
    %159 = vector.extract_strided_slice %144 {offsets = [0, 0], sizes = [1, 512], strides = [1, 1]} : vector<4x512xf32> to vector<1x512xf32>
    %160 = tpu.concatenate %158, %159 in 0 : vector<3x512xf32>, vector<1x512xf32> -> vector<4x512xf32>
    %cst_93 = arith.constant 0.000000e+00 : f32
    %161 = vector.shape_cast %157 : vector<4x1xi1> to vector<4x1xi1>
    %162 = vector.broadcast %161 : vector<4x1xi1> to vector<4x512xi1>
    %163 = vector.broadcast %cst_93 : f32 to vector<4x512xf32>
    %164 = arith.select %162, %163, %160 : vector<4x512xi1>, vector<4x512xf32>
    %165 = arith.addf %155, %164 : vector<4x512xf32>
    %166 = vector.broadcast %140 : vector<1x512xf32> to vector<4x512xf32>
    %167 = arith.mulf %165, %166 : vector<4x512xf32>
    %168 = vector.broadcast %141 : vector<1x512xf32> to vector<4x512xf32>
    %169 = arith.addf %167, %168 : vector<4x512xf32>
    %cst_94 = arith.constant 0.000000e+00 : f32
    %170 = vector.broadcast %cst_94 : f32 to vector<4x512xf32>
    %171 = arith.maximumf %169, %170 : vector<4x512xf32>
    %cst_95 = arith.constant dense<0xFF800000> : vector<512xf32>
    %172 = vector.multi_reduction <maximumf>, %171, %cst_95 [0] : vector<4x512xf32> to vector<512xf32>
    %173 = vector.shape_cast %172 : vector<512xf32> to vector<1x512xf32>
    %174 = arith.truncf %173 : vector<1x512xf32> to vector<1x512xbf16>
    %c0_96 = arith.constant 0 : index
    %c0_97 = arith.constant 0 : index
    %175 = vector.load %arg28[%c0_96, %c0_97] : memref<512x512xbf16, #tpu.memory_space<vmem>>, vector<512x512xbf16>
    %cst_98 = arith.constant dense<0.000000e+00> : vector<1x512xf32>
    %176 = tpu.matmul %174, %175, %cst_98 {dimension_numbers = #tpu.dot_dimension_numbers<[1], [0], [0], [1], [0, 0, 1, 1], [], []>} : vector<1x512xbf16>, vector<512x512xbf16>, vector<1x512xf32> -> vector<1x512xf32>
    %c0_99 = arith.constant 0 : index
    %c0_100 = arith.constant 0 : index
    %177 = vector.load %arg29[%c0_99, %c0_100] : memref<1x512xf32, #tpu.memory_space<vmem>>, vector<1x512xf32>
    %178 = arith.addf %176, %177 : vector<1x512xf32>
    %cst_101 = arith.constant 0.000000e+00 : f32
    %179 = vector.broadcast %cst_101 : f32 to vector<1x512xf32>
    %180 = arith.maximumf %178, %179 : vector<1x512xf32>
    %181 = arith.truncf %180 : vector<1x512xf32> to vector<1x512xbf16>
    %c0_102 = arith.constant 0 : index
    %c0_103 = arith.constant 0 : index
    %182 = vector.load %arg30[%c0_102, %c0_103] : memref<512x256xbf16, #tpu.memory_space<vmem>>, vector<512x256xbf16>
    %cst_104 = arith.constant dense<0.000000e+00> : vector<1x256xf32>
    %183 = tpu.matmul %181, %182, %cst_104 {dimension_numbers = #tpu.dot_dimension_numbers<[1], [0], [0], [1], [0, 0, 1, 1], [], []>} : vector<1x512xbf16>, vector<512x256xbf16>, vector<1x256xf32> -> vector<1x256xf32>
    %c0_105 = arith.constant 0 : index
    %c0_106 = arith.constant 0 : index
    %184 = vector.load %arg31[%c0_105, %c0_106] : memref<1x256xf32, #tpu.memory_space<vmem>>, vector<1x256xf32>
    %185 = arith.addf %183, %184 : vector<1x256xf32>
    %cst_107 = arith.constant 0.000000e+00 : f32
    %186 = vector.broadcast %cst_107 : f32 to vector<1x256xf32>
    %187 = arith.maximumf %185, %186 : vector<1x256xf32>
    %188 = arith.truncf %187 : vector<1x256xf32> to vector<1x256xbf16>
    %c0_108 = arith.constant 0 : index
    %c0_109 = arith.constant 0 : index
    %189 = vector.load %arg32[%c0_108, %c0_109] : memref<256x128xbf16, #tpu.memory_space<vmem>>, vector<256x128xbf16>
    %cst_110 = arith.constant dense<0.000000e+00> : vector<1x128xf32>
    %190 = tpu.matmul %188, %189, %cst_110 {dimension_numbers = #tpu.dot_dimension_numbers<[1], [0], [0], [1], [0, 0, 1, 1], [], []>} : vector<1x256xbf16>, vector<256x128xbf16>, vector<1x128xf32> -> vector<1x128xf32>
    %c0_111 = arith.constant 0 : index
    %c0_112 = arith.constant 0 : index
    %191 = vector.load %arg33[%c0_111, %c0_112] : memref<1x128xf32, #tpu.memory_space<vmem>>, vector<1x128xf32>
    %192 = arith.addf %190, %191 : vector<1x128xf32>
    %c0_113 = arith.constant 0 : index
    %c0_114 = arith.constant 0 : index
    %c0_115 = arith.constant 0 : index
    %193 = vector.load %arg34[%c0_113, %c0_114, %c0_115] : memref<1x1x128xf32, #tpu.memory_space<vmem>>, vector<1x1x128xf32>
    %194 = vector.shape_cast %193 : vector<1x1x128xf32> to vector<1x128xf32>
    %195 = vector.shape_cast %192 : vector<1x128xf32> to vector<1x1x128xf32>
    tpu.vector_store %arg34[%c0_113, %c0_114, %c0_115], %195 {strides = array<i32>} : memref<1x1x128xf32, #tpu.memory_space<vmem>>, vector<1x1x128xf32>,
    return
  }
  func.func @transform_0(%arg0: i32) -> (i32, i32, i32) {
    %c0_i32 = arith.constant 0 : i32
    %c0_i32_0 = arith.constant 0 : i32
    %c0_i32_1 = arith.constant 0 : i32
    return %arg0, %c0_i32, %c0_i32_0 : i32, i32, i32
  }
  func.func @transform_1(%arg0: i32) -> (i32, i32) {
    %c0_i32 = arith.constant 0 : i32
    %c0_i32_0 = arith.constant 0 : i32
    %c0_i32_1 = arith.constant 0 : i32
    return %c0_i32, %c0_i32_0 : i32, i32
  }
  func.func @transform_2(%arg0: i32) -> (i32, i32) {
    %c0_i32 = arith.constant 0 : i32
    %c0_i32_0 = arith.constant 0 : i32
    %c0_i32_1 = arith.constant 0 : i32
    return %c0_i32, %c0_i32_0 : i32, i32
  }
  func.func @transform_3(%arg0: i32) -> (i32, i32) {
    %c0_i32 = arith.constant 0 : i32
    %c0_i32_0 = arith.constant 0 : i32
    %c0_i32_1 = arith.constant 0 : i32
    return %c0_i32, %c0_i32_0 : i32, i32
  }
  func.func @transform_4(%arg0: i32) -> (i32, i32) {
    %c0_i32 = arith.constant 0 : i32
    %c0_i32_0 = arith.constant 0 : i32
    %c0_i32_1 = arith.constant 0 : i32
    return %c0_i32, %c0_i32_0 : i32, i32
  }
  func.func @transform_5(%arg0: i32) -> (i32, i32) {
    %c0_i32 = arith.constant 0 : i32
    %c0_i32_0 = arith.constant 0 : i32
    %c0_i32_1 = arith.constant 0 : i32
    return %c0_i32, %c0_i32_0 : i32, i32
  }
  func.func @transform_6(%arg0: i32) -> (i32, i32) {
    %c0_i32 = arith.constant 0 : i32
    %c0_i32_0 = arith.constant 0 : i32
    %c0_i32_1 = arith.constant 0 : i32
    return %c0_i32, %c0_i32_0 : i32, i32
  }
  func.func @transform_7(%arg0: i32) -> (i32, i32) {
    %c0_i32 = arith.constant 0 : i32
    %c0_i32_0 = arith.constant 0 : i32
    %c0_i32_1 = arith.constant 0 : i32
    return %c0_i32, %c0_i32_0 : i32, i32
  }
  func.func @transform_8(%arg0: i32) -> (i32, i32) {
    %c0_i32 = arith.constant 0 : i32
    %c0_i32_0 = arith.constant 0 : i32
    %c0_i32_1 = arith.constant 0 : i32
    return %c0_i32, %c0_i32_0 : i32, i32
  }
  func.func @transform_9(%arg0: i32) -> (i32, i32) {
    %c0_i32 = arith.constant 0 : i32
    %c0_i32_0 = arith.constant 0 : i32
    %c0_i32_1 = arith.constant 0 : i32
    return %c0_i32, %c0_i32_0 : i32, i32
  }
  func.func @transform_10(%arg0: i32) -> (i32, i32) {
    %c0_i32 = arith.constant 0 : i32
    %c0_i32_0 = arith.constant 0 : i32
    %c0_i32_1 = arith.constant 0 : i32
    return %c0_i32, %c0_i32_0 : i32, i32
  }
  func.func @transform_11(%arg0: i32) -> (i32, i32) {
    %c0_i32 = arith.constant 0 : i32
    %c0_i32_0 = arith.constant 0 : i32
    %c0_i32_1 = arith.constant 0 : i32
    return %c0_i32, %c0_i32_0 : i32, i32
  }
  func.func @transform_12(%arg0: i32) -> (i32, i32) {
    %c0_i32 = arith.constant 0 : i32
    %c0_i32_0 = arith.constant 0 : i32
    %c0_i32_1 = arith.constant 0 : i32
    return %c0_i32, %c0_i32_0 : i32, i32
  }
  func.func @transform_13(%arg0: i32) -> (i32, i32) {
    %c0_i32 = arith.constant 0 : i32
    %c0_i32_0 = arith.constant 0 : i32
    %c0_i32_1 = arith.constant 0 : i32
    return %c0_i32, %c0_i32_0 : i32, i32
  }
  func.func @transform_14(%arg0: i32) -> (i32, i32) {
    %c0_i32 = arith.constant 0 : i32
    %c0_i32_0 = arith.constant 0 : i32
    %c0_i32_1 = arith.constant 0 : i32
    return %c0_i32, %c0_i32_0 : i32, i32
  }
  func.func @transform_15(%arg0: i32) -> (i32, i32) {
    %c0_i32 = arith.constant 0 : i32
    %c0_i32_0 = arith.constant 0 : i32
    %c0_i32_1 = arith.constant 0 : i32
    return %c0_i32, %c0_i32_0 : i32, i32
  }
  func.func @transform_16(%arg0: i32) -> (i32, i32) {
    %c0_i32 = arith.constant 0 : i32
    %c0_i32_0 = arith.constant 0 : i32
    %c0_i32_1 = arith.constant 0 : i32
    return %c0_i32, %c0_i32_0 : i32, i32
  }
  func.func @transform_17(%arg0: i32) -> (i32, i32) {
    %c0_i32 = arith.constant 0 : i32
    %c0_i32_0 = arith.constant 0 : i32
    %c0_i32_1 = arith.constant 0 : i32
    return %c0_i32, %c0_i32_0 : i32, i32
  }
  func.func @transform_18(%arg0: i32) -> (i32, i32) {
    %c0_i32 = arith.constant 0 : i32
    %c0_i32_0 = arith.constant 0 : i32
    %c0_i32_1 = arith.constant 0 : i32
    return %c0_i32, %c0_i32_0 : i32, i32
  }
  func.func @transform_19(%arg0: i32) -> (i32, i32) {
    %c0_i32 = arith.constant 0 : i32
    %c0_i32_0 = arith.constant 0 : i32
    %c0_i32_1 = arith.constant 0 : i32
    return %c0_i32, %c0_i32_0 : i32, i32
  }
  func.func @transform_20(%arg0: i32) -> (i32, i32) {
    %c0_i32 = arith.constant 0 : i32
    %c0_i32_0 = arith.constant 0 : i32
    %c0_i32_1 = arith.constant 0 : i32
    return %c0_i32, %c0_i32_0 : i32, i32
  }
  func.func @transform_21(%arg0: i32) -> (i32, i32) {
    %c0_i32 = arith.constant 0 : i32
    %c0_i32_0 = arith.constant 0 : i32
    %c0_i32_1 = arith.constant 0 : i32
    return %c0_i32, %c0_i32_0 : i32, i32
  }
  func.func @transform_22(%arg0: i32) -> (i32, i32) {
    %c0_i32 = arith.constant 0 : i32
    %c0_i32_0 = arith.constant 0 : i32
    %c0_i32_1 = arith.constant 0 : i32
    return %c0_i32, %c0_i32_0 : i32, i32
  }
  func.func @transform_23(%arg0: i32) -> (i32, i32) {
    %c0_i32 = arith.constant 0 : i32
    %c0_i32_0 = arith.constant 0 : i32
    %c0_i32_1 = arith.constant 0 : i32
    return %c0_i32, %c0_i32_0 : i32, i32
  }
  func.func @transform_24(%arg0: i32) -> (i32, i32) {
    %c0_i32 = arith.constant 0 : i32
    %c0_i32_0 = arith.constant 0 : i32
    %c0_i32_1 = arith.constant 0 : i32
    return %c0_i32, %c0_i32_0 : i32, i32
  }
  func.func @transform_25(%arg0: i32) -> (i32, i32) {
    %c0_i32 = arith.constant 0 : i32
    %c0_i32_0 = arith.constant 0 : i32
    %c0_i32_1 = arith.constant 0 : i32
    return %c0_i32, %c0_i32_0 : i32, i32
  }
  func.func @transform_26(%arg0: i32) -> (i32, i32) {
    %c0_i32 = arith.constant 0 : i32
    %c0_i32_0 = arith.constant 0 : i32
    %c0_i32_1 = arith.constant 0 : i32
    return %c0_i32, %c0_i32_0 : i32, i32
  }
  func.func @transform_27(%arg0: i32) -> (i32, i32) {
    %c0_i32 = arith.constant 0 : i32
    %c0_i32_0 = arith.constant 0 : i32
    %c0_i32_1 = arith.constant 0 : i32
    return %c0_i32, %c0_i32_0 : i32, i32
  }
  func.func @transform_28(%arg0: i32) -> (i32, i32) {
    %c0_i32 = arith.constant 0 : i32
    %c0_i32_0 = arith.constant 0 : i32
    %c0_i32_1 = arith.constant 0 : i32
    return %c0_i32, %c0_i32_0 : i32, i32
  }
  func.func @transform_29(%arg0: i32) -> (i32, i32) {
    %c0_i32 = arith.constant 0 : i32
    %c0_i32_0 = arith.constant 0 : i32
    %c0_i32_1 = arith.constant 0 : i32
    return %c0_i32, %c0_i32_0 : i32, i32
  }
  func.func @transform_30(%arg0: i32) -> (i32, i32) {
    %c0_i32 = arith.constant 0 : i32
    %c0_i32_0 = arith.constant 0 : i32
    %c0_i32_1 = arith.constant 0 : i32
    return %c0_i32, %c0_i32_0 : i32, i32
  }
  func.func @transform_31(%arg0: i32) -> (i32, i32) {
    %c0_i32 = arith.constant 0 : i32
    %c0_i32_0 = arith.constant 0 : i32
    %c0_i32_1 = arith.constant 0 : i32
    return %c0_i32, %c0_i32_0 : i32, i32
  }
  func.func @transform_32(%arg0: i32) -> (i32, i32) {
    %c0_i32 = arith.constant 0 : i32
    %c0_i32_0 = arith.constant 0 : i32
    %c0_i32_1 = arith.constant 0 : i32
    return %c0_i32, %c0_i32_0 : i32, i32
  }
  func.func @transform_33(%arg0: i32) -> (i32, i32, i32) {
    %c0_i32 = arith.constant 0 : i32
    %c0_i32_0 = arith.constant 0 : i32
    %c0_i32_1 = arith.constant 0 : i32
    return %arg0, %c0_i32, %c0_i32_0 : i32, i32, i32
  }
}

</mosaic_0001>

<bundles_post_ra>
// kernel: raw_audio_cnn_forward.1
= control target key start
LH: loop header
LB: loop body
LE: loop exit
PB: predicated region body
PF: predicated region fallthrough
CT: control target
= control target key end

     0   :  { %s11410_s6 = smov 1   ;;  %s11411_s10 = smov 2   ;;  %s14520_s0 = inlined_call_operand.smem [shape: u32[34], index: -1, kind: input, shape index: {}] }
   0x1   :  { %s11453_s5 = sld [smem:[%s14520_s0]]   ;;  %s11412_s14 = smov 3  }
   0x2   :  { %s11458_s9 = sld [smem:[%s14520_s0 + %s11410_s6]]   ;;  %s11413_s18 = smov 4  }
   0x3   :  { %s11463_s13 = sld [smem:[%s14520_s0 + %s11411_s10]]   ;;  %s11414_s22 = smov 5  }
   0x4   :  { %s11468_s17 = sld [smem:[%s14520_s0 + %s11412_s14]]   ;;  %s11415_s26 = smov 6  }
   0x5   :  { %s11473_s21 = sld [smem:[%s14520_s0 + %s11413_s18]]   ;;  %s11416_s30 = smov 7  }
   0x6   :  { %s11478_s25 = sld [smem:[%s14520_s0 + %s11414_s22]]   ;;  %s11417_s4 = smov 8  }
   0x7   :  { %14588 = sst [smem:[#allocation5_spill]] %s11453_s5  ;;  %s11418_s10 = smov 9  }
   0x8   :  { %14589 = sst [smem:[#allocation6_spill]] %s11458_s9  ;;  %s11419_s15 = smov 10  }
   0x9   :  { %14590 = sst [smem:[#allocation7_spill]] %s11463_s13  ;;  %s11420_s20 = smov 11  }
   0xa   :  { %s11483_s29 = sld [smem:[%s14520_s0 + %s11415_s26]]   ;;  %s11421_s26 = smov 12  }
   0xb   :  { %s11488_s3 = sld [smem:[%s14520_s0 + %s11416_s30]]   ;;  %s11422_s1 = smov 13  }
   0xc   :  { %s11493_s8 = sld [smem:[%s14520_s0 + %s11417_s4]]   ;;  %s11423_s7 = smov 14  }
   0xd   :  { %s11498_s14 = sld [smem:[%s14520_s0 + %s11418_s10]]   ;;  %s11425_s22 = smov 16  }
   0xe   :  { %s11503_s19 = sld [smem:[%s14520_s0 + %s11419_s15]]   ;;  %s11424_s15 = smov 15  }
   0xf   :  { %s11508_s24 = sld [smem:[%s14520_s0 + %s11420_s20]]   ;;  %s11426_s28 = smov 17  }
  0x10   :  { %s11513_s30 = sld [smem:[%s14520_s0 + %s11421_s26]]  }
  0x11   :  { %14591 = sst [smem:[#allocation8_spill]] %s11488_s3 }
  0x12   :  { %14592 = sst [smem:[#allocation9_spill]] %s11493_s8 }
  0x13   :  { %14593 = sst [smem:[#allocation10_spill]] %s11498_s14 }
  0x14   :  { %s11518_s6 = sld [smem:[%s14520_s0 + %s11422_s1]]  }
  0x15   :  { %s11523_s12 = sld [smem:[%s14520_s0 + %s11423_s7]]   ;;  %s11427_s7 = smov 18  }
  0x16   :  { %s11528_s20 = sld [smem:[%s14520_s0 + %s11424_s15]]   ;;  %s11428_s15 = smov 19  }
  0x17   :  { %s11533_s27 = sld [smem:[%s14520_s0 + %s11425_s22]]   ;;  %s11429_s22 = smov 20  }
  0x18   :  { %s11538_s4 = sld [smem:[%s14520_s0 + %s11426_s28]]   ;;  %s11430_s28 = smov 21  }
  0x1a   :  { %14594 = sst [smem:[#allocation11_spill]] %s11518_s6 }
  0x1b   :  { %14595 = sst [smem:[#allocation12_spill]] %s11523_s12 }
  0x1c   :  { %14596 = sst [smem:[#allocation13_spill]] %s11528_s20 }
  0x1d   :  { %s11543_s12 = sld [smem:[%s14520_s0 + %s11427_s7]]   ;;  %s11431_s7 = smov 22  }
  0x1e   :  { %14597 = sst [smem:[#allocation14_spill]] %s11538_s4 }
  0x1f   :  { %s11548_s20 = sld [smem:[%s14520_s0 + %s11428_s15]]   ;;  %s11432_s15 = smov 23  }
  0x20   :  { %s11553_s6 = sld [smem:[%s14520_s0 + %s11429_s22]]   ;;  %s11433_s22 = smov 24  }
  0x21   :  { %s11558_s4 = sld [smem:[%s14520_s0 + %s11430_s28]]   ;;  %s11434_s28 = smov 25  }
  0x23   :  { %14598 = sst [smem:[#allocation15_spill]] %s11543_s12 }
  0x24   :  { %s11563_s12 = sld [smem:[%s14520_s0 + %s11431_s7]]   ;;  %s11435_s7 = smov 26  }
  0x25   :  { %14599 = sst [smem:[#allocation16_spill]] %s11548_s20 }
  0x26   :  { %14600 = sst [smem:[#allocation17_spill]] %s11553_s6 }
  0x27   :  { %14601 = sst [smem:[#allocation18_spill]] %s11558_s4 }
  0x28   :  { %s11568_s20 = sld [smem:[%s14520_s0 + %s11432_s15]]   ;;  %s11436_s15 = smov 27  }
  0x29   :  { %s11573_s6 = sld [smem:[%s14520_s0 + %s11433_s22]]   ;;  %s11437_s22 = smov 28  }
  0x2a   :  { %14602 = sst [smem:[#allocation19_spill]] %s11563_s12 }
  0x2b   :  { %s11578_s4 = sld [smem:[%s14520_s0 + %s11434_s28]]   ;;  %s11438_s28 = smov 29  }
  0x2c   :  { %s11583_s12 = sld [smem:[%s14520_s0 + %s11435_s7]]   ;;  %s11439_s7 = smov 30  }
  0x2e   :  { %14603 = sst [smem:[#allocation20_spill]] %s11568_s20 }
  0x2f   :  { %14604 = sst [smem:[#allocation21_spill]] %s11573_s6 }
  0x30   :  { %s11588_s20 = sld [smem:[%s14520_s0 + %s11436_s15]]   ;;  %s11440_s15 = smov 31  }
  0x31   :  { %14605 = sst [smem:[#allocation22_spill]] %s11578_s4 }
  0x32   :  { %14606 = sst [smem:[#allocation23_spill]] %s11583_s12 }
  0x33   :  { %s11593_s6 = sld [smem:[%s14520_s0 + %s11437_s22]]   ;;  %s11441_s22 = smov 32  }
  0x34   :  { %s11598_s4 = sld [smem:[%s14520_s0 + %s11438_s28]]   ;;  %s11442_s28 = smov 33  }
  0x35   :  { %s11603_s12 = sld [smem:[%s14520_s0 + %s11439_s7]]  }
  0x36   :  { %14607 = sst [smem:[#allocation24_spill]] %s11588_s20 }
  0x37   :  { %s11608_s20 = sld [smem:[%s14520_s0 + %s11440_s15]]  }
  0x39   :  { %14608 = sst [smem:[#allocation25_spill]] %s11593_s6 }
  0x3a   :  { %14609 = sst [smem:[#allocation26_spill]] %s11598_s4 }
  0x3b   :  { %14610 = sst [smem:[#allocation27_spill]] %s11603_s12 }
  0x3c   :  { %s11613_s6 = sld [smem:[%s14520_s0 + %s11441_s22]]  }
  0x3d   :  { %s11618_s4 = sld [smem:[%s14520_s0 + %s11442_s28]]  }
  0x42   :  { %14611 = sst [smem:[#allocation28_spill]] %s11613_s6 }
  0x43   :  { %72 = vsyncpa [#allocation3], 0 }
  0x44   :  { %74 = vsyncpa [#allocation3 + $0x1], 0  ;;  %s11620_s7 = smov 0   ;;  %s11622_s10 = smov 0  }
  0x45   :  { %s11624_s11 = smov 0   ;;  %s11626_s15 = smov 0  }
  0x46 LB: > { %s14612_s14 = sld [smem:[#allocation10_spill]]  ;;  %s11641_s0 = sadd.s32 4294967295, %s11408_s15   ;;  %s11404_s11 = sphi %s11624_s11, %s14809_s11   ;;  %s11400_s10 = sphi %s11622_s10, %s14808_s10   ;;  %s11396_s7 = sphi %s11620_s7, %s14807_s7   ;;  %s11408_s15 = sphi %s11626_s15, %s14810_s15  }
  0x47   : > { %s14613_s13 = sld [smem:[#allocation7_spill]]  ;;  %s9197_s16 = sadd.s32 4294967294, %s11408_s15  }
  0x48   : > { %s14614_s9 = sld [smem:[#allocation6_spill]]  ;;  %s11645_s18 = sadd.s32 1, %s11408_s15  }
  0x49   : > { %s785_s22 = sadd.s32 1, %s11404_s11  ;;  %s782_s23 = ssub.s32 %s11408_s15, %s11645_s18 }
  0x4a   : > { %p795_p0 = scmp.ne.s32.totalorder %s11404_s11, %s11400_s10  ;;  %p783_p1 = scmp.eq.s32.totalorder %s782_s23, 0 }
  0x4b   : > { %p796_p2 = scmp.eq.s32.totalorder %s11641_s0, 1  ;;  %p801_p3 = scmp.ne.s32.totalorder %s11400_s10, %s11396_s7 }
  0x4c   : > { %p802_p4 = scmp.eq.s32.totalorder %s9197_s16, 1  ;;  %p9200_p7 = scmp.ge.s32.totalorder %s11408_s15, 1 }
  0x4d   : > { %s11656_s26 = scalar_select %p783_p1, %s11404_s11, %s785_s22  }
  0x4e   : > { %p11658_p5 = por %p796_p2, %p795_p0  ;;  %p11662_p6 = por %p802_p4, %p801_p3 }
  0x4f   : > { %p924_p8 = scmp.lt.s32.totalorder %s11408_s15, 3 }
  0x51   : > { %p925_p9 = pnand %p9200_p7, %p924_p8 }
  0x53   : > { %928 = sbr.rel (%p925_p9) target bundleno = 3186 (0xc72), region = 152 }
  0x58   : > { %s14617_s5 = sld [smem:[#allocation5_spill]]  ;;  %v10429_v0 = vld [vmem:[%s14614_s9 + $0x38] sm:$0xff]   ;;  %p1007_p10 = scmp.lt.s32.totalorder %s11641_s0, 1  ;;  %v10430_v1 = vld [vmem:[%s14614_s9 + $0x30] sm:$0xff]   ;;  %v10431_v2 = vld [vmem:[%s14614_s9 + $0x28] sm:$0xff]   ;;  %vm5032_vm6 = vcmask 523264  }
  0x59   : > { %10068 = vmatprep.subr.bf16.mxu0 %v10429_v0  ;;  %v10432_v3 = vld [vmem:[%s14614_s9 + $0x20] sm:$0xff]   ;;  %v10433_v5 = vld [vmem:[%s14614_s9 + $0x18] sm:$0xff]   ;;  %v10434_v6 = vld [vmem:[%s14614_s9 + $0x10] sm:$0xff]   ;;  %s14684_s3 = sld [smem:[#allocation8_spill]]  ;;  %vm5883_vm8 = vcmask 130048   ;;  %vm6948_vm9 = vcmask 1040384  }
  0x5a   : > { %s1008_s2 = scalar_select %p1007_p10, %s11641_s0, 1  ;;  %10069 = vmatpush3.bf16.msra.mxu0 %v10429_v0  ;;  %v10435_v7 = vld [vmem:[%s14614_s9 + $0x8] sm:$0xff]   ;;  %v10436_v8 = vld [vmem:[%s14614_s9] sm:$0xff]   ;;  %vm7380_vm11 = vcmask 1042432   ;;  %vm7449_vm12 = vcmask 1043456  }
  0x5b   : > { %10070 = vmatprep.subr.bf16.mxu0 %v10430_v1  ;;  %v11733_v59 = vld [vmem:[%s14613_s13] ss:$0 sm:$0xff]  ;;  %s14691_s8 = sld [smem:[#allocation9_spill]] }
  0x5c   : > { %s9861_s16 = sshll.u32 %s1008_s2, 9  ;;  %v11736_v61 = vld [vmem:[%s11468_s17] ss:$0 sm:$0xff]  ;;  %s14789_s23 = sld [smem:[#allocation11_spill]] }
  0x5d   : > { %s14790_s2 = sld [smem:[#allocation12_spill]] }
  0x5e   : > { %s11674_s22 = scalar_lea.vmem %s14617_s5, %s9861_s16  ;;  %10071 = vmatpush3.bf16.msra.mxu0 %v10430_v1  ;;  %s14791_s16 = sld [smem:[#allocation15_spill]] }
  0x5f   : > { %10072 = vmatprep.subr.bf16.mxu0 %v10431_v2  ;;  %v10437_v4 = vld [vmem:[%s11674_s22] sm:$0xff]   ;;  %v10438_v9 = vld [vmem:[%s11674_s22 + $0x8] sm:$0xff]   ;;  %v10439_v10 = vld [vmem:[%s11674_s22 + $0x10] sm:$0xff]   ;;  %s14802_s5 = sld [smem:[#allocation23_spill]] }
  0x60   : > { %10084 = vmatprep.mubr.bf16.mxu0 %v10437_v4  ;;  %v10440_v11 = vld [vmem:[%s11674_s22 + $0x18] sm:$0xff]   ;;  %v10441_v12 = vld [vmem:[%s11674_s22 + $0x20] sm:$0xff]   ;;  %v10442_v13 = vld [vmem:[%s11674_s22 + $0x28] sm:$0xff]   ;;  %s14805_s12 = sld [smem:[#allocation27_spill]] }
  0x61   : > { %v10443_v14 = vld [vmem:[%s11674_s22 + $0x30] sm:$0xff]   ;;  %v10444_v15 = vld [vmem:[%s11674_s22 + $0x38] sm:$0xff]   ;;  %v10445_v16 = vld [vmem:[%s11674_s22 + $0x40] sm:$0xff]   ;;  %s14806_s6 = sld [smem:[#allocation28_spill]] }
  0x62   : > { %10073 = vmatpush3.bf16.msra.mxu0 %v10431_v2  ;;  %v10446_v17 = vld [vmem:[%s11674_s22 + $0x48] sm:$0xff]   ;;  %v10447_v18 = vld [vmem:[%s11674_s22 + $0x50] sm:$0xff]   ;;  %v10448_v19 = vld [vmem:[%s11674_s22 + $0x58] sm:$0xff]  }
  0x63   : > { %10074 = vmatprep.subr.bf16.mxu0 %v10432_v3  ;;  %v10449_v20 = vld [vmem:[%s11674_s22 + $0x60] sm:$0xff]   ;;  %v10450_v21 = vld [vmem:[%s11674_s22 + $0x68] sm:$0xff]   ;;  %v10451_v22 = vld [vmem:[%s11674_s22 + $0x70] sm:$0xff]  }
  0x64   : > { %v10452_v23 = vld [vmem:[%s11674_s22 + $0x78] sm:$0xff]   ;;  %v10453_v24 = vld [vmem:[%s11674_s22 + $0x80] sm:$0xff]   ;;  %v10454_v25 = vld [vmem:[%s11674_s22 + $0x88] sm:$0xff]  }
  0x65   : > { %v10455_v26 = vld [vmem:[%s11674_s22 + $0x90] sm:$0xff]   ;;  %v10456_v27 = vld [vmem:[%s11674_s22 + $0x98] sm:$0xff]   ;;  %v10457_v28 = vld [vmem:[%s11674_s22 + $0xa0] sm:$0xff]  }
  0x66   : > { %10075 = vmatpush3.bf16.msra.mxu0 %v10432_v3  ;;  %v10458_v29 = vld [vmem:[%s11674_s22 + $0xa8] sm:$0xff]   ;;  %v10459_v30 = vld [vmem:[%s11674_s22 + $0xb0] sm:$0xff]   ;;  %v10460_v31 = vld [vmem:[%s11674_s22 + $0xb8] sm:$0xff]  }
  0x67   : > { %10076 = vmatprep.subr.bf16.mxu0 %v10433_v5  ;;  %v10461_v32 = vld [vmem:[%s11674_s22 + $0xc0] sm:$0xff]   ;;  %v10462_v33 = vld [vmem:[%s11674_s22 + $0xc8] sm:$0xff]   ;;  %v10463_v34 = vld [vmem:[%s11674_s22 + $0xd0] sm:$0xff]  }
  0x68   : > { %v10464_v35 = vld [vmem:[%s11674_s22 + $0xd8] sm:$0xff]   ;;  %v10465_v36 = vld [vmem:[%s11674_s22 + $0xe0] sm:$0xff]   ;;  %v10466_v37 = vld [vmem:[%s11674_s22 + $0xe8] sm:$0xff]  }
  0x69   : > { %v10467_v38 = vld [vmem:[%s11674_s22 + $0xf0] sm:$0xff]   ;;  %v10468_v39 = vld [vmem:[%s11674_s22 + $0xf8] sm:$0xff]   ;;  %v10469_v40 = vld [vmem:[%s11674_s22 + $0x100] sm:$0xff]  }
  0x6a   : > { %10077 = vmatpush3.bf16.msra.mxu0 %v10433_v5  ;;  %v10470_v41 = vld [vmem:[%s11674_s22 + $0x108] sm:$0xff]   ;;  %v10471_v42 = vld [vmem:[%s11674_s22 + $0x110] sm:$0xff]   ;;  %v10472_v43 = vld [vmem:[%s11674_s22 + $0x118] sm:$0xff]  }
  0x6b   : > { %10078 = vmatprep.subr.bf16.mxu0 %v10434_v6  ;;  %v10473_v44 = vld [vmem:[%s11674_s22 + $0x120] sm:$0xff]   ;;  %v10474_v45 = vld [vmem:[%s11674_s22 + $0x128] sm:$0xff]   ;;  %v10475_v46 = vld [vmem:[%s11674_s22 + $0x130] sm:$0xff]  }
  0x6c   : > { %v10476_v47 = vld [vmem:[%s11674_s22 + $0x138] sm:$0xff]   ;;  %v10477_v48 = vld [vmem:[%s11674_s22 + $0x140] sm:$0xff]   ;;  %v10478_v49 = vld [vmem:[%s11674_s22 + $0x148] sm:$0xff]  }
  0x6d   : > { %v10479_v50 = vld [vmem:[%s11674_s22 + $0x150] sm:$0xff]   ;;  %v10480_v51 = vld [vmem:[%s11674_s22 + $0x158] sm:$0xff]   ;;  %v10481_v52 = vld [vmem:[%s11674_s22 + $0x160] sm:$0xff]  }
  0x6e   : > { %10079 = vmatpush3.bf16.msra.mxu0 %v10434_v6  ;;  %v10482_v53 = vld [vmem:[%s11674_s22 + $0x168] sm:$0xff]   ;;  %v10483_v54 = vld [vmem:[%s11674_s22 + $0x170] sm:$0xff]   ;;  %v10484_v55 = vld [vmem:[%s11674_s22 + $0x178] sm:$0xff]  }
  0x6f   : > { %10080 = vmatprep.subr.bf16.mxu0 %v10435_v7  ;;  %v10485_v56 = vld [vmem:[%s11674_s22 + $0x180] sm:$0xff]   ;;  %v10486_v57 = vld [vmem:[%s11674_s22 + $0x188] sm:$0xff]   ;;  %v10487_v58 = vld [vmem:[%s11674_s22 + $0x190] sm:$0xff]  }
  0x70   : > { %v10488_v0 = vld [vmem:[%s11674_s22 + $0x198] sm:$0xff]   ;;  %v10489_v2 = vld [vmem:[%s11674_s22 + $0x1a0] sm:$0xff]  }
  0x72   : > { %10081 = vmatpush3.bf16.msra.mxu0 %v10435_v7 }
  0x73   : > { %10082 = vmatprep.subr.bf16.mxu0 %v10436_v8 }
  0x76   : > { %10083 = vmatpush3.bf16.msra.mxu0 %v10436_v8 }
  0x79   : > { %10085 = vmatmul.mubr.bf16.vlgmr.msra.gmra.mxu0 %v10438_v9 }
  0x7a   : > { %10088 = vmatprep.mubr.bf16.mxu0 %v10439_v10 }
  0x81   : > { %10089 = vmatmul.mubr.bf16.gmra.mxu0 %v10440_v11 }
  0x82   : > { %10092 = vmatprep.mubr.bf16.mxu0 %v10441_v12 }
  0x89   : > { %10093 = vmatmul.mubr.bf16.gmra.mxu0 %v10442_v13 }
  0x8a   : > { %10096 = vmatprep.mubr.bf16.mxu0 %v10443_v14 }
  0x91   : > { %10097 = vmatmul.mubr.bf16.gmra.mxu0 %v10444_v15 }
  0x92   : > { %10100 = vmatprep.mubr.bf16.mxu0 %v10445_v16  ;;  %v10490_v16 = vld [vmem:[%s11674_s22 + $0x1a8] sm:$0xff]  }
  0x99   : > { %10101 = vmatmul.mubr.bf16.gmra.mxu0 %v10446_v17 }
  0x9a   : > { %10104 = vmatprep.mubr.bf16.mxu0 %v10447_v18 }
  0xa1   : > { %10105 = vmatmul.mubr.bf16.gmra.mxu0 %v10448_v19 }
  0xa2   : > { %10108 = vmatprep.mubr.bf16.mxu0 %v10449_v20 }
  0xa9   : > { %10109 = vmatmul.mubr.bf16.gmra.mxu0 %v10450_v21  ;;  %v10491_v21 = vld [vmem:[%s11674_s22 + $0x1b0] sm:$0xff]  }
  0xaa   : > { %10112 = vmatprep.mubr.bf16.mxu0 %v10451_v22 }
  0xb1   : > { %10113 = vmatmul.mubr.bf16.gmra.mxu0 %v10452_v23 }
  0xb2   : > { %10116 = vmatprep.mubr.bf16.mxu0 %v10453_v24 }
  0xb9   : > { %10117 = vmatmul.mubr.bf16.gmra.mxu0 %v10454_v25 }
  0xba   : > { %10120 = vmatprep.mubr.bf16.mxu0 %v10455_v26 }
  0xc1   : > { %10121 = vmatmul.mubr.bf16.gmra.mxu0 %v10456_v27 }
  0xc2   : > { %10124 = vmatprep.mubr.bf16.mxu0 %v10457_v28 }
  0xc9   : > { %10125 = vmatmul.mubr.bf16.gmra.mxu0 %v10458_v29 }
  0xca   : > { %10128 = vmatprep.mubr.bf16.mxu0 %v10459_v30 }
  0xd1   : > { %10129 = vmatmul.mubr.bf16.gmra.mxu0 %v10460_v31 }
  0xd2   : > { %10132 = vmatprep.mubr.bf16.mxu0 %v10461_v32 }
  0xd9   : > { %10133 = vmatmul.mubr.bf16.gmra.mxu0 %v10462_v33 }
  0xda   : > { %10136 = vmatprep.mubr.bf16.mxu0 %v10463_v34 }
  0xe1   : > { %10137 = vmatmul.mubr.bf16.gmra.mxu0 %v10464_v35 }
  0xe2   : > { %10140 = vmatprep.mubr.bf16.mxu0 %v10465_v36  ;;  %v10492_v36 = vld [vmem:[%s11674_s22 + $0x1b8] sm:$0xff]  }
  0xe9   : > { %10141 = vmatmul.mubr.bf16.gmra.mxu0 %v10466_v37 }
  0xea   : > { %10144 = vmatprep.mubr.bf16.mxu0 %v10467_v38 }
  0xf1   : > { %10145 = vmatmul.mubr.bf16.gmra.mxu0 %v10468_v39 }
  0xf2   : > { %10148 = vmatprep.mubr.bf16.mxu0 %v10469_v40 }
  0xf9   : > { %10149 = vmatmul.mubr.bf16.gmra.mxu0 %v10470_v41  ;;  %v10493_v41 = vld [vmem:[%s11674_s22 + $0x1c0] sm:$0xff]  }
  0xfa   : > { %10152 = vmatprep.mubr.bf16.mxu0 %v10471_v42 }
 0x101   : > { %10153 = vmatmul.mubr.bf16.gmra.mxu0 %v10472_v43 }
 0x102   : > { %10156 = vmatprep.mubr.bf16.mxu0 %v10473_v44 }
 0x109   : > { %10157 = vmatmul.mubr.bf16.gmra.mxu0 %v10474_v45 }
 0x10a   : > { %10160 = vmatprep.mubr.bf16.mxu0 %v10475_v46 }
 0x111   : > { %10161 = vmatmul.mubr.bf16.gmra.mxu0 %v10476_v47 }
 0x112   : > { %10164 = vmatprep.mubr.bf16.mxu0 %v10477_v48 }
 0x119   : > { %10165 = vmatmul.mubr.bf16.gmra.mxu0 %v10478_v49 }
 0x11a   : > { %10168 = vmatprep.mubr.bf16.mxu0 %v10479_v50 }
 0x121   : > { %10169 = vmatmul.mubr.bf16.gmra.mxu0 %v10480_v51 }
 0x122   : > { %10172 = vmatprep.mubr.bf16.mxu0 %v10481_v52 }
 0x129   : > { %10173 = vmatmul.mubr.bf16.gmra.mxu0 %v10482_v53 }
 0x12a   : > { %10176 = vmatprep.mubr.bf16.mxu0 %v10483_v54 }
 0x131   : > { %10177 = vmatmul.mubr.bf16.gmra.mxu0 %v10484_v55 }
 0x132   : > { %10180 = vmatprep.mubr.bf16.mxu0 %v10485_v56  ;;  %v10494_v56 = vld [vmem:[%s11674_s22 + $0x1c8] sm:$0xff]  }
 0x139   : > { %v10086_v60 = vpop.f32.mrf.mxu0  ;;  %10181 = vmatmul.mubr.bf16.gmra.mxu0 %v10486_v57 }
 0x13a   : > { %v2143_v62 = vmul.f32 %v10086_v60, %v11733_v59  ;;  %10184 = vmatprep.mubr.bf16.mxu0 %v10487_v58 }
 0x13b   : > { %v1623_v63 = vpop.f32.mrf.mxu0 }
 0x13c   : > { %v2141_v1 = vmul.f32 %v11733_v59, %v1623_v63  ;;  %v2278_v4 = vadd.f32 %v11736_v61, %v2143_v62  ;;  %v10495_v63 = vld [vmem:[%s11674_s22 + $0x1d0] sm:$0xff]  }
 0x13d   : > { %v10087_v3 = vpop.f32.mrf.mxu0 }
 0x13e   : > { %v2144_v5 = vmul.f32 %v10087_v3, %v11733_v59  ;;  %v2276_v7 = vadd.f32 %v11736_v61, %v2141_v1  ;;  %v2406_v11 = vmax.f32 %v2278_v4, 0.0 }
 0x13f   : > { %v1626_v6 = vpop.f32.mrf.mxu0 }
 0x140   : > { %v2279_v8 = vadd.f32 %v11736_v61, %v2144_v5  ;;  %v2142_v9 = vmul.f32 %v11733_v59, %v1626_v6  ;;  %v2404_v17 = vmax.f32 %v2276_v7, 0.0 }
 0x141   : > { %v10090_v10 = vpop.f32.mrf.mxu0  ;;  %10185 = vmatmul.mubr.bf16.gmra.mxu0 %v10488_v0 }
 0x142   : > { %v2407_v12 = vmax.f32 %v2279_v8, 0.0  ;;  %v2277_v13 = vadd.f32 %v11736_v61, %v2142_v9  ;;  %v2147_v14 = vmul.f32 %v10090_v10, %v11733_v59  ;;  %10188 = vmatprep.mubr.bf16.mxu0 %v10489_v2 }
 0x143   : > { %v1639_v15 = vpop.f32.mrf.mxu0 }
 0x144   : > { %v11750_v18 = vpack.c.bf16 %v2407_v12, %v2406_v11  ;;  %v2405_v19 = vmax.f32 %v2277_v13, 0.0  ;;  %v2145_v20 = vmul.f32 %v11733_v59, %v1639_v15  ;;  %v2282_v24 = vadd.f32 %v11736_v61, %v2147_v14  ;;  %v10496_v14 = vld [vmem:[%s11674_s22 + $0x1d8] sm:$0xff]  }
 0x145   : > { %v10091_v22 = vpop.f32.mrf.mxu0 }
 0x146   : > { %v11754_v23 = vpack.c.bf16 %v2405_v19, %v2404_v17  ;;  %v2148_v25 = vmul.f32 %v10091_v22, %v11733_v59  ;;  %v2280_v27 = vadd.f32 %v11736_v61, %v2145_v20  ;;  %v2410_v31 = vmax.f32 %v2282_v24, 0.0  ;;  %v10497_v19 = vld [vmem:[%s11674_s22 + $0x1e0] sm:$0xff]  }
 0x147   : > { %v1642_v26 = vpop.f32.mrf.mxu0 }
 0x148   : > { %v2283_v28 = vadd.f32 %v11736_v61, %v2148_v25  ;;  %v2146_v29 = vmul.f32 %v11733_v59, %v1642_v26  ;;  %v2408_v37 = vmax.f32 %v2280_v27, 0.0 }
 0x149   : > { %v10094_v30 = vpop.f32.mrf.mxu0  ;;  %10189 = vmatmul.mubr.bf16.gmra.mxu0 %v10490_v16 }
 0x14a   : > { %v2411_v32 = vmax.f32 %v2283_v28, 0.0  ;;  %v2281_v33 = vadd.f32 %v11736_v61, %v2146_v29  ;;  %v2151_v34 = vmul.f32 %v10094_v30, %v11733_v59  ;;  %10192 = vmatprep.mubr.bf16.mxu0 %v10491_v21 }
 0x14b   : > { %v1655_v35 = vpop.f32.mrf.mxu0 }
 0x14c   : > { %v11764_v38 = vpack.c.bf16 %v2411_v32, %v2410_v31  ;;  %v2409_v39 = vmax.f32 %v2281_v33, 0.0  ;;  %v2149_v40 = vmul.f32 %v11733_v59, %v1655_v35  ;;  %v2286_v44 = vadd.f32 %v11736_v61, %v2151_v34  ;;  %v10498_v33 = vld [vmem:[%s11674_s22 + $0x1e8] sm:$0xff]  }
 0x14d   : > { %v10095_v42 = vpop.f32.mrf.mxu0 }
 0x14e   : > { %v11768_v43 = vpack.c.bf16 %v2409_v39, %v2408_v37  ;;  %v2152_v45 = vmul.f32 %v10095_v42, %v11733_v59  ;;  %v2284_v47 = vadd.f32 %v11736_v61, %v2149_v40  ;;  %v2414_v51 = vmax.f32 %v2286_v44, 0.0  ;;  %v10499_v37 = vld [vmem:[%s11674_s22 + $0x1f0] sm:$0xff]  }
 0x14f   : > { %v1658_v46 = vpop.f32.mrf.mxu0 }
 0x150   : > { %v2287_v48 = vadd.f32 %v11736_v61, %v2152_v45  ;;  %v2150_v49 = vmul.f32 %v11733_v59, %v1658_v46  ;;  %v2412_v57 = vmax.f32 %v2284_v47, 0.0  ;;  %v10501_v47 = vld [vmem:[%s11473_s21 + $0x38] sm:$0xff]  }
 0x151   : > { %v10098_v50 = vpop.f32.mrf.mxu0  ;;  %10193 = vmatmul.mubr.bf16.gmra.mxu0 %v10492_v36  ;;  %10212 = vmatprep.subr.bf16.mxu1 %v10501_v47 }
 0x152   : > { %v2415_v52 = vmax.f32 %v2287_v48, 0.0  ;;  %v2285_v53 = vadd.f32 %v11736_v61, %v2150_v49  ;;  %v2155_v54 = vmul.f32 %v10098_v50, %v11733_v59  ;;  %10196 = vmatprep.mubr.bf16.mxu0 %v10493_v41  ;;  %v10500_v49 = vld [vmem:[%s11674_s22 + $0x1f8] sm:$0xff]   ;;  %10213 = vmatpush3.bf16.msra.mxu1 %v10501_v47  ;;  %s14792_s22 = sld [smem:[#allocation13_spill]] }
 0x153   : > { %v1671_v55 = vpop.f32.mrf.mxu0 }
 0x154   : > { %v11778_v58 = vpack.c.bf16 %v2415_v52, %v2414_v51  ;;  %v2413_v60 = vmax.f32 %v2285_v53, 0.0  ;;  %v2153_v62 = vmul.f32 %v11733_v59, %v1671_v55  ;;  %v2290_v2 = vadd.f32 %v11736_v61, %v2155_v54  ;;  %v10502_v54 = vld [vmem:[%s11473_s21 + $0x30] sm:$0xff]  }
 0x155   : > { %v10099_v0 = vpop.f32.mrf.mxu0  ;;  %10214 = vmatprep.subr.bf16.mxu1 %v10502_v54 }
 0x156   : > { %v11782_v1 = vpack.c.bf16 %v2413_v60, %v2412_v57  ;;  %v2156_v3 = vmul.f32 %v10099_v0, %v11733_v59  ;;  %v2288_v5 = vadd.f32 %v11736_v61, %v2153_v62  ;;  %v2418_v9 = vmax.f32 %v2290_v2, 0.0  ;;  %10215 = vmatpush3.bf16.msra.mxu1 %v10502_v54  ;;  %v10503_v0 = vld [vmem:[%s11473_s21 + $0x28] sm:$0xff]  }
 0x157   : > { %v1674_v4 = vpop.f32.mrf.mxu0  ;;  %10216 = vmatprep.subr.bf16.mxu1 %v10503_v0 }
 0x158   : > { %v2291_v6 = vadd.f32 %v11736_v61, %v2156_v3  ;;  %v2154_v7 = vmul.f32 %v11733_v59, %v1674_v4  ;;  %v2416_v15 = vmax.f32 %v2288_v5, 0.0 }
 0x159   : > { %v10102_v8 = vpop.f32.mrf.mxu0  ;;  %10197 = vmatmul.mubr.bf16.gmra.mxu0 %v10494_v56 }
 0x15a   : > { %v2419_v10 = vmax.f32 %v2291_v6, 0.0  ;;  %v2289_v11 = vadd.f32 %v11736_v61, %v2154_v7  ;;  %v2159_v12 = vmul.f32 %v10102_v8, %v11733_v59  ;;  %10200 = vmatprep.mubr.bf16.mxu0 %v10495_v63  ;;  %10217 = vmatpush3.bf16.msra.mxu1 %v10503_v0  ;;  %v10504_v7 = vld [vmem:[%s11473_s21 + $0x20] sm:$0xff]  }
 0x15b   : > { %v11791_v13 = vpop.f32.mrf.mxu0  ;;  %10218 = vmatprep.subr.bf16.mxu1 %v10504_v7 }
 0x15c   : > { %v11794_v16 = vpack.c.bf16 %v2419_v10, %v2418_v9  ;;  %v2417_v17 = vmax.f32 %v2289_v11, 0.0  ;;  %v2294_v22 = vadd.f32 %v11736_v61, %v2159_v12 }
 0x15d   : > { %v10103_v20 = vpop.f32.mrf.mxu0 }
 0x15e   : > { %v11797_v21 = vpack.c.bf16 %v2417_v17, %v2416_v15  ;;  %v2160_v24 = vmul.f32 %v10103_v20, %v11733_v59  ;;  %v2422_v28 = vmax.f32 %v2294_v22, 0.0  ;;  %10219 = vmatpush3.bf16.msra.mxu1 %v10504_v7  ;;  %v10505_v15 = vld [vmem:[%s11473_s21 + $0x18] sm:$0xff]  }
 0x15f   : > { %v11801_v25 = vpop.f32.mrf.mxu0  ;;  %10220 = vmatprep.subr.bf16.mxu1 %v10505_v15 }
 0x160   : > { %v2295_v26 = vadd.f32 %v11736_v61, %v2160_v24 }
 0x161   : > { %v10106_v27 = vpop.f32.mrf.mxu0  ;;  %10201 = vmatmul.mubr.bf16.gmra.mxu0 %v10496_v14 }
 0x162   : > { %v2423_v29 = vmax.f32 %v2295_v26, 0.0  ;;  %v2163_v30 = vmul.f32 %v10106_v27, %v11733_v59  ;;  %10204 = vmatprep.mubr.bf16.mxu0 %v10497_v19  ;;  %10221 = vmatpush3.bf16.msra.mxu1 %v10505_v15  ;;  %v10506_v27 = vld [vmem:[%s11473_s21 + $0x10] sm:$0xff]  }
 0x163   : > { %v11805_v31 = vpop.f32.mrf.mxu0  ;;  %10222 = vmatprep.subr.bf16.mxu1 %v10506_v27 }
 0x164   : > { %v11807_v32 = vpack.c.bf16 %v2423_v29, %v2422_v28  ;;  %v2298_v35 = vadd.f32 %v11736_v61, %v2163_v30 }
 0x165   : > { %v10107_v34 = vpop.f32.mrf.mxu0 }
 0x166   : > { %v2164_v36 = vmul.f32 %v10107_v34, %v11733_v59  ;;  %v2426_v42 = vmax.f32 %v2298_v35, 0.0  ;;  %10223 = vmatpush3.bf16.msra.mxu1 %v10506_v27 }
 0x167   : > { %v11813_v39 = vpop.f32.mrf.mxu0 }
 0x168   : > { %v2299_v40 = vadd.f32 %v11736_v61, %v2164_v36 }
 0x169   : > { %v10110_v41 = vpop.f32.mrf.mxu0  ;;  %10205 = vmatmul.mubr.bf16.gmra.mxu0 %v10498_v33 }
 0x16a   : > { %v2427_v44 = vmax.f32 %v2299_v40, 0.0  ;;  %v2167_v45 = vmul.f32 %v10110_v41, %v11733_v59  ;;  %10208 = vmatprep.mubr.bf16.mxu0 %v10499_v37  ;;  %v10507_v41 = vld [vmem:[%s11473_s21 + $0x8] sm:$0xff]  }
 0x16b   : > { %v11817_v46 = vpop.f32.mrf.mxu0  ;;  %10224 = vmatprep.subr.bf16.mxu1 %v10507_v41 }
 0x16c   : > { %v11820_v48 = vpack.c.bf16 %v2427_v44, %v2426_v42  ;;  %v2302_v51 = vadd.f32 %v11736_v61, %v2167_v45  ;;  %10225 = vmatpush3.bf16.msra.mxu1 %v10507_v41 }
 0x16d   : > { %v10111_v50 = vpop.f32.mrf.mxu0 }
 0x16e   : > { %v2168_v52 = vmul.f32 %v10111_v50, %v11733_v59  ;;  %v2430_v57 = vmax.f32 %v2302_v51, 0.0 }
 0x16f   : > { %v11825_v53 = vpop.f32.mrf.mxu0 }
 0x170   : > { %v2303_v55 = vadd.f32 %v11736_v61, %v2168_v52 }
 0x171   : > { %v10114_v56 = vpop.f32.mrf.mxu0  ;;  %10209 = vmatmul.mubr.bf16.gmra.mxu0 %v10500_v49 }
 0x172   : > { %v2431_v60 = vmax.f32 %v2303_v55, 0.0  ;;  %v2171_v62 = vmul.f32 %v10114_v56, %v11733_v59  ;;  %v10508_v55 = vld [vmem:[%s11473_s21] sm:$0xff]  }
 0x173   : > { %v11830_v63 = vpop.f32.mrf.mxu0  ;;  %10226 = vmatprep.subr.bf16.mxu1 %v10508_v55 }
 0x174   : > { %v11833_v2 = vpack.c.bf16 %v2431_v60, %v2430_v57  ;;  %v2306_v4 = vadd.f32 %v11736_v61, %v2171_v62  ;;  %10227 = vmatpush3.bf16.msra.mxu1 %v10508_v55 }
 0x175   : > { %v10115_v3 = vpop.f32.mrf.mxu0 }
 0x176   : > { %v2172_v5 = vmul.f32 %v10115_v3, %v11733_v59  ;;  %v2434_v10 = vmax.f32 %v2306_v4, 0.0 }
 0x177   : > { %v11837_v6 = vpop.f32.mrf.mxu0 }
 0x178   : > { %v2307_v8 = vadd.f32 %v11736_v61, %v2172_v5 }
 0x179   : > { %v10118_v9 = vpop.f32.mrf.mxu0 }
 0x17a   : > { %v2435_v11 = vmax.f32 %v2307_v8, 0.0  ;;  %v2175_v12 = vmul.f32 %v10118_v9, %v11733_v59 }
 0x17b   : > { %v1751_v14 = vpop.f32.mrf.mxu0 }
 0x17c   : > { %v11843_v17 = vpack.c.bf16 %v2435_v11, %v2434_v10  ;;  %v2173_v19 = vmul.f32 %v11733_v59, %v1751_v14  ;;  %v2310_v22 = vadd.f32 %v11736_v61, %v2175_v12 }
 0x17d   : > { %v10119_v20 = vpop.f32.mrf.mxu0 }
 0x17e   : > { %14618 = vst [vmem:[#allocation29_spill] sm:$0xff] %v11843_v17  ;;  %v2176_v24 = vmul.f32 %v10119_v20, %v11733_v59  ;;  %v2308_v28 = vadd.f32 %v11736_v61, %v2173_v19  ;;  %v2438_v34 = vmax.f32 %v2310_v22, 0.0 }
 0x17f   : > { %v1754_v26 = vpop.f32.mrf.mxu0 }
 0x180   : > { %v2311_v29 = vadd.f32 %v11736_v61, %v2176_v24  ;;  %v2174_v30 = vmul.f32 %v11733_v59, %v1754_v26  ;;  %v2436_v42 = vmax.f32 %v2308_v28, 0.0 }
 0x181   : > { %v10122_v33 = vpop.f32.mrf.mxu0 }
 0x182   : > { %v2439_v35 = vmax.f32 %v2311_v29, 0.0  ;;  %v2309_v36 = vadd.f32 %v11736_v61, %v2174_v30  ;;  %v2179_v37 = vmul.f32 %v10122_v33, %v11733_v59 }
 0x183   : > { %v1767_v40 = vpop.f32.mrf.mxu0 }
 0x184   : > { %v11855_v44 = vpack.c.bf16 %v2439_v35, %v2438_v34  ;;  %v2437_v45 = vmax.f32 %v2309_v36, 0.0  ;;  %v2177_v47 = vmul.f32 %v11733_v59, %v1767_v40  ;;  %v2314_v51 = vadd.f32 %v11736_v61, %v2179_v37 }
 0x185   : > { %v10123_v49 = vpop.f32.mrf.mxu0 }
 0x186   : > { %v11858_v50 = vpack.c.bf16 %v2437_v45, %v2436_v42  ;;  %v2180_v52 = vmul.f32 %v10123_v49, %v11733_v59  ;;  %v2312_v57 = vadd.f32 %v11736_v61, %v2177_v47  ;;  %v2442_v4 = vmax.f32 %v2314_v51, 0.0 }
 0x187   : > { %v1770_v54 = vpop.f32.mrf.mxu0 }
 0x188   : > { %v2315_v60 = vadd.f32 %v11736_v61, %v2180_v52  ;;  %v2178_v62 = vmul.f32 %v11733_v59, %v1770_v54  ;;  %v2440_v10 = vmax.f32 %v2312_v57, 0.0 }
 0x189   : > { %v10126_v3 = vpop.f32.mrf.mxu0 }
 0x18a   : > { %v2443_v5 = vmax.f32 %v2315_v60, 0.0  ;;  %v2313_v7 = vadd.f32 %v11736_v61, %v2178_v62  ;;  %v2183_v8 = vmul.f32 %v10126_v3, %v11733_v59 }
 0x18b   : > { %v1783_v9 = vpop.f32.mrf.mxu0 }
 0x18c   : > { %v11872_v11 = vpack.c.bf16 %v2443_v5, %v2442_v4  ;;  %v2441_v12 = vmax.f32 %v2313_v7, 0.0  ;;  %v2181_v14 = vmul.f32 %v11733_v59, %v1783_v9  ;;  %v2318_v20 = vadd.f32 %v11736_v61, %v2183_v8 }
 0x18d   : > { %v10127_v15 = vpop.f32.mrf.mxu0  ;;  %v2158_v5 = vmul.f32 %v11733_v59, %v11801_v25 }
 0x18e   : > { %v11875_v19 = vpack.c.bf16 %v2441_v12, %v2440_v10  ;;  %v2184_v22 = vmul.f32 %v10127_v15, %v11733_v59  ;;  %v2316_v27 = vadd.f32 %v11736_v61, %v2181_v14  ;;  %v2446_v34 = vmax.f32 %v2318_v20, 0.0 }
 0x18f   : > { %v1786_v24 = vpop.f32.mrf.mxu0  ;;  %v2157_v14 = vmul.f32 %v11733_v59, %v11791_v13 }
 0x190   : > { %v2319_v28 = vadd.f32 %v11736_v61, %v2184_v22  ;;  %v2182_v29 = vmul.f32 %v11733_v59, %v1786_v24  ;;  %v2444_v41 = vmax.f32 %v2316_v27, 0.0 }
 0x191   : > { %v10130_v33 = vpop.f32.mrf.mxu0 }
 0x192   : > { %v2447_v35 = vmax.f32 %v2319_v28, 0.0  ;;  %v2317_v36 = vadd.f32 %v11736_v61, %v2182_v29  ;;  %v2187_v37 = vmul.f32 %v10130_v33, %v11733_v59  ;;  %v2293_v28 = vadd.f32 %v11736_v61, %v2158_v5 }
 0x193   : > { %v1799_v40 = vpop.f32.mrf.mxu0  ;;  %v2161_v5 = vmul.f32 %v11733_v59, %v11805_v31 }
 0x194   : > { %v11888_v42 = vpack.c.bf16 %v2447_v35, %v2446_v34  ;;  %v2445_v45 = vmax.f32 %v2317_v36, 0.0  ;;  %v2185_v47 = vmul.f32 %v11733_v59, %v1799_v40  ;;  %v2322_v52 = vadd.f32 %v11736_v61, %v2187_v37 }
 0x195   : > { %v10131_v49 = vpop.f32.mrf.mxu0  ;;  %v2292_v35 = vadd.f32 %v11736_v61, %v2157_v14  ;;  %v2296_v31 = vadd.f32 %v11736_v61, %v2161_v5 }
 0x196   : > { %v11891_v51 = vpack.c.bf16 %v2445_v45, %v2444_v41  ;;  %v2188_v54 = vmul.f32 %v10131_v49, %v11733_v59  ;;  %v2320_v60 = vadd.f32 %v11736_v61, %v2185_v47  ;;  %v2450_v8 = vmax.f32 %v2322_v52, 0.0 }
 0x197   : > { %v1802_v55 = vpop.f32.mrf.mxu0  ;;  %v2421_v47 = vmax.f32 %v2293_v28, 0.0  ;;  %v2162_v49 = vmul.f32 %v11733_v59, %v11813_v39 }
 0x198   : > { %v2323_v62 = vadd.f32 %v11736_v61, %v2188_v54  ;;  %v2186_v3 = vmul.f32 %v11733_v59, %v1802_v55  ;;  %v2448_v20 = vmax.f32 %v2320_v60, 0.0 }
 0x199   : > { %v10134_v7 = vpop.f32.mrf.mxu0  ;;  %v2297_v39 = vadd.f32 %v11736_v61, %v2162_v49 }
 0x19a   : > { %v2451_v9 = vmax.f32 %v2323_v62, 0.0  ;;  %v2321_v10 = vadd.f32 %v11736_v61, %v2186_v3  ;;  %v2191_v12 = vmul.f32 %v10134_v7, %v11733_v59  ;;  %v2420_v3 = vmax.f32 %v2292_v35, 0.0 }
 0x19b   : > { %v1815_v15 = vpop.f32.mrf.mxu0 }
 0x19c   : > { %v11908_v22 = vpack.c.bf16 %v2451_v9, %v2450_v8  ;;  %v2449_v24 = vmax.f32 %v2321_v10, 0.0  ;;  %v2189_v27 = vmul.f32 %v11733_v59, %v1815_v15  ;;  %v2326_v33 = vadd.f32 %v11736_v61, %v2191_v12 }
 0x19d   : > { %v10135_v25 = vpop.f32.mrf.mxu0  ;;  %v11934_v15 = vpack.c.bf16 %v2421_v47, %v2420_v3 }
 0x19e   : > { %v11912_v29 = vpack.c.bf16 %v2449_v24, %v2448_v20  ;;  %v2192_v34 = vmul.f32 %v10135_v25, %v11733_v59  ;;  %v2324_v37 = vadd.f32 %v11736_v61, %v2189_v27  ;;  %v2454_v54 = vmax.f32 %v2326_v33, 0.0 }
 0x19f   : > { %v1818_v36 = vpop.f32.mrf.mxu0 }
 0x1a0   : > { %v2327_v40 = vadd.f32 %v11736_v61, %v2192_v34  ;;  %v2190_v41 = vmul.f32 %v11733_v59, %v1818_v36  ;;  %v2452_v8 = vmax.f32 %v2324_v37, 0.0  ;;  %v2425_v37 = vmax.f32 %v2297_v39, 0.0 }
 0x1a1   : > { %v10138_v52 = vpop.f32.mrf.mxu0 }
 0x1a2   : > { %v2455_v55 = vmax.f32 %v2327_v40, 0.0  ;;  %v2325_v60 = vadd.f32 %v11736_v61, %v2190_v41  ;;  %v2195_v62 = vmul.f32 %v10138_v52, %v11733_v59  ;;  %v2166_v40 = vmul.f32 %v11733_v59, %v11825_v53 }
 0x1a3   : > { %v1831_v7 = vpop.f32.mrf.mxu0 }
 0x1a4   : > { %v11930_v9 = vpack.c.bf16 %v2455_v55, %v2454_v54  ;;  %v2453_v10 = vmax.f32 %v2325_v60, 0.0  ;;  %v2193_v12 = vmul.f32 %v11733_v59, %v1831_v7  ;;  %v2330_v24 = vadd.f32 %v11736_v61, %v2195_v62 }
 0x1a5   : > { %v10139_v14 = vpop.f32.mrf.mxu0  ;;  %v2424_v55 = vmax.f32 %v2296_v31, 0.0  ;;  %v2165_v60 = vmul.f32 %v11733_v59, %v11817_v46  ;;  %v2301_v53 = vadd.f32 %v11736_v61, %v2166_v40 }
 0x1a6   : > { %v11936_v20 = vpack.c.bf16 %v2453_v10, %v2452_v8  ;;  %v2196_v27 = vmul.f32 %v10139_v14, %v11733_v59  ;;  %v2328_v33 = vadd.f32 %v11736_v61, %v2193_v12  ;;  %v2458_v47 = vmax.f32 %v2330_v24, 0.0  ;;  %v11958_v10 = vld [vmem:[%s11483_s29 + $0x38] sm:$0xff]  }
 0x1a7   : > { %v1834_v28 = vpop.f32.mrf.mxu0  ;;  %v11961_v39 = vpack.c.bf16 %v2425_v37, %v2424_v55  ;;  %10260 = vmatprep.subr.bf16.mxu1 %v11958_v10  ;;  %v2429_v40 = vmax.f32 %v2301_v53, 0.0 }
 0x1a8   : > { %v2331_v34 = vadd.f32 %v11736_v61, %v2196_v27  ;;  %v2194_v35 = vmul.f32 %v11733_v59, %v1834_v28  ;;  %v2456_v3 = vmax.f32 %v2328_v33, 0.0  ;;  %v2300_v27 = vadd.f32 %v11736_v61, %v2165_v60 }
 0x1a9   : > { %v10142_v41 = vpop.f32.mrf.mxu0 }
 0x1aa   : > { %v2459_v49 = vmax.f32 %v2331_v34, 0.0  ;;  %v2329_v52 = vadd.f32 %v11736_v61, %v2194_v35  ;;  %v2199_v54 = vmul.f32 %v10142_v41, %v11733_v59  ;;  %v2170_v41 = vmul.f32 %v11733_v59, %v11837_v6 }
 0x1ab   : > { %v1847_v62 = vpop.f32.mrf.mxu0  ;;  %v2428_v60 = vmax.f32 %v2300_v27, 0.0 }
 0x1ac   : > { %v11954_v5 = vpack.c.bf16 %v2459_v49, %v2458_v47  ;;  %v2457_v7 = vmax.f32 %v2329_v52, 0.0  ;;  %v2197_v8 = vmul.f32 %v11733_v59, %v1847_v62  ;;  %v2334_v24 = vadd.f32 %v11736_v61, %v2199_v54 }
 0x1ad   : > { %v10143_v12 = vpop.f32.mrf.mxu0  ;;  %v2169_v62 = vmul.f32 %v11733_v59, %v11830_v63  ;;  %v2305_v6 = vadd.f32 %v11736_v61, %v2170_v41  ;;  %v11998_v41 = vld [vmem:[%s14613_s13] ss:$0 sm:$0xff] }
 0x1ae   : > { %v11963_v14 = vpack.c.bf16 %v2457_v7, %v2456_v3  ;;  %v2200_v46 = vmul.f32 %v10143_v12, %v11733_v59  ;;  %v2332_v33 = vadd.f32 %v11736_v61, %v2197_v8  ;;  %v2462_v49 = vmax.f32 %v2334_v24, 0.0 }
 0x1af   : > { %v1850_v31 = vpop.f32.mrf.mxu0  ;;  %v2304_v63 = vadd.f32 %v11736_v61, %v2169_v62 }
 0x1b0   : > { %v2335_v34 = vadd.f32 %v11736_v61, %v2200_v46  ;;  %v2198_v35 = vmul.f32 %v11733_v59, %v1850_v31  ;;  %v2460_v7 = vmax.f32 %v2332_v33, 0.0  ;;  %v11986_v46 = vpack.c.bf16 %v2429_v40, %v2428_v60 }
 0x1b1   : > { %v10146_v47 = vpop.f32.mrf.mxu0 }
 0x1b2   : > { %v2463_v52 = vmax.f32 %v2335_v34, 0.0  ;;  %v2333_v54 = vadd.f32 %v11736_v61, %v2198_v35  ;;  %v2203_v55 = vmul.f32 %v10146_v47, %v11733_v59  ;;  %14619 = vst [vmem:[#allocation30_spill] sm:$0xff] %v11986_v46 }
 0x1b3   : > { %v1863_v3 = vpop.f32.mrf.mxu0 }
 0x1b4   : > { %v11982_v8 = vpack.c.bf16 %v2463_v52, %v2462_v49  ;;  %v2461_v53 = vmax.f32 %v2333_v54, 0.0  ;;  %v2201_v12 = vmul.f32 %v11733_v59, %v1863_v3  ;;  %v2338_v27 = vadd.f32 %v11736_v61, %v2203_v55 }
 0x1b5   : > { %v10147_v24 = vpop.f32.mrf.mxu0  ;;  %v2433_v54 = vmax.f32 %v2305_v6, 0.0  ;;  %v12014_v6 = vld [vmem:[%s11468_s17] ss:$0 sm:$0xff] }
 0x1b6   : > { %v11988_v31 = vpack.c.bf16 %v2461_v53, %v2460_v7  ;;  %v2204_v34 = vmul.f32 %v10147_v24, %v11733_v59  ;;  %v2336_v47 = vadd.f32 %v11736_v61, %v2201_v12  ;;  %v2466_v55 = vmax.f32 %v2338_v27, 0.0 }
 0x1b7   : > { %v1866_v35 = vpop.f32.mrf.mxu0  ;;  %v2432_v53 = vmax.f32 %v2304_v63, 0.0 }
 0x1b8   : > { %14620 = vst [vmem:[#allocation31_spill] sm:$0xff] %v11988_v31  ;;  %v2339_v49 = vadd.f32 %v11736_v61, %v2204_v34  ;;  %v2202_v40 = vmul.f32 %v11998_v41, %v1866_v35  ;;  %v2464_v12 = vmax.f32 %v2336_v47, 0.0 }
 0x1b9   : > { %v10150_v59 = vpop.f32.mrf.mxu0  ;;  %v12009_v33 = vpack.c.bf16 %v2433_v54, %v2432_v53 }
 0x1ba   : > { %v2467_v60 = vmax.f32 %v2339_v49, 0.0  ;;  %v2337_v62 = vadd.f32 %v11736_v61, %v2202_v40  ;;  %v2207_v3 = vmul.f32 %v11998_v41, %v10150_v59 }
 0x1bb   : > { %v12005_v7 = vpop.f32.mrf.mxu0  ;;  %14622 = vst [vmem:[#allocation33_spill] sm:$0xff] %v12009_v33 }
 0x1bc   : > { %v12007_v24 = vpack.c.bf16 %v2467_v60, %v2466_v55  ;;  %v2465_v34 = vmax.f32 %v2337_v62, 0.0  ;;  %v2342_v27 = vadd.f32 %v12014_v6, %v2207_v3 }
 0x1bd   : > { %v10151_v35 = vpop.f32.mrf.mxu0 }
 0x1be   : > { %14621 = vst [vmem:[#allocation32_spill] sm:$0xff] %v12007_v24  ;;  %v12011_v37 = vpack.c.bf16 %v2465_v34, %v2464_v12  ;;  %v2208_v61 = vmul.f32 %v11998_v41, %v10151_v35  ;;  %v2470_v59 = vmax.f32 %v2342_v27, 0.0 }
 0x1bf   : > { %v12018_v49 = vpop.f32.mrf.mxu0 }
 0x1c0   : > { %14623 = vst [vmem:[#allocation34_spill] sm:$0xff] %v12011_v37  ;;  %v2343_v47 = vadd.f32 %v12014_v6, %v2208_v61 }
 0x1c1   : > { %v10154_v54 = vpop.f32.mrf.mxu0 }
 0x1c2   : > { %v2471_v55 = vmax.f32 %v2343_v47, 0.0  ;;  %v2211_v60 = vmul.f32 %v11998_v41, %v10154_v54 }
 0x1c3   : > { %v12026_v62 = vpop.f32.mrf.mxu0 }
 0x1c4   : > { %v12028_v3 = vpack.c.bf16 %v2471_v55, %v2470_v59  ;;  %v2346_v12 = vadd.f32 %v12014_v6, %v2211_v60 }
 0x1c5   : > { %v10155_v53 = vpop.f32.mrf.mxu0 }
 0x1c6   : > { %v2212_v34 = vmul.f32 %v11998_v41, %v10155_v53  ;;  %v2474_v40 = vmax.f32 %v2346_v12, 0.0 }
 0x1c7   : > { %v12032_v35 = vpop.f32.mrf.mxu0 }
 0x1c8   : > { %v2347_v61 = vadd.f32 %v12014_v6, %v2212_v34 }
 0x1c9   : > { %v10158_v63 = vpop.f32.mrf.mxu0 }
 0x1ca   : > { %v2475_v52 = vmax.f32 %v2347_v61, 0.0  ;;  %v2215_v27 = vmul.f32 %v11998_v41, %v10158_v63 }
 0x1cb   : > { %v1911_v47 = vpop.f32.mrf.mxu0 }
 0x1cc   : > { %v12036_v54 = vpack.c.bf16 %v2475_v52, %v2474_v40  ;;  %v2213_v59 = vmul.f32 %v11998_v41, %v1911_v47  ;;  %v2350_v28 = vadd.f32 %v12014_v6, %v2215_v27 }
 0x1cd   : > { %v10159_v55 = vpop.f32.mrf.mxu0 }
 0x1ce   : > { %v2216_v60 = vmul.f32 %v11998_v41, %v10159_v55  ;;  %v2348_v36 = vadd.f32 %v12014_v6, %v2213_v59  ;;  %v2478_v25 = vmax.f32 %v2350_v28, 0.0 }
 0x1cf   : > { %v1914_v53 = vpop.f32.mrf.mxu0 }
 0x1d0   : > { %v2351_v34 = vadd.f32 %v12014_v6, %v2216_v60  ;;  %v2214_v12 = vmul.f32 %v11998_v41, %v1914_v53  ;;  %v2476_v45 = vmax.f32 %v2348_v36, 0.0 }
 0x1d1   : > { %v10162_v61 = vpop.f32.mrf.mxu0 }
 0x1d2   : > { %v2479_v63 = vmax.f32 %v2351_v34, 0.0  ;;  %v2349_v52 = vadd.f32 %v12014_v6, %v2214_v12  ;;  %v2219_v40 = vmul.f32 %v11998_v41, %v10162_v61 }
 0x1d3   : > { %v1927_v47 = vpop.f32.mrf.mxu0 }
 0x1d4   : > { %v12046_v13 = vpack.c.bf16 %v2479_v63, %v2478_v25  ;;  %v2477_v27 = vmax.f32 %v2349_v52, 0.0  ;;  %v2217_v55 = vmul.f32 %v11998_v41, %v1927_v47  ;;  %v2354_v60 = vadd.f32 %v12014_v6, %v2219_v40 }
 0x1d5   : > { %v10163_v4 = vpop.f32.mrf.mxu0 }
 0x1d6   : > { %v12049_v59 = vpack.c.bf16 %v2477_v27, %v2476_v45  ;;  %v2220_v53 = vmul.f32 %v11998_v41, %v10163_v4  ;;  %v2352_v34 = vadd.f32 %v12014_v6, %v2217_v55  ;;  %v2482_v25 = vmax.f32 %v2354_v60, 0.0 }
 0x1d7   : > { %v1930_v28 = vpop.f32.mrf.mxu0 }
 0x1d8   : > { %v2355_v12 = vadd.f32 %v12014_v6, %v2220_v53  ;;  %v2218_v61 = vmul.f32 %v11998_v41, %v1930_v28  ;;  %v2480_v27 = vmax.f32 %v2352_v34, 0.0 }
 0x1d9   : > { %v10166_v36 = vpop.f32.mrf.mxu0 }
 0x1da   : > { %v2483_v63 = vmax.f32 %v2355_v12, 0.0  ;;  %v2353_v52 = vadd.f32 %v12014_v6, %v2218_v61  ;;  %v2223_v47 = vmul.f32 %v11998_v41, %v10166_v36 }
 0x1db   : > { %v1943_v45 = vpop.f32.mrf.mxu0 }
 0x1dc   : > { %v12058_v57 = vpack.c.bf16 %v2483_v63, %v2482_v25  ;;  %v2481_v40 = vmax.f32 %v2353_v52, 0.0  ;;  %v2221_v4 = vmul.f32 %v11998_v41, %v1943_v45  ;;  %v2358_v53 = vadd.f32 %v12014_v6, %v2223_v47 }
 0x1dd   : > { %v10167_v30 = vpop.f32.mrf.mxu0 }
 0x1de   : > { %v12061_v55 = vpack.c.bf16 %v2481_v40, %v2480_v27  ;;  %v2224_v28 = vmul.f32 %v11998_v41, %v10167_v30  ;;  %v2356_v12 = vadd.f32 %v12014_v6, %v2221_v4  ;;  %v2486_v25 = vmax.f32 %v2358_v53, 0.0 }
 0x1df   : > { %v1946_v60 = vpop.f32.mrf.mxu0 }
 0x1e0   : > { %v2359_v61 = vadd.f32 %v12014_v6, %v2224_v28  ;;  %v2222_v36 = vmul.f32 %v11998_v41, %v1946_v60  ;;  %v2484_v40 = vmax.f32 %v2356_v12, 0.0 }
 0x1e1   : > { %v10170_v34 = vpop.f32.mrf.mxu0 }
 0x1e2   : > { %v2487_v63 = vmax.f32 %v2359_v61, 0.0  ;;  %v2357_v52 = vadd.f32 %v12014_v6, %v2222_v36  ;;  %v2227_v45 = vmul.f32 %v11998_v41, %v10170_v34 }
 0x1e3   : > { %v1959_v27 = vpop.f32.mrf.mxu0 }
 0x1e4   : > { %v12070_v26 = vpack.c.bf16 %v2487_v63, %v2486_v25  ;;  %v2485_v47 = vmax.f32 %v2357_v52, 0.0  ;;  %v2225_v30 = vmul.f32 %v11998_v41, %v1959_v27  ;;  %v2362_v28 = vadd.f32 %v12014_v6, %v2227_v45 }
 0x1e5   : > { %v10171_v0 = vpop.f32.mrf.mxu0 }
 0x1e6   : > { %v12073_v4 = vpack.c.bf16 %v2485_v47, %v2484_v40  ;;  %v2228_v60 = vmul.f32 %v11998_v41, %v10171_v0  ;;  %v2360_v61 = vadd.f32 %v12014_v6, %v2225_v30  ;;  %v2490_v25 = vmax.f32 %v2362_v28, 0.0 }
 0x1e7   : > { %v1962_v53 = vpop.f32.mrf.mxu0 }
 0x1e8   : > { %v2363_v36 = vadd.f32 %v12014_v6, %v2228_v60  ;;  %v2226_v34 = vmul.f32 %v11998_v41, %v1962_v53  ;;  %v2488_v47 = vmax.f32 %v2360_v61, 0.0 }
 0x1e9   : > { %v10174_v12 = vpop.f32.mrf.mxu0 }
 0x1ea   : > { %v2491_v63 = vmax.f32 %v2363_v36, 0.0  ;;  %v2361_v52 = vadd.f32 %v12014_v6, %v2226_v34  ;;  %v2231_v27 = vmul.f32 %v11998_v41, %v10174_v12 }
 0x1eb   : > { %v1975_v40 = vpop.f32.mrf.mxu0 }
 0x1ec   : > { %v12082_v56 = vpack.c.bf16 %v2491_v63, %v2490_v25  ;;  %v2489_v45 = vmax.f32 %v2361_v52, 0.0  ;;  %v2229_v0 = vmul.f32 %v11998_v41, %v1975_v40  ;;  %v2366_v60 = vadd.f32 %v12014_v6, %v2231_v27 }
 0x1ed   : > { %v10175_v33 = vpop.f32.mrf.mxu0 }
 0x1ee   : > { %v12085_v30 = vpack.c.bf16 %v2489_v45, %v2488_v47  ;;  %v2232_v53 = vmul.f32 %v11998_v41, %v10175_v33  ;;  %v2364_v36 = vadd.f32 %v12014_v6, %v2229_v0  ;;  %v2494_v25 = vmax.f32 %v2366_v60, 0.0 }
 0x1ef   : > { %v1978_v28 = vpop.f32.mrf.mxu0 }
 0x1f0   : > { %v2367_v34 = vadd.f32 %v12014_v6, %v2232_v53  ;;  %v2230_v12 = vmul.f32 %v11998_v41, %v1978_v28  ;;  %v2492_v45 = vmax.f32 %v2364_v36, 0.0  ;;  %v2206_v36 = vmul.f32 %v11998_v41, %v12018_v49 }
 0x1f1   : > { %v10178_v61 = vpop.f32.mrf.mxu0 }
 0x1f2   : > { %v2495_v63 = vmax.f32 %v2367_v34, 0.0  ;;  %v2365_v52 = vadd.f32 %v12014_v6, %v2230_v12  ;;  %v2235_v40 = vmul.f32 %v11998_v41, %v10178_v61  ;;  %v2341_v24 = vadd.f32 %v12014_v6, %v2206_v36 }
 0x1f3   : > { %v1991_v47 = vpop.f32.mrf.mxu0  ;;  %v2210_v36 = vmul.f32 %v11998_v41, %v12032_v35 }
 0x1f4   : > { %v12094_v37 = vpack.c.bf16 %v2495_v63, %v2494_v25  ;;  %v2493_v27 = vmax.f32 %v2365_v52, 0.0  ;;  %v2233_v33 = vmul.f32 %v11998_v41, %v1991_v47  ;;  %v2370_v53 = vadd.f32 %v12014_v6, %v2235_v40 }
 0x1f5   : > { %v10179_v17 = vpop.f32.mrf.mxu0 }
 0x1f6   : > { %v12097_v0 = vpack.c.bf16 %v2493_v27, %v2492_v45  ;;  %v2236_v28 = vmul.f32 %v11998_v41, %v10179_v17  ;;  %v2368_v34 = vadd.f32 %v12014_v6, %v2233_v33  ;;  %v2498_v63 = vmax.f32 %v2370_v53, 0.0 }
 0x1f7   : > { %v1994_v60 = vpop.f32.mrf.mxu0  ;;  %v2205_v17 = vmul.f32 %v11998_v41, %v12005_v7 }
 0x1f8   : > { %v2371_v12 = vadd.f32 %v12014_v6, %v2236_v28  ;;  %v2234_v61 = vmul.f32 %v11998_v41, %v1994_v60  ;;  %v2496_v27 = vmax.f32 %v2368_v34, 0.0 }
 0x1f9   : > { %v10182_v25 = vpop.f32.mrf.mxu0 }
 0x1fa   : > { %v2499_v52 = vmax.f32 %v2371_v12, 0.0  ;;  %v2369_v47 = vadd.f32 %v12014_v6, %v2234_v61  ;;  %v2239_v45 = vmul.f32 %v11998_v41, %v10182_v25  ;;  %v2340_v61 = vadd.f32 %v12014_v6, %v2205_v17 }
 0x1fb   : > { %v2007_v40 = vpop.f32.mrf.mxu0  ;;  %v2209_v17 = vmul.f32 %v11998_v41, %v12026_v62 }
 0x1fc   : > { %v12110_v33 = vpack.c.bf16 %v2499_v52, %v2498_v63  ;;  %v2497_v28 = vmax.f32 %v2369_v47, 0.0  ;;  %v2237_v60 = vmul.f32 %v11998_v41, %v2007_v40  ;;  %v2374_v53 = vadd.f32 %v12014_v6, %v2239_v45 }
 0x1fd   : > { %v10183_v49 = vpop.f32.mrf.mxu0  ;;  %v2469_v52 = vmax.f32 %v2341_v24, 0.0 }
 0x1fe   : > { %14624 = vst [vmem:[#allocation35_spill] sm:$0xff] %v12110_v33  ;;  %v12114_v46 = vpack.c.bf16 %v2497_v28, %v2496_v27  ;;  %v2240_v12 = vmul.f32 %v11998_v41, %v10183_v49  ;;  %v2372_v7 = vadd.f32 %v12014_v6, %v2237_v60  ;;  %v2502_v40 = vmax.f32 %v2374_v53, 0.0 }
 0x1ff   : > { %v2010_v25 = vpop.f32.mrf.mxu0  ;;  %v2468_v49 = vmax.f32 %v2340_v61, 0.0  ;;  %v2344_v61 = vadd.f32 %v12014_v6, %v2209_v17  ;;  %v14627_v17 = vmax.bf16 %v11858_v50, %v11754_v23 }
 0x200   : > { %14625 = vst [vmem:[#allocation36_spill] sm:$0xff] %v12114_v46  ;;  %v2375_v34 = vadd.f32 %v12014_v6, %v2240_v12  ;;  %v2238_v63 = vmul.f32 %v11998_v41, %v2010_v25  ;;  %v2500_v46 = vmax.f32 %v2372_v7, 0.0  ;;  %v2345_v25 = vadd.f32 %v12014_v6, %v2210_v36 }
 0x201   : > { %v10186_v47 = vpop.f32.mrf.mxu0 }
 0x202   : > { %v2503_v27 = vmax.f32 %v2375_v34, 0.0  ;;  %v2373_v45 = vadd.f32 %v12014_v6, %v2238_v63  ;;  %v2243_v28 = vmul.f32 %v11998_v41, %v10186_v47  ;;  %v2564_v34 = vpack.c.bf16 %v2469_v52, %v2468_v49 }
 0x203   : > { %v2023_v60 = vpop.f32.mrf.mxu0 }
 0x204   : > { %v2581_v12 = vpack.c.bf16 %v2503_v27, %v2502_v40  ;;  %v2501_v33 = vmax.f32 %v2373_v45, 0.0  ;;  %v2241_v24 = vmul.f32 %v11998_v41, %v2023_v60  ;;  %v2378_v35 = vadd.f32 %v12014_v6, %v2243_v28 }
 0x205   : > { %v10187_v53 = vpop.f32.mrf.mxu0  ;;  %v2473_v45 = vmax.f32 %v2345_v25, 0.0  ;;  %v10510_v25 = vld [vmem:[%s11483_s29 + $0x30] sm:$0xff]  }
 0x206   : > { %v2580_v31 = vpack.c.bf16 %v2501_v33, %v2500_v46  ;;  %v2244_v63 = vmul.f32 %v11998_v41, %v10187_v53  ;;  %v2613_v62 = vmax.bf16 %v2581_v12, %v12028_v3  ;;  %v2376_v7 = vadd.f32 %v12014_v6, %v2241_v24 }
 0x207   : > { %v2026_v47 = vpop.f32.mrf.mxu0  ;;  %v2506_v28 = vmax.f32 %v2378_v35, 0.0  ;;  %v14626_v46 = vmax.bf16 %v11855_v44, %v11750_v18  ;;  %v2472_v24 = vmax.f32 %v2344_v61, 0.0 }
 0x208   : > { %v2379_v40 = vadd.f32 %v12014_v6, %v2244_v63  ;;  %v2242_v27 = vmul.f32 %v11998_v41, %v2026_v47  ;;  %v2612_v36 = vmax.bf16 %v2580_v31, %v2564_v34  ;;  %v2504_v35 = vmax.f32 %v2376_v7, 0.0  ;;  %v10511_v7 = vld [vmem:[%s11483_s29 + $0x28] sm:$0xff]  }
 0x209   : > { %v10190_v60 = vpop.f32.mrf.mxu0  ;;  %v12140_v33 = vmax.bf16 %v2613_v62, %v14626_v46  ;;  %v2566_v47 = vpack.c.bf16 %v2473_v45, %v2472_v24  ;;  %v14628_v46 = vmax.bf16 %v11872_v11, %v11764_v38 }
 0x20a   : > { %v2507_v52 = vmax.f32 %v2379_v40, 0.0  ;;  %v2377_v49 = vadd.f32 %v12014_v6, %v2242_v27  ;;  %v2247_v3 = vmul.f32 %v11998_v41, %v10190_v60  ;;  %v12147_v12 = vmax.bf16 %v2612_v36, %v14627_v17 }
 0x20b   : > { %v2039_v31 = vpop.f32.mrf.mxu0 }
 0x20c   : > { %v2583_v53 = vpack.c.bf16 %v2507_v52, %v2506_v28  ;;  %v2505_v34 = vmax.f32 %v2377_v49, 0.0  ;;  %v2245_v18 = vmul.f32 %v11998_v41, %v2039_v31  ;;  %10228 = vmatprep.mubr.bf16.mxu1 %v12147_v12  ;;  %v2382_v44 = vadd.f32 %v12014_v6, %v2247_v3  ;;  %v10512_v31 = vld [vmem:[%s11483_s29 + $0x20] sm:$0xff]  }
 0x20d   : > { %v10191_v63 = vpop.f32.mrf.mxu0  ;;  %10229 = vmatmul.mubr.bf16.vlgmr.msra.gmra.mxu1 %v12140_v33  ;;  %v14629_v3 = vmax.bf16 %v11875_v19, %v11768_v43 }
 0x20e   : > { %v2582_v23 = vpack.c.bf16 %v2505_v34, %v2504_v35  ;;  %v2248_v50 = vmul.f32 %v11998_v41, %v10191_v63  ;;  %10261 = vmatpush3.bf16.msra.mxu1 %v11958_v10  ;;  %v2615_v62 = vmax.bf16 %v2583_v53, %v12036_v54  ;;  %v2380_v40 = vadd.f32 %v12014_v6, %v2245_v18  ;;  %v10513_v63 = vld [vmem:[%s11483_s29 + $0x18] sm:$0xff]  }
 0x20f   : > { %v2042_v61 = vpop.f32.mrf.mxu0  ;;  %10262 = vmatprep.subr.bf16.mxu1 %v10510_v25  ;;  %v2510_v60 = vmax.f32 %v2382_v44, 0.0 }
 0x210   : > { %v2383_v27 = vadd.f32 %v12014_v6, %v2248_v50  ;;  %v2246_v36 = vmul.f32 %v11998_v41, %v2042_v61  ;;  %v2614_v28 = vmax.bf16 %v2582_v23, %v2566_v47  ;;  %v12164_v52 = vmax.bf16 %v2615_v62, %v14628_v46 }
 0x211   : > { %v10194_v45 = vpop.f32.mrf.mxu0  ;;  %v2508_v35 = vmax.f32 %v2380_v40, 0.0 }
 0x212   : > { %v2511_v10 = vmax.f32 %v2383_v27, 0.0  ;;  %v2381_v54 = vadd.f32 %v12014_v6, %v2246_v36  ;;  %v2251_v49 = vmul.f32 %v11998_v41, %v10194_v45  ;;  %v12171_v17 = vmax.bf16 %v2614_v28, %v14629_v3  ;;  %10263 = vmatpush3.bf16.msra.mxu1 %v10510_v25 }
 0x213   : > { %v2055_v24 = vpop.f32.mrf.mxu0  ;;  %10264 = vmatprep.subr.bf16.mxu1 %v10511_v7  ;;  %v14630_v27 = vmax.bf16 %v11888_v42, %v11778_v58 }
 0x214   : > { %v2585_v53 = vpack.c.bf16 %v2511_v10, %v2510_v60  ;;  %v2509_v38 = vmax.f32 %v2381_v54, 0.0  ;;  %v2249_v11 = vmul.f32 %v11998_v41, %v2055_v24  ;;  %10232 = vmatprep.mubr.bf16.mxu1 %v12171_v17  ;;  %v2386_v34 = vadd.f32 %v12014_v6, %v2251_v49 }
 0x215   : > { %v10195_v18 = vpop.f32.mrf.mxu0  ;;  %10233 = vmatmul.mubr.bf16.gmra.mxu1 %v12164_v52  ;;  %v14631_v60 = vmax.bf16 %v11891_v51, %v11782_v1 }
 0x216   : > { %v2584_v43 = vpack.c.bf16 %v2509_v38, %v2508_v35  ;;  %v2252_v19 = vmul.f32 %v11998_v41, %v10195_v18  ;;  %10265 = vmatpush3.bf16.msra.mxu1 %v10511_v7  ;;  %v2617_v44 = vmax.bf16 %v2585_v53, %v12046_v13  ;;  %v2384_v47 = vadd.f32 %v12014_v6, %v2249_v11  ;;  %v10515_v35 = vld [vmem:[%s11483_s29 + $0x8] sm:$0xff]  }
 0x217   : > { %v2058_v25 = vpop.f32.mrf.mxu0  ;;  %10266 = vmatprep.subr.bf16.mxu1 %v10512_v31  ;;  %v2514_v62 = vmax.f32 %v2386_v34, 0.0 }
 0x218   : > { %v2387_v23 = vadd.f32 %v12014_v6, %v2252_v19  ;;  %v2250_v50 = vmul.f32 %v11998_v41, %v2058_v25  ;;  %v2616_v61 = vmax.bf16 %v2584_v43, %v12049_v59  ;;  %v12188_v7 = vmax.bf16 %v2617_v44, %v14630_v27  ;;  %v10514_v59 = vld [vmem:[%s11483_s29 + $0x10] sm:$0xff]  }
 0x219   : > { %v10198_v40 = vpop.f32.mrf.mxu0  ;;  %v2512_v10 = vmax.f32 %v2384_v47, 0.0  ;;  %v14632_v19 = vmax.bf16 %v11908_v22, %v11794_v16  ;;  %v14633_v47 = vmax.bf16 %v11912_v29, %v11797_v21 }
 0x21a   : > { %v2515_v36 = vmax.f32 %v2387_v23, 0.0  ;;  %v2385_v13 = vadd.f32 %v12014_v6, %v2250_v50  ;;  %v2255_v28 = vmul.f32 %v11998_v41, %v10198_v40  ;;  %v12195_v45 = vmax.bf16 %v2616_v61, %v14631_v60  ;;  %10267 = vmatpush3.bf16.msra.mxu1 %v10512_v31 }
 0x21b   : > { %v2071_v46 = vpop.f32.mrf.mxu0  ;;  %10268 = vmatprep.subr.bf16.mxu1 %v10513_v63 }
 0x21c   : > { %v2587_v54 = vpack.c.bf16 %v2515_v36, %v2514_v62  ;;  %v2513_v58 = vmax.f32 %v2385_v13, 0.0  ;;  %v2253_v42 = vmul.f32 %v11998_v41, %v2071_v46  ;;  %10236 = vmatprep.mubr.bf16.mxu1 %v12195_v45  ;;  %v2390_v49 = vadd.f32 %v12014_v6, %v2255_v28  ;;  %v12229_v28 = vld [vmem:[%s11478_s25 + $0x38] sm:$0xff]  }
 0x21d   : > { %v10199_v3 = vpop.f32.mrf.mxu0  ;;  %10237 = vmatmul.mubr.bf16.gmra.mxu1 %v12188_v7 }
 0x21e   : > { %v2586_v1 = vpack.c.bf16 %v2513_v58, %v2512_v10  ;;  %v2256_v51 = vmul.f32 %v11998_v41, %v10199_v3  ;;  %10269 = vmatpush3.bf16.msra.mxu1 %v10513_v63  ;;  %v2619_v31 = vmax.bf16 %v2587_v54, %v12058_v57  ;;  %v2388_v53 = vadd.f32 %v12014_v6, %v2253_v42 }
 0x21f   : > { %v2074_v24 = vpop.f32.mrf.mxu0  ;;  %10270 = vmatprep.subr.bf16.mxu1 %v10514_v59  ;;  %v2518_v18 = vmax.f32 %v2390_v49, 0.0  ;;  %v14634_v42 = vmax.bf16 %v11930_v9, %v11807_v32 }
 0x220   : > { %v2391_v38 = vadd.f32 %v12014_v6, %v2256_v51  ;;  %v2254_v11 = vmul.f32 %v11998_v41, %v2074_v24  ;;  %v2618_v34 = vmax.bf16 %v2586_v1, %v12061_v55  ;;  %v12212_v25 = vmax.bf16 %v2619_v31, %v14632_v19  ;;  %v10516_v55 = vld [vmem:[%s11483_s29] sm:$0xff]  }
 0x221   : > { %v10202_v43 = vpop.f32.mrf.mxu0  ;;  %v2516_v61 = vmax.f32 %v2388_v53, 0.0  ;;  %v14635_v51 = vmax.bf16 %v11936_v20, %v11934_v15 }
 0x222   : > { %v2519_v44 = vmax.f32 %v2391_v38, 0.0  ;;  %v2389_v57 = vadd.f32 %v12014_v6, %v2254_v11  ;;  %v2259_v63 = vmul.f32 %v11998_v41, %v10202_v43  ;;  %v12219_v23 = vmax.bf16 %v2618_v34, %v14633_v47  ;;  %10271 = vmatpush3.bf16.msra.mxu1 %v10514_v59 }
 0x223   : > { %v2087_v50 = vpop.f32.mrf.mxu0  ;;  %10272 = vmatprep.subr.bf16.mxu1 %v10515_v35  ;;  %v14636_v47 = vmax.bf16 %v11954_v5, %v11820_v48 }
 0x224   : > { %v2589_v62 = vpack.c.bf16 %v2519_v44, %v2518_v18  ;;  %v2517_v16 = vmax.f32 %v2389_v57, 0.0  ;;  %v2257_v22 = vmul.f32 %v11998_v41, %v2087_v50  ;;  %10240 = vmatprep.mubr.bf16.mxu1 %v12219_v23  ;;  %v2394_v40 = vadd.f32 %v12014_v6, %v2259_v63 }
 0x225   : > { %v10203_v27 = vpop.f32.mrf.mxu0  ;;  %10241 = vmatmul.mubr.bf16.gmra.mxu1 %v12212_v25 }
 0x226   : > { %v2588_v21 = vpack.c.bf16 %v2517_v16, %v2516_v61  ;;  %v2260_v29 = vmul.f32 %v11998_v41, %v10203_v27  ;;  %10273 = vmatpush3.bf16.msra.mxu1 %v10515_v35  ;;  %v2621_v13 = vmax.bf16 %v2589_v62, %v12070_v26  ;;  %v2392_v60 = vadd.f32 %v12014_v6, %v2257_v22 }
 0x227   : > { %v2090_v36 = vpop.f32.mrf.mxu0  ;;  %10274 = vmatprep.subr.bf16.mxu1 %v10516_v55  ;;  %v2522_v54 = vmax.f32 %v2394_v40, 0.0  ;;  %v14637_v62 = vmax.bf16 %v11963_v14, %v11961_v39 }
 0x228   : > { %v2395_v46 = vadd.f32 %v12014_v6, %v2260_v29  ;;  %v2258_v59 = vmul.f32 %v11998_v41, %v2090_v36  ;;  %v2620_v10 = vmax.bf16 %v2588_v21, %v12073_v4  ;;  %v12238_v49 = vmax.bf16 %v2621_v13, %v14634_v42 }
 0x229   : > { %v10206_v58 = vpop.f32.mrf.mxu0  ;;  %v2520_v4 = vmax.f32 %v2392_v60, 0.0 }
 0x22a   : > { %v2523_v3 = vmax.f32 %v2395_v46, 0.0  ;;  %v2393_v26 = vadd.f32 %v12014_v6, %v2258_v59  ;;  %v2263_v1 = vmul.f32 %v11998_v41, %v10206_v58  ;;  %v12245_v24 = vmax.bf16 %v2620_v10, %v14635_v51  ;;  %10275 = vmatpush3.bf16.msra.mxu1 %v10516_v55 }
 0x22b   : > { %v2103_v31 = vpop.f32.mrf.mxu0  ;;  %10308 = vmatprep.subr.bf16.mxu1 %v12229_v28  ;;  %v14638_v10 = vmax.bf16 %v11982_v8, %v11833_v2  ;;  %v14642_v2 = vld [vmem:[#allocation35_spill] sm:$0xff] }
 0x22c   : > { %v2591_v35 = vpack.c.bf16 %v2523_v3, %v2522_v54  ;;  %v2521_v53 = vmax.f32 %v2393_v26, 0.0  ;;  %v2261_v32 = vmul.f32 %v11998_v41, %v2103_v31  ;;  %10244 = vmatprep.mubr.bf16.mxu1 %v12245_v24  ;;  %v2398_v9 = vadd.f32 %v12014_v6, %v2263_v1  ;;  %v14639_v26 = vld [vmem:[#allocation31_spill] sm:$0xff] }
 0x22d   : > { %v10207_v38 = vpop.f32.mrf.mxu0  ;;  %10245 = vmatmul.mubr.bf16.gmra.mxu1 %v12238_v49 }
 0x22e   : > { %v2590_v11 = vpack.c.bf16 %v2521_v53, %v2520_v4  ;;  %v2264_v15 = vmul.f32 %v11998_v41, %v10207_v38  ;;  %v2623_v34 = vmax.bf16 %v2591_v35, %v12082_v56  ;;  %v2396_v18 = vadd.f32 %v12014_v6, %v2261_v32  ;;  %v14644_v32 = vld [vmem:[#allocation32_spill] sm:$0xff] }
 0x22f   : > { %v2106_v20 = vpop.f32.mrf.mxu0  ;;  %v2526_v57 = vmax.f32 %v2398_v9, 0.0  ;;  %v14645_v9 = vld [vmem:[#allocation29_spill] sm:$0xff] }
 0x230   : > { %v2399_v43 = vadd.f32 %v12014_v6, %v2264_v15  ;;  %v2262_v19 = vmul.f32 %v11998_v41, %v2106_v20  ;;  %v2622_v44 = vmax.bf16 %v2590_v11, %v12085_v30  ;;  %v12261_v50 = vmax.bf16 %v2623_v34, %v14636_v47  ;;  %v14647_v11 = vld [vmem:[#allocation34_spill] sm:$0xff]  ;;  %v14648_v15 = vld [vmem:[#allocation33_spill] sm:$0xff] }
 0x231   : > { %v10210_v63 = vpop.f32.mrf.mxu0  ;;  %v2524_v40 = vmax.f32 %v2396_v18, 0.0  ;;  %v14649_v20 = vmax.bf16 %v14647_v11, %v14648_v15  ;;  %v10518_v18 = vld [vmem:[%s11478_s25 + $0x30] sm:$0xff]  }
 0x232   : > { %v2527_v55 = vmax.f32 %v2399_v43, 0.0  ;;  %v2397_v61 = vadd.f32 %v12014_v6, %v2262_v19  ;;  %v2267_v56 = vmul.f32 %v11998_v41, %v10210_v63  ;;  %v12268_v16 = vmax.bf16 %v2622_v44, %v14637_v62  ;;  %v10519_v43 = vld [vmem:[%s11478_s25 + $0x28] sm:$0xff]   ;;  %v10520_v19 = vld [vmem:[%s11478_s25 + $0x20] sm:$0xff]   ;;  %v10521_v44 = vld [vmem:[%s11478_s25 + $0x18] sm:$0xff]  }
 0x233   : > { %v2119_v22 = vpop.f32.mrf.mxu0  ;;  %v10524_v63 = vld [vmem:[%s11478_s25] sm:$0xff]  }
 0x234   : > { %v2593_v30 = vpack.c.bf16 %v2527_v55, %v2526_v57  ;;  %v2525_v27 = vmax.f32 %v2397_v61, 0.0  ;;  %v2265_v21 = vmul.f32 %v11998_v41, %v2119_v22  ;;  %10248 = vmatprep.mubr.bf16.mxu1 %v12268_v16  ;;  %v2402_v29 = vadd.f32 %v12014_v6, %v2267_v56  ;;  %v10522_v57 = vld [vmem:[%s11478_s25 + $0x10] sm:$0xff]  }
 0x235   : > { %v10211_v48 = vpop.f32.mrf.mxu0  ;;  %10249 = vmatmul.mubr.bf16.gmra.mxu1 %v12261_v50 }
 0x236   : > { %v2592_v5 = vpack.c.bf16 %v2525_v27, %v2524_v40  ;;  %v2268_v36 = vmul.f32 %v11998_v41, %v10211_v48  ;;  %v2625_v39 = vmax.bf16 %v2593_v30, %v12094_v37  ;;  %v2400_v14 = vadd.f32 %v12014_v6, %v2265_v21  ;;  %v14640_v37 = vld [vmem:[#allocation30_spill] sm:$0xff] }
 0x237   : > { %v2122_v13 = vpop.f32.mrf.mxu0  ;;  %v2530_v58 = vmax.f32 %v2402_v29, 0.0  ;;  %v14641_v1 = vmax.bf16 %v14639_v26, %v14640_v37 }
 0x238   : > { %v2403_v60 = vadd.f32 %v12014_v6, %v2268_v36  ;;  %v2266_v46 = vmul.f32 %v11998_v41, %v2122_v13  ;;  %v2624_v59 = vmax.bf16 %v2592_v5, %v12097_v0  ;;  %v12283_v54 = vmax.bf16 %v2625_v39, %v14638_v10  ;;  %v14643_v0 = vld [vmem:[#allocation36_spill] sm:$0xff] }
 0x239   : > { %v2528_v31 = vmax.f32 %v2400_v14, 0.0 }
 0x23a   : > { %v2531_v42 = vmax.f32 %v2403_v60, 0.0  ;;  %v2401_v3 = vadd.f32 %v12014_v6, %v2266_v46  ;;  %v2640_v51 = vmax.bf16 %v2624_v59, %v14641_v1  ;;  %v14646_v6 = vmax.bf16 %v14644_v32, %v14645_v9 }
 0x23c   : > { %v2595_v4 = vpack.c.bf16 %v2531_v42, %v2530_v58  ;;  %v2529_v35 = vmax.f32 %v2401_v3, 0.0  ;;  %10252 = vmatprep.mubr.bf16.mxu1 %v2640_v51 }
 0x23d   : > { %10253 = vmatmul.mubr.bf16.gmra.mxu1 %v12283_v54 }
 0x23e   : > { %v2594_v41 = vpack.c.bf16 %v2529_v35, %v2528_v31  ;;  %v2627_v8 = vmax.bf16 %v2595_v4, %v14642_v2 }
 0x240   : > { %v2626_v53 = vmax.bf16 %v2594_v41, %v14643_v0  ;;  %v2643_v38 = vmax.bf16 %v2627_v8, %v14646_v6 }
 0x242   : > { %v2642_v34 = vmax.bf16 %v2626_v53, %v14649_v20 }
 0x244   : > { %10256 = vmatprep.mubr.bf16.mxu1 %v2642_v34 }
 0x245   : > { %10257 = vmatmul.mubr.bf16.gmra.mxu1 %v2643_v38 }
 0x246   : > { %10276 = vmatprep.mubr.bf16.mxu1 %v12147_v12 }
 0x24d   : > { %10277 = vmatmul.mubr.bf16.vlgmr.msra.gmra.mxu1 %v12140_v33 }
 0x24e   : > { %10280 = vmatprep.mubr.bf16.mxu1 %v12171_v17  ;;  %10309 = vmatpush3.bf16.msra.mxu1 %v12229_v28  ;;  %v10523_v28 = vld [vmem:[%s11478_s25 + $0x8] sm:$0xff]  }
 0x24f   : > { %10310 = vmatprep.subr.bf16.mxu1 %v10518_v18 }
 0x252   : > { %10311 = vmatpush3.bf16.msra.mxu1 %v10518_v18 }
 0x253   : > { %10312 = vmatprep.subr.bf16.mxu1 %v10519_v43 }
 0x255   : > { %10281 = vmatmul.mubr.bf16.gmra.mxu1 %v12164_v52 }
 0x256   : > { %10284 = vmatprep.mubr.bf16.mxu1 %v12195_v45  ;;  %10313 = vmatpush3.bf16.msra.mxu1 %v10519_v43 }
 0x257   : > { %10314 = vmatprep.subr.bf16.mxu1 %v10520_v19 }
 0x25a   : > { %10315 = vmatpush3.bf16.msra.mxu1 %v10520_v19 }
 0x25b   : > { %10316 = vmatprep.subr.bf16.mxu1 %v10521_v44 }
 0x25d   : > { %10285 = vmatmul.mubr.bf16.gmra.mxu1 %v12188_v7 }
 0x25e   : > { %10288 = vmatprep.mubr.bf16.mxu1 %v12219_v23  ;;  %10317 = vmatpush3.bf16.msra.mxu1 %v10521_v44 }
 0x25f   : > { %10318 = vmatprep.subr.bf16.mxu1 %v10522_v57 }
 0x262   : > { %10319 = vmatpush3.bf16.msra.mxu1 %v10522_v57 }
 0x263   : > { %10320 = vmatprep.subr.bf16.mxu1 %v10523_v28 }
 0x265   : > { %10289 = vmatmul.mubr.bf16.gmra.mxu1 %v12212_v25 }
 0x266   : > { %10292 = vmatprep.mubr.bf16.mxu1 %v12245_v24  ;;  %10321 = vmatpush3.bf16.msra.mxu1 %v10523_v28 }
 0x267   : > { %10322 = vmatprep.subr.bf16.mxu1 %v10524_v63 }
 0x26a   : > { %10323 = vmatpush3.bf16.msra.mxu1 %v10524_v63 }
 0x26d   : > { %10293 = vmatmul.mubr.bf16.gmra.mxu1 %v12238_v49 }
 0x26e   : > { %10296 = vmatprep.mubr.bf16.mxu1 %v12268_v16 }
 0x275   : > { %10297 = vmatmul.mubr.bf16.gmra.mxu1 %v12261_v50 }
 0x276   : > { %10300 = vmatprep.mubr.bf16.mxu1 %v2640_v51 }
 0x27d   : > { %10301 = vmatmul.mubr.bf16.gmra.mxu1 %v12283_v54 }
 0x27e   : > { %10304 = vmatprep.mubr.bf16.mxu1 %v2642_v34 }
 0x285   : > { %10305 = vmatmul.mubr.bf16.gmra.mxu1 %v2643_v38 }
 0x286   : > { %10324 = vmatprep.mubr.bf16.mxu1 %v12147_v12 }
 0x28d   : > { %10325 = vmatmul.mubr.bf16.vlgmr.msra.gmra.mxu1 %v12140_v33  ;;  %v3112_v33 = vlaneseq }
 0x28e   : > { %10328 = vmatprep.mubr.bf16.mxu1 %v12171_v17 }
 0x295   : > { %10329 = vmatmul.mubr.bf16.gmra.mxu1 %v12164_v52  ;;  %v12334_v52 = vshrl.u32 %v3112_v33, 7 }
 0x296   : > { %10332 = vmatprep.mubr.bf16.mxu1 %v12195_v45 }
 0x297   : > { %vm3209_vm0 = vcmp.lt.s32.totalorder %v12334_v52, 1  ;;  %vm3611_vm1 = vcmp.lt.s32.totalorder %v12334_v52, 7  ;;  %vm3145_vm2 = vcmp.eq.s32.totalorder %v12334_v52, 0  ;;  %vm4016_vm4 = vcmp.lt.s32.totalorder %v12334_v52, 2 }
 0x298   : > { %vm7359_vm10 = vcmp.eq.s32.totalorder %v12334_v52, 3 }
 0x29d   : > { %10333 = vmatmul.mubr.bf16.gmra.mxu1 %v12188_v7 }
 0x29e   : > { %10336 = vmatprep.mubr.bf16.mxu1 %v12219_v23 }
 0x2a5   : > { %10337 = vmatmul.mubr.bf16.gmra.mxu1 %v12212_v25 }
 0x2a6   : > { %10340 = vmatprep.mubr.bf16.mxu1 %v12245_v24 }
 0x2ad   : > { %10341 = vmatmul.mubr.bf16.gmra.mxu1 %v12238_v49 }
 0x2ae   : > { %10344 = vmatprep.mubr.bf16.mxu1 %v12268_v16 }
 0x2b5   : > { %10345 = vmatmul.mubr.bf16.gmra.mxu1 %v12261_v50 }
 0x2b6   : > { %10348 = vmatprep.mubr.bf16.mxu1 %v2640_v51 }
 0x2bd   : > { %10349 = vmatmul.mubr.bf16.gmra.mxu1 %v12283_v54 }
 0x2be   : > { %10352 = vmatprep.mubr.bf16.mxu1 %v2642_v34 }
 0x2c5   : > { %10353 = vmatmul.mubr.bf16.gmra.mxu1 %v2643_v38 }
 0x2cd   : > { %v12332_v12 = vpop.f32.mrf.mxu1 }
 0x2ce   : > { %v14552_v45 = vrot.slane %v12332_v12, 7 }
 0x2cf   : > { %v12336_v17 = vpop.f32.mrf.mxu1 }
 0x2d1   : > { %v10231_v7 = vpop.f32.mrf.mxu1 }
 0x2d2   : > { %v3180_v25 = vrot.slane %v10231_v7, 7 }
 0x2d3   : > { %v12340_v23 = vpop.f32.mrf.mxu1 }
 0x2d4   : > { %v12346_v49 = vsel %vm3209_vm0, %v14552_v45, %v3180_v25 }
 0x2d5   : > { %v12348_v24 = vpop.f32.mrf.mxu1 }
 0x2d6   : > { %v14550_v61 = vrot.slane %v12348_v24, 7 }
 0x2d7   : > { %v12350_v47 = vpop.f32.mrf.mxu1 }
 0x2d8   : > { %v14549_v50 = vrot.slane %v12350_v47, 7 }
 0x2d9   : > { %v10235_v55 = vpop.f32.mrf.mxu1 }
 0x2da   : > { %v3184_v56 = vrot.slane %v10235_v55, 7  ;;  %v12358_v62 = vsel %vm3209_vm0, %v3180_v25, %v14549_v50  ;;  %v14551_v55 = vrot.slane %v12336_v17, 7 }
 0x2db   : > { %v12360_v16 = vpop.f32.mrf.mxu1 }
 0x2dc   : > { %v12366_v22 = vsel %vm3209_vm0, %v14550_v61, %v3184_v56 }
 0x2dd   : > { %14650 = vst [vmem:[#allocation31_spill] sm:$0xff] %v12366_v22  ;;  %v12368_v40 = vpop.f32.mrf.mxu1 }
 0x2de   : > { %v14546_v48 = vrot.slane %v12368_v40, 7 }
 0x2df   : > { %v12370_v30 = vpop.f32.mrf.mxu1 }
 0x2e0   : > { %v14545_v27 = vrot.slane %v12370_v30, 7 }
 0x2e1   : > { %v10239_v21 = vpop.f32.mrf.mxu1 }
 0x2e2   : > { %v3188_v5 = vrot.slane %v10239_v21, 7  ;;  %v12378_v29 = vsel %vm3209_vm0, %v3184_v56, %v14545_v27 }
 0x2e3   : > { %14651 = vst [vmem:[#allocation30_spill] sm:$0xff] %v12378_v29  ;;  %v12380_v36 = vpop.f32.mrf.mxu1  ;;  %v3182_v29 = vrot.slane %v12360_v16, 7 }
 0x2e4   : > { %v12386_v13 = vsel %vm3209_vm0, %v14546_v48, %v3188_v5 }
 0x2e5   : > { %14652 = vst [vmem:[#allocation35_spill] sm:$0xff] %v12386_v13  ;;  %v12388_v39 = vpop.f32.mrf.mxu1  ;;  %v10527_v13 = vld [vmem:[%s14612_s14 + $0x4] ss:$8 sps:$4 sm:$0xff]  }
 0x2e6   : > { %v14544_v59 = vrot.slane %v12388_v39, 7  ;;  %4169 = vmatprep.mubr.bf16.mxu1 %v10527_v13 }
 0x2e7   : > { %v12390_v14 = vpop.f32.mrf.mxu1 }
 0x2e8   : > { %v14543_v60 = vrot.slane %v12390_v14, 7 }
 0x2e9   : > { %v10243_v46 = vpop.f32.mrf.mxu1 }
 0x2ea   : > { %v3192_v10 = vrot.slane %v10243_v46, 7  ;;  %v12398_v54 = vsel %vm3209_vm0, %v3188_v5, %v14543_v60 }
 0x2eb   : > { %14653 = vst [vmem:[#allocation36_spill] sm:$0xff] %v12398_v54  ;;  %v12400_v58 = vpop.f32.mrf.mxu1 }
 0x2ec   : > { %v12406_v42 = vsel %vm3209_vm0, %v14544_v59, %v3192_v10  ;;  %v3190_v13 = vrot.slane %v12400_v58, 7 }
 0x2ed   : > { %14654 = vst [vmem:[#allocation32_spill] sm:$0xff] %v12406_v42  ;;  %v12408_v3 = vpop.f32.mrf.mxu1 }
 0x2ee   : > { %v14542_v51 = vrot.slane %v12408_v3, 7 }
 0x2ef   : > { %v12410_v26 = vpop.f32.mrf.mxu1 }
 0x2f0   : > { %v14540_v37 = vrot.slane %v12410_v26, 7 }
 0x2f1   : > { %v10247_v1 = vpop.f32.mrf.mxu1 }
 0x2f2   : > { %v3196_v31 = vrot.slane %v10247_v1, 7  ;;  %v12418_v4 = vsel %vm3209_vm0, %v3192_v10, %v14540_v37 }
 0x2f3   : > { %14655 = vst [vmem:[#allocation29_spill] sm:$0xff] %v12418_v4  ;;  %v12420_v35 = vpop.f32.mrf.mxu1 }
 0x2f4   : > { %v12426_v41 = vsel %vm3209_vm0, %v14542_v51, %v3196_v31  ;;  %v3194_v16 = vrot.slane %v12420_v35, 7  ;;  %v14681_v35 = vrot.slane %v12370_v30, 7 }
 0x2f5   : > { %14656 = vst [vmem:[#allocation34_spill] sm:$0xff] %v12426_v41  ;;  %v12428_v2 = vpop.f32.mrf.mxu1 }
 0x2f6   : > { %v14539_v32 = vrot.slane %v12428_v2, 7 }
 0x2f7   : > { %v12430_v8 = vpop.f32.mrf.mxu1 }
 0x2f8   : > { %v14538_v0 = vrot.slane %v12430_v8, 7 }
 0x2f9   : > { %v10251_v53 = vpop.f32.mrf.mxu1 }
 0x2fa   : > { %v3200_v9 = vrot.slane %v10251_v53, 7  ;;  %v12438_v6 = vsel %vm3209_vm0, %v3196_v31, %v14538_v0 }
 0x2fb   : > { %14657 = vst [vmem:[#allocation33_spill] sm:$0xff] %v12438_v6  ;;  %v12440_v38 = vpop.f32.mrf.mxu1 }
 0x2fc   : > { %v12446_v11 = vsel %vm3209_vm0, %v14539_v32, %v3200_v9 }
 0x2fd   : > { %14658 = vst [vmem:[#allocation37_spill] sm:$0xff] %v12446_v11  ;;  %v12448_v15 = vpop.f32.mrf.mxu1 }
 0x2fe   : > { %v14537_v43 = vrot.slane %v12448_v15, 7 }
 0x2ff   : > { %v12450_v20 = vpop.f32.mrf.mxu1 }
 0x300   : > { %v14536_v34 = vrot.slane %v12450_v20, 7 }
 0x301   : > { %v10255_v18 = vpop.f32.mrf.mxu1 }
 0x302   : > { %v3204_v19 = vrot.slane %v10255_v18, 7  ;;  %v12458_v44 = vsel %vm3209_vm0, %v3200_v9, %v14536_v34 }
 0x303   : > { %14659 = vst [vmem:[#allocation38_spill] sm:$0xff] %v12458_v44  ;;  %v12460_v57 = vpop.f32.mrf.mxu1 }
 0x304   : > { %v12466_v28 = vsel %vm3209_vm0, %v14537_v43, %v3204_v19 }
 0x305   : > { %14660 = vst [vmem:[#allocation39_spill] sm:$0xff] %v12466_v28  ;;  %v12468_v63 = vpop.f32.mrf.mxu1 }
 0x306   : > { %v14535_v56 = vrot.slane %v12468_v63, 7 }
 0x307   : > { %v12470_v33 = vpop.f32.mrf.mxu1 }
 0x308   : > { %v14534_v7 = vrot.slane %v12470_v33, 7 }
 0x309   : > { %v10259_v25 = vpop.f32.mrf.mxu1 }
 0x30a   : > { %v3208_v21 = vrot.slane %v10259_v25, 7  ;;  %v12479_v5 = vsel %vm3209_vm0, %v3204_v19, %v14534_v7 }
 0x30b   : > { %14661 = vst [vmem:[#allocation40_spill] sm:$0xff] %v12479_v5  ;;  %v12481_v46 = vpop.f32.mrf.mxu1 }
 0x30c   : > { %v12487_v10 = vsel %vm3209_vm0, %v3208_v21, %v14551_v55  ;;  %v12493_v1 = vsel %vm3209_vm0, %v14535_v56, %v3208_v21 }
 0x30d   : > { %14662 = vst [vmem:[#allocation41_spill] sm:$0xff] %v12493_v1  ;;  %v12495_v31 = vpop.f32.mrf.mxu1 }
 0x30e   : > { %v14541_v18 = vrot.slane %v12495_v31, 1 }
 0x30f   : > { %v12497_v53 = vpop.f32.mrf.mxu1 }
 0x311   : > { %v10279_v9 = vpop.f32.mrf.mxu1 }
 0x312   : > { %v3582_v19 = vrot.slane %v10279_v9, 1 }
 0x313   : > { %v12501_v25 = vpop.f32.mrf.mxu1 }
 0x314   : > { %v12507_v7 = vsel %vm3611_vm1, %v14541_v18, %v3582_v19 }
 0x315   : > { %v12509_v21 = vpop.f32.mrf.mxu1 }
 0x316   : > { %v14548_v0 = vrot.slane %v12509_v21, 1 }
 0x317   : > { %v12511_v56 = vpop.f32.mrf.mxu1 }
 0x318   : > { %v14547_v34 = vrot.slane %v12511_v56, 1 }
 0x319   : > { %v10283_v43 = vpop.f32.mrf.mxu1 }
 0x31a   : > { %v3586_v32 = vrot.slane %v10283_v43, 1  ;;  %v12519_v9 = vsel %vm3611_vm1, %v3582_v19, %v14547_v34 }
 0x31b   : > { %v12521_v37 = vpop.f32.mrf.mxu1 }
 0x31c   : > { %v12527_v18 = vsel %vm3611_vm1, %v14548_v0, %v3586_v32 }
 0x31d   : > { %v12529_v51 = vpop.f32.mrf.mxu1 }
 0x31e   : > { %v14554_v27 = vrot.slane %v12529_v51, 1 }
 0x31f   : > { %v12531_v60 = vpop.f32.mrf.mxu1 }
 0x320   : > { %v14553_v43 = vrot.slane %v12531_v60, 1 }
 0x321   : > { %v10287_v59 = vpop.f32.mrf.mxu1 }
 0x322   : > { %v3590_v48 = vrot.slane %v10287_v59, 1  ;;  %v12539_v19 = vsel %vm3611_vm1, %v3586_v32, %v14553_v43 }
 0x323   : > { %14663 = vst [vmem:[#allocation42_spill] sm:$0xff] %v12539_v19  ;;  %v12541_v34 = vpop.f32.mrf.mxu1  ;;  %v3186_v19 = vrot.slane %v12380_v36, 7  ;;  %v3198_v36 = vrot.slane %v12440_v38, 7 }
 0x324   : > { %v12547_v0 = vsel %vm3611_vm1, %v14554_v27, %v3590_v48 }
 0x325   : > { %14664 = vst [vmem:[#allocation43_spill] sm:$0xff] %v12547_v0  ;;  %v12549_v50 = vpop.f32.mrf.mxu1 }
 0x326   : > { %v14556_v45 = vrot.slane %v12549_v50, 1 }
 0x327   : > { %v12551_v61 = vpop.f32.mrf.mxu1 }
 0x328   : > { %v14555_v59 = vrot.slane %v12551_v61, 1 }
 0x329   : > { %v10291_v55 = vpop.f32.mrf.mxu1 }
 0x32a   : > { %v3594_v1 = vrot.slane %v10291_v55, 1  ;;  %v12559_v32 = vsel %vm3611_vm1, %v3590_v48, %v14555_v59 }
 0x32b   : > { %14665 = vst [vmem:[#allocation44_spill] sm:$0xff] %v12559_v32  ;;  %v12561_v43 = vpop.f32.mrf.mxu1 }
 0x32c   : > { %v12567_v27 = vsel %vm3611_vm1, %v14556_v45, %v3594_v1 }
 0x32d   : > { %14666 = vst [vmem:[#allocation45_spill] sm:$0xff] %v12567_v27  ;;  %v12569_v5 = vpop.f32.mrf.mxu1 }
 0x32e   : > { %v14558_v11 = vrot.slane %v12569_v5, 1 }
 0x32f   : > { %v12571_v28 = vpop.f32.mrf.mxu1 }
 0x330   : > { %v14557_v55 = vrot.slane %v12571_v28, 1 }
 0x331   : > { %v10295_v44 = vpop.f32.mrf.mxu1 }
 0x332   : > { %v3598_v6 = vrot.slane %v10295_v44, 1  ;;  %v12579_v48 = vsel %vm3611_vm1, %v3594_v1, %v14557_v55 }
 0x333   : > { %14667 = vst [vmem:[#allocation46_spill] sm:$0xff] %v12579_v48  ;;  %v12581_v59 = vpop.f32.mrf.mxu1 }
 0x334   : > { %v12587_v45 = vsel %vm3611_vm1, %v14558_v11, %v3598_v6 }
 0x335   : > { %14668 = vst [vmem:[#allocation47_spill] sm:$0xff] %v12587_v45  ;;  %v12589_v41 = vpop.f32.mrf.mxu1 }
 0x336   : > { %v14560_v54 = vrot.slane %v12589_v41, 1 }
 0x337   : > { %v12591_v4 = vpop.f32.mrf.mxu1 }
 0x338   : > { %v14559_v44 = vrot.slane %v12591_v4, 1 }
 0x339   : > { %v10299_v42 = vpop.f32.mrf.mxu1 }
 0x33a   : > { %v3602_v1 = vrot.slane %v10299_v42, 1  ;;  %v12599_v55 = vsel %vm3611_vm1, %v3598_v6, %v14559_v44 }
 0x33b   : > { %14669 = vst [vmem:[#allocation48_spill] sm:$0xff] %v12599_v55  ;;  %v12601_v48 = vpop.f32.mrf.mxu1 }
 0x33c   : > { %v12607_v11 = vsel %vm3611_vm1, %v14560_v54, %v3602_v1  ;;  %v3178_v54 = vrot.slane %v12340_v23, 7  ;;  %v14676_v23 = vrot.slane %v12348_v24, 7  ;;  %v14679_v24 = vrot.slane %v12350_v47, 7 }
 0x33d   : > { %14670 = vst [vmem:[#allocation49_spill] sm:$0xff] %v12607_v11  ;;  %v12609_v45 = vpop.f32.mrf.mxu1  ;;  %v14682_v47 = vrot.slane %v12388_v39, 7 }
 0x33e   : > { %14671 = vst [vmem:[#allocation50_spill] sm:$0xff] %v12609_v45  ;;  %v14561_v0 = vrot.slane %v12609_v45, 1 }
 0x33f   : > { %v12611_v27 = vpop.f32.mrf.mxu1 }
 0x340   : > { %v14562_v42 = vrot.slane %v12611_v27, 1 }
 0x341   : > { %v10303_v32 = vpop.f32.mrf.mxu1 }
 0x342   : > { %v3606_v6 = vrot.slane %v10303_v32, 1  ;;  %v12620_v44 = vsel %vm3611_vm1, %v3602_v1, %v14562_v42  ;;  %v14674_v1 = vrot.slane %v12332_v12, 7  ;;  %v12645_v42 = vadd.s32 248, %v12334_v52 }
 0x343   : > { %14672 = vst [vmem:[#allocation51_spill] sm:$0xff] %v12620_v44  ;;  %v12622_v55 = vpop.f32.mrf.mxu1  ;;  %v14675_v44 = vrot.slane %v12336_v17, 7  ;;  %v12657_v12 = vsel %vm3209_vm0, %v3182_v29, %v14676_v23  ;;  %v12674_v23 = vsel %vm3209_vm0, %v14679_v24, %v3182_v29  ;;  %v12693_v29 = vsel %vm3209_vm0, %v3190_v13, %v14682_v47 }
 0x344   : > { %v12629_v11 = vsel %vm3611_vm1, %v14561_v0, %v3606_v6  ;;  %v3239_v0 = vsel %vm3209_vm0, %v3178_v54, %v14674_v1  ;;  %v3579_v1 = vrot.slane %v12497_v53, 1  ;;  %v14680_v53 = vrot.slane %v12368_v40, 7 }
 0x345   : > { %14673 = vst [vmem:[#allocation52_spill] sm:$0xff] %v12629_v11  ;;  %v12632_v32 = vpop.f32.mrf.mxu1  ;;  %v3240_v58 = vsel %vm3209_vm0, %v14675_v44, %v3178_v54  ;;  %v3202_v54 = vrot.slane %v12460_v57, 7  ;;  %v3206_v57 = vrot.slane %v12481_v46, 7  ;;  %v3580_v46 = vrot.slane %v12501_v25, 1 }
 0x346   : > { %v14683_v40 = vrot.slane %v12632_v32, 1  ;;  %v14686_v24 = vrot.slane %v12390_v14, 7  ;;  %v14687_v47 = vrot.slane %v12408_v3, 7  ;;  %v3584_v25 = vrot.slane %v12521_v37, 1 }
 0x347   : > { %v12635_v22 = vpop.f32.mrf.mxu1  ;;  %v14689_v14 = vrot.slane %v12428_v2, 7  ;;  %v14690_v3 = vrot.slane %v12430_v8, 7  ;;  %v3306_v37 = vsel %vm3145_vm2, 0.0, %v12487_v10  ;;  %vm3578_vm3 = vcmp.eq.s32.totalorder %v12645_v42, 255 }
 0x348   : > { %v14677_v38 = vrot.slane %v12635_v22, 1  ;;  %v14694_v10 = vrot.slane %v12468_v63, 7 }
 0x349   : > { %v10307_v11 = vpop.f32.mrf.mxu1 }
 0x34a   : > { %v3610_v45 = vrot.slane %v10307_v11, 1  ;;  %v12665_v17 = vsel %vm3611_vm1, %v3606_v6, %v14677_v38  ;;  %v12680_v11 = vsel %vm3209_vm0, %v3186_v19, %v14680_v53  ;;  %v12686_v6 = vsel %vm3209_vm0, %v14681_v35, %v3186_v19  ;;  %v10531_v19 = vld [vmem:[%s11513_s30 + $0x70] ss:$8 sps:$4 sm:$0xff]   ;;  %v10533_v35 = vld [vmem:[%s11513_s30 + $0x74] ss:$8 sps:$4 sm:$0xff]  }
 0x34b   : > { %14678 = vst [vmem:[#allocation53_spill] sm:$0xff] %v12665_v17  ;;  %v12668_v44 = vpop.f32.mrf.mxu1  ;;  %v12712_v53 = vsel %vm3209_vm0, %v14686_v24, %v3190_v13  ;;  %v12731_v13 = vsel %vm3209_vm0, %v3198_v36, %v14689_v14  ;;  %v12737_v24 = vsel %vm3209_vm0, %v14690_v3, %v3198_v36  ;;  %4489 = vmatprep.subr.bf16.mxu0 %v10533_v35  ;;  %v14693_v36 = vrot.slane %v12450_v20, 7 }
 0x34c   : > { %v12699_v38 = vsel %vm3611_vm1, %v14683_v40, %v3610_v45  ;;  %v12703_v30 = vsel %vm3611_vm1, %v3610_v45, %v3579_v1  ;;  %v12718_v40 = vsel %vm3209_vm0, %v3194_v16, %v14687_v47  ;;  %v14688_v45 = vrot.slane %v12410_v26, 7  ;;  %4490 = vmatpush1.bf16.msra.mxu0 %v10531_v19  ;;  %v12775_v19 = vld [vmem:[%s14691_s8] ss:$0 sm:$0xff] }
 0x34d   : > { %14685 = vst [vmem:[#allocation54_spill] sm:$0xff] %v12699_v38  ;;  %v10326_v39 = vpop.f32.mrf.mxu1  ;;  %v3588_v26 = vrot.slane %v12541_v34, 1  ;;  %v12756_v35 = vsel %vm3209_vm0, %v14693_v36, %v3202_v54  ;;  %v14695_v47 = vrot.slane %v12470_v33, 7 }
 0x34e   : > { %v12724_v38 = vsel %vm3209_vm0, %v14688_v45, %v3194_v16  ;;  %v3429_v17 = vadd.f32 %v10326_v39, %v3239_v0  ;;  %v12741_v16 = vld [vmem:[%s14684_s3] ss:$0 sm:$0xff]  ;;  %v14692_v0 = vrot.slane %v12448_v15, 7  ;;  %v12764_v15 = vsel %vm3209_vm0, %v3206_v57, %v14694_v10  ;;  %s14796_s3 = sld [smem:[#allocation17_spill]] }
 0x34f   : > { %v3420_v2 = vpop.f32.mrf.mxu1  ;;  %v12770_v20 = vsel %vm3209_vm0, %v14695_v47, %v3206_v57  ;;  %v3596_v45 = vrot.slane %v12581_v59, 1  ;;  %v14702_v10 = vrot.slane %v12549_v50, 1 }
 0x350   : > { %v12750_v8 = vsel %vm3209_vm0, %v3202_v54, %v14692_v0  ;;  %v3742_v34 = vadd.f32 %v12507_v7, %v3429_v17  ;;  %v3421_v39 = vadd.f32 %v3420_v2, %v3306_v37  ;;  %v3592_v54 = vrot.slane %v12561_v43, 1 }
 0x351   : > { %v3642_v7 = vsel %vm3611_vm1, %v3579_v1, %v3580_v46  ;;  %v10327_v63 = vpop.f32.mrf.mxu1  ;;  %v14696_v17 = vrot.slane %v12495_v31, 1  ;;  %v14697_v43 = vrot.slane %v12511_v56, 1  ;;  %v3600_v37 = vrot.slane %v12601_v48, 1 }
 0x352   : > { %v3780_v33 = vmul.f32 %v12741_v16, %v3742_v34  ;;  %v3740_v3 = vadd.f32 %v3642_v7, %v3421_v39  ;;  %v3432_v57 = vadd.f32 %v10327_v63, %v12346_v49  ;;  %v3604_v1 = vrot.slane %v12622_v55, 1 }
 0x353   : > { %v3641_v14 = vsel %vm3611_vm1, %v3580_v46, %v14696_v17  ;;  %v3638_v59 = vsel %vm3611_vm1, %v14697_v43, %v3584_v25  ;;  %v3423_v2 = vpop.f32.mrf.mxu1  ;;  %v14698_v31 = vrot.slane %v12509_v21, 1  ;;  %v14699_v0 = vrot.slane %v12531_v60, 1 }
 0x354   : > { %v12802_v56 = vadd.f32 %v12775_v19, %v3780_v33  ;;  %v3778_v36 = vmul.f32 %v12741_v16, %v3740_v3  ;;  %v3743_v48 = vadd.f32 %v12519_v9, %v3432_v57  ;;  %v3424_v55 = vadd.f32 %v3423_v2, %v3240_v58 }
 0x355   : > { %v3637_v46 = vsel %vm3611_vm1, %v3584_v25, %v14698_v31  ;;  %v12799_v49 = vsel %vm3611_vm1, %v14699_v0, %v3588_v26  ;;  %v10330_v34 = vpop.f32.mrf.mxu1  ;;  %v14700_v21 = vrot.slane %v12529_v51, 1  ;;  %v14701_v60 = vrot.slane %v12551_v61, 1  ;;  %v14709_v0 = vld [vmem:[#allocation50_spill] sm:$0xff] }
 0x356   : > { %v12822_v47 = vsel %vm3611_vm1, %v3592_v54, %v14702_v10  ;;  %v14703_v9 = vrot.slane %v12571_v28, 1  ;;  %v12831_v58 = vadd.f32 %v12775_v19, %v3778_v36  ;;  %v3781_v61 = vmul.f32 %v12741_v16, %v3743_v48  ;;  %v14711_v48 = vld [vmem:[#allocation31_spill] sm:$0xff] }
 0x357   : > { %v12810_v25 = vsel %vm3611_vm1, %v3588_v26, %v14700_v21  ;;  %v12816_v39 = vsel %vm3611_vm1, %v14701_v60, %v3592_v54  ;;  %v3741_v26 = vadd.f32 %v3641_v14, %v3424_v55  ;;  %v14705_v7 = vrot.slane %v12569_v5, 1  ;;  %v3436_v17 = vpop.f32.mrf.mxu1 }
 0x358   : > { %v12828_v51 = vsel %vm3611_vm1, %v14703_v9, %v3596_v45  ;;  %14704 = vst [vmem:[#allocation55_spill] sm:$0xff] %v12831_v58  ;;  %v3608_v54 = vrot.slane %v12668_v44, 1  ;;  %v3850_v28 = vmax.f32 %v12802_v56, 0.0  ;;  %v3445_v63 = vadd.f32 %v10330_v34, %v12657_v12 }
 0x359   : > { %v12838_v50 = vsel %vm3611_vm1, %v3596_v45, %v14705_v7  ;;  %v14706_v33 = vrot.slane %v12591_v4, 1  ;;  %v3819_v14 = vadd.f32 %v12775_v19, %v3781_v61  ;;  %v3779_v5 = vmul.f32 %v12741_v16, %v3741_v26  ;;  %v10331_v31 = vpop.f32.mrf.mxu1  ;;  %v14713_v26 = vld [vmem:[#allocation42_spill] sm:$0xff] }
 0x35a   : > { %v14707_v45 = vrot.slane %v12589_v41, 1  ;;  %v14708_v57 = vrot.slane %v12611_v27, 1  ;;  %v14564_v4 = vmax.f32 %v12831_v58, 0.0  ;;  %v3746_v43 = vadd.f32 %v12527_v18, %v3445_v63  ;;  %v10540_v7 = vld [vmem:[%s11513_s30 + $0x60] ss:$8 sps:$4 sm:$0xff]  }
 0x35b   : > { %v12847_v3 = vsel %vm3611_vm1, %v14706_v33, %v3600_v37  ;;  %v3437_v2 = vadd.f32 %v3436_v17, %v12358_v62  ;;  %v14710_v41 = vrot.slane %v14709_v0, 1  ;;  %v3851_v27 = vmax.f32 %v3819_v14, 0.0  ;;  %v3439_v60 = vpop.f32.mrf.mxu1  ;;  %v10542_v63 = vld [vmem:[%s11513_s30 + $0x64] ss:$8 sps:$4 sm:$0xff]  }
 0x35c   : > { %v12855_v44 = vsel %vm3611_vm1, %v3600_v37, %v14707_v45  ;;  %v12861_v12 = vsel %vm3611_vm1, %v14708_v57, %v3604_v1  ;;  %v3817_v36 = vadd.f32 %v12775_v19, %v3779_v5  ;;  %v3448_v55 = vadd.f32 %v10331_v31, %v14711_v48  ;;  %4491 = vmatprep.subr.bf16.mxu0 %v10542_v63  ;;  %v14717_v63 = vld [vmem:[#allocation43_spill] sm:$0xff] }
 0x35d   : > { %v12870_v37 = vsel %vm3611_vm1, %v3604_v1, %v14710_v41  ;;  %v12877_v18 = vsel %vm3578_vm3, 0.0, %v12703_v30  ;;  %v3890_v62 = vrot.slane %v3850_v28, 7  ;;  %v3784_v34 = vmul.f32 %v12741_v16, %v3746_v43  ;;  %v10334_v33 = vpop.f32.mrf.mxu1  ;;  %4492 = vmatpush1.bf16.msra.mxu0 %v10540_v7 }
 0x35e   : > { %v3744_v21 = vadd.f32 %v3638_v59, %v3437_v2  ;;  %v14712_v1 = vrot.slane %v12635_v22, 1  ;;  %v3891_v9 = vrot.slane %v3851_v27, 7  ;;  %v3849_v61 = vmax.f32 %v3817_v36, 0.0  ;;  %v10543_v36 = vld [vmem:[%s11513_s30 + $0x50] ss:$8 sps:$4 sm:$0xff]  }
 0x35f   : > { %v3747_v42 = vadd.f32 %v14713_v26, %v3448_v55  ;;  %v3440_v30 = vadd.f32 %v3439_v60, %v12674_v23  ;;  %v12894_v17 = vrot.slane %v14564_v4, 7  ;;  %v12897_v59 = vadd.f32 %v12775_v19, %v3784_v34  ;;  %v10545_v23 = vld [vmem:[%s11513_s30 + $0x54] ss:$8 sps:$4 sm:$0xff]   ;;  %v14716_v34 = vld [vmem:[#allocation30_spill] sm:$0xff] }
 0x360   : > { %v12886_v10 = vsel %vm3611_vm1, %v14712_v1, %v3608_v54  ;;  %v3782_v22 = vmul.f32 %v12741_v16, %v3744_v21  ;;  %v14715_v14 = vrot.slane %v12632_v32, 1  ;;  %v3948_v45 = vsel %vm3209_vm0, %v3890_v62, %v3891_v9  ;;  %4493 = vmatprep.subr.bf16.mxu0 %v10545_v23  ;;  %v10548_v21 = vld [vmem:[%s11513_s30 + $0x44] ss:$8 sps:$4 sm:$0xff]  }
 0x361   : > { %14714 = vst [vmem:[#allocation50_spill] sm:$0xff] %v12894_v17  ;;  %v3889_v57 = vrot.slane %v3849_v61, 7  ;;  %v3785_v43 = vmul.f32 %v12741_v16, %v3747_v42  ;;  %v3745_v2 = vadd.f32 %v3637_v46, %v3440_v30  ;;  %v12910_v31 = vmax.f32 %v3851_v27, %v3948_v45  ;;  %v14718_v45 = vld [vmem:[#allocation35_spill] sm:$0xff]  ;;  %4494 = vmatpush1.bf16.msra.mxu0 %v10543_v36 }
 0x362   : > { %v12904_v5 = vsel %vm3611_vm1, %v3608_v54, %v14715_v14  ;;  %v14565_v0 = vmax.f32 %v12897_v59, 0.0  ;;  %v3820_v32 = vadd.f32 %v12775_v19, %v3782_v22  ;;  %v3461_v41 = vadd.f32 %v10334_v33, %v12680_v11  ;;  %v3452_v54 = vpop.f32.mrf.mxu1  ;;  %4495 = vmatprep.subr.bf16.mxu0 %v10548_v21 }
 0x363   : > { %v3950_v48 = vsel %vm3209_vm0, %v12894_v17, %v3889_v57  ;;  %v3823_v55 = vadd.f32 %v12775_v19, %v3785_v43  ;;  %v3783_v46 = vmul.f32 %v12741_v16, %v3745_v2  ;;  %v3453_v27 = vadd.f32 %v3452_v54, %v14716_v34  ;;  %v14719_v34 = vld [vmem:[#allocation44_spill] sm:$0xff] }
 0x364   : > { %v12924_v1 = vmax.f32 %v3849_v61, %v3950_v48  ;;  %v12928_v11 = vrot.slane %v14565_v0, 7  ;;  %v3852_v26 = vmax.f32 %v3820_v32, 0.0  ;;  %v10335_v42 = vpop.f32.mrf.mxu1  ;;  %v3750_v22 = vadd.f32 %v14717_v63, %v3461_v41  ;;  %v10546_v32 = vld [vmem:[%s11513_s30 + $0x40] ss:$8 sps:$4 sm:$0xff]   ;;  %v10551_v41 = vld [vmem:[%s11513_s30 + $0x34] ss:$8 sps:$4 sm:$0xff]  }
 0x365   : > { %v3855_v30 = vmax.f32 %v3823_v55, 0.0  ;;  %v3821_v7 = vadd.f32 %v12775_v19, %v3783_v46  ;;  %v3748_v33 = vadd.f32 %v12799_v49, %v3453_v27  ;;  %v3464_v61 = vadd.f32 %v10335_v42, %v14718_v45  ;;  %4496 = vmatpush1.bf16.msra.mxu0 %v10546_v32 }
 0x366   : > { %v3892_v23 = vrot.slane %v3852_v26, 7  ;;  %v3455_v43 = vpop.f32.mrf.mxu1  ;;  %v3949_v2 = vsel %vm3209_vm0, %v3889_v57, %v3890_v62  ;;  %v3788_v55 = vmul.f32 %v12741_v16, %v3750_v22  ;;  %4497 = vmatprep.subr.bf16.mxu0 %v10551_v41 }
 0x367   : > { %v3895_v54 = vrot.slane %v3855_v30, 7  ;;  %v3853_v48 = vmax.f32 %v3821_v7, 0.0  ;;  %v3786_v46 = vmul.f32 %v12741_v16, %v3748_v33  ;;  %v3751_v27 = vadd.f32 %v14719_v34, %v3464_v61  ;;  %v14720_v34 = vld [vmem:[#allocation45_spill] sm:$0xff] }
 0x368   : > { %v3947_v49 = vsel %vm3209_vm0, %v3891_v9, %v3892_v23  ;;  %v3456_v42 = vadd.f32 %v3455_v43, %v12686_v6  ;;  %v10338_v63 = vpop.f32.mrf.mxu1  ;;  %v12947_v62 = vmax.f32 %v3850_v28, %v3949_v2  ;;  %v12955_v7 = vadd.f32 %v12775_v19, %v3788_v55 }
 0x369   : > { %v12949_v57 = vmax.f32 %v3852_v26, %v3947_v49  ;;  %v3944_v36 = vsel %vm3209_vm0, %v12928_v11, %v3895_v54  ;;  %v3893_v21 = vrot.slane %v3853_v48, 7  ;;  %v3824_v6 = vadd.f32 %v12775_v19, %v3786_v46  ;;  %v10549_v26 = vld [vmem:[%s11513_s30 + $0x30] ss:$8 sps:$4 sm:$0xff]  }
 0x36a   : > { %v12957_v9 = vmax.f32 %v3855_v30, %v3944_v36  ;;  %v3789_v22 = vmul.f32 %v12741_v16, %v3751_v27  ;;  %v3749_v56 = vadd.f32 %v12810_v25, %v3456_v42  ;;  %v3468_v28 = vpop.f32.mrf.mxu1  ;;  %v14567_v61 = vmax.f32 %v12955_v7, 0.0  ;;  %v10554_v30 = vld [vmem:[%s11513_s30 + $0x24] ss:$8 sps:$4 sm:$0xff]   ;;  %4498 = vmatpush1.bf16.msra.mxu0 %v10549_v26 }
 0x36b   : > { %v3946_v45 = vsel %vm3209_vm0, %v3892_v23, %v3893_v21  ;;  %v3477_v43 = vadd.f32 %v10338_v63, %v12693_v29  ;;  %v3856_v25 = vmax.f32 %v3824_v6, 0.0  ;;  %v14721_v29 = vld [vmem:[#allocation36_spill] sm:$0xff]  ;;  %4499 = vmatprep.subr.bf16.mxu0 %v10554_v30  ;;  %v12993_v26 = vsel %vm3209_vm0, %v3893_v21, %v12928_v11  ;;  %v14732_v21 = vld [vmem:[#allocation37_spill] sm:$0xff] }
 0x36c   : > { %v12970_v55 = vmax.f32 %v3853_v48, %v3946_v45  ;;  %v3827_v32 = vadd.f32 %v12775_v19, %v3789_v22  ;;  %v10339_v46 = vpop.f32.mrf.mxu1  ;;  %v12975_v49 = vrot.slane %v14567_v61, 7  ;;  %v3787_v23 = vmul.f32 %v12741_v16, %v3749_v56  ;;  %v14722_v48 = vld [vmem:[#allocation32_spill] sm:$0xff] }
 0x36d   : > { %v3754_v27 = vadd.f32 %v14720_v34, %v3477_v43  ;;  %v3469_v41 = vadd.f32 %v3468_v28, %v14721_v29  ;;  %v3896_v63 = vrot.slane %v3856_v25, 7  ;;  %v3480_v45 = vadd.f32 %v10339_v46, %v14722_v48  ;;  %v10552_v22 = vld [vmem:[%s11513_s30 + $0x20] ss:$8 sps:$4 sm:$0xff]  }
 0x36e   : > { %v3859_v36 = vmax.f32 %v3827_v32, 0.0  ;;  %v3471_v6 = vpop.f32.mrf.mxu1  ;;  %v3825_v4 = vadd.f32 %v12775_v19, %v3787_v23  ;;  %v14723_v34 = vld [vmem:[#allocation46_spill] sm:$0xff]  ;;  %4500 = vmatpush1.bf16.msra.mxu0 %v10552_v22 }
 0x36f   : > { %v3792_v14 = vmul.f32 %v12741_v16, %v3754_v27  ;;  %v3752_v60 = vadd.f32 %v12816_v39, %v3469_v41  ;;  %v3472_v56 = vadd.f32 %v3471_v6, %v12712_v53  ;;  %v3943_v28 = vsel %vm3209_vm0, %v3895_v54, %v3896_v63  ;;  %v14724_v6 = vld [vmem:[#allocation47_spill] sm:$0xff] }
 0x370   : > { %v3899_v43 = vrot.slane %v3859_v36, 7  ;;  %v3755_v32 = vadd.f32 %v14723_v34, %v3480_v45  ;;  %v10342_v29 = vpop.f32.mrf.mxu1  ;;  %v12995_v46 = vmax.f32 %v3856_v25, %v3943_v28  ;;  %v3857_v23 = vmax.f32 %v3825_v4, 0.0  ;;  %v14725_v28 = vld [vmem:[#allocation29_spill] sm:$0xff] }
 0x371   : > { %v12998_v39 = vadd.f32 %v12775_v19, %v3792_v14  ;;  %v3790_v53 = vmul.f32 %v12741_v16, %v3752_v60  ;;  %v3753_v27 = vadd.f32 %v12822_v47, %v3472_v56  ;;  %v3493_v41 = vadd.f32 %v10342_v29, %v12718_v40 }
 0x372   : > { %v3940_v54 = vsel %vm3209_vm0, %v12975_v49, %v3899_v43  ;;  %v3793_v30 = vmul.f32 %v12741_v16, %v3755_v32  ;;  %v3484_v11 = vpop.f32.mrf.mxu1  ;;  %v13010_v14 = vrot.slane %v3857_v23, 7 }
 0x373   : > { %v13008_v4 = vmax.f32 %v3859_v36, %v3940_v54  ;;  %v14571_v60 = vmax.f32 %v12998_v39, 0.0  ;;  %v3828_v25 = vadd.f32 %v12775_v19, %v3790_v53  ;;  %v3791_v45 = vmul.f32 %v12741_v16, %v3753_v27 }
 0x374   : > { %v3831_v48 = vadd.f32 %v12775_v19, %v3793_v30  ;;  %v3758_v47 = vadd.f32 %v14724_v6, %v3493_v41  ;;  %v10343_v56 = vpop.f32.mrf.mxu1  ;;  %v3942_v36 = vsel %vm3209_vm0, %v3896_v63, %v13010_v14  ;;  %v3485_v34 = vadd.f32 %v3484_v11, %v14725_v28  ;;  %v14726_v6 = vld [vmem:[#allocation34_spill] sm:$0xff] }
 0x375   : > { %v3902_v22 = vrot.slane %v14571_v60, 7  ;;  %v13024_v32 = vmax.f32 %v3857_v23, %v3942_v36  ;;  %v3860_v29 = vmax.f32 %v3828_v25, 0.0  ;;  %v3829_v54 = vadd.f32 %v12775_v19, %v3791_v45  ;;  %v14728_v45 = vld [vmem:[#allocation48_spill] sm:$0xff] }
 0x376   : > { %v3863_v53 = vmax.f32 %v3831_v48, 0.0  ;;  %v3487_v30 = vpop.f32.mrf.mxu1  ;;  %v3796_v27 = vmul.f32 %v12741_v16, %v3758_v47  ;;  %v3756_v41 = vadd.f32 %v12828_v51, %v3485_v34  ;;  %v3496_v33 = vadd.f32 %v10343_v56, %v14726_v6  ;;  %v14730_v6 = vld [vmem:[#allocation49_spill] sm:$0xff] }
 0x377   : > { %v3488_v63 = vadd.f32 %v3487_v30, %v12724_v38  ;;  %v3900_v0 = vrot.slane %v3860_v29, 7  ;;  %v3861_v23 = vmax.f32 %v3829_v54, 0.0 }
 0x378   : > { %v13032_v2 = vrot.slane %v3863_v53, 7  ;;  %v10346_v11 = vpop.f32.mrf.mxu1  ;;  %v13035_v25 = vadd.f32 %v12775_v19, %v3796_v27  ;;  %v3794_v48 = vmul.f32 %v12741_v16, %v3756_v41  ;;  %v3759_v47 = vadd.f32 %v14728_v45, %v3496_v33 }
 0x379   : > { %v3757_v51 = vadd.f32 %v12838_v50, %v3488_v63  ;;  %v3939_v56 = vsel %vm3209_vm0, %v3899_v43, %v3900_v0  ;;  %v3901_v36 = vrot.slane %v3861_v23, 7  ;;  %v3509_v28 = vadd.f32 %v10346_v11, %v12731_v13 }
 0x37a   : > { %14727 = vst [vmem:[#allocation31_spill] sm:$0xff] %v13032_v2  ;;  %v3936_v38 = vsel %vm3209_vm0, %v3902_v22, %v13032_v2  ;;  %v3500_v34 = vpop.f32.mrf.mxu1  ;;  %v13046_v54 = vmax.f32 %v3860_v29, %v3939_v56  ;;  %v14566_v27 = vmax.f32 %v13035_v25, 0.0  ;;  %v13052_v33 = vadd.f32 %v12775_v19, %v3794_v48 }
 0x37b   : > { %v13048_v30 = vmax.f32 %v3863_v53, %v3936_v38  ;;  %v3938_v50 = vsel %vm3209_vm0, %v3900_v0, %v3901_v36  ;;  %v3797_v43 = vmul.f32 %v12741_v16, %v3759_v47  ;;  %v3795_v41 = vmul.f32 %v12741_v16, %v3757_v51  ;;  %v14734_v53 = vld [vmem:[#allocation51_spill] sm:$0xff] }
 0x37c   : > { %14729 = vst [vmem:[#allocation42_spill] sm:$0xff] %v13052_v33  ;;  %v3762_v63 = vadd.f32 %v14730_v6, %v3509_v28  ;;  %v10347_v13 = vpop.f32.mrf.mxu1  ;;  %v13061_v11 = vmax.f32 %v3861_v23, %v3938_v50  ;;  %v13065_v48 = vrot.slane %v14566_v27, 7  ;;  %v14568_v45 = vmax.f32 %v13052_v33, 0.0  ;;  %v14731_v28 = vld [vmem:[#allocation33_spill] sm:$0xff] }
 0x37d   : > { %v3835_v0 = vadd.f32 %v12775_v19, %v3797_v43  ;;  %v3833_v47 = vadd.f32 %v12775_v19, %v3795_v41  ;;  %v3501_v6 = vadd.f32 %v3500_v34, %v14731_v28  ;;  %v3512_v23 = vadd.f32 %v10347_v13, %v14732_v21 }
 0x37e   : > { %v3800_v51 = vmul.f32 %v12741_v16, %v3762_v63  ;;  %v3503_v56 = vpop.f32.mrf.mxu1  ;;  %v13077_v27 = vrot.slane %v14568_v45, 7  ;;  %v14744_v33 = vrot.slane %v13061_v11, 6 }
 0x37f   : > { %v3504_v50 = vadd.f32 %v3503_v56, %v12737_v24  ;;  %v3867_v42 = vmax.f32 %v3835_v0, 0.0  ;;  %v3865_v61 = vmax.f32 %v3833_v47, 0.0  ;;  %v3760_v63 = vadd.f32 %v12847_v3, %v3501_v6 }
 0x380   : > { %14733 = vst [vmem:[#allocation30_spill] sm:$0xff] %v13077_v27  ;;  %v13080_v43 = vadd.f32 %v12775_v19, %v3800_v51  ;;  %v10350_v41 = vpop.f32.mrf.mxu1  ;;  %v3763_v40 = vadd.f32 %v14734_v53, %v3512_v23  ;;  %v13093_v47 = vsel %vm3209_vm0, %v3901_v36, %v3902_v22  ;;  %v14736_v36 = vld [vmem:[#allocation38_spill] sm:$0xff] }
 0x381   : > { %v3761_v34 = vadd.f32 %v12855_v44, %v3504_v50  ;;  %v3525_v21 = vadd.f32 %v10350_v41, %v12750_v8  ;;  %v13086_v13 = vrot.slane %v3867_v42, 7  ;;  %v13088_v24 = vrot.slane %v3865_v61, 7  ;;  %v14735_v44 = vld [vmem:[#allocation52_spill] sm:$0xff] }
 0x382   : > { %v14569_v56 = vmax.f32 %v13080_v43, 0.0  ;;  %v3516_v0 = vpop.f32.mrf.mxu1  ;;  %v3798_v51 = vmul.f32 %v12741_v16, %v3760_v63  ;;  %v3801_v3 = vmul.f32 %v12741_v16, %v3763_v40 }
 0x383   : > { %v3799_v53 = vmul.f32 %v12741_v16, %v3761_v34  ;;  %v3766_v28 = vadd.f32 %v14735_v44, %v3525_v21  ;;  %v3932_v8 = vsel %vm3209_vm0, %v13065_v48, %v13086_v13  ;;  %v3934_v6 = vsel %vm3209_vm0, %v13077_v27, %v13088_v24 }
 0x384   : > { %v13109_v22 = vrot.slane %v14569_v56, 7  ;;  %v3517_v40 = vadd.f32 %v3516_v0, %v14736_v36  ;;  %v10351_v23 = vpop.f32.mrf.mxu1  ;;  %v13112_v50 = vmax.f32 %v3867_v42, %v3932_v8  ;;  %v13114_v41 = vmax.f32 %v3865_v61, %v3934_v6  ;;  %v14738_v56 = vld [vmem:[#allocation39_spill] sm:$0xff] }
 0x385   : > { %v13117_v63 = vadd.f32 %v12775_v19, %v3798_v51  ;;  %v3839_v34 = vadd.f32 %v12775_v19, %v3801_v3  ;;  %v3837_v21 = vadd.f32 %v12775_v19, %v3799_v53  ;;  %v3804_v44 = vmul.f32 %v12741_v16, %v3766_v28  ;;  %v14739_v53 = vld [vmem:[#allocation53_spill] sm:$0xff] }
 0x386   : > { %14737 = vst [vmem:[#allocation43_spill] sm:$0xff] %v13114_v41  ;;  %v3764_v45 = vadd.f32 %v12861_v12, %v3517_v40  ;;  %v3528_v29 = vadd.f32 %v10351_v23, %v14738_v56  ;;  %v3519_v38 = vpop.f32.mrf.mxu1  ;;  %v14749_v41 = vrot.slane %v13061_v11, 6 }
 0x387   : > { %v14570_v61 = vmax.f32 %v13117_v63, 0.0  ;;  %v3871_v8 = vmax.f32 %v3839_v34, 0.0  ;;  %v3869_v51 = vmax.f32 %v3837_v21, 0.0  ;;  %v13128_v6 = vadd.f32 %v12775_v19, %v3804_v44 }
 0x388   : > { %v3802_v3 = vmul.f32 %v12741_v16, %v3764_v45  ;;  %v3767_v28 = vadd.f32 %v14739_v53, %v3528_v29  ;;  %v10354_v36 = vpop.f32.mrf.mxu1  ;;  %v3520_v40 = vadd.f32 %v3519_v38, %v12756_v35  ;;  %v14740_v35 = vld [vmem:[#allocation54_spill] sm:$0xff] }
 0x389   : > { %v13135_v12 = vrot.slane %v14570_v61, 7  ;;  %v13137_v56 = vrot.slane %v3871_v8, 7  ;;  %v3541_v23 = vadd.f32 %v10354_v36, %v12764_v15  ;;  %v13141_v34 = vrot.slane %v3869_v51, 7  ;;  %v14741_v15 = vld [vmem:[#allocation40_spill] sm:$0xff] }
 0x38a   : > { %v14573_v21 = vmax.f32 %v13128_v6, 0.0  ;;  %v13145_v45 = vadd.f32 %v12775_v19, %v3802_v3  ;;  %v3805_v29 = vmul.f32 %v12741_v16, %v3767_v28  ;;  %v3532_v44 = vpop.f32.mrf.mxu1  ;;  %v3765_v42 = vadd.f32 %v12870_v37, %v3520_v40 }
 0x38b   : > { %v3928_v53 = vsel %vm3209_vm0, %v13109_v22, %v13137_v56  ;;  %v3770_v38 = vadd.f32 %v14740_v35, %v3541_v23  ;;  %v3533_v36 = vadd.f32 %v3532_v44, %v14741_v15  ;;  %v3930_v3 = vsel %vm3209_vm0, %v13135_v12, %v13141_v34  ;;  %v14742_v35 = vld [vmem:[#allocation41_spill] sm:$0xff] }
 0x38c   : > { %v13155_v0 = vmax.f32 %v3871_v8, %v3928_v53  ;;  %v3914_v28 = vrot.slane %v14573_v21, 7  ;;  %v14575_v61 = vmax.f32 %v13145_v45, 0.0  ;;  %v10355_v60 = vpop.f32.mrf.mxu1  ;;  %v13164_v58 = vmax.f32 %v3869_v51, %v3930_v3 }
 0x38d   : > { %v3843_v37 = vadd.f32 %v12775_v19, %v3805_v29  ;;  %v3803_v40 = vmul.f32 %v12741_v16, %v3765_v42  ;;  %v3808_v8 = vmul.f32 %v12741_v16, %v3770_v38  ;;  %v3768_v53 = vadd.f32 %v12886_v10, %v3533_v36 }
 0x38e   : > { %v3912_v44 = vrot.slane %v14575_v61, 7  ;;  %v3544_v15 = vadd.f32 %v10355_v60, %v14742_v35  ;;  %v3535_v21 = vpop.f32.mrf.mxu1  ;;  %v14743_v61 = vmax.f32 %v12998_v39, 0.0 }
 0x38f   : > { %v3875_v51 = vmax.f32 %v3843_v37, 0.0  ;;  %v3841_v3 = vadd.f32 %v12775_v19, %v3803_v40  ;;  %v3846_v29 = vadd.f32 %v12775_v19, %v3808_v8  ;;  %v3806_v42 = vmul.f32 %v12741_v16, %v3768_v53 }
 0x390   : > { %v3771_v38 = vadd.f32 %v12877_v18, %v3544_v15  ;;  %v3536_v23 = vadd.f32 %v3535_v21, %v12770_v20  ;;  %v3966_v10 = vmax.f32 %v14743_v61, %v13093_v47  ;;  %v14745_v37 = vrot.slane %v13046_v54, 6 }
 0x391   : > { %v3915_v36 = vrot.slane %v3875_v51, 7  ;;  %v3873_v60 = vmax.f32 %v3841_v3, 0.0  ;;  %v3878_v35 = vmax.f32 %v3846_v29, 0.0  ;;  %v3844_v8 = vadd.f32 %v12775_v19, %v3806_v42 }
 0x392   : > { %v4035_v40 = vsel %vm4016_vm4, %v14745_v37, %v14744_v33  ;;  %v3809_v18 = vmul.f32 %v12741_v16, %v3771_v38  ;;  %v3769_v20 = vadd.f32 %v12904_v5, %v3536_v23  ;;  %v3998_v21 = vrot.slane %v3966_v10, 6 }
 0x393   : > { %v3924_v39 = vsel %vm3209_vm0, %v3914_v28, %v3915_v36  ;;  %v3913_v47 = vrot.slane %v3873_v60, 7  ;;  %v3918_v61 = vrot.slane %v3878_v35, 7  ;;  %v14746_v53 = vmov %v14745_v37 }
 0x394   : > { %v14747_v15 = vrot.slane %v13008_v4, 6  ;;  %v3979_v33 = vmax.f32 %v3875_v51, %v3924_v39  ;;  %v3876_v29 = vmax.f32 %v3844_v8, 0.0  ;;  %v3847_v42 = vadd.f32 %v12775_v19, %v3809_v18 }
 0x395   : > { %v3807_v38 = vmul.f32 %v12741_v16, %v3769_v20  ;;  %v3926_v5 = vsel %vm3209_vm0, %v3912_v44, %v3913_v47  ;;  %v14748_v23 = vrot.slane %v13048_v30, 6  ;;  %v4034_v17 = vsel %vm4016_vm4, %v14749_v41, %v3998_v21 }
 0x396   : > { %v4036_v3 = vsel %vm4016_vm4, %v14747_v15, %v14746_v53  ;;  %v4011_v8 = vrot.slane %v3979_v33, 6  ;;  %v13213_v39 = vmax.f32 %v3873_v60, %v3926_v5  ;;  %v3916_v18 = vrot.slane %v3876_v29, 7 }
 0x397   : > { %v4033_v37 = vsel %vm4016_vm4, %v3998_v21, %v14748_v23  ;;  %v4061_v51 = vmax.f32 %v13046_v54, %v4036_v3  ;;  %v3879_v16 = vmax.f32 %v3847_v42, 0.0  ;;  %v3845_v20 = vadd.f32 %v12775_v19, %v3807_v38 }
 0x398   : > { %v4063_v53 = vmax.f32 %v3966_v10, %v4034_v17  ;;  %v4064_v15 = vmax.f32 %v13048_v30, %v4033_v37  ;;  %v4062_v2 = vmax.f32 %v13061_v11, %v4035_v40  ;;  %v4009_v23 = vrot.slane %v13213_v39, 6 }
 0x399   : > { %v13219_v27 = vrot.slane %v3879_v16, 7  ;;  %v3923_v41 = vsel %vm3209_vm0, %v3915_v36, %v3916_v18  ;;  %v3925_v54 = vsel %vm3209_vm0, %v3913_v47, %v3914_v28  ;;  %v3877_v60 = vmax.f32 %v3845_v20, 0.0 }
 0x39a   : > { %v4088_v21 = vpack.c.bf16 %v4064_v15, %v4063_v53  ;;  %v3980_v3 = vmax.f32 %v3876_v29, %v3923_v41  ;;  %v13225_v42 = vpack.c.bf16 %v4062_v2, %v4061_v51  ;;  %v14750_v17 = vmax.f32 %v13128_v6, 0.0 }
 0x39b   : > { %v3920_v19 = vsel %vm3209_vm0, %v3918_v61, %v13219_v27  ;;  %v3941_v10 = vsel %vm3209_vm0, %v13010_v14, %v12975_v49  ;;  %v3927_v28 = vsel %vm3209_vm0, %v13137_v56, %v3912_v44  ;;  %v3917_v36 = vrot.slane %v3877_v60, 7 }
 0x39c   : > { %v3978_v11 = vmax.f32 %v14750_v17, %v3925_v54  ;;  %v13239_v40 = vmax.f32 %v3879_v16, %v3920_v19  ;;  %v4012_v2 = vrot.slane %v3980_v3, 6  ;;  %v14751_v47 = vmax.f32 %v12955_v7, 0.0 }
 0x39d   : > { %v14752_v6 = vmax.f32 %v13145_v45, 0.0  ;;  %v14753_v37 = vrot.slane %v13024_v32, 6  ;;  %v14754_v51 = vrot.slane %v12995_v46, 6  ;;  %v14756_v56 = vrot.slane %v12957_v9, 6 }
 0x39e   : > { %v3962_v29 = vmax.f32 %v14751_v47, %v3941_v10  ;;  %v4010_v38 = vrot.slane %v3978_v11, 6  ;;  %v3922_v7 = vsel %vm3209_vm0, %v3916_v18, %v3917_v36  ;;  %v3921_v45 = vsel %vm3209_vm0, %v3917_v36, %v3918_v61 }
 0x39f   : > { %v3976_v5 = vmax.f32 %v14752_v6, %v3927_v28  ;;  %v4039_v49 = vsel %vm4016_vm4, %v14754_v51, %v14753_v37  ;;  %v14755_v14 = vmov %v14754_v51  ;;  %v4015_v16 = vrot.slane %v13239_v40, 6 }
 0x3a0   : > { %v4040_v44 = vsel %vm4016_vm4, %v14756_v56, %v14755_v14  ;;  %v4020_v20 = vsel %vm4016_vm4, %v4011_v8, %v4012_v2  ;;  %v3981_v53 = vmax.f32 %v3877_v60, %v3922_v7  ;;  %v3982_v15 = vmax.f32 %v3878_v35, %v3921_v45 }
 0x3a1   : > { %v4077_v41 = vmax.f32 %v3980_v3, %v4020_v20  ;;  %v4021_v54 = vsel %vm4016_vm4, %v4010_v38, %v4011_v8  ;;  %v4022_v19 = vsel %vm4016_vm4, %v4009_v23, %v4010_v38  ;;  %v3994_v10 = vrot.slane %v3962_v29, 6 }
 0x3a2   : > { %v4076_v17 = vmax.f32 %v3979_v33, %v4021_v54  ;;  %v4008_v18 = vrot.slane %v3976_v5, 6  ;;  %v4013_v28 = vrot.slane %v3981_v53, 6  ;;  %v4014_v47 = vrot.slane %v3982_v15, 6 }
 0x3a3   : > { %v4075_v61 = vmax.f32 %v3978_v11, %v4022_v19  ;;  %v4057_v36 = vmax.f32 %v12995_v46, %v4040_v44  ;;  %v14757_v6 = vrot.slane %v13008_v4, 6  ;;  %v14758_v60 = vmov %v14753_v37 }
 0x3a4   : > { %v4038_v8 = vsel %vm4016_vm4, %v14758_v60, %v3994_v10  ;;  %v4023_v33 = vsel %vm4016_vm4, %v4008_v18, %v4009_v23  ;;  %v14759_v3 = vrot.slane %v13155_v0, 6  ;;  %v4017_v46 = vsel %vm4016_vm4, %v4014_v47, %v4015_v16 }
 0x3a5   : > { %v4037_v35 = vsel %vm4016_vm4, %v3994_v10, %v14757_v6  ;;  %v4018_v38 = vsel %vm4016_vm4, %v4013_v28, %v4014_v47  ;;  %v4019_v37 = vsel %vm4016_vm4, %v4012_v2, %v4013_v28  ;;  %v4094_v51 = vpack.c.bf16 %v4076_v17, %v4075_v61 }
 0x3a6   : > { %v4024_v11 = vsel %vm4016_vm4, %v14759_v3, %v4008_v18  ;;  %v4079_v14 = vmax.f32 %v3982_v15, %v4018_v38  ;;  %v4080_v23 = vmax.f32 %v13239_v40, %v4017_v46  ;;  %v4078_v56 = vmax.f32 %v3981_v53, %v4019_v37  ;;  %v10557_v40 = vld [vmem:[%s11503_s19 + $0x74] ss:$8 sps:$4 sm:$0xff]  }
 0x3a7   : > { %v4059_v44 = vmax.f32 %v3962_v29, %v4038_v8  ;;  %v4060_v7 = vmax.f32 %v13008_v4, %v4037_v35  ;;  %v4073_v45 = vmax.f32 %v3976_v5, %v4024_v11  ;;  %v4074_v20 = vmax.f32 %v13213_v39, %v4023_v33 }
 0x3a8   : > { %v4058_v54 = vmax.f32 %v13024_v32, %v4039_v49  ;;  %v4096_v19 = vpack.c.bf16 %v4080_v23, %v4079_v14  ;;  %v4095_v10 = vpack.c.bf16 %v4078_v56, %v4077_v41  ;;  %v3929_v2 = vsel %vm3209_vm0, %v13141_v34, %v13109_v22 }
 0x3a9   : > { %v14760_v15 = vmax.f32 %v12897_v59, 0.0  ;;  %v4086_v53 = vpack.c.bf16 %v4060_v7, %v4059_v44  ;;  %v4093_v29 = vpack.c.bf16 %v4074_v20, %v4073_v45  ;;  %v14761_v4 = vmax.f32 %v13080_v43, 0.0 }
 0x3aa   : > { %v4085_v18 = vpack.c.bf16 %v4058_v54, %v4057_v36  ;;  %10006 = vmatprep.subr.bf16.mxu1 %v4096_v19  ;;  %v3931_v32 = vsel %vm3209_vm0, %v13086_v13, %v13135_v12  ;;  %v14762_v49 = vrot.slane %v12970_v55, 6  ;;  %v14763_v22 = vrot.slane %v12949_v57, 6 }
 0x3ab   : > { %v3958_v17 = vmax.f32 %v14760_v15, %v12993_v26  ;;  %v3974_v5 = vmax.f32 %v14761_v4, %v3929_v2  ;;  %v14765_v34 = vrot.slane %v12910_v31, 6  ;;  %10007 = vmatpush3.bf16.msra.mxu1 %v4088_v21  ;;  %v14766_v28 = vmax.f32 %v13117_v63, 0.0  ;;  %v14777_v15 = vld [vmem:[#allocation31_spill] sm:$0xff]  ;;  %v14778_v4 = vld [vmem:[#allocation50_spill] sm:$0xff] }
 0x3ac   : > { %v4043_v59 = vsel %vm4016_vm4, %v14763_v22, %v14762_v49  ;;  %v14764_v26 = vmov %v14763_v22  ;;  %10008 = vmatprep.subr.bf16.mxu1 %v4095_v10  ;;  %v14767_v61 = vrot.slane %v12957_v9, 6  ;;  %v14768_v6 = vmov %v14762_v49 }
 0x3ad   : > { %v3990_v39 = vrot.slane %v3958_v17, 6  ;;  %v4044_v43 = vsel %vm4016_vm4, %v14765_v34, %v14764_v26  ;;  %v4006_v41 = vrot.slane %v3974_v5, 6  ;;  %v3972_v47 = vmax.f32 %v14766_v28, %v3931_v32  ;;  %v14780_v32 = vld [vmem:[#allocation43_spill] sm:$0xff] }
 0x3ae   : > { %v4053_v13 = vmax.f32 %v12949_v57, %v4044_v43  ;;  %v4054_v12 = vmax.f32 %v12970_v55, %v4043_v59  ;;  %v3933_v63 = vsel %vm3209_vm0, %v13088_v24, %v13065_v48  ;;  %v3986_v57 = vrot.slane %v12947_v62, 6 }
 0x3af   : > { %v4041_v36 = vsel %vm4016_vm4, %v3990_v39, %v14767_v61  ;;  %v4042_v35 = vsel %vm4016_vm4, %v14768_v6, %v3990_v39  ;;  %v14769_v21 = vmov %v14759_v3  ;;  %v14770_v8 = vrot.slane %v13164_v58, 6  ;;  %10009 = vmatpush3.bf16.msra.mxu1 %v13225_v42 }
 0x3b0   : > { %v4025_v60 = vsel %vm4016_vm4, %v4006_v41, %v14769_v21  ;;  %v4055_v33 = vmax.f32 %v3958_v17, %v4042_v35  ;;  %v4056_v3 = vmax.f32 %v12957_v9, %v4041_v36  ;;  %v4004_v38 = vrot.slane %v3972_v47, 6  ;;  %10010 = vmatprep.subr.bf16.mxu1 %v4094_v51  ;;  %v14776_v51 = vld [vmem:[#allocation30_spill] sm:$0xff] }
 0x3b1   : > { %v4026_v55 = vsel %vm4016_vm4, %v14770_v8, %v4006_v41  ;;  %v4072_v46 = vmax.f32 %v13155_v0, %v4025_v60  ;;  %v4083_v48 = vpack.c.bf16 %v4054_v12, %v4053_v13  ;;  %v14771_v37 = vmax.f32 %v13035_v25, 0.0 }
 0x3b2   : > { %v4071_v11 = vmax.f32 %v3974_v5, %v4026_v55  ;;  %v4084_v24 = vpack.c.bf16 %v4056_v3, %v4055_v33  ;;  %v14772_v23 = vmov %v14765_v34  ;;  %v14773_v44 = vrot.slane %v12924_v1, 6  ;;  %v14782_v34 = vld [vmem:[#allocation42_spill] sm:$0xff]  ;;  %v10528_v55 = vld [vmem:[%s14612_s14 + $0x14] ss:$8 sps:$4 sm:$0xff]  }
 0x3b3   : > { %v3970_v14 = vmax.f32 %v14771_v37, %v3933_v63  ;;  %v4045_v56 = vsel %vm4016_vm4, %v3986_v57, %v14772_v23  ;;  %v14774_v7 = vmov %v14770_v8  ;;  %v14775_v25 = vrot.slane %v13112_v50, 6  ;;  %10011 = vmatpush3.bf16.msra.mxu1 %v4086_v53  ;;  %v14784_v53 = vld [vmem:[#allocation55_spill] sm:$0xff]  ;;  %v10558_v3 = vld [vmem:[%s11503_s19 + $0x60] ss:$8 sps:$4 sm:$0xff]  }
 0x3b4   : > { %v4046_v9 = vsel %vm4016_vm4, %v14773_v44, %v3986_v57  ;;  %v4092_v0 = vpack.c.bf16 %v4072_v46, %v4071_v11  ;;  %v4027_v42 = vsel %vm4016_vm4, %v4004_v38, %v14774_v7  ;;  %v4052_v2 = vmax.f32 %v12910_v31, %v4045_v56  ;;  %10012 = vmatprep.subr.bf16.mxu1 %v4093_v29  ;;  %v10555_v33 = vld [vmem:[%s11503_s19 + $0x70] ss:$8 sps:$4 sm:$0xff]   ;;  %v10563_v11 = vld [vmem:[%s11503_s19 + $0x54] ss:$8 sps:$4 sm:$0xff]   ;;  %v10564_v37 = vld [vmem:[%s11503_s19 + $0x40] ss:$8 sps:$4 sm:$0xff]  }
 0x3b5   : > { %v4028_v45 = vsel %vm4016_vm4, %v14775_v25, %v4004_v38  ;;  %v4051_v20 = vmax.f32 %v12947_v62, %v4046_v9  ;;  %v4070_v19 = vmax.f32 %v13164_v58, %v4027_v42  ;;  %v4002_v10 = vrot.slane %v3970_v14, 6  ;;  %v10530_v46 = vld [vmem:[%s14612_s14 + $0x10] ss:$8 sps:$4 sm:$0xff]   ;;  %v10534_v38 = vld [vmem:[%s14612_s14 + $0x24] ss:$8 sps:$4 sm:$0xff]  }
 0x3b6   : > { %v4069_v54 = vmax.f32 %v3972_v47, %v4028_v45  ;;  %v3935_v17 = vsel %vm3209_vm0, %v14777_v15, %v14776_v51  ;;  %v3951_v5 = vsel %vm3209_vm0, %v13219_v27, %v14778_v4  ;;  %v14779_v62 = vmov %v14775_v25  ;;  %v10536_v23 = vld [vmem:[%s14612_s14 + $0x20] ss:$8 sps:$4 sm:$0xff]   ;;  %v10537_v56 = vld [vmem:[%s14612_s14 + $0x34] ss:$8 sps:$4 sm:$0xff]   ;;  %v10572_v9 = vld [vmem:[%s11503_s19 + $0x24] ss:$8 sps:$4 sm:$0xff]  }
 0x3b7   : > { %v4029_v58 = vsel %vm4016_vm4, %v4002_v10, %v14779_v62  ;;  %v14781_v49 = vrot.slane %v14780_v32, 6  ;;  %v4082_v22 = vpack.c.bf16 %v4052_v2, %v4051_v20  ;;  %v14783_v43 = vmax.f32 %v14782_v34, 0.0  ;;  %10013 = vmatpush3.bf16.msra.mxu1 %v4085_v18  ;;  %v10539_v7 = vld [vmem:[%s14612_s14 + $0x30] ss:$8 sps:$4 sm:$0xff]   ;;  %v10575_v25 = vld [vmem:[%s11503_s19 + $0x14] ss:$8 sps:$4 sm:$0xff]  }
 0x3b8   : > { %v4091_v39 = vpack.c.bf16 %v4070_v19, %v4069_v54  ;;  %v4068_v26 = vmax.f32 %v13112_v50, %v4029_v58  ;;  %v14785_v41 = vmax.f32 %v14784_v53, 0.0  ;;  %10014 = vmatprep.subr.bf16.mxu1 %v4092_v0  ;;  %v14787_v29 = vrot.slane %v13048_v30, 6  ;;  %v10570_v0 = vld [vmem:[%s11503_s19 + $0x20] ss:$8 sps:$4 sm:$0xff]   ;;  %v10573_v42 = vld [vmem:[%s11503_s19 + $0x10] ss:$8 sps:$4 sm:$0xff]  }
 0x3b9   : > { %v4030_v31 = vsel %vm4016_vm4, %v14781_v49, %v4002_v10  ;;  %v3968_v27 = vmax.f32 %v14783_v43, %v3935_v17  ;;  %v14786_v61 = vmov %v14781_v49  ;;  %v14788_v6 = vmov %v14773_v44  ;;  %v10567_v44 = vld [vmem:[%s11503_s19 + $0x30] ss:$8 sps:$4 sm:$0xff]   ;;  %v10578_v20 = vld [vmem:[%s11513_s30 + $0x14] ss:$8 sps:$4 sm:$0xff]   ;;  %v10579_v54 = vld [vmem:[%s11503_s19] ss:$8 sps:$4 sm:$0xff]  }
 0x3ba   : > { %v4067_v59 = vmax.f32 %v3970_v14, %v4030_v31  ;;  %v3952_v28 = vmax.f32 %v14785_v41, %v3951_v5  ;;  %v10569_v14 = vld [vmem:[%s11503_s19 + $0x34] ss:$8 sps:$4 sm:$0xff]   ;;  %v10576_v45 = vld [vmem:[%s11513_s30 + $0x10] ss:$8 sps:$4 sm:$0xff]   ;;  %4501 = vmatprep.subr.bf16.mxu0 %v10578_v20  ;;  %v10581_v19 = vld [vmem:[%s11503_s19 + $0x4] ss:$8 sps:$4 sm:$0xff]  }
 0x3bb   : > { %v4000_v13 = vrot.slane %v3968_v27, 6  ;;  %10015 = vmatpush3.bf16.msra.mxu1 %v4084_v24  ;;  %v10566_v24 = vld [vmem:[%s11503_s19 + $0x44] ss:$8 sps:$4 sm:$0xff]   ;;  %4502 = vmatpush1.bf16.msra.mxu0 %v10576_v45  ;;  %v10582_v10 = vld [vmem:[%s11513_s30] ss:$8 sps:$4 sm:$0xff]   ;;  %v11443_v15 = vmov 0  }
 0x3bc   : > { %v4090_v47 = vpack.c.bf16 %v4068_v26, %v4067_v59  ;;  %v3984_v12 = vrot.slane %v3952_v28, 6  ;;  %10016 = vmatprep.subr.bf16.mxu1 %v4091_v39  ;;  %v10584_v2 = vld [vmem:[%s11513_s30 + $0x4] ss:$8 sps:$4 sm:$0xff]   ;;  %v10587_v51 = vld [vmem:[%s11508_s24 + $0x74] ss:$8 sps:$4 sm:$0xff]   ;;  %4521 = vmatprep.mubr.bf16.mxu0 %v11443_v15 }
 0x3bd   : > { %v4031_v36 = vsel %vm4016_vm4, %v4000_v13, %v14786_v61  ;;  %v4032_v50 = vsel %vm4016_vm4, %v14787_v29, %v4000_v13  ;;  %4503 = vmatprep.subr.bf16.mxu0 %v10584_v2  ;;  %v10585_v49 = vld [vmem:[%s11508_s24 + $0x70] ss:$8 sps:$4 sm:$0xff]   ;;  %v10588_v34 = vld [vmem:[%s11508_s24 + $0x60] ss:$8 sps:$4 sm:$0xff]   ;;  %v10593_v43 = vld [vmem:[%s11508_s24 + $0x54] ss:$8 sps:$4 sm:$0xff]  }
 0x3be   : > { %v4047_v35 = vsel %vm4016_vm4, %v3984_v12, %v14788_v6  ;;  %v4048_v18 = vsel %vm4016_vm4, %v4015_v16, %v3984_v12  ;;  %v4065_v63 = vmax.f32 %v3968_v27, %v4032_v50  ;;  %v4066_v30 = vmax.f32 %v14780_v32, %v4031_v36  ;;  %v10525_v16 = vld [vmem:[%s14612_s14] ss:$8 sps:$4 sm:$0xff]   ;;  %v10596_v12 = vld [vmem:[%s11508_s24 + $0x44] ss:$8 sps:$4 sm:$0xff]   ;;  %v10599_v50 = vld [vmem:[%s11508_s24 + $0x34] ss:$8 sps:$4 sm:$0xff]  }
 0x3bf   : > { %v4049_v57 = vmax.f32 %v3952_v28, %v4048_v18  ;;  %v4050_v21 = vmax.f32 %v12924_v1, %v4047_v35  ;;  %10017 = vmatpush3.bf16.msra.mxu1 %v4083_v48  ;;  %v10560_v1 = vld [vmem:[%s11503_s19 + $0x64] ss:$8 sps:$4 sm:$0xff]   ;;  %v10561_v48 = vld [vmem:[%s11503_s19 + $0x50] ss:$8 sps:$4 sm:$0xff]   ;;  %4504 = vmatpush1.bf16.msra.mxu0 %v10582_v10  ;;  %v10594_v29 = vld [vmem:[%s11508_s24 + $0x40] ss:$8 sps:$4 sm:$0xff]  }
 0x3c0   : > { %v4089_v60 = vpack.c.bf16 %v4066_v30, %v4065_v63  ;;  %10018 = vmatprep.subr.bf16.mxu1 %v4090_v47  ;;  %v10591_v47 = vld [vmem:[%s11508_s24 + $0x50] ss:$8 sps:$4 sm:$0xff]   ;;  %v10636_v45 = vld [vmem:[%s11533_s27 + $0x14] ss:$8 sps:$4 sm:$0xff]   ;;  %v10640_v2 = vld [vmem:[%s11533_s27] ss:$8 sps:$4 sm:$0xff]  }
 0x3c1   : > { %v4081_v8 = vpack.c.bf16 %v4050_v21, %v4049_v57  ;;  %v10597_v30 = vld [vmem:[%s11508_s24 + $0x30] ss:$8 sps:$4 sm:$0xff]   ;;  %v10602_v21 = vld [vmem:[%s11508_s24 + $0x24] ss:$8 sps:$4 sm:$0xff]   ;;  %s11444_s14 = smov [#allocation2]  }
 0x3c2   : > { %v10634_v20 = vld [vmem:[%s11533_s27 + $0x10] ss:$8 sps:$4 sm:$0xff]  }
 0x3c3   : > { %10019 = vmatpush3.bf16.msra.mxu1 %v4082_v22  ;;  %v10590_v22 = vld [vmem:[%s11508_s24 + $0x64] ss:$8 sps:$4 sm:$0xff]  }
 0x3c4   : > { %10020 = vmatprep.subr.bf16.mxu1 %v4089_v60 }
 0x3c7   : > { %10021 = vmatpush3.bf16.msra.mxu1 %v4081_v8 }
 0x3c8   : > { %4336 = vmatprep.subr.bf16.mxu1 %v10557_v40  ;;  %v10600_v40 = vld [vmem:[%s11508_s24 + $0x20] ss:$8 sps:$4 sm:$0xff]  }
 0x3ca   : > { %4170 = vmatmul.mubr.bf16.vlgmr.msra.gmra.mxu1 %v10525_v16  ;;  %v10605_v16 = vld [vmem:[%s11508_s24 + $0x14] ss:$8 sps:$4 sm:$0xff]  }
 0x3cb   : > { %4177 = vmatprep.mubr.bf16.mxu1 %v10528_v55  ;;  %4337 = vmatpush1.bf16.msra.mxu1 %v10555_v33 }
 0x3cc   : > { %4338 = vmatprep.subr.bf16.mxu1 %v10560_v1 }
 0x3cf   : > { %4339 = vmatpush1.bf16.msra.mxu1 %v10558_v3  ;;  %v10603_v3 = vld [vmem:[%s11508_s24 + $0x10] ss:$8 sps:$4 sm:$0xff]  }
 0x3d0   : > { %4340 = vmatprep.subr.bf16.mxu1 %v10563_v11 }
 0x3d2   : > { %4178 = vmatmul.mubr.bf16.gmra.mxu1 %v10530_v46  ;;  %v10608_v46 = vld [vmem:[%s11508_s24 + $0x4] ss:$8 sps:$4 sm:$0xff]  }
 0x3d3   : > { %4185 = vmatprep.mubr.bf16.mxu1 %v10534_v38  ;;  %4341 = vmatpush1.bf16.msra.mxu1 %v10561_v48  ;;  %v10606_v38 = vld [vmem:[%s11508_s24] ss:$8 sps:$4 sm:$0xff]   ;;  %v10610_v48 = vld [vmem:[%s11533_s27 + $0x70] ss:$8 sps:$4 sm:$0xff]  }
 0x3d4   : > { %4342 = vmatprep.subr.bf16.mxu1 %v10566_v24  ;;  %v10612_v24 = vld [vmem:[%s11533_s27 + $0x74] ss:$8 sps:$4 sm:$0xff]  }
 0x3d7   : > { %4343 = vmatpush1.bf16.msra.mxu1 %v10564_v37  ;;  %v10615_v37 = vld [vmem:[%s11533_s27 + $0x64] ss:$8 sps:$4 sm:$0xff]  }
 0x3d8   : > { %4344 = vmatprep.subr.bf16.mxu1 %v10569_v14  ;;  %v10613_v14 = vld [vmem:[%s11533_s27 + $0x60] ss:$8 sps:$4 sm:$0xff]  }
 0x3da   : > { %4186 = vmatmul.mubr.bf16.gmra.mxu1 %v10536_v23  ;;  %v10618_v23 = vld [vmem:[%s11533_s27 + $0x54] ss:$8 sps:$4 sm:$0xff]  }
 0x3db   : > { %4193 = vmatprep.mubr.bf16.mxu1 %v10537_v56  ;;  %4345 = vmatpush1.bf16.msra.mxu1 %v10567_v44  ;;  %v10616_v56 = vld [vmem:[%s11533_s27 + $0x50] ss:$8 sps:$4 sm:$0xff]   ;;  %v10621_v44 = vld [vmem:[%s11533_s27 + $0x44] ss:$8 sps:$4 sm:$0xff]  }
 0x3dc   : > { %4346 = vmatprep.subr.bf16.mxu1 %v10572_v9  ;;  %v10619_v9 = vld [vmem:[%s11533_s27 + $0x40] ss:$8 sps:$4 sm:$0xff]  }
 0x3df   : > { %4347 = vmatpush1.bf16.msra.mxu1 %v10570_v0  ;;  %v10624_v0 = vld [vmem:[%s11533_s27 + $0x34] ss:$8 sps:$4 sm:$0xff]  }
 0x3e0   : > { %4348 = vmatprep.subr.bf16.mxu1 %v10575_v25  ;;  %v10628_v25 = vld [vmem:[%s11533_s27 + $0x20] ss:$8 sps:$4 sm:$0xff]  }
 0x3e2   : > { %4194 = vmatmul.mubr.bf16.gmra.mxu1 %v10539_v7  ;;  %v10622_v7 = vld [vmem:[%s11533_s27 + $0x30] ss:$8 sps:$4 sm:$0xff]  }
 0x3e3   : > { %4349 = vmatpush1.bf16.msra.mxu1 %v10573_v42  ;;  %4368 = vmatprep.mubr.bf16.mxu1 %v11443_v15  ;;  %v10630_v42 = vld [vmem:[%s11533_s27 + $0x24] ss:$8 sps:$4 sm:$0xff]  }
 0x3e4   : > { %4350 = vmatprep.subr.bf16.mxu1 %v10581_v19 }
 0x3e7   : > { %4351 = vmatpush1.bf16.msra.mxu1 %v10579_v54  ;;  %v10642_v54 = vld [vmem:[%s11533_s27 + $0x4] ss:$8 sps:$4 sm:$0xff]  }
 0x3e8   : > { %4690 = vmatprep.subr.bf16.mxu1 %v10587_v51 }
 0x48a   : > { %v10022_v17 = vpop.f32.mrf.mxu1 }
 0x48c   : > { %v10023_v4 = vpop.f32.mrf.mxu1 }
 0x48d   : > { %v10024_v62 = vadd.f32 %v10023_v4, %v10022_v17  ;;  %v10648_v4 = vld [vmem:[%s11533_s27 + $0xf4] ss:$8 sps:$4 sm:$0xff]  }
 0x48e   : > { %v10025_v5 = vpop.f32.mrf.mxu1 }
 0x490   : > { %v10026_v39 = vpop.f32.mrf.mxu1 }
 0x491   : > { %v10027_v58 = vadd.f32 %v10026_v39, %v10025_v5 }
 0x492   : > { %v10028_v32 = vpop.f32.mrf.mxu1 }
 0x493   : > { %v13439_v31 = vpack.c.bf16 %v10027_v58, %v10024_v62  ;;  %v10646_v62 = vld [vmem:[%s11533_s27 + $0xf0] ss:$8 sps:$4 sm:$0xff]  }
 0x494   : > { %v10029_v59 = vpop.f32.mrf.mxu1 }
 0x495   : > { %4369 = vmatmul.mubr.bf16.vlgmr.msra.gmra.mxu1 %v13439_v31  ;;  %4522 = vmatmul.mubr.bf16.vlgmr.msra.gmra.mxu0 %v13439_v31  ;;  %v10030_v53 = vadd.f32 %v10029_v59, %v10028_v32  ;;  %v10652_v59 = vld [vmem:[%s11533_s27 + $0xe0] ss:$8 sps:$4 sm:$0xff]  }
 0x496   : > { %v10031_v26 = vpop.f32.mrf.mxu1  ;;  %4691 = vmatpush1.bf16.msra.mxu1 %v10585_v49  ;;  %4378 = vmatprep.mubr.bf16.mxu1 %v11443_v15  ;;  %v10654_v49 = vld [vmem:[%s11533_s27 + $0xe4] ss:$8 sps:$4 sm:$0xff]  }
 0x497   : > { %4692 = vmatprep.subr.bf16.mxu1 %v10590_v22  ;;  %4531 = vmatprep.mubr.bf16.mxu0 %v11443_v15 }
 0x498   : > { %v10032_v27 = vpop.f32.mrf.mxu1 }
 0x499   : > { %v10033_v41 = vadd.f32 %v10032_v27, %v10031_v26 }
 0x49a   : > { %v10034_v28 = vpop.f32.mrf.mxu1  ;;  %4693 = vmatpush1.bf16.msra.mxu1 %v10588_v34 }
 0x49b   : > { %v4203_v13 = vpack.c.bf16 %v10033_v41, %v10030_v53  ;;  %4694 = vmatprep.subr.bf16.mxu1 %v10593_v43  ;;  %v10660_v43 = vld [vmem:[%s11533_s27 + $0xd4] ss:$8 sps:$4 sm:$0xff]   ;;  %v10658_v41 = vld [vmem:[%s11533_s27 + $0xd0] ss:$8 sps:$4 sm:$0xff]  }
 0x49c   : > { %v10035_v61 = vpop.f32.mrf.mxu1 }
 0x49d   : > { %4379 = vmatmul.mubr.bf16.gmra.mxu1 %v4203_v13  ;;  %4532 = vmatmul.mubr.bf16.gmra.mxu0 %v4203_v13  ;;  %v10036_v35 = vadd.f32 %v10035_v61, %v10034_v28 }
 0x49e   : > { %v10037_v36 = vpop.f32.mrf.mxu1  ;;  %4695 = vmatpush1.bf16.msra.mxu1 %v10591_v47  ;;  %4388 = vmatprep.mubr.bf16.mxu1 %v11443_v15 }
 0x49f   : > { %4696 = vmatprep.subr.bf16.mxu1 %v10596_v12  ;;  %4541 = vmatprep.mubr.bf16.mxu0 %v11443_v15 }
 0x4a0   : > { %v10038_v6 = vpop.f32.mrf.mxu1 }
 0x4a1   : > { %v10039_v18 = vadd.f32 %v10038_v6, %v10037_v36  ;;  %v10664_v36 = vld [vmem:[%s11533_s27 + $0xc0] ss:$8 sps:$4 sm:$0xff]  }
 0x4a2   : > { %v10040_v63 = vpop.f32.mrf.mxu1  ;;  %4697 = vmatpush1.bf16.msra.mxu1 %v10594_v29 }
 0x4a3   : > { %v4204_v57 = vpack.c.bf16 %v10039_v18, %v10036_v35  ;;  %4698 = vmatprep.subr.bf16.mxu1 %v10599_v50  ;;  %v10672_v50 = vld [vmem:[%s11533_s27 + $0xb4] ss:$8 sps:$4 sm:$0xff]   ;;  %v10670_v18 = vld [vmem:[%s11533_s27 + $0xb0] ss:$8 sps:$4 sm:$0xff]  }
 0x4a4   : > { %v10041_v60 = vpop.f32.mrf.mxu1 }
 0x4a5   : > { %4389 = vmatmul.mubr.bf16.gmra.mxu1 %v4204_v57  ;;  %4542 = vmatmul.mubr.bf16.gmra.mxu0 %v4204_v57  ;;  %v10042_v33 = vadd.f32 %v10041_v60, %v10040_v63 }
 0x4a6   : > { %v10043_v8 = vpop.f32.mrf.mxu1  ;;  %4699 = vmatpush1.bf16.msra.mxu1 %v10597_v30  ;;  %4398 = vmatprep.mubr.bf16.mxu1 %v11443_v15  ;;  %v10678_v30 = vld [vmem:[%s11533_s27 + $0xa4] ss:$8 sps:$4 sm:$0xff]  }
 0x4a7   : > { %4700 = vmatprep.subr.bf16.mxu1 %v10602_v21  ;;  %4551 = vmatprep.mubr.bf16.mxu0 %v11443_v15  ;;  %v13544_v21 = vsub.s32 1, %v12334_v52 }
 0x4a8   : > { %v10044_v55 = vpop.f32.mrf.mxu1 }
 0x4a9   : > { %v10045_v1 = vadd.f32 %v10044_v55, %v10043_v8  ;;  %v4254_v8 = vld [vmem:[%s14789_s23] sm:$0x3]  ;;  %s14793_s23 = sld [smem:[#allocation14_spill]] }
 0x4aa   : > { %4701 = vmatpush1.bf16.msra.mxu1 %v10600_v40  ;;  %v4255_v40 = vld [vmem:[%s14790_s2] sm:$0x3]  ;;  %s14794_s2 = sld [smem:[#allocation19_spill]] }
 0x4ab   : > { %v4205_v11 = vpack.c.bf16 %v10045_v1, %v10042_v33  ;;  %4702 = vmatprep.subr.bf16.mxu1 %v10605_v16  ;;  %v10676_v55 = vld [vmem:[%s11533_s27 + $0xa0] ss:$8 sps:$4 sm:$0xff]  }
 0x4ad   : > { %4399 = vmatmul.mubr.bf16.gmra.mxu1 %v4205_v11  ;;  %4552 = vmatmul.mubr.bf16.gmra.mxu0 %v4205_v11 }
 0x4ae   : > { %4703 = vmatpush1.bf16.msra.mxu1 %v10603_v3  ;;  %4722 = vmatprep.mubr.bf16.mxu1 %v11443_v15 }
 0x4af   : > { %4704 = vmatprep.subr.bf16.mxu1 %v10608_v46  ;;  %5068 = vmatprep.mubr.bf16.mxu0 %v11443_v15  ;;  %v13563_v46 = vrot.slane %v4254_v8, %v13544_v21 }
 0x4b2   : > { %4705 = vmatpush1.bf16.msra.mxu1 %v10606_v38 }
 0x4b3   : > { %5339 = vmatprep.subr.bf16.mxu1 %v10612_v24 }
 0x4b5   : > { %4723 = vmatmul.mubr.bf16.vlgmr.msra.gmra.mxu1 %v13439_v31 }
 0x4b6   : > { %4732 = vmatprep.mubr.bf16.mxu1 %v11443_v15  ;;  %5340 = vmatpush1.bf16.msra.mxu1 %v10610_v48 }
 0x4b7   : > { %5341 = vmatprep.subr.bf16.mxu1 %v10615_v37 }
 0x4ba   : > { %5342 = vmatpush1.bf16.msra.mxu1 %v10613_v14 }
 0x4bb   : > { %5343 = vmatprep.subr.bf16.mxu1 %v10618_v23 }
 0x4bd   : > { %4733 = vmatmul.mubr.bf16.gmra.mxu1 %v4203_v13  ;;  %v10666_v13 = vld [vmem:[%s11533_s27 + $0xc4] ss:$8 sps:$4 sm:$0xff]  }
 0x4be   : > { %4742 = vmatprep.mubr.bf16.mxu1 %v11443_v15  ;;  %5344 = vmatpush1.bf16.msra.mxu1 %v10616_v56 }
 0x4bf   : > { %5345 = vmatprep.subr.bf16.mxu1 %v10621_v44 }
 0x4c2   : > { %5346 = vmatpush1.bf16.msra.mxu1 %v10619_v9  ;;  %v13576_v9 = vrot.slane %v4255_v40, %v13544_v21 }
 0x4c3   : > { %5347 = vmatprep.subr.bf16.mxu1 %v10624_v0  ;;  %v13579_v0 = vadd.s32 56, %v12334_v52 }
 0x4c5   : > { %4743 = vmatmul.mubr.bf16.gmra.mxu1 %v4204_v57  ;;  %v13541_v57 = vsub.s32 0, %v12334_v52  ;;  %vm4770_vm5 = vcmp.eq.s32.totalorder %v13579_v0, 63 }
 0x4c6   : > { %4752 = vmatprep.mubr.bf16.mxu1 %v11443_v15  ;;  %5348 = vmatpush1.bf16.msra.mxu1 %v10622_v7 }
 0x4c7   : > { %5349 = vmatprep.subr.bf16.mxu1 %v10630_v42  ;;  %v13557_v3 = vrot.slane %v4254_v8, %v13541_v57 }
 0x4ca   : > { %5350 = vmatpush1.bf16.msra.mxu1 %v10628_v25 }
 0x4cb   : > { %5351 = vmatprep.subr.bf16.mxu1 %v10636_v45 }
 0x4cd   : > { %4753 = vmatmul.mubr.bf16.gmra.mxu1 %v4205_v11  ;;  %v13560_v11 = vrot.slane %v4255_v40, %v13541_v57 }
 0x4ce   : > { %5352 = vmatpush1.bf16.msra.mxu1 %v10634_v20 }
 0x4cf   : > { %5353 = vmatprep.subr.bf16.mxu1 %v10642_v54 }
 0x4d2   : > { %5354 = vmatpush1.bf16.msra.mxu1 %v10640_v2 }
 0x4d3   : > { %5355 = vmatprep.subr.bf16.mxu1 %v10648_v4 }
 0x4d6   : > { %5356 = vmatpush2.bf16.msra.mxu1 %v10646_v62 }
 0x4d7   : > { %5357 = vmatprep.subr.bf16.mxu1 %v10654_v49 }
 0x4da   : > { %5358 = vmatpush2.bf16.msra.mxu1 %v10652_v59 }
 0x4db   : > { %5359 = vmatprep.subr.bf16.mxu1 %v10660_v43 }
 0x4de   : > { %5360 = vmatpush2.bf16.msra.mxu1 %v10658_v41 }
 0x4df   : > { %5361 = vmatprep.subr.bf16.mxu1 %v10666_v13 }
 0x4e2   : > { %5362 = vmatpush2.bf16.msra.mxu1 %v10664_v36 }
 0x4e3   : > { %5363 = vmatprep.subr.bf16.mxu1 %v10672_v50 }
 0x4e6   : > { %5364 = vmatpush2.bf16.msra.mxu1 %v10670_v18 }
 0x4e7   : > { %5365 = vmatprep.subr.bf16.mxu1 %v10678_v30 }
 0x4ea   : > { %5366 = vmatpush2.bf16.msra.mxu1 %v10676_v55 }
 0x555   : > { %v13484_v19 = vpop.f32.mrf.mxu1  ;;  %v13486_v10 = vpop.f32.mrf.mxu0 }
 0x556   : > { %v4771_v38 = vrot.slane %v13486_v10, 1  ;;  %v4562_v23 = vrot.slane %v13484_v19, 7 }
 0x557   : > { %v13489_v51 = vpop.f32.mrf.mxu1  ;;  %v13491_v17 = vpop.f32.mrf.mxu0 }
 0x558   : > { %v4563_v7 = vrot.slane %v13489_v51, 7  ;;  %v4772_v42 = vrot.slane %v13491_v17, 1 }
 0x559   : > { %v13494_v5 = vpop.f32.mrf.mxu1  ;;  %v13496_v39 = vpop.f32.mrf.mxu0 }
 0x55a   : > { %v4773_v33 = vrot.slane %v13496_v39, 1  ;;  %v4564_v48 = vrot.slane %v13494_v5, 7 }
 0x55b   : > { %v13499_v58 = vpop.f32.mrf.mxu1  ;;  %v13501_v32 = vpop.f32.mrf.mxu0 }
 0x55c   : > { %v4565_v24 = vrot.slane %v13499_v58, 7  ;;  %v4774_v37 = vrot.slane %v13501_v32, 1  ;;  %v4799_v20 = vsel %vm3611_vm1, %v4771_v38, %v4773_v33  ;;  %v4590_v62 = vsel %vm3209_vm0, %v4562_v23, %v4564_v48 }
 0x55d   : > { %v13504_v31 = vpop.f32.mrf.mxu1  ;;  %v13506_v22 = vpop.f32.mrf.mxu0 }
 0x55e   : > { %v4775_v25 = vrot.slane %v13506_v22, 1  ;;  %v4566_v54 = vrot.slane %v13504_v31, 7  ;;  %v4800_v39 = vsel %vm3611_vm1, %v4772_v42, %v4774_v37  ;;  %v4591_v58 = vsel %vm3209_vm0, %v4563_v7, %v4565_v24 }
 0x55f   : > { %v13509_v26 = vpop.f32.mrf.mxu1  ;;  %v13511_v34 = vpop.f32.mrf.mxu0 }
 0x560   : > { %v4776_v19 = vrot.slane %v13511_v34, 1  ;;  %v4567_v32 = vrot.slane %v13509_v26, 7  ;;  %v4797_v26 = vsel %vm3611_vm1, %v4773_v33, %v4775_v25  ;;  %v4588_v18 = vsel %vm3209_vm0, %v4564_v48, %v4566_v54 }
 0x561   : > { %v13514_v27 = vpop.f32.mrf.mxu1  ;;  %v13516_v53 = vpop.f32.mrf.mxu0 }
 0x562   : > { %v4777_v49 = vrot.slane %v13516_v53, 1  ;;  %v4568_v34 = vrot.slane %v13514_v27, 7  ;;  %v4798_v50 = vsel %vm3611_vm1, %v4774_v37, %v4776_v19  ;;  %v4589_v37 = vsel %vm3209_vm0, %v4565_v24, %v4567_v32 }
 0x563   : > { %v13519_v28 = vpop.f32.mrf.mxu1  ;;  %v13521_v47 = vpop.f32.mrf.mxu0 }
 0x564   : > { %v4778_v43 = vrot.slane %v13521_v47, 1  ;;  %v4569_v53 = vrot.slane %v13519_v28, 7 }
 0x565   : > { %v13524_v12 = vpop.f32.mrf.mxu1  ;;  %v13526_v61 = vpop.f32.mrf.mxu0 }
 0x566   : > { %v4570_v27 = vrot.slane %v13524_v12, 7  ;;  %v4779_v47 = vrot.slane %v13526_v61, 1  ;;  %v4796_v61 = vsel %vm3611_vm1, %v4776_v19, %v4778_v43 }
 0x567   : > { %v13529_v29 = vpop.f32.mrf.mxu1  ;;  %v13534_v35 = vpop.f32.mrf.mxu0 }
 0x568   : > { %v4780_v30 = vrot.slane %v13534_v35, 1  ;;  %v4571_v55 = vrot.slane %v13529_v29, 7  ;;  %v4586_v35 = vsel %vm3209_vm0, %v4566_v54, %v4568_v34  ;;  %v4584_v19 = vsel %vm3209_vm0, %v4568_v34, %v4570_v27 }
 0x569   : > { %v13532_v6 = vpop.f32.mrf.mxu1  ;;  %v13550_v16 = vpop.f32.mrf.mxu0 }
 0x56a   : > { %v4781_v48 = vrot.slane %v13550_v16, 1  ;;  %v4572_v29 = vrot.slane %v13532_v6, 7  ;;  %v4793_v16 = vsel %vm3611_vm1, %v4777_v49, %v4779_v47 }
 0x56b   : > { %v13537_v63 = vpop.f32.mrf.mxu1  ;;  %v13572_v56 = vpop.f32.mrf.mxu0 }
 0x56c   : > { %v4573_v54 = vrot.slane %v13537_v63, 7 }
 0x56d   : > { %v13546_v60 = vpop.f32.mrf.mxu1  ;;  %v13609_v31 = vpop.f32.mrf.mxu0 }
 0x56e   : > { %v4783_v34 = vrot.slane %v13609_v31, 1 }
 0x56f   : > { %v13554_v1 = vpop.f32.mrf.mxu1  ;;  %v13630_v33 = vpop.f32.mrf.mxu0 }
 0x570   : > { %v4784_v31 = vrot.slane %v13630_v33, 1 }
 0x571   : > { %v13569_v14 = vpop.f32.mrf.mxu1  ;;  %v4557_v6 = vpop.f32.mrf.mxu0 }
 0x572   : > { %v4576_v44 = vrot.slane %v13569_v14, 7 }
 0x573   : > { %v13584_v45 = vpop.f32.mrf.mxu1 }
 0x574   : > { %v4577_v2 = vrot.slane %v13584_v45, 7  ;;  %v4592_v51 = vsel %vm3209_vm0, %v4576_v44, %v4562_v23  ;;  %v4795_v23 = vsel %vm3611_vm1, %v4775_v25, %v4777_v49  ;;  %v4587_v25 = vsel %vm3209_vm0, %v4567_v32, %v4569_v53 }
 0x575   : > { %v4594_v4 = vsel %vm3145_vm2, 0.0, %v4592_v51  ;;  %v4724_v5 = vpop.f32.mrf.mxu1  ;;  %v4782_v32 = vrot.slane %v13572_v56, 1  ;;  %v4574_v56 = vrot.slane %v13546_v60, 7 }
 0x576   : > { %v4725_v22 = vadd.f32 %v4724_v5, %v4594_v4  ;;  %v4593_v59 = vsel %vm3209_vm0, %v4577_v2, %v4563_v7  ;;  %v4794_v5 = vsel %vm3611_vm1, %v4778_v43, %v4780_v30  ;;  %v4791_v43 = vsel %vm3611_vm1, %v4779_v47, %v4781_v48 }
 0x577   : > { %v4595_v41 = vsel %vm3145_vm2, 0.0, %v4593_v59  ;;  %v4726_v13 = vpop.f32.mrf.mxu1 }
 0x578   : > { %v4727_v36 = vadd.f32 %v4726_v13, %v4595_v41  ;;  %v4835_v8 = vadd.f32 %v4799_v20, %v4725_v22  ;;  %v4582_v13 = vsel %vm3209_vm0, %v4570_v27, %v4572_v29  ;;  %v4785_v27 = vrot.slane %v4557_v6, 1 }
 0x579   : > { %v4728_v40 = vpop.f32.mrf.mxu1 }
 0x57a   : > { %v4729_v28 = vadd.f32 %v4728_v40, %v4590_v62  ;;  %v4836_v12 = vadd.f32 %v4800_v39, %v4727_v36  ;;  %v4862_v4 = vmul.f32 %v13557_v3, %v4835_v8 }
 0x57b   : > { %v4730_v7 = vpop.f32.mrf.mxu1 }
 0x57c   : > { %v4837_v20 = vadd.f32 %v4797_v26, %v4729_v28  ;;  %v4731_v51 = vadd.f32 %v4730_v7, %v4591_v58  ;;  %v4585_v58 = vsel %vm3209_vm0, %v4569_v53, %v4571_v55  ;;  %v4863_v22 = vmul.f32 %v13563_v46, %v4836_v12 }
 0x57d   : > { %v4734_v24 = vpop.f32.mrf.mxu1  ;;  %v4575_v26 = vrot.slane %v13554_v1, 7  ;;  %v13670_v53 = vadd.f32 %v13560_v11, %v4862_v4  ;;  %v4792_v1 = vsel %vm3611_vm1, %v4780_v30, %v4782_v32 }
 0x57e   : > { %v4864_v39 = vmul.f32 %v13557_v3, %v4837_v20  ;;  %v4838_v62 = vadd.f32 %v4798_v50, %v4731_v51  ;;  %v4735_v49 = vadd.f32 %v4734_v24, %v4588_v18  ;;  %v4559_v18 = vpop.f32.mrf.mxu0  ;;  %v13677_v28 = vadd.f32 %v13576_v9, %v4863_v22 }
 0x57f   : > { %v4736_v59 = vpop.f32.mrf.mxu1  ;;  %v4905_v20 = vmax.f32 %v13670_v53, 0.0  ;;  %v4580_v24 = vsel %vm3209_vm0, %v4572_v29, %v4574_v56  ;;  %v4801_v29 = vsel %vm3611_vm1, %v4785_v27, %v4771_v38  ;;  %v4578_v38 = vsel %vm3209_vm0, %v4574_v56, %v4576_v44 }
 0x580   : > { %v13661_v63 = vadd.f32 %v13560_v11, %v4864_v39  ;;  %v4865_v41 = vmul.f32 %v13563_v46, %v4838_v62  ;;  %v4839_v36 = vadd.f32 %v4795_v23, %v4735_v49  ;;  %v4737_v8 = vadd.f32 %v4736_v59, %v4589_v37 }
 0x581   : > { %v4738_v50 = vpop.f32.mrf.mxu1  ;;  %v4583_v23 = vsel %vm3209_vm0, %v4571_v55, %v4573_v54  ;;  %v4789_v37 = vsel %vm3611_vm1, %v4781_v48, %v4783_v34  ;;  %v4790_v55 = vsel %vm3611_vm1, %v4782_v32, %v4784_v31  ;;  %v4906_v39 = vmax.f32 %v13677_v28, 0.0 }
 0x582   : > { %v13674_v47 = vadd.f32 %v13576_v9, %v4865_v41  ;;  %v4739_v40 = vadd.f32 %v4738_v50, %v4586_v35  ;;  %v4907_v12 = vmax.f32 %v13661_v63, 0.0  ;;  %v4866_v33 = vmul.f32 %v13557_v3, %v4839_v36 }
 0x583   : > { %v4740_v60 = vpop.f32.mrf.mxu1  ;;  %v4786_v35 = vrot.slane %v4559_v18, 1  ;;  %v4840_v6 = vadd.f32 %v4796_v61, %v4737_v8  ;;  %v13723_v41 = vrot.slane %v4906_v39, 7 }
 0x584   : > { %v4741_v7 = vadd.f32 %v4740_v60, %v4587_v25  ;;  %v4841_v51 = vadd.f32 %v4793_v16, %v4739_v40  ;;  %v4908_v30 = vmax.f32 %v13674_v47, 0.0  ;;  %v4581_v25 = vsel %vm3209_vm0, %v4573_v54, %v4575_v26 }
 0x585   : > { %v4744_v4 = vpop.f32.mrf.mxu1  ;;  %v4787_v16 = vsel %vm3611_vm1, %v4783_v34, %v4785_v27  ;;  %v13702_v22 = vrot.slane %v4907_v12, 7  ;;  %v13705_v61 = vadd.f32 %v13560_v11, %v4866_v33  ;;  %v13709_v54 = vrot.slane %v4905_v20, 7 }
 0x586   : > { %v4745_v48 = vadd.f32 %v4744_v4, %v4584_v19  ;;  %v4842_v32 = vadd.f32 %v4794_v5, %v4741_v7  ;;  %v4868_v19 = vmul.f32 %v13557_v3, %v4841_v51  ;;  %v4788_v10 = vsel %vm3611_vm1, %v4784_v31, %v4786_v35 }
 0x587   : > { %v4746_v62 = vpop.f32.mrf.mxu1  ;;  %v13718_v34 = vrot.slane %v4908_v30, 7  ;;  %v4867_v5 = vmul.f32 %v13563_v46, %v4840_v6  ;;  %v4833_v31 = vsel %vm4770_vm5, 0.0, %v4801_v29  ;;  %v4802_v14 = vsel %vm3611_vm1, %v4786_v35, %v4772_v42 }
 0x588   : > { %v4747_v49 = vadd.f32 %v4746_v62, %v4585_v58  ;;  %v4843_v58 = vadd.f32 %v4791_v43, %v4745_v48  ;;  %v4951_v44 = vsel %vm3209_vm0, %v13709_v54, %v13702_v22  ;;  %v4909_v43 = vmax.f32 %v13705_v61, 0.0 }
 0x589   : > { %v4748_v59 = vpop.f32.mrf.mxu1  ;;  %v4869_v56 = vmul.f32 %v13563_v46, %v4842_v32  ;;  %v13739_v18 = vadd.f32 %v13560_v11, %v4868_v19  ;;  %v4952_v42 = vsel %vm3209_vm0, %v13723_v41, %v13718_v34  ;;  %v13747_v27 = vadd.f32 %v13576_v9, %v4867_v5 }
 0x58a   : > { %v4844_v63 = vadd.f32 %v4792_v1, %v4747_v49  ;;  %v4749_v36 = vadd.f32 %v4748_v59, %v4582_v13  ;;  %v4870_v13 = vmul.f32 %v13557_v3, %v4843_v58  ;;  %v4579_v60 = vsel %vm3209_vm0, %v4575_v26, %v4577_v2 }
 0x58b   : > { %v4750_v50 = vpop.f32.mrf.mxu1  ;;  %v4834_v1 = vsel %vm4770_vm5, 0.0, %v4802_v14  ;;  %v13760_v51 = vmax.f32 %v4907_v12, %v4951_v44  ;;  %v4896_v4 = vadd.f32 %v13576_v9, %v4869_v56  ;;  %v13763_v48 = vmax.f32 %v4908_v30, %v4952_v42 }
 0x58c   : > { %v4871_v47 = vmul.f32 %v13563_v46, %v4844_v63  ;;  %v4845_v17 = vadd.f32 %v4789_v37, %v4749_v36  ;;  %v4751_v8 = vadd.f32 %v4750_v50, %v4583_v23  ;;  %v13756_v33 = vadd.f32 %v13560_v11, %v4870_v13 }
 0x58d   : > { %v4754_v40 = vpop.f32.mrf.mxu1  ;;  %v4927_v0 = vrot.slane %v4909_v43, 7  ;;  %v4911_v2 = vmax.f32 %v13739_v18, 0.0  ;;  %v4910_v49 = vmax.f32 %v13747_v27, 0.0  ;;  %v4912_v59 = vmax.f32 %v4896_v4, 0.0 }
 0x58e   : > { %v4898_v23 = vadd.f32 %v13576_v9, %v4871_v47  ;;  %v4872_v7 = vmul.f32 %v13557_v3, %v4845_v17  ;;  %v4846_v37 = vadd.f32 %v4790_v55, %v4751_v8  ;;  %v4755_v45 = vadd.f32 %v4754_v40, %v4580_v24 }
 0x58f   : > { %v4756_v35 = vpop.f32.mrf.mxu1  ;;  %v4913_v24 = vmax.f32 %v13756_v33, 0.0  ;;  %v4929_v36 = vrot.slane %v4911_v2, 7  ;;  %v4928_v18 = vrot.slane %v4910_v49, 7  ;;  %v4930_v8 = vrot.slane %v4912_v59, 7 }
 0x590   : > { %v4757_v6 = vadd.f32 %v4756_v35, %v4581_v25  ;;  %v4899_v26 = vadd.f32 %v13560_v11, %v4872_v7  ;;  %v4914_v29 = vmax.f32 %v4898_v23, 0.0  ;;  %v4873_v55 = vmul.f32 %v13563_v46, %v4846_v37 }
 0x591   : > { %v4758_v62 = vpop.f32.mrf.mxu1  ;;  %v4847_v32 = vadd.f32 %v4787_v16, %v4755_v45  ;;  %v4947_v33 = vsel %vm3209_vm0, %v4927_v0, %v4929_v36 }
 0x592   : > { %v4848_v12 = vadd.f32 %v4788_v10, %v4757_v6  ;;  %v4915_v25 = vmax.f32 %v4899_v26, 0.0  ;;  %v4759_v30 = vadd.f32 %v4758_v62, %v4578_v38  ;;  %v4900_v5 = vadd.f32 %v13576_v9, %v4873_v55 }
 0x593   : > { %v4760_v19 = vpop.f32.mrf.mxu1  ;;  %v4874_v58 = vmul.f32 %v13557_v3, %v4847_v32  ;;  %v4932_v16 = vrot.slane %v4914_v29, 7  ;;  %v4931_v38 = vrot.slane %v4913_v24, 7 }
 0x594   : > { %v4875_v63 = vmul.f32 %v13563_v46, %v4848_v12  ;;  %v4933_v50 = vrot.slane %v4915_v25, 7  ;;  %v4849_v14 = vadd.f32 %v4833_v31, %v4759_v30  ;;  %v4761_v44 = vadd.f32 %v4760_v19, %v4579_v60 }
 0x595   : > { %v4916_v10 = vmax.f32 %v4900_v5, 0.0  ;;  %v4901_v56 = vadd.f32 %v13560_v11, %v4874_v58  ;;  %v4945_v35 = vsel %vm3209_vm0, %v4929_v36, %v4931_v38  ;;  %v4949_v19 = vsel %vm3209_vm0, %v13702_v22, %v4927_v0 }
 0x596   : > { %v4902_v13 = vadd.f32 %v13576_v9, %v4875_v63  ;;  %v4876_v47 = vmul.f32 %v13557_v3, %v4849_v14  ;;  %v4850_v17 = vadd.f32 %v4834_v1, %v4761_v44  ;;  %v4943_v31 = vsel %vm3209_vm0, %v4931_v38, %v4933_v50 }
 0x597   : > { %v4934_v40 = vrot.slane %v4916_v10, 7  ;;  %v4917_v42 = vmax.f32 %v4901_v56, 0.0  ;;  %v4946_v1 = vsel %vm3209_vm0, %v4930_v8, %v4932_v16  ;;  %v13812_v14 = vmax.f32 %v4911_v2, %v4947_v33 }
 0x598   : > { %v4918_v27 = vmax.f32 %v4902_v13, 0.0  ;;  %v4903_v60 = vadd.f32 %v13560_v11, %v4876_v47  ;;  %v4877_v23 = vmul.f32 %v13563_v46, %v4850_v17  ;;  %v4948_v11 = vsel %vm3209_vm0, %v4928_v18, %v4930_v8 }
 0x599   : > { %v4944_v7 = vsel %vm3209_vm0, %v4932_v16, %v4934_v40  ;;  %v4935_v37 = vrot.slane %v4917_v42, 7  ;;  %v13795_v46 = vmax.f32 %v4915_v25, %v4943_v31  ;;  %v4964_v30 = vmax.f32 %v4914_v29, %v4946_v1 }
 0x59a   : > { %v4936_v3 = vrot.slane %v4918_v27, 7  ;;  %v13790_v4 = vmax.f32 %v4916_v10, %v4944_v7  ;;  %v4919_v45 = vmax.f32 %v4903_v60, 0.0  ;;  %v4904_v6 = vadd.f32 %v13576_v9, %v4877_v23 }
 0x59b   : > { %v4941_v26 = vsel %vm3209_vm0, %v4933_v50, %v4935_v37  ;;  %v13804_v9 = vmax.f32 %v4913_v24, %v4945_v35  ;;  %v4950_v25 = vsel %vm3209_vm0, %v13718_v34, %v4928_v18  ;;  %v4962_v58 = vmax.f32 %v4912_v59, %v4948_v11 }
 0x59c   : > { %v4942_v62 = vsel %vm3209_vm0, %v4934_v40, %v4936_v3  ;;  %v4967_v55 = vmax.f32 %v4917_v42, %v4941_v26  ;;  %v4937_v32 = vrot.slane %v4919_v45, 7  ;;  %v4920_v12 = vmax.f32 %v4904_v6, 0.0 }
 0x59d   : > { %v4968_v5 = vmax.f32 %v4918_v27, %v4942_v62  ;;  %v4982_v63 = vrot.slane %v13790_v4, 6  ;;  %v4981_v29 = vrot.slane %v13795_v46, 6  ;;  %v4980_v16 = vrot.slane %v4964_v30, 6 }
 0x59e   : > { %v4939_v36 = vsel %vm3209_vm0, %v4935_v37, %v4937_v32  ;;  %v4938_v50 = vrot.slane %v4920_v12, 7  ;;  %v4983_v0 = vrot.slane %v4967_v55, 6  ;;  %v4960_v10 = vmax.f32 %v4910_v49, %v4950_v25 }
 0x59f   : > { %v4969_v44 = vmax.f32 %v4919_v45, %v4939_v36  ;;  %v4984_v22 = vrot.slane %v4968_v5, 6  ;;  %v4974_v34 = vrot.slane %v13763_v48, 6  ;;  %v4979_v59 = vrot.slane %v13804_v9, 6 }
 0x5a0   : > { %v4940_v24 = vsel %vm3209_vm0, %v4936_v3, %v4938_v50  ;;  %v4959_v2 = vmax.f32 %v4909_v43, %v4949_v19  ;;  %v4978_v18 = vrot.slane %v4962_v58, 6  ;;  %v4992_v47 = vsel %vm4016_vm4, %v4980_v16, %v4982_v63 }
 0x5a1   : > { %v4985_v56 = vrot.slane %v4969_v44, 6  ;;  %v4970_v13 = vmax.f32 %v4920_v12, %v4940_v24  ;;  %v4990_v38 = vsel %vm4016_vm4, %v4982_v63, %v4984_v22  ;;  %v4977_v17 = vrot.slane %v13812_v14, 6 }
 0x5a2   : > { %v4991_v40 = vsel %vm4016_vm4, %v4979_v59, %v4981_v29  ;;  %v4989_v61 = vsel %vm4016_vm4, %v4981_v29, %v4983_v0  ;;  %v4994_v43 = vsel %vm4016_vm4, %v4978_v18, %v4980_v16  ;;  %v4976_v42 = vrot.slane %v4960_v10, 6 }
 0x5a3   : > { %v4986_v8 = vrot.slane %v4970_v13, 6  ;;  %v4987_v49 = vsel %vm4016_vm4, %v4983_v0, %v4985_v56  ;;  %v4954_v27 = vsel %vm3209_vm0, %v4938_v50, %v13723_v41  ;;  %v5016_v31 = vmax.f32 %v4968_v5, %v4990_v38  ;;  %v10651_v38 = vld [vmem:[%s14791_s16 + $0x34] ss:$8 sps:$4 sm:$0xff]  }
 0x5a4   : > { %v5017_v60 = vmax.f32 %v4969_v44, %v4987_v49  ;;  %v5014_v23 = vmax.f32 %v13790_v4, %v4992_v47  ;;  %v4996_v37 = vsel %vm4016_vm4, %v4976_v42, %v4978_v18  ;;  %v4956_v3 = vmax.f32 %v4906_v39, %v4954_v27  ;;  %v10643_v18 = vld [vmem:[%s14791_s16 + $0x40] ss:$8 sps:$4 sm:$0xff]   ;;  %v10649_v47 = vld [vmem:[%s14791_s16 + $0x30] ss:$8 sps:$4 sm:$0xff]   ;;  %v10663_v49 = vld [vmem:[%s14791_s16 + $0x14] ss:$8 sps:$4 sm:$0xff]  }
 0x5a5   : > { %v4988_v33 = vsel %vm4016_vm4, %v4984_v22, %v4986_v8  ;;  %v4953_v1 = vsel %vm3209_vm0, %v4937_v32, %v13709_v54  ;;  %v4975_v35 = vrot.slane %v4959_v2, 6  ;;  %v5015_v41 = vmax.f32 %v4967_v55, %v4989_v61  ;;  %v10669_v61 = vld [vmem:[%s14791_s16 + $0x4] ss:$8 sps:$4 sm:$0xff]   ;;  %v10673_v27 = vld [vmem:[%s14791_s16 + $0xf0] ss:$8 sps:$4 sm:$0xff]  }
 0x5a6   : > { %v5018_v7 = vmax.f32 %v4970_v13, %v4988_v33  ;;  %v4993_v45 = vsel %vm4016_vm4, %v4977_v17, %v4979_v59  ;;  %v4955_v6 = vmax.f32 %v4905_v20, %v4953_v1  ;;  %v5012_v11 = vmax.f32 %v4964_v30, %v4994_v43  ;;  %v10633_v59 = vld [vmem:[%s14791_s16 + $0x64] ss:$8 sps:$4 sm:$0xff]   ;;  %v10637_v13 = vld [vmem:[%s14791_s16 + $0x50] ss:$8 sps:$4 sm:$0xff]   ;;  %v10667_v43 = vld [vmem:[%s14791_s16] ss:$8 sps:$4 sm:$0xff]  }
 0x5a7   : > { %v4998_v26 = vsel %vm4016_vm4, %v4974_v34, %v4976_v42  ;;  %v4972_v62 = vrot.slane %v4956_v3, 6  ;;  %v5025_v28 = vpack.c.bf16 %v5017_v60, %v5015_v41  ;;  %v5013_v39 = vmax.f32 %v13795_v46, %v4991_v40  ;;  %v10661_v40 = vld [vmem:[%s14791_s16 + $0x10] ss:$8 sps:$4 sm:$0xff]   ;;  %v10675_v42 = vld [vmem:[%s14791_s16 + $0xf4] ss:$8 sps:$4 sm:$0xff]  }
 0x5a8   : > { %v5026_v4 = vpack.c.bf16 %v5018_v7, %v5016_v31  ;;  %v5010_v12 = vmax.f32 %v4962_v58, %v4996_v37  ;;  %v4973_v54 = vrot.slane %v13760_v51, 6  ;;  %v5024_v55 = vpack.c.bf16 %v5014_v23, %v5012_v11  ;;  %v10681_v33 = vld [vmem:[%s14791_s16 + $0xe4] ss:$8 sps:$4 sm:$0xff]   ;;  %v10679_v31 = vld [vmem:[%s14791_s16 + $0xe0] ss:$8 sps:$4 sm:$0xff]  }
 0x5a9   : > { %v4995_v32 = vsel %vm4016_vm4, %v4975_v35, %v4977_v17  ;;  %v4971_v19 = vrot.slane %v4955_v6, 6  ;;  %v5011_v53 = vmax.f32 %v13804_v9, %v4993_v45  ;;  %v5008_v20 = vmax.f32 %v4960_v10, %v4998_v26  ;;  %v10609_v10 = vld [vmem:[%s14792_s22] sm:$0xff]   ;;  %v10682_v60 = vld [vmem:[%s11533_s27 + $0x90] ss:$8 sps:$4 sm:$0xff]   ;;  %v10684_v23 = vld [vmem:[%s11533_s27 + $0x94] ss:$8 sps:$4 sm:$0xff]  }
 0x5aa   : > { %5044 = vmatprep.subr.bf16.mxu0 %v5026_v4  ;;  %v5000_v30 = vsel %vm4016_vm4, %v4972_v62, %v4974_v34  ;;  %v5002_v5 = vsel %vm4016_vm4, %v4986_v8, %v4972_v62  ;;  %v4997_v46 = vsel %vm4016_vm4, %v4973_v54, %v4975_v35  ;;  %v5009_v63 = vmax.f32 %v13812_v14, %v4995_v32  ;;  %v10625_v34 = vld [vmem:[%s14791_s16 + $0x70] ss:$8 sps:$4 sm:$0xff]   ;;  %v10657_v17 = vld [vmem:[%s14791_s16 + $0x24] ss:$8 sps:$4 sm:$0xff]   ;;  %v10655_v8 = vld [vmem:[%s14791_s16 + $0x20] ss:$8 sps:$4 sm:$0xff]  }
 0x5ab   : > { %5045 = vmatpush1.bf16.msra.mxu0 %v5025_v28  ;;  %v5023_v25 = vpack.c.bf16 %v5013_v39, %v5011_v53  ;;  %v5022_v58 = vpack.c.bf16 %v5010_v12, %v5008_v20  ;;  %v5004_v36 = vmax.f32 %v4956_v3, %v5002_v5  ;;  %v5006_v9 = vmax.f32 %v13763_v48, %v5000_v30  ;;  %v10627_v48 = vld [vmem:[%s14791_s16 + $0x74] ss:$8 sps:$4 sm:$0xff]   ;;  %v10685_v7 = vld [vmem:[%s14791_s16 + $0xd0] ss:$8 sps:$4 sm:$0xff]   ;;  %v10688_v3 = vld [vmem:[%s11533_s27 + $0x80] ss:$8 sps:$4 sm:$0xff]  }
 0x5ac   : > { %5046 = vmatprep.subr.bf16.mxu0 %v5024_v55  ;;  %v4999_v50 = vsel %vm4016_vm4, %v4971_v19, %v4973_v54  ;;  %v5001_v29 = vsel %vm4016_vm4, %v4985_v56, %v4971_v19  ;;  %v5007_v44 = vmax.f32 %v4959_v2, %v4997_v46  ;;  %v10639_v56 = vld [vmem:[%s14791_s16 + $0x54] ss:$8 sps:$4 sm:$0xff]   ;;  %v10645_v2 = vld [vmem:[%s14791_s16 + $0x44] ss:$8 sps:$4 sm:$0xff]   ;;  %5367 = vmatprep.subr.bf16.mxu1 %v10684_v23  ;;  %v10691_v35 = vld [vmem:[%s14791_s16 + $0xc0] ss:$8 sps:$4 sm:$0xff]  }
 0x5ad   : > { %v5003_v0 = vmax.f32 %v4955_v6, %v5001_v29  ;;  %v5005_v14 = vmax.f32 %v13760_v51, %v4999_v50  ;;  %v5020_v24 = vpack.c.bf16 %v5006_v9, %v5004_v36  ;;  %v10631_v51 = vld [vmem:[%s14791_s16 + $0x60] ss:$8 sps:$4 sm:$0xff]   ;;  %v10687_v37 = vld [vmem:[%s14791_s16 + $0xd4] ss:$8 sps:$4 sm:$0xff]   ;;  %5368 = vmatpush2.bf16.msra.mxu1 %v10682_v60  ;;  %v10690_v1 = vld [vmem:[%s11533_s27 + $0x84] ss:$8 sps:$4 sm:$0xff]  }
 0x5ae   : > { %v5021_v22 = vpack.c.bf16 %v5009_v63, %v5007_v44  ;;  %v10693_v41 = vld [vmem:[%s14791_s16 + $0xc4] ss:$8 sps:$4 sm:$0xff]   ;;  %5369 = vmatprep.subr.bf16.mxu1 %v10690_v1  ;;  %v10694_v45 = vld [vmem:[%s14791_s16 + $0xb0] ss:$8 sps:$4 sm:$0xff]   ;;  %v10696_v6 = vld [vmem:[%s14791_s16 + $0xb4] ss:$8 sps:$4 sm:$0xff]  }
 0x5af   : > { %5047 = vmatpush1.bf16.msra.mxu0 %v5023_v25  ;;  %v5019_v16 = vpack.c.bf16 %v5005_v14, %v5003_v0  ;;  %v10699_v4 = vld [vmem:[%s14793_s23 + $0x74] ss:$8 sps:$4 sm:$0xff]   ;;  %v10702_v11 = vld [vmem:[%s14791_s16 + $0xa4] ss:$8 sps:$4 sm:$0xff]   ;;  %v10700_v26 = vld [vmem:[%s14791_s16 + $0xa0] ss:$8 sps:$4 sm:$0xff]  }
 0x5b0   : > { %5048 = vmatprep.subr.bf16.mxu0 %v5022_v58  ;;  %v10708_v62 = vld [vmem:[%s14791_s16 + $0x94] ss:$8 sps:$4 sm:$0xff]   ;;  %v10706_v28 = vld [vmem:[%s14791_s16 + $0x90] ss:$8 sps:$4 sm:$0xff]   ;;  %v10714_v39 = vld [vmem:[%s14791_s16 + $0x84] ss:$8 sps:$4 sm:$0xff]  }
 0x5b1   : > { %5370 = vmatpush2.bf16.msra.mxu1 %v10688_v3  ;;  %v10712_v12 = vld [vmem:[%s14791_s16 + $0x80] ss:$8 sps:$4 sm:$0xff]   ;;  %v10697_v20 = vld [vmem:[%s14793_s23 + $0x70] ss:$8 sps:$4 sm:$0xff]   ;;  %v10705_v5 = vld [vmem:[%s14793_s23 + $0x64] ss:$8 sps:$4 sm:$0xff]  }
 0x5b2   : > { %5757 = vmatprep.subr.bf16.mxu1 %v10699_v4  ;;  %v10703_v46 = vld [vmem:[%s14793_s23 + $0x60] ss:$8 sps:$4 sm:$0xff]   ;;  %v10711_v25 = vld [vmem:[%s14793_s23 + $0x54] ss:$8 sps:$4 sm:$0xff]   ;;  %v10709_v58 = vld [vmem:[%s14793_s23 + $0x50] ss:$8 sps:$4 sm:$0xff]  }
 0x5b3   : > { %5049 = vmatpush1.bf16.msra.mxu0 %v5021_v22  ;;  %v10717_v63 = vld [vmem:[%s14793_s23 + $0x44] ss:$8 sps:$4 sm:$0xff]   ;;  %v10715_v36 = vld [vmem:[%s14793_s23 + $0x40] ss:$8 sps:$4 sm:$0xff]   ;;  %v10720_v9 = vld [vmem:[%s14793_s23 + $0x34] ss:$8 sps:$4 sm:$0xff]  }
 0x5b4   : > { %5050 = vmatprep.subr.bf16.mxu0 %v5020_v24  ;;  %v10718_v50 = vld [vmem:[%s14793_s23 + $0x30] ss:$8 sps:$4 sm:$0xff]   ;;  %v10723_v29 = vld [vmem:[%s14793_s23 + $0x24] ss:$8 sps:$4 sm:$0xff]   ;;  %v10726_v44 = vld [vmem:[%s14793_s23 + $0x14] ss:$8 sps:$4 sm:$0xff]  }
 0x5b5   : > { %v10724_v22 = vld [vmem:[%s14793_s23 + $0x10] ss:$8 sps:$4 sm:$0xff]   ;;  %v10729_v0 = vld [vmem:[%s14793_s23 + $0x4] ss:$8 sps:$4 sm:$0xff]   ;;  %v10727_v14 = vld [vmem:[%s14793_s23] ss:$8 sps:$4 sm:$0xff]  }
 0x5b6   : > { %v10732_v24 = vld [vmem:[%s14793_s23 + $0xf4] ss:$8 sps:$4 sm:$0xff]   ;;  %v10775_v60 = vld [vmem:[%s14794_s2 + $0x88] ss:$16 sps:$4 sm:$0xff]   ;;  %s14795_s22 = sld [smem:[#allocation16_spill]] }
 0x5b7   : > { %5051 = vmatpush1.bf16.msra.mxu0 %v5019_v16  ;;  %v10735_v16 = vld [vmem:[%s14793_s23 + $0xe4] ss:$8 sps:$4 sm:$0xff]   ;;  %v10787_v3 = vld [vmem:[%s14794_s2 + $0x48] ss:$16 sps:$4 sm:$0xff]  }
 0x5b8   : > { %5542 = vmatprep.subr.bf16.mxu0 %v10627_v48  ;;  %v10730_v48 = vld [vmem:[%s14793_s23 + $0xf0] ss:$8 sps:$4 sm:$0xff]   ;;  %v10783_v23 = vld [vmem:[%s14794_s2 + $0x6c] ss:$16 sps:$4 sm:$0xff]  }
 0x5b9   : > { %v10795_v1 = vld [vmem:[%s14794_s2 + $0x2c] ss:$16 sps:$4 sm:$0xff]   ;;  %v10805_v4 = vld [vmem:[%s14794_s2 + $0x1e8] ss:$16 sps:$4 sm:$0xff]  }
 0x5ba   : > { %9360 = vmatmul.mubr.msk.bf16.vlgmr.msra.gmra.mxu0 %vm5032_vm6, %v10609_v10  ;;  %v10733_v10 = vld [vmem:[%s14793_s23 + $0xe0] ss:$8 sps:$4 sm:$0xff]  }
 0x5bb   : > { %5543 = vmatpush1.bf16.msra.mxu0 %v10625_v34  ;;  %v10738_v34 = vld [vmem:[%s14793_s23 + $0xd4] ss:$8 sps:$4 sm:$0xff]  }
 0x5bc   : > { %5544 = vmatprep.subr.bf16.mxu0 %v10633_v59  ;;  %v10736_v59 = vld [vmem:[%s14793_s23 + $0xd0] ss:$8 sps:$4 sm:$0xff]  }
 0x5bf   : > { %5545 = vmatpush1.bf16.msra.mxu0 %v10631_v51  ;;  %v10741_v51 = vld [vmem:[%s14793_s23 + $0xc4] ss:$8 sps:$4 sm:$0xff]  }
 0x5c0   : > { %5546 = vmatprep.subr.bf16.mxu0 %v10639_v56  ;;  %v10739_v56 = vld [vmem:[%s14793_s23 + $0xc0] ss:$8 sps:$4 sm:$0xff]  }
 0x5c3   : > { %5547 = vmatpush1.bf16.msra.mxu0 %v10637_v13  ;;  %v10744_v13 = vld [vmem:[%s14793_s23 + $0xb4] ss:$8 sps:$4 sm:$0xff]  }
 0x5c4   : > { %5548 = vmatprep.subr.bf16.mxu0 %v10645_v2  ;;  %v10742_v2 = vld [vmem:[%s14793_s23 + $0xb0] ss:$8 sps:$4 sm:$0xff]  }
 0x5c7   : > { %5549 = vmatpush1.bf16.msra.mxu0 %v10643_v18  ;;  %v10747_v18 = vld [vmem:[%s14793_s23 + $0xa4] ss:$8 sps:$4 sm:$0xff]  }
 0x5c8   : > { %5550 = vmatprep.subr.bf16.mxu0 %v10651_v38  ;;  %v10745_v38 = vld [vmem:[%s14793_s23 + $0xa0] ss:$8 sps:$4 sm:$0xff]  }
 0x5cb   : > { %5551 = vmatpush1.bf16.msra.mxu0 %v10649_v47  ;;  %v10750_v47 = vld [vmem:[%s14793_s23 + $0x94] ss:$8 sps:$4 sm:$0xff]  }
 0x5cc   : > { %5552 = vmatprep.subr.bf16.mxu0 %v10657_v17  ;;  %v10748_v17 = vld [vmem:[%s14793_s23 + $0x90] ss:$8 sps:$4 sm:$0xff]  }
 0x5cf   : > { %5553 = vmatpush1.bf16.msra.mxu0 %v10655_v8  ;;  %v10753_v8 = vld [vmem:[%s14793_s23 + $0x84] ss:$8 sps:$4 sm:$0xff]  }
 0x5d0   : > { %5554 = vmatprep.subr.bf16.mxu0 %v10663_v49  ;;  %v10751_v49 = vld [vmem:[%s14793_s23 + $0x80] ss:$8 sps:$4 sm:$0xff]  }
 0x5d3   : > { %5555 = vmatpush1.bf16.msra.mxu0 %v10661_v40  ;;  %v10757_v40 = vld [vmem:[%s14794_s2 + $0xe8] ss:$16 sps:$4 sm:$0xff]  }
 0x5d4   : > { %5556 = vmatprep.subr.bf16.mxu0 %v10669_v61  ;;  %v10759_v61 = vld [vmem:[%s14794_s2 + $0xec] ss:$16 sps:$4 sm:$0xff]  }
 0x5d7   : > { %5557 = vmatpush1.bf16.msra.mxu0 %v10667_v43  ;;  %v10765_v43 = vld [vmem:[%s14794_s2 + $0xcc] ss:$16 sps:$4 sm:$0xff]  }
 0x5d8   : > { %5558 = vmatprep.subr.bf16.mxu0 %v10675_v42  ;;  %v10763_v42 = vld [vmem:[%s14794_s2 + $0xc8] ss:$16 sps:$4 sm:$0xff]  }
 0x5db   : > { %5559 = vmatpush2.bf16.msra.mxu0 %v10673_v27  ;;  %v10771_v27 = vld [vmem:[%s14794_s2 + $0xac] ss:$16 sps:$4 sm:$0xff]  }
 0x5dc   : > { %5560 = vmatprep.subr.bf16.mxu0 %v10681_v33  ;;  %v10769_v33 = vld [vmem:[%s14794_s2 + $0xa8] ss:$16 sps:$4 sm:$0xff]  }
 0x5df   : > { %5561 = vmatpush2.bf16.msra.mxu0 %v10679_v31  ;;  %v10777_v31 = vld [vmem:[%s14794_s2 + $0x8c] ss:$16 sps:$4 sm:$0xff]  }
 0x5e0   : > { %5562 = vmatprep.subr.bf16.mxu0 %v10687_v37  ;;  %v10789_v37 = vld [vmem:[%s14794_s2 + $0x4c] ss:$16 sps:$4 sm:$0xff]  }
 0x5e3   : > { %5563 = vmatpush2.bf16.msra.mxu0 %v10685_v7  ;;  %v10781_v7 = vld [vmem:[%s14794_s2 + $0x68] ss:$16 sps:$4 sm:$0xff]  }
 0x5e4   : > { %5564 = vmatprep.subr.bf16.mxu0 %v10693_v41  ;;  %v10801_v41 = vld [vmem:[%s14794_s2 + $0xc] ss:$16 sps:$4 sm:$0xff]  }
 0x5e7   : > { %5565 = vmatpush2.bf16.msra.mxu0 %v10691_v35  ;;  %v10793_v35 = vld [vmem:[%s14794_s2 + $0x28] ss:$16 sps:$4 sm:$0xff]  }
 0x5e8   : > { %5566 = vmatprep.subr.bf16.mxu0 %v10696_v6  ;;  %v10807_v6 = vld [vmem:[%s14794_s2 + $0x1ec] ss:$16 sps:$4 sm:$0xff]  }
 0x5eb   : > { %5567 = vmatpush2.bf16.msra.mxu0 %v10694_v45  ;;  %v10799_v45 = vld [vmem:[%s14794_s2 + $0x8] ss:$16 sps:$4 sm:$0xff]  }
 0x5ec   : > { %5568 = vmatprep.subr.bf16.mxu0 %v10702_v11  ;;  %v10813_v11 = vld [vmem:[%s14794_s2 + $0x1cc] ss:$16 sps:$4 sm:$0xff]  }
 0x5ef   : > { %5569 = vmatpush2.bf16.msra.mxu0 %v10700_v26  ;;  %v10811_v26 = vld [vmem:[%s14794_s2 + $0x1c8] ss:$16 sps:$4 sm:$0xff]  }
 0x5f0   : > { %5570 = vmatprep.subr.bf16.mxu0 %v10708_v62  ;;  %v10819_v62 = vld [vmem:[%s14794_s2 + $0x1ac] ss:$16 sps:$4 sm:$0xff]  }
 0x5f3   : > { %5571 = vmatpush2.bf16.msra.mxu0 %v10706_v28  ;;  %v10817_v28 = vld [vmem:[%s14794_s2 + $0x1a8] ss:$16 sps:$4 sm:$0xff]  }
 0x5f4   : > { %5572 = vmatprep.subr.bf16.mxu0 %v10714_v39  ;;  %v10825_v39 = vld [vmem:[%s14794_s2 + $0x18c] ss:$16 sps:$4 sm:$0xff]  }
 0x5f7   : > { %5573 = vmatpush2.bf16.msra.mxu0 %v10712_v12  ;;  %v10823_v12 = vld [vmem:[%s14794_s2 + $0x188] ss:$16 sps:$4 sm:$0xff]  }
 0x67a   : > { %v5070_v54 = vpop.f32.mrf.mxu0 }
 0x67c   : > { %v5072_v55 = vpop.f32.mrf.mxu0 }
 0x67e   : > { %v5074_v32 = vpop.f32.mrf.mxu0 }
 0x67f   : > { %v13910_v30 = vpack.c.bf16 %v5074_v32, %v5070_v54  ;;  %v10831_v54 = vld [vmem:[%s14794_s2 + $0x16c] ss:$16 sps:$4 sm:$0xff]  }
 0x680   : > { %v5076_v19 = vpop.f32.mrf.mxu0  ;;  %v10837_v32 = vld [vmem:[%s14794_s2 + $0x14c] ss:$16 sps:$4 sm:$0xff]  }
 0x681   : > { %v5080_v53 = vpack.c.bf16 %v5076_v19, %v5072_v55  ;;  %v10829_v55 = vld [vmem:[%s14794_s2 + $0x168] ss:$16 sps:$4 sm:$0xff]  }
 0x682   : > { %v10835_v19 = vld [vmem:[%s14794_s2 + $0x148] ss:$16 sps:$4 sm:$0xff]  }
 0x683   : > { %5371 = vmatprep.mubr.bf16.mxu1 %v5080_v53  ;;  %5574 = vmatprep.mubr.bf16.mxu0 %v5080_v53 }
 0x684   : > { %5372 = vmatmul.mubr.bf16.vlgmr.msra.gmra.mxu1 %v13910_v30  ;;  %5575 = vmatmul.mubr.bf16.vlgmr.msra.gmra.mxu0 %v13910_v30 }
 0x685   : > { %5758 = vmatpush1.bf16.msra.mxu1 %v10697_v20  ;;  %5789 = vmatprep.mubr.bf16.mxu1 %v5080_v53  ;;  %v10843_v53 = vld [vmem:[%s14794_s2 + $0x12c] ss:$16 sps:$4 sm:$0xff]   ;;  %v10841_v20 = vld [vmem:[%s14794_s2 + $0x128] ss:$16 sps:$4 sm:$0xff]  }
 0x686   : > { %5759 = vmatprep.subr.bf16.mxu1 %v10705_v5  ;;  %5919 = vmatprep.mubr.bf16.mxu0 %v11443_v15  ;;  %v10721_v15 = vld [vmem:[%s14793_s23 + $0x20] ss:$8 sps:$4 sm:$0xff]  }
 0x689   : > { %5760 = vmatpush1.bf16.msra.mxu1 %v10703_v46 }
 0x68a   : > { %5761 = vmatprep.subr.bf16.mxu1 %v10711_v25 }
 0x68d   : > { %5762 = vmatpush1.bf16.msra.mxu1 %v10709_v58 }
 0x68e   : > { %5763 = vmatprep.subr.bf16.mxu1 %v10717_v63 }
 0x691   : > { %5764 = vmatpush1.bf16.msra.mxu1 %v10715_v36 }
 0x692   : > { %5765 = vmatprep.subr.bf16.mxu1 %v10720_v9 }
 0x695   : > { %5766 = vmatpush1.bf16.msra.mxu1 %v10718_v50 }
 0x696   : > { %5767 = vmatprep.subr.bf16.mxu1 %v10723_v29 }
 0x699   : > { %5768 = vmatpush1.bf16.msra.mxu1 %v10721_v15 }
 0x69a   : > { %5769 = vmatprep.subr.bf16.mxu1 %v10726_v44 }
 0x69d   : > { %5770 = vmatpush1.bf16.msra.mxu1 %v10724_v22 }
 0x69e   : > { %5771 = vmatprep.subr.bf16.mxu1 %v10729_v0 }
 0x6a1   : > { %5772 = vmatpush1.bf16.msra.mxu1 %v10727_v14  ;;  %v5177_v14 = vld [vmem:[%s14795_s22] sm:$0x3]  ;;  %s14798_s22 = sld [smem:[#allocation21_spill]] }
 0x6a2   : > { %5773 = vmatprep.subr.bf16.mxu1 %v10732_v24  ;;  %v5178_v24 = vld [vmem:[%s14796_s3] sm:$0x3]  ;;  %s14797_s3 = sld [smem:[#allocation18_spill]] }
 0x6a5   : > { %5774 = vmatpush2.bf16.msra.mxu1 %v10730_v48  ;;  %v3114_v48 = vadd.s32 8, %v12334_v52 }
 0x6a6   : > { %5775 = vmatprep.subr.bf16.mxu1 %v10735_v16 }
 0x6a7   : > { %vm5801_vm7 = vcmp.eq.s32.totalorder %v3114_v48, 15 }
 0x6a9   : > { %5776 = vmatpush2.bf16.msra.mxu1 %v10733_v10 }
 0x6aa   : > { %5777 = vmatprep.subr.bf16.mxu1 %v10738_v34 }
 0x6ad   : > { %5778 = vmatpush2.bf16.msra.mxu1 %v10736_v59 }
 0x6ae   : > { %5779 = vmatprep.subr.bf16.mxu1 %v10741_v51 }
 0x6b1   : > { %5780 = vmatpush2.bf16.msra.mxu1 %v10739_v56 }
 0x6b2   : > { %5781 = vmatprep.subr.bf16.mxu1 %v10744_v13  ;;  %v5826_v13 = vrot.slane %v5177_v14, %v13541_v57 }
 0x6b5   : > { %5782 = vmatpush2.bf16.msra.mxu1 %v10742_v2  ;;  %v5841_v2 = vrot.slane %v5178_v24, %v13541_v57 }
 0x6b6   : > { %5783 = vmatprep.subr.bf16.mxu1 %v10747_v18 }
 0x6b9   : > { %5784 = vmatpush2.bf16.msra.mxu1 %v10745_v38 }
 0x6ba   : > { %5785 = vmatprep.subr.bf16.mxu1 %v10750_v47 }
 0x6bd   : > { %5786 = vmatpush2.bf16.msra.mxu1 %v10748_v17 }
 0x6be   : > { %5787 = vmatprep.subr.bf16.mxu1 %v10753_v8 }
 0x6c1   : > { %5788 = vmatpush2.bf16.msra.mxu1 %v10751_v49 }
 0x6c2   : > { %6485 = vmatprep.subr.bf16.mxu1 %v10759_v61 }
 0x6c4   : > { %5790 = vmatmul.mubr.bf16.vlgmr.msra.gmra.mxu1 %v13910_v30 }
 0x6c5   : > { %6486 = vmatpush1.bf16.msra.mxu1 %v10757_v40  ;;  %v5830_v40 = vrot.slane %v5177_v14, %v13544_v21 }
 0x6c6   : > { %6487 = vmatprep.subr.bf16.mxu1 %v10765_v43 }
 0x6c9   : > { %6488 = vmatpush1.bf16.msra.mxu1 %v10763_v42  ;;  %v5845_v42 = vrot.slane %v5178_v24, %v13544_v21 }
 0x6ca   : > { %6489 = vmatprep.subr.bf16.mxu1 %v10771_v27 }
 0x6cd   : > { %6490 = vmatpush1.bf16.msra.mxu1 %v10769_v33 }
 0x6ce   : > { %6491 = vmatprep.subr.bf16.mxu1 %v10777_v31 }
 0x6d1   : > { %6492 = vmatpush1.bf16.msra.mxu1 %v10775_v60 }
 0x6d2   : > { %6493 = vmatprep.subr.bf16.mxu1 %v10783_v23 }
 0x6d5   : > { %6494 = vmatpush1.bf16.msra.mxu1 %v10781_v7 }
 0x6d6   : > { %6495 = vmatprep.subr.bf16.mxu1 %v10789_v37 }
 0x6d9   : > { %6496 = vmatpush1.bf16.msra.mxu1 %v10787_v3 }
 0x6da   : > { %6497 = vmatprep.subr.bf16.mxu1 %v10795_v1 }
 0x6dd   : > { %6498 = vmatpush1.bf16.msra.mxu1 %v10793_v35 }
 0x6de   : > { %6499 = vmatprep.subr.bf16.mxu1 %v10801_v41 }
 0x6e1   : > { %6500 = vmatpush1.bf16.msra.mxu1 %v10799_v45 }
 0x6e2   : > { %6501 = vmatprep.subr.bf16.mxu1 %v10807_v6 }
 0x6e5   : > { %6502 = vmatpush2.bf16.msra.mxu1 %v10805_v4 }
 0x6e6   : > { %6503 = vmatprep.subr.bf16.mxu1 %v10813_v11 }
 0x6e9   : > { %6504 = vmatpush2.bf16.msra.mxu1 %v10811_v26 }
 0x6ea   : > { %6505 = vmatprep.subr.bf16.mxu1 %v10819_v62 }
 0x6ed   : > { %6506 = vmatpush2.bf16.msra.mxu1 %v10817_v28 }
 0x6ee   : > { %6507 = vmatprep.subr.bf16.mxu1 %v10825_v39 }
 0x6f1   : > { %6508 = vmatpush2.bf16.msra.mxu1 %v10823_v12 }
 0x6f2   : > { %6509 = vmatprep.subr.bf16.mxu1 %v10831_v54 }
 0x6f5   : > { %6510 = vmatpush2.bf16.msra.mxu1 %v10829_v55 }
 0x6f6   : > { %6511 = vmatprep.subr.bf16.mxu1 %v10837_v32 }
 0x6f9   : > { %6512 = vmatpush2.bf16.msra.mxu1 %v10835_v19 }
 0x6fa   : > { %6513 = vmatprep.subr.bf16.mxu1 %v10843_v53 }
 0x6fd   : > { %6514 = vmatpush2.bf16.msra.mxu1 %v10841_v20 }
 0x744   : > { %v5373_v30 = vpop.f32.mrf.mxu1  ;;  %v5576_v46 = vpop.f32.mrf.mxu0 }
 0x745   : > { %v5585_v50 = vrot.slane %v5373_v30, 7  ;;  %v5802_v10 = vrot.slane %v5576_v46, 1 }
 0x746   : > { %v5375_v5 = vpop.f32.mrf.mxu1  ;;  %v5578_v58 = vpop.f32.mrf.mxu0 }
 0x747   : > { %v5586_v15 = vrot.slane %v5375_v5, 7  ;;  %v5803_v18 = vrot.slane %v5578_v58, 1 }
 0x748   : > { %v5377_v25 = vpop.f32.mrf.mxu1  ;;  %v5580_v9 = vpop.f32.mrf.mxu0 }
 0x749   : > { %v5587_v36 = vrot.slane %v5377_v25, 7  ;;  %v5804_v0 = vrot.slane %v5580_v9, 1 }
 0x74a   : > { %v5379_v63 = vpop.f32.mrf.mxu1  ;;  %v5582_v44 = vpop.f32.mrf.mxu0 }
 0x74b   : > { %v5588_v29 = vrot.slane %v5379_v63, 7  ;;  %v5591_v22 = vsel %vm3209_vm0, %v5587_v36, %v5585_v50  ;;  %v5805_v34 = vrot.slane %v5582_v44, 1  ;;  %v5806_v38 = vsel %vm3611_vm1, %v5802_v10, %v5804_v0 }
 0x74c   : > { %v5593_v59 = vsel %vm3145_vm2, 0.0, %v5591_v22  ;;  %v5808_v61 = vsel %vm3611_vm1, %v5804_v0, %v5802_v10  ;;  %v5589_v27 = vsel %vm3209_vm0, %v5585_v50, %v5587_v36 }
 0x74d   : > { %v5592_v16 = vsel %vm3209_vm0, %v5588_v29, %v5586_v15  ;;  %v5807_v43 = vsel %vm3611_vm1, %v5803_v18, %v5805_v34  ;;  %v5809_v7 = vsel %vm3611_vm1, %v5805_v34, %v5803_v18  ;;  %v5816_v37 = vsel %vm5801_vm7, 0.0, %v5808_v61  ;;  %v5856_v18 = vld [vmem:[%s14797_s3] sm:$0x3]  ;;  %s14799_s3 = sld [smem:[#allocation20_spill]] }
 0x74e   : > { %v5594_v47 = vsel %vm3145_vm2, 0.0, %v5592_v16  ;;  %v5590_v3 = vsel %vm3209_vm0, %v5586_v15, %v5588_v29  ;;  %v5817_v4 = vsel %vm5801_vm7, 0.0, %v5809_v7  ;;  %v10772_v61 = vld [vmem:[%s14794_s2 + $0x80] ss:$16 sps:$4 sm:$0xff]  }
 0x74f   : > { %v10796_v7 = vld [vmem:[%s14794_s2] ss:$16 sps:$4 sm:$0xff]  }
 0x784   : > { %v5791_v51 = vpop.f32.mrf.mxu1 }
 0x785   : > { %v5792_v56 = vadd.f32 %v5791_v51, %v5593_v59 }
 0x786   : > { %v5793_v17 = vpop.f32.mrf.mxu1 }
 0x787   : > { %v5818_v8 = vadd.f32 %v5806_v38, %v5792_v56  ;;  %v5794_v49 = vadd.f32 %v5793_v17, %v5594_v47  ;;  %v10754_v38 = vld [vmem:[%s14794_s2 + $0xe0] ss:$16 sps:$4 sm:$0xff]   ;;  %v10762_v47 = vld [vmem:[%s14794_s2 + $0xc4] ss:$16 sps:$4 sm:$0xff]  }
 0x788   : > { %v5795_v33 = vpop.f32.mrf.mxu1  ;;  %v10760_v17 = vld [vmem:[%s14794_s2 + $0xc0] ss:$16 sps:$4 sm:$0xff]  }
 0x789   : > { %v5833_v31 = vmul.f32 %v5826_v13, %v5818_v8  ;;  %v5819_v60 = vadd.f32 %v5807_v43, %v5794_v49  ;;  %v5796_v23 = vadd.f32 %v5795_v33, %v5589_v27  ;;  %v10768_v8 = vld [vmem:[%s14794_s2 + $0xa4] ss:$16 sps:$4 sm:$0xff]   ;;  %v10766_v49 = vld [vmem:[%s14794_s2 + $0xa0] ss:$16 sps:$4 sm:$0xff]  }
 0x78a   : > { %v5797_v1 = vpop.f32.mrf.mxu1  ;;  %v10780_v43 = vld [vmem:[%s14794_s2 + $0x64] ss:$16 sps:$4 sm:$0xff]   ;;  %v10784_v33 = vld [vmem:[%s14794_s2 + $0x40] ss:$16 sps:$4 sm:$0xff]  }
 0x78b   : > { %v5848_v35 = vadd.f32 %v5841_v2, %v5833_v31  ;;  %v5834_v41 = vmul.f32 %v5830_v40, %v5819_v60  ;;  %v5820_v45 = vadd.f32 %v5816_v37, %v5796_v23  ;;  %v5798_v6 = vadd.f32 %v5797_v1, %v5590_v3  ;;  %v10786_v27 = vld [vmem:[%s14794_s2 + $0x44] ss:$16 sps:$4 sm:$0xff]   ;;  %v10790_v60 = vld [vmem:[%s14794_s2 + $0x20] ss:$16 sps:$4 sm:$0xff]  }
 0x78c   : > { %v10792_v31 = vld [vmem:[%s14794_s2 + $0x24] ss:$16 sps:$4 sm:$0xff]   ;;  %v10802_v3 = vld [vmem:[%s14794_s2 + $0x1e0] ss:$16 sps:$4 sm:$0xff]  }
 0x78d   : > { %v5849_v11 = vadd.f32 %v5845_v42, %v5834_v41  ;;  %v5835_v26 = vmul.f32 %v5826_v13, %v5820_v45  ;;  %v5821_v62 = vadd.f32 %v5817_v4, %v5798_v6  ;;  %v5852_v28 = vmax.f32 %v5848_v35, 0.0  ;;  %v10756_v13 = vld [vmem:[%s14794_s2 + $0xe4] ss:$16 sps:$4 sm:$0xff]   ;;  %v10808_v35 = vld [vmem:[%s14794_s2 + $0x1c0] ss:$16 sps:$4 sm:$0xff]  }
 0x78e   : > { %v10798_v23 = vld [vmem:[%s14794_s2 + $0x4] ss:$16 sps:$4 sm:$0xff]   ;;  %v10814_v45 = vld [vmem:[%s14794_s2 + $0x1a0] ss:$16 sps:$4 sm:$0xff]  }
 0x78f   : > { %v5850_v39 = vadd.f32 %v5841_v2, %v5835_v26  ;;  %v5836_v12 = vmul.f32 %v5830_v40, %v5821_v62  ;;  %v5853_v54 = vmax.f32 %v5849_v11, 0.0  ;;  %v5857_v19 = vrot.slane %v5852_v28, 7  ;;  %v10774_v40 = vld [vmem:[%s14794_s2 + $0x84] ss:$16 sps:$4 sm:$0xff]   ;;  %v10820_v4 = vld [vmem:[%s14794_s2 + $0x180] ss:$16 sps:$4 sm:$0xff]  }
 0x790   : > { %v10804_v37 = vld [vmem:[%s14794_s2 + $0x1e4] ss:$16 sps:$4 sm:$0xff]   ;;  %v10826_v26 = vld [vmem:[%s14794_s2 + $0x160] ss:$16 sps:$4 sm:$0xff]  }
 0x791   : > { %v5854_v55 = vmax.f32 %v5850_v39, 0.0  ;;  %v5851_v32 = vadd.f32 %v5845_v42, %v5836_v12  ;;  %v5858_v30 = vrot.slane %v5853_v54, 7  ;;  %v10778_v42 = vld [vmem:[%s14794_s2 + $0x60] ss:$16 sps:$4 sm:$0xff]   ;;  %v10810_v1 = vld [vmem:[%s14794_s2 + $0x1c4] ss:$16 sps:$4 sm:$0xff]  }
 0x792   : > { %v10816_v41 = vld [vmem:[%s14794_s2 + $0x1a4] ss:$16 sps:$4 sm:$0xff]   ;;  %v10838_v12 = vld [vmem:[%s14794_s2 + $0x120] ss:$16 sps:$4 sm:$0xff]  }
 0x793   : > { %v5859_v53 = vrot.slane %v5854_v55, 7  ;;  %v5855_v20 = vmax.f32 %v5851_v32, 0.0  ;;  %v10822_v6 = vld [vmem:[%s14794_s2 + $0x184] ss:$16 sps:$4 sm:$0xff]   ;;  %v10847_v32 = vld [vmem:[%s14794_s2 + $0x108] ss:$16 sps:$4 sm:$0xff]  }
 0x794   : > { %v10828_v11 = vld [vmem:[%s14794_s2 + $0x164] ss:$16 sps:$4 sm:$0xff]  }
 0x795   : > { %v5861_v5 = vsel %vm3209_vm0, %v5857_v19, %v5859_v53  ;;  %v5860_v46 = vrot.slane %v5855_v20, 7  ;;  %v5863_v25 = vsel %vm3209_vm0, %v5859_v53, %v5857_v19  ;;  %v10834_v62 = vld [vmem:[%s14794_s2 + $0x144] ss:$16 sps:$4 sm:$0xff]   ;;  %v10849_v19 = vld [vmem:[%s14794_s2 + $0x10c] ss:$16 sps:$4 sm:$0xff]  }
 0x796   : > { %v5867_v58 = vmax.f32 %v5854_v55, %v5861_v5  ;;  %v5865_v63 = vmax.f32 %v5852_v28, %v5863_v25  ;;  %v10832_v28 = vld [vmem:[%s14794_s2 + $0x140] ss:$16 sps:$4 sm:$0xff]   ;;  %v10840_v39 = vld [vmem:[%s14794_s2 + $0x124] ss:$16 sps:$4 sm:$0xff]   ;;  %6515 = vmatprep.subr.bf16.mxu1 %v10849_v19 }
 0x797   : > { %v5862_v36 = vsel %vm3209_vm0, %v5858_v30, %v5860_v46  ;;  %v5864_v9 = vsel %vm3209_vm0, %v5860_v46, %v5858_v30  ;;  %v10846_v55 = vld [vmem:[%s14794_s2 + $0x104] ss:$16 sps:$4 sm:$0xff]   ;;  %6516 = vmatpush2.bf16.msra.mxu1 %v10847_v32  ;;  %v10850_v25 = vld [vmem:[%s14798_s22 + $0xe0] ss:$16 sps:$4 sm:$0xff]   ;;  %v10933_v32 = vld [vmem:[%s14798_s22 + $0x14c] ss:$16 sps:$4 sm:$0xff]  }
 0x798   : > { %v5871_v50 = vrot.slane %v5867_v58, 6  ;;  %v5866_v29 = vmax.f32 %v5853_v54, %v5864_v9  ;;  %v5868_v15 = vmax.f32 %v5855_v20, %v5862_v36  ;;  %v5869_v44 = vrot.slane %v5865_v63, 6  ;;  %v10844_v54 = vld [vmem:[%s14794_s2 + $0x100] ss:$16 sps:$4 sm:$0xff]   ;;  %v10852_v53 = vld [vmem:[%s14798_s22 + $0xe4] ss:$16 sps:$4 sm:$0xff]  }
 0x799   : > { %v10855_v20 = vld [vmem:[%s14798_s22 + $0xec] ss:$16 sps:$4 sm:$0xff]   ;;  %v10858_v36 = vld [vmem:[%s14798_s22 + $0xc4] ss:$16 sps:$4 sm:$0xff]   ;;  %v10928_v19 = vld [vmem:[%s14798_s22 + $0x140] ss:$16 sps:$4 sm:$0xff]  }
 0x79a   : > { %v5870_v22 = vrot.slane %v5866_v29, 6  ;;  %v5872_v0 = vrot.slane %v5868_v15, 6  ;;  %v5873_v14 = vsel %vm4016_vm4, %v5869_v44, %v5871_v50  ;;  %v5875_v24 = vsel %vm4016_vm4, %v5871_v50, %v5869_v44  ;;  %6887 = vmatprep.subr.bf16.mxu1 %v10855_v20  ;;  %v10861_v9 = vld [vmem:[%s14798_s22 + $0xcc] ss:$16 sps:$4 sm:$0xff]   ;;  %v10859_v44 = vld [vmem:[%s14798_s22 + $0xc8] ss:$16 sps:$4 sm:$0xff]  }
 0x79b   : > { %v5877_v10 = vmax.f32 %v5865_v63, %v5875_v24  ;;  %v5879_v34 = vmax.f32 %v5867_v58, %v5873_v14  ;;  %v10853_v58 = vld [vmem:[%s14798_s22 + $0xe8] ss:$16 sps:$4 sm:$0xff]   ;;  %v10862_v14 = vld [vmem:[%s14798_s22 + $0xa0] ss:$16 sps:$4 sm:$0xff]   ;;  %v10936_v20 = vld [vmem:[%s14798_s22 + $0x124] ss:$16 sps:$4 sm:$0xff]  }
 0x79c   : > { %v5874_v48 = vsel %vm4016_vm4, %v5870_v22, %v5872_v0  ;;  %v5876_v16 = vsel %vm4016_vm4, %v5872_v0, %v5870_v22  ;;  %v10864_v22 = vld [vmem:[%s14798_s22 + $0xa4] ss:$16 sps:$4 sm:$0xff]   ;;  %v10867_v0 = vld [vmem:[%s14798_s22 + $0xac] ss:$16 sps:$4 sm:$0xff]   ;;  %v10865_v24 = vld [vmem:[%s14798_s22 + $0xa8] ss:$16 sps:$4 sm:$0xff]  }
 0x79d   : > { %v5878_v59 = vmax.f32 %v5866_v29, %v5876_v16  ;;  %v5880_v51 = vmax.f32 %v5868_v15, %v5874_v48  ;;  %v5881_v2 = vpack.c.bf16 %v5879_v34, %v5877_v10  ;;  %v10856_v15 = vld [vmem:[%s14798_s22 + $0xc0] ss:$16 sps:$4 sm:$0xff]   ;;  %v10870_v48 = vld [vmem:[%s14798_s22 + $0x84] ss:$16 sps:$4 sm:$0xff]   ;;  %v10873_v16 = vld [vmem:[%s14798_s22 + $0x8c] ss:$16 sps:$4 sm:$0xff]  }
 0x79e   : > { %v10868_v10 = vld [vmem:[%s14798_s22 + $0x80] ss:$16 sps:$4 sm:$0xff]   ;;  %v10871_v34 = vld [vmem:[%s14798_s22 + $0x88] ss:$16 sps:$4 sm:$0xff]   ;;  %s14800_s2 = sld [smem:[#allocation24_spill]] }
 0x79f   : > { %v5882_v56 = vpack.c.bf16 %v5880_v51, %v5878_v59  ;;  %v10876_v59 = vld [vmem:[%s14798_s22 + $0x64] ss:$16 sps:$4 sm:$0xff]   ;;  %v10879_v51 = vld [vmem:[%s14798_s22 + $0x6c] ss:$16 sps:$4 sm:$0xff]  }
 0x7a1   : > { %5901 = vmatprep.subr.bf16.mxu0 %v5882_v56  ;;  %v10874_v56 = vld [vmem:[%s14798_s22 + $0x60] ss:$16 sps:$4 sm:$0xff]  }
 0x7a2   : > { %5902 = vmatpush1.bf16.msra.mxu0 %v5881_v2  ;;  %v10882_v2 = vld [vmem:[%s14798_s22 + $0x44] ss:$16 sps:$4 sm:$0xff]  }
 0x7a3   : > { %6444 = vmatprep.subr.bf16.mxu0 %v10756_v13  ;;  %v10877_v13 = vld [vmem:[%s14798_s22 + $0x68] ss:$16 sps:$4 sm:$0xff]  }
 0x7a5   : > { %9457 = vmatmul.mubr.msk.bf16.vlgmr.msra.gmra.mxu0 %vm5883_vm8, %v5856_v18  ;;  %v10885_v18 = vld [vmem:[%s14798_s22 + $0x4c] ss:$16 sps:$4 sm:$0xff]  }
 0x7a6   : > { %6445 = vmatpush1.bf16.msra.mxu0 %v10754_v38  ;;  %v10880_v38 = vld [vmem:[%s14798_s22 + $0x40] ss:$16 sps:$4 sm:$0xff]  }
 0x7a7   : > { %6446 = vmatprep.subr.bf16.mxu0 %v10762_v47  ;;  %v10883_v47 = vld [vmem:[%s14798_s22 + $0x48] ss:$16 sps:$4 sm:$0xff]  }
 0x7aa   : > { %6447 = vmatpush1.bf16.msra.mxu0 %v10760_v17  ;;  %v10888_v17 = vld [vmem:[%s14798_s22 + $0x24] ss:$16 sps:$4 sm:$0xff]  }
 0x7ab   : > { %6448 = vmatprep.subr.bf16.mxu0 %v10768_v8  ;;  %v10891_v8 = vld [vmem:[%s14798_s22 + $0x2c] ss:$16 sps:$4 sm:$0xff]  }
 0x7ae   : > { %6449 = vmatpush1.bf16.msra.mxu0 %v10766_v49  ;;  %v10886_v49 = vld [vmem:[%s14798_s22 + $0x20] ss:$16 sps:$4 sm:$0xff]  }
 0x7af   : > { %6450 = vmatprep.subr.bf16.mxu0 %v10774_v40  ;;  %v10889_v40 = vld [vmem:[%s14798_s22 + $0x28] ss:$16 sps:$4 sm:$0xff]  }
 0x7b2   : > { %6451 = vmatpush1.bf16.msra.mxu0 %v10772_v61  ;;  %v10894_v61 = vld [vmem:[%s14798_s22 + $0x4] ss:$16 sps:$4 sm:$0xff]  }
 0x7b3   : > { %6452 = vmatprep.subr.bf16.mxu0 %v10780_v43  ;;  %v10897_v43 = vld [vmem:[%s14798_s22 + $0xc] ss:$16 sps:$4 sm:$0xff]  }
 0x7b6   : > { %6453 = vmatpush1.bf16.msra.mxu0 %v10778_v42  ;;  %v10892_v42 = vld [vmem:[%s14798_s22] ss:$16 sps:$4 sm:$0xff]  }
 0x7b7   : > { %6454 = vmatprep.subr.bf16.mxu0 %v10786_v27  ;;  %v10895_v27 = vld [vmem:[%s14798_s22 + $0x8] ss:$16 sps:$4 sm:$0xff]  }
 0x7ba   : > { %6455 = vmatpush1.bf16.msra.mxu0 %v10784_v33  ;;  %v10900_v33 = vld [vmem:[%s14798_s22 + $0x1e4] ss:$16 sps:$4 sm:$0xff]  }
 0x7bb   : > { %6456 = vmatprep.subr.bf16.mxu0 %v10792_v31  ;;  %v10903_v31 = vld [vmem:[%s14798_s22 + $0x1ec] ss:$16 sps:$4 sm:$0xff]  }
 0x7be   : > { %6457 = vmatpush1.bf16.msra.mxu0 %v10790_v60  ;;  %v10898_v60 = vld [vmem:[%s14798_s22 + $0x1e0] ss:$16 sps:$4 sm:$0xff]  }
 0x7bf   : > { %6458 = vmatprep.subr.bf16.mxu0 %v10798_v23  ;;  %v10901_v23 = vld [vmem:[%s14798_s22 + $0x1e8] ss:$16 sps:$4 sm:$0xff]  }
 0x7c2   : > { %6459 = vmatpush1.bf16.msra.mxu0 %v10796_v7  ;;  %v10906_v7 = vld [vmem:[%s14798_s22 + $0x1c4] ss:$16 sps:$4 sm:$0xff]  }
 0x7c3   : > { %6460 = vmatprep.subr.bf16.mxu0 %v10804_v37  ;;  %v10909_v37 = vld [vmem:[%s14798_s22 + $0x1cc] ss:$16 sps:$4 sm:$0xff]  }
 0x7c6   : > { %6461 = vmatpush2.bf16.msra.mxu0 %v10802_v3  ;;  %v10904_v3 = vld [vmem:[%s14798_s22 + $0x1c0] ss:$16 sps:$4 sm:$0xff]  }
 0x7c7   : > { %6462 = vmatprep.subr.bf16.mxu0 %v10810_v1  ;;  %v10907_v1 = vld [vmem:[%s14798_s22 + $0x1c8] ss:$16 sps:$4 sm:$0xff]  }
 0x7ca   : > { %6463 = vmatpush2.bf16.msra.mxu0 %v10808_v35  ;;  %v10912_v35 = vld [vmem:[%s14798_s22 + $0x1a4] ss:$16 sps:$4 sm:$0xff]  }
 0x7cb   : > { %6464 = vmatprep.subr.bf16.mxu0 %v10816_v41  ;;  %v10915_v41 = vld [vmem:[%s14798_s22 + $0x1ac] ss:$16 sps:$4 sm:$0xff]  }
 0x7ce   : > { %6465 = vmatpush2.bf16.msra.mxu0 %v10814_v45  ;;  %v10910_v45 = vld [vmem:[%s14798_s22 + $0x1a0] ss:$16 sps:$4 sm:$0xff]  }
 0x7cf   : > { %6466 = vmatprep.subr.bf16.mxu0 %v10822_v6  ;;  %v10913_v6 = vld [vmem:[%s14798_s22 + $0x1a8] ss:$16 sps:$4 sm:$0xff]  }
 0x7d2   : > { %6467 = vmatpush2.bf16.msra.mxu0 %v10820_v4  ;;  %v10918_v4 = vld [vmem:[%s14798_s22 + $0x184] ss:$16 sps:$4 sm:$0xff]  }
 0x7d3   : > { %6468 = vmatprep.subr.bf16.mxu0 %v10828_v11  ;;  %v10921_v11 = vld [vmem:[%s14798_s22 + $0x18c] ss:$16 sps:$4 sm:$0xff]  }
 0x7d6   : > { %6469 = vmatpush2.bf16.msra.mxu0 %v10826_v26  ;;  %v10916_v26 = vld [vmem:[%s14798_s22 + $0x180] ss:$16 sps:$4 sm:$0xff]  }
 0x7d7   : > { %6470 = vmatprep.subr.bf16.mxu0 %v10834_v62  ;;  %v10919_v62 = vld [vmem:[%s14798_s22 + $0x188] ss:$16 sps:$4 sm:$0xff]  }
 0x7da   : > { %6471 = vmatpush2.bf16.msra.mxu0 %v10832_v28  ;;  %v10924_v28 = vld [vmem:[%s14798_s22 + $0x164] ss:$16 sps:$4 sm:$0xff]  }
 0x7db   : > { %6472 = vmatprep.subr.bf16.mxu0 %v10840_v39  ;;  %v10927_v39 = vld [vmem:[%s14798_s22 + $0x16c] ss:$16 sps:$4 sm:$0xff]  }
 0x7de   : > { %6473 = vmatpush2.bf16.msra.mxu0 %v10838_v12  ;;  %v10922_v12 = vld [vmem:[%s14798_s22 + $0x160] ss:$16 sps:$4 sm:$0xff]  }
 0x7df   : > { %6474 = vmatprep.subr.bf16.mxu0 %v10846_v55  ;;  %v10930_v55 = vld [vmem:[%s14798_s22 + $0x144] ss:$16 sps:$4 sm:$0xff]  }
 0x7e2   : > { %6475 = vmatpush2.bf16.msra.mxu0 %v10844_v54  ;;  %v10925_v54 = vld [vmem:[%s14798_s22 + $0x168] ss:$16 sps:$4 sm:$0xff]  }
 0x7e3   : > { %6846 = vmatprep.subr.bf16.mxu0 %v10852_v53  ;;  %v10931_v53 = vld [vmem:[%s14798_s22 + $0x148] ss:$16 sps:$4 sm:$0xff]  }
 0x865   : > { %v5921_v30 = vpop.f32.mrf.mxu0 }
 0x866   : > { %v14062_v63 = vpack.c.bf16 %v5921_v30, %v5921_v30  ;;  %v10939_v30 = vld [vmem:[%s14798_s22 + $0x12c] ss:$16 sps:$4 sm:$0xff]  }
 0x867   : > { %v5923_v5 = vpop.f32.mrf.mxu0 }
 0x868   : > { %v14058_v46 = vpack.c.bf16 %v5923_v5, %v5923_v5  ;;  %v10934_v5 = vld [vmem:[%s14798_s22 + $0x120] ss:$16 sps:$4 sm:$0xff]  }
 0x869   : > { %v5925_v50 = vpop.f32.mrf.mxu0 }
 0x86a   : > { %6476 = vmatprep.mubr.bf16.mxu0 %v14058_v46  ;;  %6517 = vmatprep.mubr.bf16.mxu1 %v14058_v46  ;;  %v10943_v50 = vld [vmem:[%s14798_s22 + $0x108] ss:$16 sps:$4 sm:$0xff]  }
 0x86b   : > { %6477 = vmatmul.mubr.bf16.vlgmr.msra.gmra.mxu0 %v14062_v63  ;;  %6518 = vmatmul.mubr.bf16.vlgmr.msra.gmra.mxu1 %v14062_v63  ;;  %v5926_v29 = vpop.f32.mrf.mxu0 }
 0x86c   : > { %6847 = vmatpush1.bf16.msra.mxu0 %v10850_v25  ;;  %6888 = vmatpush1.bf16.msra.mxu1 %v10853_v58  ;;  %v10937_v25 = vld [vmem:[%s14798_s22 + $0x128] ss:$16 sps:$4 sm:$0xff]   ;;  %v10942_v58 = vld [vmem:[%s14798_s22 + $0x104] ss:$16 sps:$4 sm:$0xff]  }
 0x86d   : > { %6848 = vmatprep.subr.bf16.mxu0 %v10858_v36  ;;  %6889 = vmatprep.subr.bf16.mxu1 %v10861_v9  ;;  %v10945_v36 = vld [vmem:[%s14798_s22 + $0x10c] ss:$16 sps:$4 sm:$0xff]   ;;  %v10940_v9 = vld [vmem:[%s14798_s22 + $0x100] ss:$16 sps:$4 sm:$0xff]   ;;  %v10948_v29 = vld [vmem:[%s14799_s3 + $0xe4] ss:$16 sps:$4 sm:$0xff]  }
 0x86e   : > { %6878 = vmatprep.mubr.bf16.mxu0 %v14058_v46  ;;  %6919 = vmatprep.mubr.bf16.mxu1 %v14058_v46 }
 0x870   : > { %6849 = vmatpush1.bf16.msra.mxu0 %v10856_v15  ;;  %6890 = vmatpush1.bf16.msra.mxu1 %v10859_v44  ;;  %v10951_v15 = vld [vmem:[%s14799_s3 + $0xec] ss:$16 sps:$4 sm:$0xff]   ;;  %v10946_v44 = vld [vmem:[%s14799_s3 + $0xe0] ss:$16 sps:$4 sm:$0xff]  }
 0x871   : > { %6850 = vmatprep.subr.bf16.mxu0 %v10864_v22  ;;  %6891 = vmatprep.subr.bf16.mxu1 %v10867_v0  ;;  %v10949_v22 = vld [vmem:[%s14799_s3 + $0xe8] ss:$16 sps:$4 sm:$0xff]   ;;  %v10954_v0 = vld [vmem:[%s14799_s3 + $0xc4] ss:$16 sps:$4 sm:$0xff]  }
 0x874   : > { %6851 = vmatpush1.bf16.msra.mxu0 %v10862_v14  ;;  %6892 = vmatpush1.bf16.msra.mxu1 %v10865_v24  ;;  %v10957_v14 = vld [vmem:[%s14799_s3 + $0xcc] ss:$16 sps:$4 sm:$0xff]   ;;  %v10952_v24 = vld [vmem:[%s14799_s3 + $0xc0] ss:$16 sps:$4 sm:$0xff]  }
 0x875   : > { %6852 = vmatprep.subr.bf16.mxu0 %v10870_v48  ;;  %6893 = vmatprep.subr.bf16.mxu1 %v10873_v16  ;;  %v10955_v48 = vld [vmem:[%s14799_s3 + $0xc8] ss:$16 sps:$4 sm:$0xff]   ;;  %v10960_v16 = vld [vmem:[%s14799_s3 + $0xa4] ss:$16 sps:$4 sm:$0xff]  }
 0x878   : > { %6853 = vmatpush1.bf16.msra.mxu0 %v10868_v10  ;;  %6894 = vmatpush1.bf16.msra.mxu1 %v10871_v34  ;;  %v10963_v10 = vld [vmem:[%s14799_s3 + $0xac] ss:$16 sps:$4 sm:$0xff]   ;;  %v10958_v34 = vld [vmem:[%s14799_s3 + $0xa0] ss:$16 sps:$4 sm:$0xff]  }
 0x879   : > { %6854 = vmatprep.subr.bf16.mxu0 %v10876_v59  ;;  %6895 = vmatprep.subr.bf16.mxu1 %v10879_v51  ;;  %v10961_v59 = vld [vmem:[%s14799_s3 + $0xa8] ss:$16 sps:$4 sm:$0xff]   ;;  %v10966_v51 = vld [vmem:[%s14799_s3 + $0x84] ss:$16 sps:$4 sm:$0xff]  }
 0x87c   : > { %6855 = vmatpush1.bf16.msra.mxu0 %v10874_v56  ;;  %6896 = vmatpush1.bf16.msra.mxu1 %v10877_v13  ;;  %v10969_v56 = vld [vmem:[%s14799_s3 + $0x8c] ss:$16 sps:$4 sm:$0xff]   ;;  %v10967_v13 = vld [vmem:[%s14799_s3 + $0x88] ss:$16 sps:$4 sm:$0xff]  }
 0x87d   : > { %6856 = vmatprep.subr.bf16.mxu0 %v10882_v2  ;;  %6897 = vmatprep.subr.bf16.mxu1 %v10885_v18  ;;  %v10972_v2 = vld [vmem:[%s14799_s3 + $0x64] ss:$16 sps:$4 sm:$0xff]   ;;  %v10975_v18 = vld [vmem:[%s14799_s3 + $0x6c] ss:$16 sps:$4 sm:$0xff]  }
 0x880   : > { %6857 = vmatpush1.bf16.msra.mxu0 %v10880_v38  ;;  %6898 = vmatpush1.bf16.msra.mxu1 %v10883_v47  ;;  %v10970_v38 = vld [vmem:[%s14799_s3 + $0x60] ss:$16 sps:$4 sm:$0xff]   ;;  %v10973_v47 = vld [vmem:[%s14799_s3 + $0x68] ss:$16 sps:$4 sm:$0xff]  }
 0x881   : > { %6858 = vmatprep.subr.bf16.mxu0 %v10888_v17  ;;  %6899 = vmatprep.subr.bf16.mxu1 %v10891_v8  ;;  %v10978_v17 = vld [vmem:[%s14799_s3 + $0x44] ss:$16 sps:$4 sm:$0xff]   ;;  %v10981_v8 = vld [vmem:[%s14799_s3 + $0x4c] ss:$16 sps:$4 sm:$0xff]  }
 0x884   : > { %6859 = vmatpush1.bf16.msra.mxu0 %v10886_v49  ;;  %6900 = vmatpush1.bf16.msra.mxu1 %v10889_v40  ;;  %v10976_v49 = vld [vmem:[%s14799_s3 + $0x40] ss:$16 sps:$4 sm:$0xff]   ;;  %v10979_v40 = vld [vmem:[%s14799_s3 + $0x48] ss:$16 sps:$4 sm:$0xff]  }
 0x885   : > { %6860 = vmatprep.subr.bf16.mxu0 %v10894_v61  ;;  %6901 = vmatprep.subr.bf16.mxu1 %v10897_v43  ;;  %v10984_v61 = vld [vmem:[%s14799_s3 + $0x24] ss:$16 sps:$4 sm:$0xff]   ;;  %v10987_v43 = vld [vmem:[%s14799_s3 + $0x2c] ss:$16 sps:$4 sm:$0xff]  }
 0x888   : > { %6861 = vmatpush1.bf16.msra.mxu0 %v10892_v42  ;;  %6902 = vmatpush1.bf16.msra.mxu1 %v10895_v27  ;;  %v10982_v42 = vld [vmem:[%s14799_s3 + $0x20] ss:$16 sps:$4 sm:$0xff]   ;;  %v10985_v27 = vld [vmem:[%s14799_s3 + $0x28] ss:$16 sps:$4 sm:$0xff]  }
 0x889   : > { %6862 = vmatprep.subr.bf16.mxu0 %v10900_v33  ;;  %6903 = vmatprep.subr.bf16.mxu1 %v10903_v31  ;;  %v10990_v33 = vld [vmem:[%s14799_s3 + $0x4] ss:$16 sps:$4 sm:$0xff]   ;;  %v10993_v31 = vld [vmem:[%s14799_s3 + $0xc] ss:$16 sps:$4 sm:$0xff]  }
 0x88c   : > { %6863 = vmatpush2.bf16.msra.mxu0 %v10898_v60  ;;  %6904 = vmatpush2.bf16.msra.mxu1 %v10901_v23  ;;  %v10988_v60 = vld [vmem:[%s14799_s3] ss:$16 sps:$4 sm:$0xff]   ;;  %v10991_v23 = vld [vmem:[%s14799_s3 + $0x8] ss:$16 sps:$4 sm:$0xff]  }
 0x88d   : > { %6864 = vmatprep.subr.bf16.mxu0 %v10906_v7  ;;  %6905 = vmatprep.subr.bf16.mxu1 %v10909_v37  ;;  %v10996_v7 = vld [vmem:[%s14799_s3 + $0x1e4] ss:$16 sps:$4 sm:$0xff]   ;;  %v10999_v37 = vld [vmem:[%s14799_s3 + $0x1ec] ss:$16 sps:$4 sm:$0xff]  }
 0x890   : > { %6865 = vmatpush2.bf16.msra.mxu0 %v10904_v3  ;;  %6906 = vmatpush2.bf16.msra.mxu1 %v10907_v1  ;;  %v10994_v3 = vld [vmem:[%s14799_s3 + $0x1e0] ss:$16 sps:$4 sm:$0xff]   ;;  %v10997_v1 = vld [vmem:[%s14799_s3 + $0x1e8] ss:$16 sps:$4 sm:$0xff]  }
 0x891   : > { %6866 = vmatprep.subr.bf16.mxu0 %v10912_v35  ;;  %6907 = vmatprep.subr.bf16.mxu1 %v10915_v41  ;;  %v11002_v35 = vld [vmem:[%s14799_s3 + $0x1c4] ss:$16 sps:$4 sm:$0xff]   ;;  %v11005_v41 = vld [vmem:[%s14799_s3 + $0x1cc] ss:$16 sps:$4 sm:$0xff]  }
 0x894   : > { %6867 = vmatpush2.bf16.msra.mxu0 %v10910_v45  ;;  %6908 = vmatpush2.bf16.msra.mxu1 %v10913_v6  ;;  %v11000_v45 = vld [vmem:[%s14799_s3 + $0x1c0] ss:$16 sps:$4 sm:$0xff]   ;;  %v11003_v6 = vld [vmem:[%s14799_s3 + $0x1c8] ss:$16 sps:$4 sm:$0xff]  }
 0x895   : > { %6868 = vmatprep.subr.bf16.mxu0 %v10918_v4  ;;  %6909 = vmatprep.subr.bf16.mxu1 %v10921_v11  ;;  %v11008_v4 = vld [vmem:[%s14799_s3 + $0x1a4] ss:$16 sps:$4 sm:$0xff]   ;;  %v11011_v11 = vld [vmem:[%s14799_s3 + $0x1ac] ss:$16 sps:$4 sm:$0xff]  }
 0x898   : > { %6869 = vmatpush2.bf16.msra.mxu0 %v10916_v26  ;;  %6910 = vmatpush2.bf16.msra.mxu1 %v10919_v62  ;;  %v11006_v26 = vld [vmem:[%s14799_s3 + $0x1a0] ss:$16 sps:$4 sm:$0xff]   ;;  %v11009_v62 = vld [vmem:[%s14799_s3 + $0x1a8] ss:$16 sps:$4 sm:$0xff]  }
 0x899   : > { %6870 = vmatprep.subr.bf16.mxu0 %v10924_v28  ;;  %6911 = vmatprep.subr.bf16.mxu1 %v10927_v39  ;;  %v11014_v28 = vld [vmem:[%s14799_s3 + $0x184] ss:$16 sps:$4 sm:$0xff]   ;;  %v11017_v39 = vld [vmem:[%s14799_s3 + $0x18c] ss:$16 sps:$4 sm:$0xff]  }
 0x89c   : > { %6871 = vmatpush2.bf16.msra.mxu0 %v10922_v12  ;;  %6912 = vmatpush2.bf16.msra.mxu1 %v10925_v54  ;;  %v11012_v12 = vld [vmem:[%s14799_s3 + $0x180] ss:$16 sps:$4 sm:$0xff]   ;;  %v11015_v54 = vld [vmem:[%s14799_s3 + $0x188] ss:$16 sps:$4 sm:$0xff]  }
 0x89d   : > { %6872 = vmatprep.subr.bf16.mxu0 %v10930_v55  ;;  %6913 = vmatprep.subr.bf16.mxu1 %v10933_v32  ;;  %v11020_v55 = vld [vmem:[%s14799_s3 + $0x164] ss:$16 sps:$4 sm:$0xff]   ;;  %v11023_v32 = vld [vmem:[%s14799_s3 + $0x16c] ss:$16 sps:$4 sm:$0xff]  }
 0x8a0   : > { %6873 = vmatpush2.bf16.msra.mxu0 %v10928_v19  ;;  %6914 = vmatpush2.bf16.msra.mxu1 %v10931_v53  ;;  %v11018_v19 = vld [vmem:[%s14799_s3 + $0x160] ss:$16 sps:$4 sm:$0xff]   ;;  %v11021_v53 = vld [vmem:[%s14799_s3 + $0x168] ss:$16 sps:$4 sm:$0xff]  }
 0x8a1   : > { %6874 = vmatprep.subr.bf16.mxu0 %v10936_v20  ;;  %6915 = vmatprep.subr.bf16.mxu1 %v10939_v30  ;;  %v11026_v20 = vld [vmem:[%s14799_s3 + $0x144] ss:$16 sps:$4 sm:$0xff]   ;;  %v11029_v30 = vld [vmem:[%s14799_s3 + $0x14c] ss:$16 sps:$4 sm:$0xff]  }
 0x8a4   : > { %6875 = vmatpush2.bf16.msra.mxu0 %v10934_v5  ;;  %6916 = vmatpush2.bf16.msra.mxu1 %v10937_v25  ;;  %v11024_v5 = vld [vmem:[%s14799_s3 + $0x140] ss:$16 sps:$4 sm:$0xff]   ;;  %v11027_v25 = vld [vmem:[%s14799_s3 + $0x148] ss:$16 sps:$4 sm:$0xff]  }
 0x8a5   : > { %6876 = vmatprep.subr.bf16.mxu0 %v10942_v58  ;;  %6917 = vmatprep.subr.bf16.mxu1 %v10945_v36  ;;  %v11032_v58 = vld [vmem:[%s14799_s3 + $0x124] ss:$16 sps:$4 sm:$0xff]   ;;  %v11035_v36 = vld [vmem:[%s14799_s3 + $0x12c] ss:$16 sps:$4 sm:$0xff]  }
 0x8a8   : > { %6877 = vmatpush2.bf16.msra.mxu0 %v10940_v9  ;;  %6918 = vmatpush2.bf16.msra.mxu1 %v10943_v50  ;;  %v11030_v9 = vld [vmem:[%s14799_s3 + $0x120] ss:$16 sps:$4 sm:$0xff]   ;;  %v11033_v50 = vld [vmem:[%s14799_s3 + $0x128] ss:$16 sps:$4 sm:$0xff]  }
 0x8a9   : > { %7277 = vmatprep.subr.bf16.mxu0 %v10948_v29  ;;  %7318 = vmatprep.subr.bf16.mxu1 %v10951_v15  ;;  %v11038_v29 = vld [vmem:[%s14799_s3 + $0x104] ss:$16 sps:$4 sm:$0xff]   ;;  %v11041_v15 = vld [vmem:[%s14799_s3 + $0x10c] ss:$16 sps:$4 sm:$0xff]  }
 0x8ab   : > { %6879 = vmatmul.mubr.bf16.vlgmr.msra.gmra.mxu0 %v14062_v63  ;;  %6920 = vmatmul.mubr.bf16.vlgmr.msra.gmra.mxu1 %v14062_v63 }
 0x8ac   : > { %7278 = vmatpush1.bf16.msra.mxu0 %v10946_v44  ;;  %7309 = vmatprep.mubr.bf16.mxu0 %v14058_v46  ;;  %v11036_v44 = vld [vmem:[%s14799_s3 + $0x100] ss:$16 sps:$4 sm:$0xff]  }
 0x8ad   : > { %7319 = vmatpush1.bf16.msra.mxu1 %v10949_v22  ;;  %7350 = vmatprep.mubr.bf16.mxu1 %v14058_v46  ;;  %v10964_v46 = vld [vmem:[%s14799_s3 + $0x80] ss:$16 sps:$4 sm:$0xff]   ;;  %v11039_v22 = vld [vmem:[%s14799_s3 + $0x108] ss:$16 sps:$4 sm:$0xff]   ;;  %s14801_s3 = sld [smem:[#allocation22_spill]] }
 0x8ae   : > { %7279 = vmatprep.subr.bf16.mxu0 %v10954_v0  ;;  %7320 = vmatprep.subr.bf16.mxu1 %v10957_v14  ;;  %v11042_v0 = vld [vmem:[%s14800_s2 + $0xe0] ss:$16 sps:$4 sm:$0xff]   ;;  %v11044_v14 = vld [vmem:[%s14800_s2 + $0xe4] ss:$16 sps:$4 sm:$0xff]  }
 0x8b0   : > { %7280 = vmatpush1.bf16.msra.mxu0 %v10952_v24  ;;  %v11045_v24 = vld [vmem:[%s14800_s2 + $0x2e0] ss:$16 sps:$4 sm:$0xff]  }
 0x8b1   : > { %7321 = vmatpush1.bf16.msra.mxu1 %v10955_v48  ;;  %7281 = vmatprep.subr.bf16.mxu0 %v10960_v16  ;;  %v11047_v48 = vld [vmem:[%s14800_s2 + $0x2e4] ss:$16 sps:$4 sm:$0xff]  }
 0x8b2   : > { %7322 = vmatprep.subr.bf16.mxu1 %v10963_v10  ;;  %v11050_v16 = vld [vmem:[%s14800_s2 + $0xc4] ss:$16 sps:$4 sm:$0xff]  }
 0x8b3   : > { %v11053_v10 = vld [vmem:[%s14800_s2 + $0x2c4] ss:$16 sps:$4 sm:$0xff]  }
 0x8b4   : > { %7282 = vmatpush1.bf16.msra.mxu0 %v10958_v34  ;;  %v11048_v34 = vld [vmem:[%s14800_s2 + $0xc0] ss:$16 sps:$4 sm:$0xff]  }
 0x8b5   : > { %7323 = vmatpush1.bf16.msra.mxu1 %v10961_v59  ;;  %7283 = vmatprep.subr.bf16.mxu0 %v10966_v51  ;;  %v11051_v59 = vld [vmem:[%s14800_s2 + $0x2c0] ss:$16 sps:$4 sm:$0xff]   ;;  %v11059_v51 = vld [vmem:[%s14800_s2 + $0x2a4] ss:$16 sps:$4 sm:$0xff]  }
 0x8b6   : > { %7324 = vmatprep.subr.bf16.mxu1 %v10969_v56  ;;  %v11054_v56 = vld [vmem:[%s14800_s2 + $0xa0] ss:$16 sps:$4 sm:$0xff]  }
 0x8b8   : > { %7284 = vmatpush1.bf16.msra.mxu0 %v10964_v46  ;;  %v11057_v46 = vld [vmem:[%s14800_s2 + $0x2a0] ss:$16 sps:$4 sm:$0xff]  }
 0x8b9   : > { %7325 = vmatpush1.bf16.msra.mxu1 %v10967_v13  ;;  %7285 = vmatprep.subr.bf16.mxu0 %v10972_v2  ;;  %v11062_v13 = vld [vmem:[%s14800_s2 + $0x84] ss:$16 sps:$4 sm:$0xff]  }
 0x8ba   : > { %7326 = vmatprep.subr.bf16.mxu1 %v10975_v18  ;;  %v11065_v2 = vld [vmem:[%s14800_s2 + $0x284] ss:$16 sps:$4 sm:$0xff]   ;;  %v11060_v18 = vld [vmem:[%s14800_s2 + $0x80] ss:$16 sps:$4 sm:$0xff]  }
 0x8bc   : > { %7286 = vmatpush1.bf16.msra.mxu0 %v10970_v38  ;;  %v11063_v38 = vld [vmem:[%s14800_s2 + $0x280] ss:$16 sps:$4 sm:$0xff]  }
 0x8bd   : > { %7327 = vmatpush1.bf16.msra.mxu1 %v10973_v47  ;;  %7287 = vmatprep.subr.bf16.mxu0 %v10978_v17  ;;  %v11068_v47 = vld [vmem:[%s14800_s2 + $0x64] ss:$16 sps:$4 sm:$0xff]  }
 0x8be   : > { %7328 = vmatprep.subr.bf16.mxu1 %v10981_v8  ;;  %v11071_v17 = vld [vmem:[%s14800_s2 + $0x264] ss:$16 sps:$4 sm:$0xff]   ;;  %v11066_v8 = vld [vmem:[%s14800_s2 + $0x60] ss:$16 sps:$4 sm:$0xff]  }
 0x8c0   : > { %7288 = vmatpush1.bf16.msra.mxu0 %v10976_v49  ;;  %v11069_v49 = vld [vmem:[%s14800_s2 + $0x260] ss:$16 sps:$4 sm:$0xff]  }
 0x8c1   : > { %7329 = vmatpush1.bf16.msra.mxu1 %v10979_v40  ;;  %7289 = vmatprep.subr.bf16.mxu0 %v10984_v61  ;;  %v11074_v40 = vld [vmem:[%s14800_s2 + $0x44] ss:$16 sps:$4 sm:$0xff]  }
 0x8c2   : > { %7330 = vmatprep.subr.bf16.mxu1 %v10987_v43  ;;  %v11077_v61 = vld [vmem:[%s14800_s2 + $0x244] ss:$16 sps:$4 sm:$0xff]   ;;  %v11072_v43 = vld [vmem:[%s14800_s2 + $0x40] ss:$16 sps:$4 sm:$0xff]  }
 0x8c4   : > { %7290 = vmatpush1.bf16.msra.mxu0 %v10982_v42  ;;  %v11075_v42 = vld [vmem:[%s14800_s2 + $0x240] ss:$16 sps:$4 sm:$0xff]  }
 0x8c5   : > { %7331 = vmatpush1.bf16.msra.mxu1 %v10985_v27  ;;  %7291 = vmatprep.subr.bf16.mxu0 %v10990_v33  ;;  %v11080_v27 = vld [vmem:[%s14800_s2 + $0x24] ss:$16 sps:$4 sm:$0xff]  }
 0x8c6   : > { %7332 = vmatprep.subr.bf16.mxu1 %v10993_v31  ;;  %v11083_v33 = vld [vmem:[%s14800_s2 + $0x224] ss:$16 sps:$4 sm:$0xff]   ;;  %v11078_v31 = vld [vmem:[%s14800_s2 + $0x20] ss:$16 sps:$4 sm:$0xff]  }
 0x8c8   : > { %7292 = vmatpush1.bf16.msra.mxu0 %v10988_v60  ;;  %v11081_v60 = vld [vmem:[%s14800_s2 + $0x220] ss:$16 sps:$4 sm:$0xff]  }
 0x8c9   : > { %7333 = vmatpush1.bf16.msra.mxu1 %v10991_v23  ;;  %7293 = vmatprep.subr.bf16.mxu0 %v10996_v7  ;;  %v11086_v23 = vld [vmem:[%s14800_s2 + $0x4] ss:$16 sps:$4 sm:$0xff]  }
 0x8ca   : > { %7334 = vmatprep.subr.bf16.mxu1 %v10999_v37  ;;  %v11089_v7 = vld [vmem:[%s14800_s2 + $0x204] ss:$16 sps:$4 sm:$0xff]   ;;  %v11084_v37 = vld [vmem:[%s14800_s2] ss:$16 sps:$4 sm:$0xff]  }
 0x8cc   : > { %7294 = vmatpush2.bf16.msra.mxu0 %v10994_v3  ;;  %v11087_v3 = vld [vmem:[%s14800_s2 + $0x200] ss:$16 sps:$4 sm:$0xff]  }
 0x8cd   : > { %7335 = vmatpush2.bf16.msra.mxu1 %v10997_v1  ;;  %7295 = vmatprep.subr.bf16.mxu0 %v11002_v35  ;;  %v11092_v1 = vld [vmem:[%s14800_s2 + $0x1e4] ss:$16 sps:$4 sm:$0xff]  }
 0x8ce   : > { %7336 = vmatprep.subr.bf16.mxu1 %v11005_v41  ;;  %v11095_v35 = vld [vmem:[%s14800_s2 + $0x3e4] ss:$16 sps:$4 sm:$0xff]   ;;  %v11090_v41 = vld [vmem:[%s14800_s2 + $0x1e0] ss:$16 sps:$4 sm:$0xff]  }
 0x8d0   : > { %7296 = vmatpush2.bf16.msra.mxu0 %v11000_v45  ;;  %v11093_v45 = vld [vmem:[%s14800_s2 + $0x3e0] ss:$16 sps:$4 sm:$0xff]  }
 0x8d1   : > { %7337 = vmatpush2.bf16.msra.mxu1 %v11003_v6  ;;  %7297 = vmatprep.subr.bf16.mxu0 %v11008_v4 }
 0x8d2   : > { %7338 = vmatprep.subr.bf16.mxu1 %v11011_v11 }
 0x8d4   : > { %7298 = vmatpush2.bf16.msra.mxu0 %v11006_v26 }
 0x8d5   : > { %7339 = vmatpush2.bf16.msra.mxu1 %v11009_v62  ;;  %7299 = vmatprep.subr.bf16.mxu0 %v11014_v28 }
 0x8d6   : > { %7340 = vmatprep.subr.bf16.mxu1 %v11017_v39 }
 0x8d8   : > { %7300 = vmatpush2.bf16.msra.mxu0 %v11012_v12 }
 0x8d9   : > { %7341 = vmatpush2.bf16.msra.mxu1 %v11015_v54  ;;  %7301 = vmatprep.subr.bf16.mxu0 %v11020_v55  ;;  %v11096_v54 = vld [vmem:[%s14800_s2 + $0x1c0] ss:$16 sps:$4 sm:$0xff]   ;;  %v11098_v55 = vld [vmem:[%s14800_s2 + $0x1c4] ss:$16 sps:$4 sm:$0xff]  }
 0x8da   : > { %7342 = vmatprep.subr.bf16.mxu1 %v11023_v32  ;;  %v11099_v32 = vld [vmem:[%s14800_s2 + $0x3c0] ss:$16 sps:$4 sm:$0xff]  }
 0x8dc   : > { %7302 = vmatpush2.bf16.msra.mxu0 %v11018_v19  ;;  %v11101_v19 = vld [vmem:[%s14800_s2 + $0x3c4] ss:$16 sps:$4 sm:$0xff]  }
 0x8dd   : > { %7343 = vmatpush2.bf16.msra.mxu1 %v11021_v53  ;;  %7303 = vmatprep.subr.bf16.mxu0 %v11026_v20  ;;  %v11104_v53 = vld [vmem:[%s14800_s2 + $0x1a4] ss:$16 sps:$4 sm:$0xff]  }
 0x8de   : > { %7344 = vmatprep.subr.bf16.mxu1 %v11029_v30  ;;  %v11107_v20 = vld [vmem:[%s14800_s2 + $0x3a4] ss:$16 sps:$4 sm:$0xff]   ;;  %v11102_v30 = vld [vmem:[%s14800_s2 + $0x1a0] ss:$16 sps:$4 sm:$0xff]  }
 0x8e0   : > { %7304 = vmatpush2.bf16.msra.mxu0 %v11024_v5  ;;  %v11105_v5 = vld [vmem:[%s14800_s2 + $0x3a0] ss:$16 sps:$4 sm:$0xff]  }
 0x8e1   : > { %7345 = vmatpush2.bf16.msra.mxu1 %v11027_v25  ;;  %7305 = vmatprep.subr.bf16.mxu0 %v11032_v58  ;;  %v11110_v25 = vld [vmem:[%s14800_s2 + $0x184] ss:$16 sps:$4 sm:$0xff]  }
 0x8e2   : > { %7346 = vmatprep.subr.bf16.mxu1 %v11035_v36  ;;  %v11113_v58 = vld [vmem:[%s14800_s2 + $0x384] ss:$16 sps:$4 sm:$0xff]   ;;  %v11108_v36 = vld [vmem:[%s14800_s2 + $0x180] ss:$16 sps:$4 sm:$0xff]  }
 0x8e4   : > { %7306 = vmatpush2.bf16.msra.mxu0 %v11030_v9  ;;  %v11111_v9 = vld [vmem:[%s14800_s2 + $0x380] ss:$16 sps:$4 sm:$0xff]  }
 0x8e5   : > { %7347 = vmatpush2.bf16.msra.mxu1 %v11033_v50  ;;  %7307 = vmatprep.subr.bf16.mxu0 %v11038_v29  ;;  %v11116_v50 = vld [vmem:[%s14800_s2 + $0x164] ss:$16 sps:$4 sm:$0xff]  }
 0x8e6   : > { %7348 = vmatprep.subr.bf16.mxu1 %v11041_v15  ;;  %v11119_v29 = vld [vmem:[%s14800_s2 + $0x364] ss:$16 sps:$4 sm:$0xff]   ;;  %v11114_v15 = vld [vmem:[%s14800_s2 + $0x160] ss:$16 sps:$4 sm:$0xff]  }
 0x8e8   : > { %7308 = vmatpush2.bf16.msra.mxu0 %v11036_v44  ;;  %v11117_v44 = vld [vmem:[%s14800_s2 + $0x360] ss:$16 sps:$4 sm:$0xff]  }
 0x8e9   : > { %7349 = vmatpush2.bf16.msra.mxu1 %v11039_v22  ;;  %8272 = vmatprep.subr.bf16.mxu0 %v11044_v14  ;;  %v11122_v22 = vld [vmem:[%s14800_s2 + $0x144] ss:$16 sps:$4 sm:$0xff]   ;;  %v11120_v14 = vld [vmem:[%s14800_s2 + $0x140] ss:$16 sps:$4 sm:$0xff]  }
 0x8ea   : > { %8313 = vmatprep.subr.bf16.mxu1 %v11047_v48  ;;  %v11128_v48 = vld [vmem:[%s14800_s2 + $0x124] ss:$16 sps:$4 sm:$0xff]  }
 0x8eb   : > { %7310 = vmatmul.mubr.bf16.vlgmr.msra.gmra.mxu0 %v14062_v63 }
 0x8ec   : > { %7351 = vmatmul.mubr.bf16.vlgmr.msra.gmra.mxu1 %v14062_v63  ;;  %8273 = vmatpush1.bf16.msra.mxu0 %v11042_v0  ;;  %v11056_v63 = vld [vmem:[%s14800_s2 + $0xa4] ss:$16 sps:$4 sm:$0xff]  }
 0x8ed   : > { %8314 = vmatpush1.bf16.msra.mxu1 %v11045_v24  ;;  %8274 = vmatprep.subr.bf16.mxu0 %v11050_v16  ;;  %v11125_v0 = vld [vmem:[%s14800_s2 + $0x344] ss:$16 sps:$4 sm:$0xff]   ;;  %v11123_v24 = vld [vmem:[%s14800_s2 + $0x340] ss:$16 sps:$4 sm:$0xff]  }
 0x8ee   : > { %8315 = vmatprep.subr.bf16.mxu1 %v11053_v10  ;;  %v11131_v16 = vld [vmem:[%s14800_s2 + $0x324] ss:$16 sps:$4 sm:$0xff]   ;;  %v11126_v10 = vld [vmem:[%s14800_s2 + $0x120] ss:$16 sps:$4 sm:$0xff]  }
 0x8f0   : > { %8275 = vmatpush1.bf16.msra.mxu0 %v11048_v34  ;;  %v11129_v34 = vld [vmem:[%s14800_s2 + $0x320] ss:$16 sps:$4 sm:$0xff]  }
 0x8f1   : > { %8316 = vmatpush1.bf16.msra.mxu1 %v11051_v59  ;;  %8276 = vmatprep.subr.bf16.mxu0 %v11056_v63  ;;  %v11134_v59 = vld [vmem:[%s14800_s2 + $0x104] ss:$16 sps:$4 sm:$0xff]  }
 0x8f2   : > { %8317 = vmatprep.subr.bf16.mxu1 %v11059_v51  ;;  %v11137_v63 = vld [vmem:[%s14800_s2 + $0x304] ss:$16 sps:$4 sm:$0xff]   ;;  %v11132_v51 = vld [vmem:[%s14800_s2 + $0x100] ss:$16 sps:$4 sm:$0xff]  }
 0x8f4   : > { %8277 = vmatpush1.bf16.msra.mxu0 %v11054_v56  ;;  %v11135_v56 = vld [vmem:[%s14800_s2 + $0x300] ss:$16 sps:$4 sm:$0xff]  }
 0x8f5   : > { %8318 = vmatpush1.bf16.msra.mxu1 %v11057_v46  ;;  %8278 = vmatprep.subr.bf16.mxu0 %v11062_v13  ;;  %v11140_v46 = vld [vmem:[%s14800_s2 + $0xec] ss:$16 sps:$4 sm:$0xff]  }
 0x8f6   : > { %8319 = vmatprep.subr.bf16.mxu1 %v11065_v2  ;;  %v11143_v13 = vld [vmem:[%s14800_s2 + $0x2ec] ss:$16 sps:$4 sm:$0xff]  }
 0x8f8   : > { %8279 = vmatpush1.bf16.msra.mxu0 %v11060_v18 }
 0x8f9   : > { %8320 = vmatpush1.bf16.msra.mxu1 %v11063_v38  ;;  %8280 = vmatprep.subr.bf16.mxu0 %v11068_v47 }
 0x8fa   : > { %8321 = vmatprep.subr.bf16.mxu1 %v11071_v17 }
 0x8fc   : > { %8281 = vmatpush1.bf16.msra.mxu0 %v11066_v8 }
 0x8fd   : > { %8322 = vmatpush1.bf16.msra.mxu1 %v11069_v49  ;;  %8282 = vmatprep.subr.bf16.mxu0 %v11074_v40 }
 0x8fe   : > { %8323 = vmatprep.subr.bf16.mxu1 %v11077_v61 }
 0x900   : > { %8283 = vmatpush1.bf16.msra.mxu0 %v11072_v43 }
 0x901   : > { %8324 = vmatpush1.bf16.msra.mxu1 %v11075_v42  ;;  %8284 = vmatprep.subr.bf16.mxu0 %v11080_v27 }
 0x902   : > { %8325 = vmatprep.subr.bf16.mxu1 %v11083_v33 }
 0x904   : > { %8285 = vmatpush1.bf16.msra.mxu0 %v11078_v31 }
 0x905   : > { %8326 = vmatpush1.bf16.msra.mxu1 %v11081_v60  ;;  %8286 = vmatprep.subr.bf16.mxu0 %v11086_v23 }
 0x906   : > { %8327 = vmatprep.subr.bf16.mxu1 %v11089_v7 }
 0x908   : > { %8287 = vmatpush1.bf16.msra.mxu0 %v11084_v37 }
 0x909   : > { %8328 = vmatpush1.bf16.msra.mxu1 %v11087_v3  ;;  %8288 = vmatprep.subr.bf16.mxu0 %v11092_v1  ;;  %v6122_v3 = vld [vmem:[%s14801_s3] sm:$0xf]  ;;  %s14804_s3 = sld [smem:[#allocation25_spill]] }
 0x90a   : > { %8329 = vmatprep.subr.bf16.mxu1 %v11095_v35 }
 0x90c   : > { %8289 = vmatpush2.bf16.msra.mxu0 %v11090_v41  ;;  %v6123_v41 = vld [vmem:[%s14802_s5] sm:$0xf]  ;;  %s14803_s5 = sld [smem:[#allocation26_spill]] }
 0x90d   : > { %8330 = vmatpush2.bf16.msra.mxu1 %v11093_v45  ;;  %8290 = vmatprep.subr.bf16.mxu0 %v11098_v55 }
 0x90e   : > { %8331 = vmatprep.subr.bf16.mxu1 %v11101_v19  ;;  %v7424_v19 = vrot.slane %v6123_v41, %v13541_v57 }
 0x910   : > { %8291 = vmatpush2.bf16.msra.mxu0 %v11096_v54 }
 0x911   : > { %8332 = vmatpush2.bf16.msra.mxu1 %v11099_v32  ;;  %8292 = vmatprep.subr.bf16.mxu0 %v11104_v53  ;;  %v7399_v32 = vrot.slane %v6122_v3, %v13541_v57 }
 0x912   : > { %8333 = vmatprep.subr.bf16.mxu1 %v11107_v20 }
 0x914   : > { %8293 = vmatpush2.bf16.msra.mxu0 %v11102_v30 }
 0x915   : > { %8334 = vmatpush2.bf16.msra.mxu1 %v11105_v5  ;;  %8294 = vmatprep.subr.bf16.mxu0 %v11110_v25  ;;  %v14303_v25 = vsub.s32 3, %v12334_v52 }
 0x916   : > { %8335 = vmatprep.subr.bf16.mxu1 %v11113_v58 }
 0x918   : > { %8295 = vmatpush2.bf16.msra.mxu0 %v11108_v36 }
 0x919   : > { %8336 = vmatpush2.bf16.msra.mxu1 %v11111_v9  ;;  %8296 = vmatprep.subr.bf16.mxu0 %v11116_v50  ;;  %v7403_v50 = vrot.slane %v6122_v3, %v13544_v21 }
 0x91a   : > { %8337 = vmatprep.subr.bf16.mxu1 %v11119_v29 }
 0x91c   : > { %8297 = vmatpush2.bf16.msra.mxu0 %v11114_v15 }
 0x91d   : > { %8338 = vmatpush2.bf16.msra.mxu1 %v11117_v44  ;;  %8298 = vmatprep.subr.bf16.mxu0 %v11122_v22 }
 0x91e   : > { %8339 = vmatprep.subr.bf16.mxu1 %v11125_v0 }
 0x920   : > { %8299 = vmatpush2.bf16.msra.mxu0 %v11120_v14 }
 0x921   : > { %8340 = vmatpush2.bf16.msra.mxu1 %v11123_v24  ;;  %8300 = vmatprep.subr.bf16.mxu0 %v11128_v48 }
 0x922   : > { %8341 = vmatprep.subr.bf16.mxu1 %v11131_v16 }
 0x924   : > { %8301 = vmatpush2.bf16.msra.mxu0 %v11126_v10 }
 0x925   : > { %8342 = vmatpush2.bf16.msra.mxu1 %v11129_v34  ;;  %8302 = vmatprep.subr.bf16.mxu0 %v11134_v59 }
 0x926   : > { %8343 = vmatprep.subr.bf16.mxu1 %v11137_v63 }
 0x928   : > { %8303 = vmatpush2.bf16.msra.mxu0 %v11132_v51 }
 0x929   : > { %8344 = vmatpush2.bf16.msra.mxu1 %v11135_v56  ;;  %8354 = vmatprep.subr.bf16.mxu0 %v11140_v46  ;;  %v7411_v56 = vrot.slane %v6122_v3, %v14303_v25 }
 0x92a   : > { %8395 = vmatprep.subr.bf16.mxu1 %v11143_v13 }
 0x92b   : > { %v14236_v6 = vpop.f32.mrf.mxu0  ;;  %v14238_v4 = vpop.f32.mrf.mxu1 }
 0x92c   : > { %v6932_v61 = vrot.slane %v14236_v6, 3  ;;  %v6940_v43 = vrot.slane %v14236_v6, 7  ;;  %v6934_v42 = vrot.slane %v14238_v4, 3  ;;  %v6942_v27 = vrot.slane %v14238_v4, 7 }
 0x92d   : > { %v14240_v11 = vpop.f32.mrf.mxu0  ;;  %v14242_v26 = vpop.f32.mrf.mxu1 }
 0x92e   : > { %v6933_v33 = vrot.slane %v14240_v11, 3  ;;  %v6941_v31 = vrot.slane %v14240_v11, 7  ;;  %v6935_v60 = vrot.slane %v14242_v26, 3  ;;  %v6943_v23 = vrot.slane %v14242_v26, 7 }
 0x92f   : > { %v6482_v62 = vpop.f32.mrf.mxu0  ;;  %v6523_v28 = vpop.f32.mrf.mxu1  ;;  %v6949_v45 = vsel %vm6948_vm9, %v6932_v61, %v6940_v43  ;;  %v14289_v26 = vsub.s32 2, %v12334_v52 }
 0x930   : > { %v6951_v62 = vsel %vm6948_vm9, %v6934_v42, %v6942_v27  ;;  %v6950_v11 = vsel %vm6948_vm9, %v6933_v33, %v6941_v31  ;;  %v6953_v54 = vsel %vm3145_vm2, 0.0, %v6949_v45 }
 0x931   : > { %v6483_v39 = vpop.f32.mrf.mxu0  ;;  %v6524_v12 = vpop.f32.mrf.mxu1  ;;  %v6955_v20 = vsel %vm3145_vm2, 0.0, %v6951_v62  ;;  %v6954_v5 = vsel %vm3145_vm2, 0.0, %v6950_v11  ;;  %v7407_v22 = vrot.slane %v6122_v3, %v14289_v26  ;;  %v7432_v16 = vrot.slane %v6123_v41, %v14289_v26 }
 0x932   : > { %v6952_v12 = vsel %vm6948_vm9, %v6935_v60, %v6943_v23 }
 0x933   : > { %v6956_v29 = vsel %vm3145_vm2, 0.0, %v6952_v12 }
 0x96b   : > { %v6880_v2 = vpop.f32.mrf.mxu0  ;;  %v6921_v18 = vpop.f32.mrf.mxu1 }
 0x96c   : > { %v7364_v7 = vrot.slane %v6880_v2, 1  ;;  %v7372_v37 = vrot.slane %v6880_v2, 5  ;;  %v7366_v1 = vrot.slane %v6921_v18, 1  ;;  %v7374_v35 = vrot.slane %v6921_v18, 5 }
 0x96d   : > { %v6882_v38 = vpop.f32.mrf.mxu0  ;;  %v6923_v47 = vpop.f32.mrf.mxu1  ;;  %v7428_v18 = vrot.slane %v6123_v41, %v13544_v21 }
 0x96e   : > { %v7365_v6 = vrot.slane %v6882_v38, 1  ;;  %v7373_v4 = vrot.slane %v6882_v38, 5  ;;  %v7367_v28 = vrot.slane %v6923_v47, 1  ;;  %v7375_v39 = vrot.slane %v6923_v47, 5 }
 0x96f   : > { %v6884_v17 = vpop.f32.mrf.mxu0  ;;  %v6925_v8 = vpop.f32.mrf.mxu1  ;;  %v7381_v55 = vsel %vm7380_vm11, %v7364_v7, %v7372_v37  ;;  %v7383_v30 = vsel %vm7380_vm11, %v7366_v1, %v7374_v35 }
 0x970   : > { %v7382_v9 = vsel %vm7380_vm11, %v7365_v6, %v7373_v4  ;;  %v7387_v15 = vsel %vm7359_vm10, 0.0, %v7381_v55  ;;  %v7384_v14 = vsel %vm7380_vm11, %v7367_v28, %v7375_v39  ;;  %v7389_v48 = vsel %vm7359_vm10, 0.0, %v7383_v30 }
 0x971   : > { %v6885_v49 = vpop.f32.mrf.mxu0  ;;  %v6926_v40 = vpop.f32.mrf.mxu1  ;;  %v7388_v63 = vsel %vm7359_vm10, 0.0, %v7382_v9  ;;  %v7390_v38 = vsel %vm7359_vm10, 0.0, %v7384_v14  ;;  %v11138_v14 = vld [vmem:[%s14800_s2 + $0xe8] ss:$16 sps:$4 sm:$0xff]  }
 0x972   : > { %v7436_v49 = vrot.slane %v6123_v41, %v14303_v25 }
 0x9ab   : > { %v7311_v53 = vpop.f32.mrf.mxu0 }
 0x9ac   : > { %v7312_v58 = vadd.f32 %v7311_v53, %v6953_v54  ;;  %v7352_v36 = vpop.f32.mrf.mxu1 }
 0x9ad   : > { %v7353_v44 = vadd.f32 %v7352_v36, %v6955_v20  ;;  %v7313_v0 = vpop.f32.mrf.mxu0 }
 0x9ae   : > { %v7391_v24 = vadd.f32 %v7387_v15, %v7312_v58  ;;  %v7314_v10 = vadd.f32 %v7313_v0, %v6954_v5  ;;  %v7354_v34 = vpop.f32.mrf.mxu1 }
 0x9af   : > { %v7393_v59 = vadd.f32 %v7389_v48, %v7353_v44  ;;  %v7355_v51 = vadd.f32 %v7354_v34, %v6956_v29  ;;  %v7315_v46 = vpop.f32.mrf.mxu0  ;;  %v11141_v48 = vld [vmem:[%s14800_s2 + $0x2e8] ss:$16 sps:$4 sm:$0xff]   ;;  %v11146_v34 = vld [vmem:[%s14800_s2 + $0xcc] ss:$16 sps:$4 sm:$0xff]  }
 0x9b0   : > { %v7416_v13 = vmul.f32 %v7399_v32, %v7391_v24  ;;  %v7392_v2 = vadd.f32 %v7388_v63, %v7314_v10  ;;  %v7356_v47 = vpop.f32.mrf.mxu1  ;;  %v11144_v63 = vld [vmem:[%s14800_s2 + $0xc8] ss:$16 sps:$4 sm:$0xff]   ;;  %v11155_v46 = vld [vmem:[%s14800_s2 + $0x2ac] ss:$16 sps:$4 sm:$0xff]  }
 0x9b1   : > { %v7418_v17 = vmul.f32 %v7407_v22, %v7393_v59  ;;  %v7394_v8 = vadd.f32 %v7390_v38, %v7355_v51  ;;  %v7316_v40 = vpop.f32.mrf.mxu0  ;;  %v11149_v59 = vld [vmem:[%s14800_s2 + $0x2cc] ss:$16 sps:$4 sm:$0xff]   ;;  %v11147_v51 = vld [vmem:[%s14800_s2 + $0x2c8] ss:$16 sps:$4 sm:$0xff]  }
 0x9b2   : > { %v7441_v61 = vadd.f32 %v7424_v19, %v7416_v13  ;;  %v7417_v43 = vmul.f32 %v7403_v50, %v7392_v2  ;;  %v7357_v42 = vpop.f32.mrf.mxu1  ;;  %v11150_v13 = vld [vmem:[%s14800_s2 + $0xa8] ss:$16 sps:$4 sm:$0xff]   ;;  %v11161_v38 = vld [vmem:[%s14800_s2 + $0x28c] ss:$16 sps:$4 sm:$0xff]  }
 0x9b3   : > { %v7443_v27 = vadd.f32 %v7432_v16, %v7418_v17  ;;  %v7419_v33 = vmul.f32 %v7411_v56, %v7394_v8  ;;  %v11152_v56 = vld [vmem:[%s14800_s2 + $0xac] ss:$16 sps:$4 sm:$0xff]   ;;  %v11153_v2 = vld [vmem:[%s14800_s2 + $0x2a8] ss:$16 sps:$4 sm:$0xff]  }
 0x9b4   : > { %v7445_v31 = vmax.f32 %v7441_v61, 0.0  ;;  %v7442_v60 = vadd.f32 %v7428_v18, %v7417_v43  ;;  %v11158_v18 = vld [vmem:[%s14800_s2 + $0x8c] ss:$16 sps:$4 sm:$0xff]   ;;  %v11156_v47 = vld [vmem:[%s14800_s2 + $0x88] ss:$16 sps:$4 sm:$0xff]  }
 0x9b5   : > { %v7447_v23 = vmax.f32 %v7443_v27, 0.0  ;;  %v7444_v7 = vadd.f32 %v7436_v49, %v7419_v33  ;;  %v11159_v17 = vld [vmem:[%s14800_s2 + $0x288] ss:$16 sps:$4 sm:$0xff]   ;;  %v11164_v8 = vld [vmem:[%s14800_s2 + $0x6c] ss:$16 sps:$4 sm:$0xff]  }
 0x9b6   : > { %v7450_v37 = vsel %vm7449_vm12, %v7445_v31, -inf  ;;  %v7446_v52 = vmax.f32 %v7442_v60, 0.0  ;;  %v11167_v49 = vld [vmem:[%s14800_s2 + $0x26c] ss:$16 sps:$4 sm:$0xff]   ;;  %v11162_v40 = vld [vmem:[%s14800_s2 + $0x68] ss:$16 sps:$4 sm:$0xff]  }
 0x9b7   : > { %v7451_v3 = vrot.slane %v7450_v37, 4  ;;  %v7464_v1 = vsel %vm7449_vm12, %v7447_v23, -inf  ;;  %v7448_v35 = vmax.f32 %v7444_v7, 0.0  ;;  %v11165_v61 = vld [vmem:[%s14800_s2 + $0x268] ss:$16 sps:$4 sm:$0xff]  }
 0x9b8   : > { %v7465_v45 = vrot.slane %v7464_v1, 4  ;;  %v7457_v41 = vsel %vm7449_vm12, %v7446_v52, -inf  ;;  %v11170_v43 = vld [vmem:[%s14800_s2 + $0x4c] ss:$16 sps:$4 sm:$0xff]   ;;  %v11168_v27 = vld [vmem:[%s14800_s2 + $0x48] ss:$16 sps:$4 sm:$0xff]  }
 0x9b9   : > { %v7452_v6 = vmax.f32 %v7450_v37, %v7451_v3  ;;  %v7458_v4 = vrot.slane %v7457_v41, 4  ;;  %v7471_v62 = vsel %vm7449_vm12, %v7448_v35, -inf  ;;  %v11173_v42 = vld [vmem:[%s14800_s2 + $0x24c] ss:$16 sps:$4 sm:$0xff]   ;;  %v11171_v33 = vld [vmem:[%s14800_s2 + $0x248] ss:$16 sps:$4 sm:$0xff]  }
 0x9ba   : > { %v7466_v11 = vmax.f32 %v7464_v1, %v7465_v45  ;;  %v7472_v28 = vrot.slane %v7471_v62, 4  ;;  %v11176_v31 = vld [vmem:[%s14800_s2 + $0x2c] ss:$16 sps:$4 sm:$0xff]   ;;  %v11174_v23 = vld [vmem:[%s14800_s2 + $0x28] ss:$16 sps:$4 sm:$0xff]  }
 0x9bb   : > { %v7453_v39 = vrot.slane %v7452_v6, 2  ;;  %v7459_v12 = vmax.f32 %v7457_v41, %v7458_v4  ;;  %v11179_v60 = vld [vmem:[%s14800_s2 + $0x22c] ss:$16 sps:$4 sm:$0xff]   ;;  %v11177_v7 = vld [vmem:[%s14800_s2 + $0x228] ss:$16 sps:$4 sm:$0xff]  }
 0x9bc   : > { %v7467_v54 = vrot.slane %v7466_v11, 2  ;;  %v7473_v55 = vmax.f32 %v7471_v62, %v7472_v28  ;;  %v11182_v37 = vld [vmem:[%s14800_s2 + $0xc] ss:$16 sps:$4 sm:$0xff]   ;;  %v11180_v3 = vld [vmem:[%s14800_s2 + $0x8] ss:$16 sps:$4 sm:$0xff]  }
 0x9bd   : > { %v7454_v32 = vmax.f32 %v7452_v6, %v7453_v39  ;;  %v7460_v19 = vrot.slane %v7459_v12, 2  ;;  %v11185_v52 = vld [vmem:[%s14800_s2 + $0x20c] ss:$16 sps:$4 sm:$0xff]   ;;  %v11183_v1 = vld [vmem:[%s14800_s2 + $0x208] ss:$16 sps:$4 sm:$0xff]  }
 0x9be   : > { %v7468_v53 = vmax.f32 %v7466_v11, %v7467_v54  ;;  %v7474_v20 = vrot.slane %v7473_v55, 2  ;;  %v11188_v35 = vld [vmem:[%s14800_s2 + $0x1ec] ss:$16 sps:$4 sm:$0xff]   ;;  %v11186_v41 = vld [vmem:[%s14800_s2 + $0x1e8] ss:$16 sps:$4 sm:$0xff]  }
 0x9bf   : > { %v7455_v30 = vrot.slane %v7454_v32, 1  ;;  %v7461_v5 = vmax.f32 %v7459_v12, %v7460_v19  ;;  %v11191_v45 = vld [vmem:[%s14800_s2 + $0x3ec] ss:$16 sps:$4 sm:$0xff]   ;;  %v11189_v6 = vld [vmem:[%s14800_s2 + $0x3e8] ss:$16 sps:$4 sm:$0xff]  }
 0x9c0   : > { %v7469_v58 = vrot.slane %v7468_v53, 1  ;;  %v7475_v36 = vmax.f32 %v7473_v55, %v7474_v20  ;;  %v11194_v4 = vld [vmem:[%s14800_s2 + $0x1cc] ss:$16 sps:$4 sm:$0xff]   ;;  %v11192_v11 = vld [vmem:[%s14800_s2 + $0x1c8] ss:$16 sps:$4 sm:$0xff]  }
 0x9c1   : > { %v7462_v9 = vrot.slane %v7461_v5, 1  ;;  %v7456_v29 = vmax.f32 %v7454_v32, %v7455_v30  ;;  %v11197_v62 = vld [vmem:[%s14800_s2 + $0x3cc] ss:$16 sps:$4 sm:$0xff]   ;;  %v11195_v28 = vld [vmem:[%s14800_s2 + $0x3c8] ss:$16 sps:$4 sm:$0xff]  }
 0x9c2   : > { %v7476_v50 = vrot.slane %v7475_v36, 1  ;;  %v7470_v44 = vmax.f32 %v7468_v53, %v7469_v58  ;;  %v11200_v39 = vld [vmem:[%s14800_s2 + $0x1ac] ss:$16 sps:$4 sm:$0xff]   ;;  %v11198_v54 = vld [vmem:[%s14800_s2 + $0x1a8] ss:$16 sps:$4 sm:$0xff]  }
 0x9c3   : > { %v7463_v15 = vmax.f32 %v7461_v5, %v7462_v9  ;;  %v14329_v16 = vpack.c.bf16 %v7456_v29, %v7456_v29  ;;  %v11203_v12 = vld [vmem:[%s14800_s2 + $0x3ac] ss:$16 sps:$4 sm:$0xff]   ;;  %v11201_v55 = vld [vmem:[%s14800_s2 + $0x3a8] ss:$16 sps:$4 sm:$0xff]  }
 0x9c4   : > { %v7477_v22 = vmax.f32 %v7475_v36, %v7476_v50  ;;  %v14331_v10 = vpack.c.bf16 %v7470_v44, %v7470_v44  ;;  %v11206_v32 = vld [vmem:[%s14800_s2 + $0x18c] ss:$16 sps:$4 sm:$0xff]   ;;  %v11204_v53 = vld [vmem:[%s14800_s2 + $0x188] ss:$16 sps:$4 sm:$0xff]  }
 0x9c5   : > { %v7479_v0 = vpack.c.bf16 %v7463_v15, %v7463_v15  ;;  %v11209_v19 = vld [vmem:[%s14800_s2 + $0x38c] ss:$16 sps:$4 sm:$0xff]   ;;  %v11207_v20 = vld [vmem:[%s14800_s2 + $0x388] ss:$16 sps:$4 sm:$0xff]  }
 0x9c6   : > { %v7481_v24 = vpack.c.bf16 %v7477_v22, %v7477_v22  ;;  %v11212_v30 = vld [vmem:[%s14800_s2 + $0x16c] ss:$16 sps:$4 sm:$0xff]   ;;  %v11210_v58 = vld [vmem:[%s14800_s2 + $0x168] ss:$16 sps:$4 sm:$0xff]  }
 0x9c7   : > { %8304 = vmatprep.mubr.bf16.mxu0 %v7479_v0  ;;  %v11215_v5 = vld [vmem:[%s14800_s2 + $0x36c] ss:$16 sps:$4 sm:$0xff]   ;;  %v11213_v36 = vld [vmem:[%s14800_s2 + $0x368] ss:$16 sps:$4 sm:$0xff]  }
 0x9c8   : > { %8345 = vmatprep.mubr.bf16.mxu1 %v7481_v24  ;;  %8305 = vmatmul.mubr.bf16.vlgmr.msra.gmra.mxu0 %v14329_v16  ;;  %v11218_v9 = vld [vmem:[%s14800_s2 + $0x14c] ss:$16 sps:$4 sm:$0xff]   ;;  %v11216_v29 = vld [vmem:[%s14800_s2 + $0x148] ss:$16 sps:$4 sm:$0xff]  }
 0x9c9   : > { %8346 = vmatmul.mubr.bf16.vlgmr.msra.gmra.mxu1 %v14331_v10  ;;  %8355 = vmatpush1.bf16.msra.mxu0 %v11138_v14  ;;  %v11221_v50 = vld [vmem:[%s14800_s2 + $0x34c] ss:$16 sps:$4 sm:$0xff]   ;;  %v11219_v15 = vld [vmem:[%s14800_s2 + $0x348] ss:$16 sps:$4 sm:$0xff]  }
 0x9ca   : > { %8396 = vmatpush1.bf16.msra.mxu1 %v11141_v48  ;;  %8386 = vmatprep.mubr.bf16.mxu0 %v7479_v0  ;;  %v11224_v44 = vld [vmem:[%s14800_s2 + $0x12c] ss:$16 sps:$4 sm:$0xff]   ;;  %v11222_v0 = vld [vmem:[%s14800_s2 + $0x128] ss:$16 sps:$4 sm:$0xff]  }
 0x9cb   : > { %8427 = vmatprep.mubr.bf16.mxu1 %v7481_v24  ;;  %8356 = vmatprep.subr.bf16.mxu0 %v11146_v34  ;;  %v11227_v22 = vld [vmem:[%s14800_s2 + $0x32c] ss:$16 sps:$4 sm:$0xff]   ;;  %v11225_v14 = vld [vmem:[%s14800_s2 + $0x328] ss:$16 sps:$4 sm:$0xff]  }
 0x9cc   : > { %8397 = vmatprep.subr.bf16.mxu1 %v11149_v59  ;;  %v11230_v24 = vld [vmem:[%s14800_s2 + $0x10c] ss:$16 sps:$4 sm:$0xff]   ;;  %v11228_v34 = vld [vmem:[%s14800_s2 + $0x108] ss:$16 sps:$4 sm:$0xff]  }
 0x9cd   : > { %8357 = vmatpush1.bf16.msra.mxu0 %v11144_v63  ;;  %v11233_v48 = vld [vmem:[%s14800_s2 + $0x30c] ss:$16 sps:$4 sm:$0xff]   ;;  %v11231_v59 = vld [vmem:[%s14800_s2 + $0x308] ss:$16 sps:$4 sm:$0xff]   ;;  %s9858_s2 = sshll.u32 %s11641_s0, 4 }
 0x9ce   : > { %8398 = vmatpush1.bf16.msra.mxu1 %v11147_v51  ;;  %8358 = vmatprep.subr.bf16.mxu0 %v11152_v56  ;;  %v11236_v63 = vld [vmem:[%s14803_s5 + $0x74] ss:$8 sps:$4 sm:$0xff]   ;;  %v11234_v51 = vld [vmem:[%s14803_s5 + $0x70] ss:$8 sps:$4 sm:$0xff]   ;;  %v11239_v56 = vld [vmem:[%s14803_s5 + $0x64] ss:$8 sps:$4 sm:$0xff]   ;;  %s14489_s9 = scalar_lea.hbm %s11618_s4, %s9858_s2 }
 0x9cf   : > { %8399 = vmatprep.subr.bf16.mxu1 %v11155_v46  ;;  %v11237_v46 = vld [vmem:[%s14803_s5 + $0x60] ss:$8 sps:$4 sm:$0xff]  }
 0x9d1   : > { %8359 = vmatpush1.bf16.msra.mxu0 %v11150_v13  ;;  %v11242_v13 = vld [vmem:[%s14803_s5 + $0x54] ss:$8 sps:$4 sm:$0xff]  }
 0x9d2   : > { %8400 = vmatpush1.bf16.msra.mxu1 %v11153_v2  ;;  %8360 = vmatprep.subr.bf16.mxu0 %v11158_v18  ;;  %v11240_v2 = vld [vmem:[%s14803_s5 + $0x50] ss:$8 sps:$4 sm:$0xff]   ;;  %v11245_v18 = vld [vmem:[%s14803_s5 + $0x44] ss:$8 sps:$4 sm:$0xff]  }
 0x9d3   : > { %8401 = vmatprep.subr.bf16.mxu1 %v11161_v38  ;;  %v11243_v38 = vld [vmem:[%s14803_s5 + $0x40] ss:$8 sps:$4 sm:$0xff]  }
 0x9d5   : > { %8361 = vmatpush1.bf16.msra.mxu0 %v11156_v47  ;;  %v11282_v47 = vld [vmem:[%s14803_s5 + $0x170] ss:$8 sps:$4 sm:$0xff]  }
 0x9d6   : > { %8402 = vmatpush1.bf16.msra.mxu1 %v11159_v17  ;;  %8362 = vmatprep.subr.bf16.mxu0 %v11164_v8  ;;  %v11287_v17 = vld [vmem:[%s14803_s5 + $0x164] ss:$8 sps:$4 sm:$0xff]   ;;  %v11246_v8 = vld [vmem:[%s14803_s5 + $0x30] ss:$8 sps:$4 sm:$0xff]  }
 0x9d7   : > { %8403 = vmatprep.subr.bf16.mxu1 %v11167_v49  ;;  %v11251_v49 = vld [vmem:[%s14803_s5 + $0x24] ss:$8 sps:$4 sm:$0xff]  }
 0x9d9   : > { %8363 = vmatpush1.bf16.msra.mxu0 %v11162_v40  ;;  %v11285_v40 = vld [vmem:[%s14803_s5 + $0x160] ss:$8 sps:$4 sm:$0xff]  }
 0x9da   : > { %8404 = vmatpush1.bf16.msra.mxu1 %v11165_v61  ;;  %8364 = vmatprep.subr.bf16.mxu0 %v11170_v43  ;;  %v11290_v61 = vld [vmem:[%s14803_s5 + $0x154] ss:$8 sps:$4 sm:$0xff]   ;;  %v11249_v43 = vld [vmem:[%s14803_s5 + $0x20] ss:$8 sps:$4 sm:$0xff]  }
 0x9db   : > { %8405 = vmatprep.subr.bf16.mxu1 %v11173_v42  ;;  %v11254_v42 = vld [vmem:[%s14803_s5 + $0x14] ss:$8 sps:$4 sm:$0xff]  }
 0x9dd   : > { %8365 = vmatpush1.bf16.msra.mxu0 %v11168_v27  ;;  %v11288_v27 = vld [vmem:[%s14803_s5 + $0x150] ss:$8 sps:$4 sm:$0xff]  }
 0x9de   : > { %8406 = vmatpush1.bf16.msra.mxu1 %v11171_v33  ;;  %8366 = vmatprep.subr.bf16.mxu0 %v11176_v31  ;;  %v11293_v33 = vld [vmem:[%s14803_s5 + $0x144] ss:$8 sps:$4 sm:$0xff]   ;;  %v11252_v31 = vld [vmem:[%s14803_s5 + $0x10] ss:$8 sps:$4 sm:$0xff]  }
 0x9df   : > { %8407 = vmatprep.subr.bf16.mxu1 %v11179_v60  ;;  %v11257_v60 = vld [vmem:[%s14803_s5 + $0x4] ss:$8 sps:$4 sm:$0xff]  }
 0x9e1   : > { %8367 = vmatpush1.bf16.msra.mxu0 %v11174_v23  ;;  %v11291_v23 = vld [vmem:[%s14803_s5 + $0x140] ss:$8 sps:$4 sm:$0xff]  }
 0x9e2   : > { %8408 = vmatpush1.bf16.msra.mxu1 %v11177_v7  ;;  %8368 = vmatprep.subr.bf16.mxu0 %v11182_v37  ;;  %v11296_v7 = vld [vmem:[%s14803_s5 + $0x134] ss:$8 sps:$4 sm:$0xff]   ;;  %v11255_v37 = vld [vmem:[%s14803_s5] ss:$8 sps:$4 sm:$0xff]  }
 0x9e3   : > { %8409 = vmatprep.subr.bf16.mxu1 %v11185_v52  ;;  %v11260_v52 = vld [vmem:[%s14803_s5 + $0xf4] ss:$8 sps:$4 sm:$0xff]  }
 0x9e5   : > { %8369 = vmatpush1.bf16.msra.mxu0 %v11180_v3  ;;  %v11294_v3 = vld [vmem:[%s14803_s5 + $0x130] ss:$8 sps:$4 sm:$0xff]  }
 0x9e6   : > { %8410 = vmatpush1.bf16.msra.mxu1 %v11183_v1  ;;  %8370 = vmatprep.subr.bf16.mxu0 %v11188_v35  ;;  %v11299_v1 = vld [vmem:[%s14803_s5 + $0x124] ss:$8 sps:$4 sm:$0xff]   ;;  %v11258_v35 = vld [vmem:[%s14803_s5 + $0xf0] ss:$8 sps:$4 sm:$0xff]  }
 0x9e7   : > { %8411 = vmatprep.subr.bf16.mxu1 %v11191_v45  ;;  %v11263_v45 = vld [vmem:[%s14803_s5 + $0xe4] ss:$8 sps:$4 sm:$0xff]  }
 0x9e9   : > { %8371 = vmatpush2.bf16.msra.mxu0 %v11186_v41  ;;  %v11297_v41 = vld [vmem:[%s14803_s5 + $0x120] ss:$8 sps:$4 sm:$0xff]  }
 0x9ea   : > { %8412 = vmatpush2.bf16.msra.mxu1 %v11189_v6  ;;  %8372 = vmatprep.subr.bf16.mxu0 %v11194_v4  ;;  %v11302_v6 = vld [vmem:[%s14803_s5 + $0x114] ss:$8 sps:$4 sm:$0xff]   ;;  %v11261_v4 = vld [vmem:[%s14803_s5 + $0xe0] ss:$8 sps:$4 sm:$0xff]  }
 0x9eb   : > { %8413 = vmatprep.subr.bf16.mxu1 %v11197_v62  ;;  %v11266_v62 = vld [vmem:[%s14803_s5 + $0xd4] ss:$8 sps:$4 sm:$0xff]  }
 0x9ed   : > { %8373 = vmatpush2.bf16.msra.mxu0 %v11192_v11  ;;  %v11300_v11 = vld [vmem:[%s14803_s5 + $0x110] ss:$8 sps:$4 sm:$0xff]  }
 0x9ee   : > { %8414 = vmatpush2.bf16.msra.mxu1 %v11195_v28  ;;  %8374 = vmatprep.subr.bf16.mxu0 %v11200_v39  ;;  %v11305_v28 = vld [vmem:[%s14803_s5 + $0x104] ss:$8 sps:$4 sm:$0xff]   ;;  %v11264_v39 = vld [vmem:[%s14803_s5 + $0xd0] ss:$8 sps:$4 sm:$0xff]  }
 0x9ef   : > { %8415 = vmatprep.subr.bf16.mxu1 %v11203_v12  ;;  %v11269_v12 = vld [vmem:[%s14803_s5 + $0xc4] ss:$8 sps:$4 sm:$0xff]  }
 0x9f1   : > { %8375 = vmatpush2.bf16.msra.mxu0 %v11198_v54  ;;  %v11303_v54 = vld [vmem:[%s14803_s5 + $0x100] ss:$8 sps:$4 sm:$0xff]  }
 0x9f2   : > { %8416 = vmatpush2.bf16.msra.mxu1 %v11201_v55  ;;  %8376 = vmatprep.subr.bf16.mxu0 %v11206_v32  ;;  %v11308_v55 = vld [vmem:[%s14803_s5 + $0x1f4] ss:$8 sps:$4 sm:$0xff]   ;;  %v11267_v32 = vld [vmem:[%s14803_s5 + $0xc0] ss:$8 sps:$4 sm:$0xff]  }
 0x9f3   : > { %8417 = vmatprep.subr.bf16.mxu1 %v11209_v19  ;;  %v11272_v19 = vld [vmem:[%s14803_s5 + $0xb4] ss:$8 sps:$4 sm:$0xff]  }
 0x9f5   : > { %8377 = vmatpush2.bf16.msra.mxu0 %v11204_v53  ;;  %v11306_v53 = vld [vmem:[%s14803_s5 + $0x1f0] ss:$8 sps:$4 sm:$0xff]  }
 0x9f6   : > { %8418 = vmatpush2.bf16.msra.mxu1 %v11207_v20  ;;  %8378 = vmatprep.subr.bf16.mxu0 %v11212_v30  ;;  %v11311_v20 = vld [vmem:[%s14803_s5 + $0x1e4] ss:$8 sps:$4 sm:$0xff]   ;;  %v11270_v30 = vld [vmem:[%s14803_s5 + $0xb0] ss:$8 sps:$4 sm:$0xff]  }
 0x9f7   : > { %8419 = vmatprep.subr.bf16.mxu1 %v11215_v5  ;;  %v11275_v5 = vld [vmem:[%s14803_s5 + $0xa4] ss:$8 sps:$4 sm:$0xff]  }
 0x9f9   : > { %8379 = vmatpush2.bf16.msra.mxu0 %v11210_v58  ;;  %v11309_v58 = vld [vmem:[%s14803_s5 + $0x1e0] ss:$8 sps:$4 sm:$0xff]  }
 0x9fa   : > { %8420 = vmatpush2.bf16.msra.mxu1 %v11213_v36  ;;  %8380 = vmatprep.subr.bf16.mxu0 %v11218_v9  ;;  %v11314_v36 = vld [vmem:[%s14803_s5 + $0x1d4] ss:$8 sps:$4 sm:$0xff]   ;;  %v11273_v9 = vld [vmem:[%s14803_s5 + $0xa0] ss:$8 sps:$4 sm:$0xff]  }
 0x9fb   : > { %8421 = vmatprep.subr.bf16.mxu1 %v11221_v50  ;;  %v11278_v50 = vld [vmem:[%s14803_s5 + $0x94] ss:$8 sps:$4 sm:$0xff]  }
 0x9fd   : > { %8381 = vmatpush2.bf16.msra.mxu0 %v11216_v29  ;;  %v11312_v29 = vld [vmem:[%s14803_s5 + $0x1d0] ss:$8 sps:$4 sm:$0xff]  }
 0x9fe   : > { %8422 = vmatpush2.bf16.msra.mxu1 %v11219_v15  ;;  %8382 = vmatprep.subr.bf16.mxu0 %v11224_v44  ;;  %v11317_v15 = vld [vmem:[%s14803_s5 + $0x1c4] ss:$8 sps:$4 sm:$0xff]   ;;  %v11276_v44 = vld [vmem:[%s14803_s5 + $0x90] ss:$8 sps:$4 sm:$0xff]  }
 0x9ff   : > { %8423 = vmatprep.subr.bf16.mxu1 %v11227_v22  ;;  %v11281_v22 = vld [vmem:[%s14803_s5 + $0x84] ss:$8 sps:$4 sm:$0xff]  }
 0xa01   : > { %8383 = vmatpush2.bf16.msra.mxu0 %v11222_v0  ;;  %v11315_v0 = vld [vmem:[%s14803_s5 + $0x1c0] ss:$8 sps:$4 sm:$0xff]  }
 0xa02   : > { %8424 = vmatpush2.bf16.msra.mxu1 %v11225_v14  ;;  %8384 = vmatprep.subr.bf16.mxu0 %v11230_v24  ;;  %v11320_v14 = vld [vmem:[%s14803_s5 + $0x1b4] ss:$8 sps:$4 sm:$0xff]   ;;  %v11279_v24 = vld [vmem:[%s14803_s5 + $0x80] ss:$8 sps:$4 sm:$0xff]  }
 0xa03   : > { %8425 = vmatprep.subr.bf16.mxu1 %v11233_v48  ;;  %v11318_v48 = vld [vmem:[%s14803_s5 + $0x1b0] ss:$8 sps:$4 sm:$0xff]  }
 0xa05   : > { %8385 = vmatpush2.bf16.msra.mxu0 %v11228_v34  ;;  %v11321_v34 = vld [vmem:[%s14803_s5 + $0x1a0] ss:$8 sps:$4 sm:$0xff]  }
 0xa06   : > { %8426 = vmatpush2.bf16.msra.mxu1 %v11231_v59  ;;  %8840 = vmatprep.subr.bf16.mxu0 %v11236_v63  ;;  %v11323_v59 = vld [vmem:[%s14803_s5 + $0x1a4] ss:$8 sps:$4 sm:$0xff]   ;;  %v11326_v63 = vld [vmem:[%s14803_s5 + $0x194] ss:$8 sps:$4 sm:$0xff]  }
 0xa08   : > { %8387 = vmatmul.mubr.bf16.vlgmr.msra.gmra.mxu0 %v14329_v16  ;;  %v11248_v16 = vld [vmem:[%s14803_s5 + $0x34] ss:$8 sps:$4 sm:$0xff]  }
 0xa09   : > { %8428 = vmatmul.mubr.bf16.vlgmr.msra.gmra.mxu1 %v14331_v10  ;;  %8841 = vmatpush1.bf16.msra.mxu0 %v11234_v51  ;;  %v11284_v10 = vld [vmem:[%s14803_s5 + $0x174] ss:$8 sps:$4 sm:$0xff]   ;;  %v11324_v51 = vld [vmem:[%s14803_s5 + $0x190] ss:$8 sps:$4 sm:$0xff]  }
 0xa0a   : > { %8842 = vmatprep.subr.bf16.mxu0 %v11239_v56  ;;  %8881 = vmatprep.subr.bf16.mxu1 %v11284_v10  ;;  %v11329_v56 = vld [vmem:[%s14803_s5 + $0x184] ss:$8 sps:$4 sm:$0xff]  }
 0xa0b   : > { %8882 = vmatpush1.bf16.msra.mxu1 %v11282_v47 }
 0xa0c   : > { %8883 = vmatprep.subr.bf16.mxu1 %v11287_v17 }
 0xa0d   : > { %8843 = vmatpush1.bf16.msra.mxu0 %v11237_v46  ;;  %v11327_v46 = vld [vmem:[%s14803_s5 + $0x180] ss:$8 sps:$4 sm:$0xff]  }
 0xa0e   : > { %8844 = vmatprep.subr.bf16.mxu0 %v11242_v13  ;;  %v7610_v13 = vld [vmem:[%s14804_s3] sm:$0xf]  ;;  %s1005_s3 = sand.u32 1, %s11400_s10  }
 0xa0f   : > { %8884 = vmatpush1.bf16.msra.mxu1 %v11285_v40  ;;  %s1006_s5 = scalar_lea.vmem [#allocation2], %s1005_s3 }
 0xa10   : > { %8885 = vmatprep.subr.bf16.mxu1 %v11290_v61  ;;  %s9109_s8 = sshll.u32 %s1006_s5, 4  ;;  %s9110_s8 = int_to_ptr.vmem [resolvable:$true] %s9109_s8 }
 0xa11   : > { %8845 = vmatpush1.bf16.msra.mxu0 %v11240_v2  ;;  %v8255_v2 = vrot.slane %v7610_v13, %v13541_v57  ;;  %s11348_s13 = scalar_lea.vmem %s9110_s8, 16 }
 0xa12   : > { %8846 = vmatprep.subr.bf16.mxu0 %v11245_v18  ;;  %v8259_v18 = vrot.slane %v7610_v13, %v13544_v21  ;;  %p11349_p11 = scmp.ne.s32.totalorder %s9110_s8, %s11348_s13 }
 0xa13   : > { %8886 = vmatpush1.bf16.msra.mxu1 %v11288_v27 }
 0xa14   : > { %8887 = vmatprep.subr.bf16.mxu1 %v11293_v33  ;;  %p11350_p12 = pnand %p11349_p11, %p11658_p5 }
 0xa15   : > { %8847 = vmatpush1.bf16.msra.mxu0 %v11243_v38 }
 0xa16   : > { %8848 = vmatprep.subr.bf16.mxu0 %v11248_v16  ;;  %p11351_p13 = pneg %p11350_p12 }
 0xa17   : > { %8888 = vmatpush1.bf16.msra.mxu1 %v11291_v23 }
 0xa18   : > { %8889 = vmatprep.subr.bf16.mxu1 %v11296_v7  ;;  %v8263_v7 = vrot.slane %v7610_v13, %v14289_v26 }
 0xa19   : > { %8849 = vmatpush1.bf16.msra.mxu0 %v11246_v8 }
 0xa1a   : > { %8850 = vmatprep.subr.bf16.mxu0 %v11251_v49 }
 0xa1b   : > { %8890 = vmatpush1.bf16.msra.mxu1 %v11294_v3 }
 0xa1c   : > { %8891 = vmatprep.subr.bf16.mxu1 %v11299_v1 }
 0xa1d   : > { %8851 = vmatpush1.bf16.msra.mxu0 %v11249_v43 }
 0xa1e   : > { %8852 = vmatprep.subr.bf16.mxu0 %v11254_v42 }
 0xa1f   : > { %8892 = vmatpush1.bf16.msra.mxu1 %v11297_v41 }
 0xa20   : > { %8893 = vmatprep.subr.bf16.mxu1 %v11302_v6 }
 0xa21   : > { %8853 = vmatpush1.bf16.msra.mxu0 %v11252_v31 }
 0xa22   : > { %8854 = vmatprep.subr.bf16.mxu0 %v11257_v60 }
 0xa23   : > { %8894 = vmatpush1.bf16.msra.mxu1 %v11300_v11 }
 0xa24   : > { %8895 = vmatprep.subr.bf16.mxu1 %v11305_v28 }
 0xa25   : > { %8855 = vmatpush1.bf16.msra.mxu0 %v11255_v37  ;;  %v8267_v37 = vrot.slane %v7610_v13, %v14303_v25 }
 0xa26   : > { %8856 = vmatprep.subr.bf16.mxu0 %v11260_v52 }
 0xa27   : > { %8896 = vmatpush1.bf16.msra.mxu1 %v11303_v54 }
 0xa28   : > { %8897 = vmatprep.subr.bf16.mxu1 %v11308_v55  ;;  %v11330_v55 = vld [vmem:[%s11608_s20 + $0x78] sm:$0xff]  }
 0xa29   : > { %8857 = vmatpush2.bf16.msra.mxu0 %v11258_v35 }
 0xa2a   : > { %8858 = vmatprep.subr.bf16.mxu0 %v11263_v45 }
 0xa2b   : > { %8898 = vmatpush2.bf16.msra.mxu1 %v11306_v53  ;;  %v11333_v53 = vld [vmem:[%s11608_s20 + $0x30] sm:$0xff]  }
 0xa2c   : > { %8899 = vmatprep.subr.bf16.mxu1 %v11311_v20  ;;  %v11334_v20 = vld [vmem:[%s11608_s20 + $0x68] sm:$0xff]  }
 0xa2d   : > { %8859 = vmatpush2.bf16.msra.mxu0 %v11261_v4 }
 0xa2e   : > { %8860 = vmatprep.subr.bf16.mxu0 %v11266_v62 }
 0xa2f   : > { %8900 = vmatpush2.bf16.msra.mxu1 %v11309_v58  ;;  %v11337_v58 = vld [vmem:[%s11608_s20 + $0x20] sm:$0xff]  }
 0xa30   : > { %8901 = vmatprep.subr.bf16.mxu1 %v11314_v36  ;;  %v11338_v36 = vld [vmem:[%s11608_s20 + $0x58] sm:$0xff]  }
 0xa31   : > { %8861 = vmatpush2.bf16.msra.mxu0 %v11264_v39 }
 0xa32   : > { %8862 = vmatprep.subr.bf16.mxu0 %v11269_v12 }
 0xa33   : > { %8902 = vmatpush2.bf16.msra.mxu1 %v11312_v29  ;;  %v11341_v29 = vld [vmem:[%s11608_s20 + $0x10] sm:$0xff]  }
 0xa34   : > { %8903 = vmatprep.subr.bf16.mxu1 %v11317_v15  ;;  %v11342_v15 = vld [vmem:[%s11608_s20 + $0x48] sm:$0xff]  }
 0xa35   : > { %8863 = vmatpush2.bf16.msra.mxu0 %v11267_v32  ;;  %v11331_v32 = vld [vmem:[%s11608_s20 + $0x38] sm:$0xff]  }
 0xa36   : > { %8864 = vmatprep.subr.bf16.mxu0 %v11272_v19  ;;  %v11332_v19 = vld [vmem:[%s11608_s20 + $0x70] sm:$0xff]  }
 0xa37   : > { %8904 = vmatpush2.bf16.msra.mxu1 %v11315_v0  ;;  %v11345_v0 = vld [vmem:[%s11608_s20] sm:$0xff]  }
 0xa38   : > { %8905 = vmatprep.subr.bf16.mxu1 %v11320_v14 }
 0xa39   : > { %8865 = vmatpush2.bf16.msra.mxu0 %v11270_v30  ;;  %v11335_v30 = vld [vmem:[%s11608_s20 + $0x28] sm:$0xff]  }
 0xa3a   : > { %8866 = vmatprep.subr.bf16.mxu0 %v11275_v5  ;;  %v11336_v5 = vld [vmem:[%s11608_s20 + $0x60] sm:$0xff]  }
 0xa3b   : > { %8906 = vmatpush2.bf16.msra.mxu1 %v11318_v48 }
 0xa3c   : > { %8907 = vmatprep.subr.bf16.mxu1 %v11323_v59  ;;  %v8508_v59 = vld [vmem:[%s14805_s12] sm:$0x3]  ;;  %s9097_s12 = scalar_lea.sflag [#allocation3], %s1005_s3 }
 0xa3d   : > { %8867 = vmatpush2.bf16.msra.mxu0 %v11273_v9  ;;  %v11339_v9 = vld [vmem:[%s11608_s20 + $0x18] sm:$0xff]  }
 0xa3e   : > { %8868 = vmatprep.subr.bf16.mxu0 %v11278_v50  ;;  %v11340_v50 = vld [vmem:[%s11608_s20 + $0x50] sm:$0xff]  }
 0xa3f   : > { %8908 = vmatpush2.bf16.msra.mxu1 %v11321_v34 }
 0xa40   : > { %8909 = vmatprep.subr.bf16.mxu1 %v11326_v63  ;;  %v8833_v63 = vrot.slane %v8508_v59, %v13541_v57 }
 0xa41   : > { %8869 = vmatpush2.bf16.msra.mxu0 %v11276_v44  ;;  %v11343_v44 = vld [vmem:[%s11608_s20 + $0x8] sm:$0xff]  }
 0xa42   : > { %8870 = vmatprep.subr.bf16.mxu0 %v11281_v22  ;;  %v11344_v22 = vld [vmem:[%s11608_s20 + $0x40] sm:$0xff]  }
 0xa43   : > { %8910 = vmatpush2.bf16.msra.mxu1 %v11324_v51  ;;  %v8837_v51 = vrot.slane %v8508_v59, %v13544_v21  ;;  %v8958_v21 = vld [vmem:[%s14806_s6] sm:$0x1]  ;;  %s11352_s6 = sshll.u32 %s11444_s14, 4  ;;  %s11353_s6 = int_to_ptr.vmem [resolvable:$false] %s11352_s6 }
 0xa44   : > { %8911 = vmatprep.subr.bf16.mxu1 %v11329_v56  ;;  %s11354_s0 = scalar_lea.vmem %s11353_s6, 32  ;;  %p11355_p0 = scmp.lt.s32.totalorder %s9110_s8, %s11353_s6 }
 0xa45   : > { %8871 = vmatpush2.bf16.msra.mxu0 %v11279_v24  ;;  %p11356_p1 = scmp.lt.s32.totalorder %s11354_s0, %s11348_s13 }
 0xa46   : > { %10046 = vmatprep.subr.bf16.mxu0 %v11330_v55 }
 0xa47   : > { %8912 = vmatpush2.bf16.msra.mxu1 %v11327_v46  ;;  %p11357_p2 = por %p11356_p1, %p11355_p0 }
 0xa49   : > { %p11358_p3 = pnand %p11357_p2, %p11351_p13 }
 0xa88   : > { %v8306_v38 = vpop.f32.mrf.mxu0 }
 0xa89   : > { %v8307_v16 = vadd.f32 %v8306_v38, %v8255_v2  ;;  %v8347_v47 = vpop.f32.mrf.mxu1 }
 0xa8a   : > { %v8308_v10 = vpop.f32.mrf.mxu0 }
 0xa8b   : > { %v8348_v17 = vadd.f32 %v8347_v47, %v8307_v16  ;;  %v8309_v8 = vadd.f32 %v8308_v10, %v8259_v18  ;;  %v8349_v49 = vpop.f32.mrf.mxu1 }
 0xa8c   : > { %v8310_v40 = vpop.f32.mrf.mxu0 }
 0xa8d   : > { %v8350_v61 = vadd.f32 %v8349_v49, %v8309_v8  ;;  %v8351_v43 = vpop.f32.mrf.mxu1  ;;  %v8436_v42 = vmax.f32 %v8348_v17, 0.0 }
 0xa8e   : > { %v8311_v27 = vpop.f32.mrf.mxu0 }
 0xa8f   : > { %v8437_v33 = vmax.f32 %v8350_v61, 0.0  ;;  %v8352_v31 = vpop.f32.mrf.mxu1  ;;  %v8440_v23 = vpack.c.bf16 %v8436_v42, %v8436_v42 }
 0xa91   : > { %v8441_v60 = vpack.c.bf16 %v8437_v33, %v8437_v33 }
 0xa93   : > { %8872 = vmatprep.mubr.bf16.mxu0 %v8441_v60 }
 0xa94   : > { %8873 = vmatmul.mubr.bf16.vlgmr.msra.gmra.mxu0 %v8440_v23 }
 0xa95   : > { %10047 = vmatpush3.bf16.msra.mxu0 %v11331_v32 }
 0xa96   : > { %10048 = vmatprep.subr.bf16.mxu0 %v11332_v19 }
 0xa99   : > { %10049 = vmatpush3.bf16.msra.mxu0 %v11333_v53 }
 0xa9a   : > { %10050 = vmatprep.subr.bf16.mxu0 %v11334_v20 }
 0xa9d   : > { %10051 = vmatpush3.bf16.msra.mxu0 %v11335_v30 }
 0xa9e   : > { %10052 = vmatprep.subr.bf16.mxu0 %v11336_v5 }
 0xaa1   : > { %10053 = vmatpush3.bf16.msra.mxu0 %v11337_v58 }
 0xaa2   : > { %10054 = vmatprep.subr.bf16.mxu0 %v11338_v36 }
 0xaa5   : > { %10055 = vmatpush3.bf16.msra.mxu0 %v11339_v9 }
 0xaa6   : > { %10056 = vmatprep.subr.bf16.mxu0 %v11340_v50 }
 0xaa9   : > { %10057 = vmatpush3.bf16.msra.mxu0 %v11341_v29 }
 0xaaa   : > { %10058 = vmatprep.subr.bf16.mxu0 %v11342_v15 }
 0xaad   : > { %10059 = vmatpush3.bf16.msra.mxu0 %v11343_v44 }
 0xaae   : > { %10060 = vmatprep.subr.bf16.mxu0 %v11344_v22 }
 0xab1   : > { %10061 = vmatpush3.bf16.msra.mxu0 %v11345_v0 }
 0xac8   : > { %v8388_v52 = vpop.f32.mrf.mxu0 }
 0xac9   : > { %v8389_v3 = vadd.f32 %v8388_v52, %v8263_v7  ;;  %v8429_v1 = vpop.f32.mrf.mxu1 }
 0xaca   : > { %v8390_v35 = vpop.f32.mrf.mxu0 }
 0xacb   : > { %v8430_v45 = vadd.f32 %v8429_v1, %v8389_v3  ;;  %v8391_v41 = vadd.f32 %v8390_v35, %v8267_v37  ;;  %v8431_v6 = vpop.f32.mrf.mxu1 }
 0xacc   : > { %v8392_v4 = vpop.f32.mrf.mxu0 }
 0xacd   : > { %v8432_v62 = vadd.f32 %v8431_v6, %v8391_v41  ;;  %v8433_v11 = vpop.f32.mrf.mxu1  ;;  %v8438_v28 = vmax.f32 %v8430_v45, 0.0 }
 0xace   : > { %v8393_v39 = vpop.f32.mrf.mxu0 }
 0xacf   : > { %v8439_v26 = vmax.f32 %v8432_v62, 0.0  ;;  %v8434_v25 = vpop.f32.mrf.mxu1  ;;  %v8442_v54 = vpack.c.bf16 %v8438_v28, %v8438_v28 }
 0xad1   : > { %v8443_v12 = vpack.c.bf16 %v8439_v26, %v8439_v26 }
 0xad3   : > { %8913 = vmatprep.mubr.bf16.mxu1 %v8443_v12 }
 0xad4   : > { %8914 = vmatmul.mubr.bf16.vlgmr.msra.gmra.mxu1 %v8442_v54 }
 0xb54   : > { %v8874_v14 = vpop.f32.mrf.mxu0 }
 0xb55   : > { %v8875_v56 = vadd.f32 %v8874_v14, %v8833_v63 }
 0xb56   : > { %v8876_v24 = vpop.f32.mrf.mxu0 }
 0xb57   : > { %v8877_v13 = vadd.f32 %v8876_v24, %v8837_v51 }
 0xb58   : > { %v8878_v48 = vpop.f32.mrf.mxu0 }
 0xb5a   : > { %v8879_v34 = vpop.f32.mrf.mxu0 }
 0xb94   : > { %v8915_v46 = vpop.f32.mrf.mxu1 }
 0xb95   : > { %v8916_v2 = vadd.f32 %v8915_v46, %v8875_v56 }
 0xb96   : > { %v8917_v18 = vpop.f32.mrf.mxu1 }
 0xb97   : > { %v8918_v38 = vadd.f32 %v8917_v18, %v8877_v13  ;;  %v8922_v16 = vmax.f32 %v8916_v2, 0.0 }
 0xb98   : > { %v8919_v47 = vpop.f32.mrf.mxu1 }
 0xb99   : > { %v8923_v10 = vmax.f32 %v8918_v38, 0.0  ;;  %v8924_v49 = vpack.c.bf16 %v8922_v16, %v8922_v16 }
 0xb9a   : > { %v8920_v17 = vpop.f32.mrf.mxu1 }
 0xb9b   : > { %v8925_v8 = vpack.c.bf16 %v8923_v10, %v8923_v10 }
 0xb9d   : > { %9087 = vmatprep.mubr.bf16.mxu0 %v8925_v8 }
 0xb9e   : > { %9088 = vmatmul.mubr.bf16.vlgmr.msra.gmra.mxu0 %v8924_v49 }
 0xc5e   : > { %v10062_v57 = vpop.f32.mrf.mxu0 }
 0xc60   : > { %v10063_v40 = vpop.f32.mrf.mxu0 }
 0xc61   : > { %v10064_v61 = vadd.f32 %v10063_v40, %v10062_v57 }
 0xc62   : > { %v10065_v43 = vpop.f32.mrf.mxu0 }
 0xc63   : > { %v9090_v42 = vadd.f32 %v10064_v61, %v8958_v21 }
 0xc64   : > { %v10066_v27 = vpop.f32.mrf.mxu0 }
 0xc65   : > { %9095 = vst [vmem:[%s1006_s5] sm:$0x1] %v9090_v42 }
 0xc66   : > { %11361 = shalt.err (!%p11358_p3)
}
 0xc67   : > { %s11362_s2 = scalar_lea.hbm %s14489_s9, 16  ;;  %s11366_s5 = scalar_lea.hbm %s11618_s4, 32 }
 0xc68   : > { %p11363_p4 = scmp.ne.s32.totalorder %s14489_s9, %s11362_s2  ;;  %p11367_p9 = scmp.lt.s32.totalorder %s14489_s9, %s11618_s4 }
 0xc69   : > { %p11368_p10 = scmp.lt.s32.totalorder %s11366_s5, %s11362_s2 }
 0xc6a   : > { %p11364_p7 = pnand %p11363_p4, %p11658_p5 }
 0xc6b   : > { %p11369_p11 = por %p11368_p10, %p11367_p9 }
 0xc6c   : > { %p11365_p8 = pneg %p11364_p7 }
 0xc6e   : > { %p11370_p12 = pnand %p11369_p11, %p11365_p8 }
 0xc70   : > { %11373 = shalt.err (!%p11370_p12)
}
 0xc71   : > { %10356 = dma.vmem_to_hbm [thread:$0]  (%p11658_p5), %s9110_s8, 16, %s14489_s9, %s9097_s12  }
 0xc72 PF: > { %p10362_p13 = scmp.ge.s32.totalorder %s11408_s15, 2  ;;  %s9121_s13 = sand.u32 1, %s11396_s7  }
 0xc73   : > { %s9122_s14 = scalar_lea.sflag [#allocation3], %s9121_s13 }
 0xc74   : > { %p10359_p0 = pnand %p10362_p13, %p11662_p6 }
 0xc76   : > { %p10360_p1 = pneg %p10359_p0 }
 0xc78   : > { %11391 = dma.done.wait (%p10360_p1), %s9122_s14, 16  }
 0xc79   : > { %11393 = vsyncadd (%p10360_p1), %s9122_s14, 4294967280  ;;  %p77_p2 = scmp.ge.s32.totalorder %s11645_s18, 4   ;;  %s14807_s7 = smov %s11400_s10 }
 0xc7a   : > { %s14808_s10 = smov %s11404_s11  ;;  %s14809_s11 = smov %s11656_s26 }
 0xc7b   : > { %s14810_s15 = smov %s11645_s18  ;;  %79 = sbr.rel (!%p77_p2) target bundleno = 70 (0x46), region = 220 }
 0xc80   :  { %9126 = vsyncpa [#allocation3], 1 }
 0xc81   :  { %9128 = vsyncpa [#allocation3 + $0x1], 1 }

</bundles_post_ra>
